<compile_context>
chip_gen: v7x
topology: tpu7x:2x2x1
jax: 0.10.0
libtpu: 0.0.40
codegen_flags: <defaults>
</compile_context>

<pallas_src>
import math
import functools

import jax
import jax.numpy as jnp
from jax import lax
from jax.experimental import pallas as pl
from jax.experimental.pallas import tpu as pltpu

# ---------------- small test configuration ----------------
HIDDEN = 16
N_HARMONIC = 8
N_BANDS = 5            # filter_size = 2*(N_BANDS-1) = 8 <= BLOCK_SIZE
SAMPLING_RATE = 16     # also the Reverb impulse length; must be <= T_FRAMES*BLOCK_SIZE
BLOCK_SIZE = 8
BATCH = 2
T_FRAMES = 8

assert BLOCK_SIZE >= 2 * (N_BANDS - 1)
assert T_FRAMES * BLOCK_SIZE >= SAMPLING_RATE

_VMEM = pl.BlockSpec(memory_space=pltpu.MemorySpace.VMEM)


def _vmem_specs(n):
    return [pl.BlockSpec(memory_space=pltpu.MemorySpace.VMEM) for _ in range(n)]


def _fiota(shape, dim):
    # int iota -> f32 (int iota is the safest Mosaic path)
    return lax.broadcasted_iota(jnp.int32, shape, dim).astype(jnp.float32)


# =======================  Pallas kernels  =======================

def _controller_kernel(x2_ref,
                       iw1, ib1, ig1, ie1, iw2, ib2, ig2, ie2, iw3, ib3, ig3, ie3,
                       wih_ref, whh_ref, bih_ref, bhh_ref,
                       ow1, ob1, og1, oe1, ow2, ob2, og2, oe2, ow3, ob3, og3, oe3,
                       pw_ref, pb_ref,
                       o_ref,
                       gru_scr,
                       *, B, T, H, nh, sr):
    """Fused controller: shared in_mlp -> GRU -> out_mlp -> merged projections ->
    scale_function -> nyquist mask + normalisation.  Rows are time-major (row = t*B + b).
    Output slab columns: [amps_norm (nh) | amps_scaled (nh) | total_amp (1) | param1]."""
    R = B * T

    def ln_lrelu(h, g_r, e_r):
        mu = jnp.mean(h, axis=-1, keepdims=True)
        var = jnp.mean((h - mu) ** 2, axis=-1, keepdims=True)
        h = (h - mu) * lax.rsqrt(var + 1e-5) * g_r[...] + e_r[...]
        return jnp.where(h >= 0.0, h, 0.01 * h)            # LeakyReLU(0.01)

    # ---- shared in_mlp, evaluated once on stacked [pitch ; loudness] rows (2R, 1) ----
    x2 = x2_ref[...]                                        # (2R, 1)
    h = x2 * iw1[...] + ib1[...]                            # Linear(in_features=1) = broadcast
    h = ln_lrelu(h, ig1, ie1)
    h = ln_lrelu(jnp.dot(h, iw2[...], preferred_element_type=jnp.float32) + ib2[...], ig2, ie2)
    feat = ln_lrelu(jnp.dot(h, iw3[...], preferred_element_type=jnp.float32) + ib3[...], ig3, ie3)
    p_feat = feat[:R, :]                                    # (R, H) pitch branch
    l_feat = feat[R:, :]                                    # (R, H) loudness branch
    pitch = x2[:R, :]                                       # (R, 1)
    loud = x2[R:, :]                                        # (R, 1)

    # ---- GRU: input projection hoisted out of the recurrence (one big matmul) ----
    wih = wih_ref[...]                                      # (2H, 3H)
    gx_all = (jnp.dot(p_feat, wih[:H, :], preferred_element_type=jnp.float32)
              + jnp.dot(l_feat, wih[H:, :], preferred_element_type=jnp.float32)
              + bih_ref[...])                               # (R, 3H), time-major rows
    whh = whh_ref[...]
    bhh = bhh_ref[...]
    h_t = jnp.zeros((B, H), jnp.float32)                    # h0 = 0
    for t in range(T):                                      # static unroll (T is small)
        gx = gx_all[t * B:(t + 1) * B, :]                   # (B, 3H) contiguous slice
        gh = jnp.dot(h_t, whh, preferred_element_type=jnp.float32) + bhh
        r = jax.nn.sigmoid(gx[:, :H] + gh[:, :H])
        z = jax.nn.sigmoid(gx[:, H:2 * H] + gh[:, H:2 * H])
        n = jnp.tanh(gx[:, 2 * H:] + r * gh[:, 2 * H:])
        h_t = (1.0 - z) * n + z * h_t
        gru_scr[pl.ds(t * B, B), :] = h_t
    gru_out = gru_scr[...]                                  # (R, H)

    # ---- out_mlp on [gru_out | pitch | loud] without materialising the concat ----
    w1 = ow1[...]                                           # (H+2, H)
    h = (jnp.dot(gru_out, w1[:H, :], preferred_element_type=jnp.float32)
         + pitch * w1[H:H + 1, :] + loud * w1[H + 1:H + 2, :] + ob1[...])
    h = ln_lrelu(h, og1, oe1)
    h = ln_lrelu(jnp.dot(h, ow2[...], preferred_element_type=jnp.float32) + ob2[...], og2, oe2)
    hidden = ln_lrelu(jnp.dot(h, ow3[...], preferred_element_type=jnp.float32) + ob3[...], og3, oe3)

    # ---- merged proj0|proj1 + scale_function (offset -5 folded into proj1 bias) ----
    y = jnp.dot(hidden, pw_ref[...], preferred_element_type=jnp.float32) + pb_ref[...]
    s = jax.nn.sigmoid(y)
    # 2 * s**log(10) + 1e-7, written as a single exp(log(s)*ln10) (one EUP exp + one log)
    param = 2.0 * jnp.exp(math.log(10.0) * jnp.log(s)) + 1e-7

    total_amp = param[:, 0:1]
    amps = param[:, 1:1 + nh]
    param1 = param[:, 1 + nh:]

    # ---- remove_above_nyquist + normalisation (harmonic index built in-kernel) ----
    harm = _fiota((1, nh), 1) + 1.0
    aa = jnp.where(pitch * harm < sr / 2.0, 1.0, 0.0) + 1e-4
    amps = amps * aa
    amps_norm = amps / jnp.sum(amps, axis=-1, keepdims=True)
    amps_scaled = amps_norm * total_amp

    # ---- single lane-packed output slab ----
    o_ref[:, 0:nh] = amps_norm
    o_ref[:, nh:2 * nh] = amps_scaled
    o_ref[:, 2 * nh:2 * nh + 1] = total_amp
    o_ref[:, 2 * nh + 1:] = param1


def _harmonic_kernel(omega_ref, amps_ref, o_ref, *, nh):
    """Lane-dense harmonic synth: omega (rows, n), amps (nh, rows, n) -> out (rows, n)."""
    om = omega_ref[...]
    acc = jnp.zeros_like(om)
    for k in range(nh):
        acc = acc + jnp.sin(om * (k + 1.0)) * amps_ref[k]
    o_ref[...] = acc


def _noise_branch_kernel(param1_ref, noise_ref, o_ref, *, nbands, blk):
    """amp_to_impulse_response + fft_convolve(noise, impulse), fused.

    irfft of a purely-real spectrum == cosine transform (exact); the equal-length
    fft_convolve == causal convolution truncated to blk, done as a shift-accumulate."""
    K = nbands
    M = 2 * (K - 1)
    rows = param1_ref.shape[0]

    # cosine (irfft-of-real-spectrum) matrix, built in-kernel from iotas
    ki = lax.broadcasted_iota(jnp.int32, (K, M), 0)
    kk = ki.astype(jnp.float32)
    nn = _fiota((K, M), 1)
    coef = jnp.where((ki == 0) | (ki == K - 1), 1.0, 2.0)
    cmat = coef * jnp.cos(2.0 * math.pi * kk * nn / M) / M          # (K, M)

    h = jnp.dot(param1_ref[...], cmat, preferred_element_type=jnp.float32)   # (rows, M)
    h = pltpu.roll(h, M // 2, 1)
    win = 0.5 - 0.5 * jnp.cos(2.0 * math.pi * _fiota((1, M), 1) / M)  # hann window
    h = h * win
    if M < blk:
        h = jnp.concatenate([h, jnp.zeros((rows, blk - M), jnp.float32)], axis=1)
    h = pltpu.roll(h, (blk - M // 2) % blk, 1)                       # roll(-M//2) over blk

    # causal convolution of the uniform noise with the per-frame impulse (shift-accumulate)
    noise = noise_ref[...]                                           # (rows, blk)
    col = lax.broadcasted_iota(jnp.int32, (rows, blk), 1)
    out = h[:, 0:1] * noise                                          # lag 0
    for j in range(1, blk):
        sh = jnp.where(col >= j, pltpu.roll(noise, j, 1), 0.0)       # noise[p-j], zero-filled
        out = out + h[:, j:j + 1] * sh
    o_ref[...] = out


def _synth_reverb_kernel(omega_ref, amps_ref, noise_ref, rnoise_ref, dw_ref, o_ref,
                         *, nh, L, sr):
    """Audio-rate harmonic synth + noise add + reverb, fused.

    omega/noise: (B, N) lane-dense; amps: (nh, B, N); rnoise: (1, L); dw: (1, 2)=[decay,wet].
    Reverb keeps only the impulse resident; causal conv is a shift-accumulate over L lags."""
    om = omega_ref[...]                                              # (B, N)
    B, N = om.shape
    acc = jnp.zeros_like(om)
    for k in range(nh):
        acc = acc + jnp.sin(om * (k + 1.0)) * amps_ref[k]
    sig = acc + noise_ref[...]

    # build the reverb impulse (length L) in-kernel
    t = _fiota((1, L), 1) / sr
    dw = dw_ref[...]
    decay = dw[:, 0:1]
    wet = dw[:, 1:2]
    sp = jnp.log(1.0 + jnp.exp(-decay))                              # softplus(-decay)
    env = jnp.exp(-sp * t * 500.0)
    imp = rnoise_ref[...] * env * jax.nn.sigmoid(wet)
    lane = lax.broadcasted_iota(jnp.int32, (1, L), 1)
    imp = jnp.where(lane == 0, 1.0, imp)                             # impulse[0] = 1 (dry path)

    # y[n] = sum_{j < L, j <= n} imp[j] * sig[n - j]
    # TODO(synk): for production sampling_rate the L-lag loop should become a tiled grid.
    col = lax.broadcasted_iota(jnp.int32, (B, N), 1)
    out = imp[:, 0:1] * sig                                          # lag 0
    for j in range(1, L):
        sh = jnp.where(col >= j, pltpu.roll(sig, j, 1), 0.0)
        out = out + imp[:, j:j + 1] * sh
    o_ref[...] = out


# =======================  kernel wrappers  =======================

def controller_forward(pitch_tm, loud_tm, params, b, t):
    R = pitch_tm.shape[0]
    x2 = jnp.concatenate([pitch_tm, loud_tm], axis=0)                # (2R, 1)
    im, om, g = params["in_mlp"], params["out_mlp"], params["gru"]
    proj_w = jnp.concatenate([params["proj0_w"], params["proj1_w"]], axis=1)
    proj_b = jnp.concatenate([params["proj0_b"], params["proj1_b"] - 5.0], axis=1)
    args = (x2,
            im["w1"], im["b1"], im["g1"], im["be1"],
            im["w2"], im["b2"], im["g2"], im["be2"],
            im["w3"], im["b3"], im["g3"], im["be3"],
            g["wih"], g["whh"], g["bih"], g["bhh"],
            om["w1"], om["b1"], om["g1"], om["be1"],
            om["w2"], om["b2"], om["g2"], om["be2"],
            om["w3"], om["b3"], om["g3"], om["be3"],
            proj_w, proj_b)
    width = 2 * N_HARMONIC + 1 + N_BANDS
    kern = functools.partial(_controller_kernel, B=b, T=t, H=HIDDEN,
                             nh=N_HARMONIC, sr=float(SAMPLING_RATE))
    return pl.pallas_call(
        kern,
        out_shape=jax.ShapeDtypeStruct((R, width), jnp.float32),
        in_specs=_vmem_specs(len(args)),
        out_specs=_VMEM,
        scratch_shapes=[pltpu.VMEM((R, HIDDEN), jnp.float32)],
    )(*args)


def harmonic_synth(omega, amps_h):
    kern = functools.partial(_harmonic_kernel, nh=amps_h.shape[0])
    return pl.pallas_call(
        kern,
        out_shape=jax.ShapeDtypeStruct(omega.shape, jnp.float32),
        in_specs=_vmem_specs(2),
        out_specs=_VMEM,
    )(omega, amps_h)


def noise_branch(param1, uni_noise):
    kern = functools.partial(_noise_branch_kernel,
                             nbands=param1.shape[1], blk=uni_noise.shape[1])
    return pl.pallas_call(
        kern,
        out_shape=jax.ShapeDtypeStruct(uni_noise.shape, jnp.float32),
        in_specs=_vmem_specs(2),
        out_specs=_VMEM,
    )(param1, uni_noise)


def synth_reverb(omega, amps_h, noise_full, rnoise, dw):
    kern = functools.partial(_synth_reverb_kernel, nh=amps_h.shape[0],
                             L=rnoise.shape[1], sr=float(SAMPLING_RATE))
    return pl.pallas_call(
        kern,
        out_shape=jax.ShapeDtypeStruct(omega.shape, jnp.float32),
        in_specs=_vmem_specs(5),
        out_specs=_VMEM,
    )(omega, amps_h, noise_full, rnoise, dw)


# =======================  full forward  =======================

def ddsp_forward(params, pitch, loudness, noise_key):
    B, T, _ = pitch.shape
    nh = N_HARMONIC
    sr = float(SAMPLING_RATE)
    blk = BLOCK_SIZE
    N = T * blk
    R = B * T

    pitch = pitch.astype(jnp.float32)
    loudness = loudness.astype(jnp.float32)

    # time-major frame rows (row = t*B + b): lets the GRU slice contiguous per-step blocks
    pitch_tm = jnp.transpose(pitch, (1, 0, 2)).reshape(R, 1)
    loud_tm = jnp.transpose(loudness, (1, 0, 2)).reshape(R, 1)

    slab = controller_forward(pitch_tm, loud_tm, params, B, T)   # (R, 2nh+1+n_bands)
    amps_norm_tm = slab[:, :nh]
    amps_scaled_tm = slab[:, nh:2 * nh]
    total_amp_tm = slab[:, 2 * nh:2 * nh + 1]
    param1_tm = slab[:, 2 * nh + 1:]

    def tm_to_bt(x_tm, width):
        return jnp.transpose(x_tm.reshape(T, B, width), (1, 0, 2))

    def tm_to_hbt(x_tm, width):
        return jnp.transpose(x_tm.reshape(T, B, width), (2, 1, 0))   # (width, B, T)

    # torch `amplitudes *= total_amp` is in-place -> amplitude_return is the scaled version
    amplitude_return = tm_to_bt(amps_scaled_tm, nh)                  # (B, T, nh)
    total_amp_return = tm_to_bt(total_amp_tm, 1)                     # (B, T, 1)
    pitch_return = pitch

    # frame-rate harmonic_return (uses normalised amps, computed before the scaling)
    omega_f = jnp.cumsum(2.0 * math.pi * pitch / sr, axis=1)[..., 0]           # (B, T)
    harmonic_return = harmonic_synth(omega_f, tm_to_hbt(amps_norm_tm, nh))[..., None]

    # audio-rate phase + upsampled scaled amps (harmonics on the leading axis, lane-dense time)
    pitch_up = jnp.repeat(pitch, blk, axis=1)                                  # (B, N, 1)
    omega_up = jnp.cumsum(2.0 * math.pi * pitch_up / sr, axis=1)[..., 0]       # (B, N)
    amps_up = jnp.repeat(tm_to_hbt(amps_scaled_tm, nh), blk, axis=2)           # (nh, B, N)

    # filtered-noise branch (per-frame impulse response + causal convolution, fused kernel)
    uni = jax.random.uniform(noise_key, (R, blk), jnp.float32) * 2.0 - 1.0
    noise_tm = noise_branch(param1_tm, uni)                                    # (R, blk)
    noise_full = jnp.transpose(noise_tm.reshape(T, B, blk), (1, 0, 2)).reshape(B, N)

    # harmonic synth + noise add + reverb, fused in one kernel
    rp = params["reverb"]
    dw = jnp.stack([jnp.asarray(rp["decay"], jnp.float32),
                    jnp.asarray(rp["wet"], jnp.float32)]).reshape(1, 2)
    rnoise = rp["noise"].reshape(1, -1)
    signal = synth_reverb(omega_up, amps_up, noise_full, rnoise, dw)[..., None]  # (B, N, 1)

    return signal, amplitude_return, total_amp_return, pitch_return, harmonic_return


# =======================  deterministic parameter init  =======================

def init_params(key):
    ks = jax.random.split(key, 8)
    H = HIDDEN

    def linear(k, cin, cout, scale=0.1):
        kw, kb = jax.random.split(k)
        return (jax.random.normal(kw, (cin, cout), jnp.float32) * scale,
                jax.random.normal(kb, (1, cout), jnp.float32) * scale)

    def mlp_p(k, cin):
        k1, k2, k3 = jax.random.split(k, 3)
        w1, b1 = linear(k1, cin, H)
        w2, b2 = linear(k2, H, H)
        w3, b3 = linear(k3, H, H)
        ones = jnp.ones((1, H), jnp.float32)
        zeros = jnp.zeros((1, H), jnp.float32)
        return dict(w1=w1, b1=b1, g1=ones, be1=zeros,
                    w2=w2, b2=b2, g2=ones, be2=zeros,
                    w3=w3, b3=b3, g3=ones, be3=zeros)

    in_mlp = mlp_p(ks[0], 1)          # shared by pitch & loudness branches
    out_mlp = mlp_p(ks[1], H + 2)

    kih, khh, kbi, kbh = jax.random.split(ks[2], 4)
    gru_p = dict(
        wih=jax.random.normal(kih, (2 * H, 3 * H), jnp.float32) * 0.1,  # gate order r,z,n
        whh=jax.random.normal(khh, (H, 3 * H), jnp.float32) * 0.1,
        bih=jax.random.normal(kbi, (1, 3 * H), jnp.float32) * 0.1,
        bhh=jax.random.normal(kbh, (1, 3 * H), jnp.float32) * 0.1,
    )

    p0w, p0b = linear(ks[3], H, N_HARMONIC + 1)
    p1w, p1b = linear(ks[4], H, N_BANDS)

    reverb = dict(
        noise=jax.random.uniform(ks[5], (SAMPLING_RATE,), jnp.float32) * 2.0 - 1.0,
        decay=jnp.float32(5.0),
        wet=jnp.float32(0.0),
    )

    return dict(in_mlp=in_mlp, out_mlp=out_mlp, gru=gru_p,
                proj0_w=p0w, proj0_b=p0b, proj1_w=p1w, proj1_b=p1b,
                reverb=reverb)


# =======================  main  =======================

if __name__ == "__main__":
    key = jax.random.PRNGKey(0)
    kp, kl, kn, kw = jax.random.split(key, 4)

    params = init_params(kw)
    pitch = jax.random.uniform(kp, (BATCH, T_FRAMES, 1), jnp.float32, 0.5, 4.0)
    loudness = jax.random.uniform(kl, (BATCH, T_FRAMES, 1), jnp.float32, -1.0, 1.0)

    forward = jax.jit(ddsp_forward)
    outs = forward(params, pitch, loudness, kn)
    outs = jax.block_until_ready(outs)

    signal, amp_r, ta_r, p_r, h_r = outs
    assert signal.shape == (BATCH, T_FRAMES * BLOCK_SIZE, 1)
    assert amp_r.shape == (BATCH, T_FRAMES, N_HARMONIC)
    assert ta_r.shape == (BATCH, T_FRAMES, 1)
    assert p_r.shape == (BATCH, T_FRAMES, 1)
    assert h_r.shape == (BATCH, T_FRAMES, 1)
    assert all(bool(jnp.all(jnp.isfinite(o))) for o in outs)

    print("KERNEL_OK")
</pallas_src>

<mosaic_0001>
module attributes {stable_mosaic.version = 11 : i64} {
  func.func @_controller_kernel(%arg0: memref<32x1xf32, #tpu.memory_space<vmem>>, %arg1: memref<1x16xf32, #tpu.memory_space<vmem>>, %arg2: memref<1x16xf32, #tpu.memory_space<vmem>>, %arg3: memref<1x16xf32, #tpu.memory_space<vmem>>, %arg4: memref<1x16xf32, #tpu.memory_space<vmem>>, %arg5: memref<16x16xf32, #tpu.memory_space<vmem>>, %arg6: memref<1x16xf32, #tpu.memory_space<vmem>>, %arg7: memref<1x16xf32, #tpu.memory_space<vmem>>, %arg8: memref<1x16xf32, #tpu.memory_space<vmem>>, %arg9: memref<16x16xf32, #tpu.memory_space<vmem>>, %arg10: memref<1x16xf32, #tpu.memory_space<vmem>>, %arg11: memref<1x16xf32, #tpu.memory_space<vmem>>, %arg12: memref<1x16xf32, #tpu.memory_space<vmem>>, %arg13: memref<32x48xf32, #tpu.memory_space<vmem>>, %arg14: memref<16x48xf32, #tpu.memory_space<vmem>>, %arg15: memref<1x48xf32, #tpu.memory_space<vmem>>, %arg16: memref<1x48xf32, #tpu.memory_space<vmem>>, %arg17: memref<18x16xf32, #tpu.memory_space<vmem>>, %arg18: memref<1x16xf32, #tpu.memory_space<vmem>>, %arg19: memref<1x16xf32, #tpu.memory_space<vmem>>, %arg20: memref<1x16xf32, #tpu.memory_space<vmem>>, %arg21: memref<16x16xf32, #tpu.memory_space<vmem>>, %arg22: memref<1x16xf32, #tpu.memory_space<vmem>>, %arg23: memref<1x16xf32, #tpu.memory_space<vmem>>, %arg24: memref<1x16xf32, #tpu.memory_space<vmem>>, %arg25: memref<16x16xf32, #tpu.memory_space<vmem>>, %arg26: memref<1x16xf32, #tpu.memory_space<vmem>>, %arg27: memref<1x16xf32, #tpu.memory_space<vmem>>, %arg28: memref<1x16xf32, #tpu.memory_space<vmem>>, %arg29: memref<16x14xf32, #tpu.memory_space<vmem>>, %arg30: memref<1x14xf32, #tpu.memory_space<vmem>>, %arg31: memref<16x22xf32, #tpu.memory_space<vmem>>, %arg32: memref<16x16xf32, #tpu.memory_space<vmem>>) attributes {dimension_semantics = [], scalar_prefetch = 0 : i64, scratch_operands = 1 : i64, tpu.core_type = #tpu.core_type<tc>} {
    %c0 = arith.constant 0 : index
    %c0_0 = arith.constant 0 : index
    %0 = vector.load %arg0[%c0, %c0_0] : memref<32x1xf32, #tpu.memory_space<vmem>>, vector<32x1xf32>
    %c0_1 = arith.constant 0 : index
    %c0_2 = arith.constant 0 : index
    %1 = vector.load %arg1[%c0_1, %c0_2] : memref<1x16xf32, #tpu.memory_space<vmem>>, vector<1x16xf32>
    %2 = vector.broadcast %0 : vector<32x1xf32> to vector<32x16xf32>
    %3 = vector.broadcast %1 : vector<1x16xf32> to vector<32x16xf32>
    %4 = arith.mulf %2, %3 : vector<32x16xf32>
    %c0_3 = arith.constant 0 : index
    %c0_4 = arith.constant 0 : index
    %5 = vector.load %arg2[%c0_3, %c0_4] : memref<1x16xf32, #tpu.memory_space<vmem>>, vector<1x16xf32>
    %6 = vector.broadcast %5 : vector<1x16xf32> to vector<32x16xf32>
    %7 = arith.addf %4, %6 : vector<32x16xf32>
    %cst = arith.constant dense<0.000000e+00> : vector<32xf32>
    %8 = vector.multi_reduction <add>, %7, %cst [1] : vector<32x16xf32> to vector<32xf32>
    %9 = vector.shape_cast %8 : vector<32xf32> to vector<32x1xf32>
    %cst_5 = arith.constant 1.600000e+01 : f32
    %10 = vector.broadcast %cst_5 : f32 to vector<32x1xf32>
    %11 = arith.divf %9, %10 : vector<32x1xf32>
    %12 = vector.broadcast %11 : vector<32x1xf32> to vector<32x16xf32>
    %13 = arith.subf %7, %12 : vector<32x16xf32>
    %14 = arith.mulf %13, %13 : vector<32x16xf32>
    %cst_6 = arith.constant dense<0.000000e+00> : vector<32xf32>
    %15 = vector.multi_reduction <add>, %14, %cst_6 [1] : vector<32x16xf32> to vector<32xf32>
    %16 = vector.shape_cast %15 : vector<32xf32> to vector<32x1xf32>
    %cst_7 = arith.constant 1.600000e+01 : f32
    %17 = vector.broadcast %cst_7 : f32 to vector<32x1xf32>
    %18 = arith.divf %16, %17 : vector<32x1xf32>
    %19 = vector.broadcast %11 : vector<32x1xf32> to vector<32x16xf32>
    %20 = arith.subf %7, %19 : vector<32x16xf32>
    %cst_8 = arith.constant 9.99999974E-6 : f32
    %21 = vector.broadcast %cst_8 : f32 to vector<32x1xf32>
    %22 = arith.addf %18, %21 : vector<32x1xf32>
    %23 = math.rsqrt %22 : vector<32x1xf32>
    %24 = vector.broadcast %23 : vector<32x1xf32> to vector<32x16xf32>
    %25 = arith.mulf %20, %24 : vector<32x16xf32>
    %c0_9 = arith.constant 0 : index
    %c0_10 = arith.constant 0 : index
    %26 = vector.load %arg3[%c0_9, %c0_10] : memref<1x16xf32, #tpu.memory_space<vmem>>, vector<1x16xf32>
    %27 = vector.broadcast %26 : vector<1x16xf32> to vector<32x16xf32>
    %28 = arith.mulf %25, %27 : vector<32x16xf32>
    %c0_11 = arith.constant 0 : index
    %c0_12 = arith.constant 0 : index
    %29 = vector.load %arg4[%c0_11, %c0_12] : memref<1x16xf32, #tpu.memory_space<vmem>>, vector<1x16xf32>
    %30 = vector.broadcast %29 : vector<1x16xf32> to vector<32x16xf32>
    %31 = arith.addf %28, %30 : vector<32x16xf32>
    %cst_13 = arith.constant 0.000000e+00 : f32
    %32 = vector.broadcast %cst_13 : f32 to vector<32x16xf32>
    %33 = arith.cmpf oge, %31, %32 : vector<32x16xf32>
    %cst_14 = arith.constant 0.00999999977 : f32
    %34 = vector.broadcast %cst_14 : f32 to vector<32x16xf32>
    %35 = arith.mulf %34, %31 : vector<32x16xf32>
    %36 = arith.select %33, %31, %35 : vector<32x16xi1>, vector<32x16xf32>
    %c0_15 = arith.constant 0 : index
    %c0_16 = arith.constant 0 : index
    %37 = vector.load %arg5[%c0_15, %c0_16] : memref<16x16xf32, #tpu.memory_space<vmem>>, vector<16x16xf32>
    %cst_17 = arith.constant dense<0.000000e+00> : vector<32x16xf32>
    %38 = tpu.matmul %36, %37, %cst_17 {dimension_numbers = #tpu.dot_dimension_numbers<[1], [0], [0], [1], [0, 0, 1, 1], [], []>} : vector<32x16xf32>, vector<16x16xf32>, vector<32x16xf32> -> vector<32x16xf32>
    %c0_18 = arith.constant 0 : index
    %c0_19 = arith.constant 0 : index
    %39 = vector.load %arg6[%c0_18, %c0_19] : memref<1x16xf32, #tpu.memory_space<vmem>>, vector<1x16xf32>
    %40 = vector.broadcast %39 : vector<1x16xf32> to vector<32x16xf32>
    %41 = arith.addf %38, %40 : vector<32x16xf32>
    %cst_20 = arith.constant dense<0.000000e+00> : vector<32xf32>
    %42 = vector.multi_reduction <add>, %41, %cst_20 [1] : vector<32x16xf32> to vector<32xf32>
    %43 = vector.shape_cast %42 : vector<32xf32> to vector<32x1xf32>
    %cst_21 = arith.constant 1.600000e+01 : f32
    %44 = vector.broadcast %cst_21 : f32 to vector<32x1xf32>
    %45 = arith.divf %43, %44 : vector<32x1xf32>
    %46 = vector.broadcast %45 : vector<32x1xf32> to vector<32x16xf32>
    %47 = arith.subf %41, %46 : vector<32x16xf32>
    %48 = arith.mulf %47, %47 : vector<32x16xf32>
    %cst_22 = arith.constant dense<0.000000e+00> : vector<32xf32>
    %49 = vector.multi_reduction <add>, %48, %cst_22 [1] : vector<32x16xf32> to vector<32xf32>
    %50 = vector.shape_cast %49 : vector<32xf32> to vector<32x1xf32>
    %cst_23 = arith.constant 1.600000e+01 : f32
    %51 = vector.broadcast %cst_23 : f32 to vector<32x1xf32>
    %52 = arith.divf %50, %51 : vector<32x1xf32>
    %53 = vector.broadcast %45 : vector<32x1xf32> to vector<32x16xf32>
    %54 = arith.subf %41, %53 : vector<32x16xf32>
    %cst_24 = arith.constant 9.99999974E-6 : f32
    %55 = vector.broadcast %cst_24 : f32 to vector<32x1xf32>
    %56 = arith.addf %52, %55 : vector<32x1xf32>
    %57 = math.rsqrt %56 : vector<32x1xf32>
    %58 = vector.broadcast %57 : vector<32x1xf32> to vector<32x16xf32>
    %59 = arith.mulf %54, %58 : vector<32x16xf32>
    %c0_25 = arith.constant 0 : index
    %c0_26 = arith.constant 0 : index
    %60 = vector.load %arg7[%c0_25, %c0_26] : memref<1x16xf32, #tpu.memory_space<vmem>>, vector<1x16xf32>
    %61 = vector.broadcast %60 : vector<1x16xf32> to vector<32x16xf32>
    %62 = arith.mulf %59, %61 : vector<32x16xf32>
    %c0_27 = arith.constant 0 : index
    %c0_28 = arith.constant 0 : index
    %63 = vector.load %arg8[%c0_27, %c0_28] : memref<1x16xf32, #tpu.memory_space<vmem>>, vector<1x16xf32>
    %64 = vector.broadcast %63 : vector<1x16xf32> to vector<32x16xf32>
    %65 = arith.addf %62, %64 : vector<32x16xf32>
    %cst_29 = arith.constant 0.000000e+00 : f32
    %66 = vector.broadcast %cst_29 : f32 to vector<32x16xf32>
    %67 = arith.cmpf oge, %65, %66 : vector<32x16xf32>
    %cst_30 = arith.constant 0.00999999977 : f32
    %68 = vector.broadcast %cst_30 : f32 to vector<32x16xf32>
    %69 = arith.mulf %68, %65 : vector<32x16xf32>
    %70 = arith.select %67, %65, %69 : vector<32x16xi1>, vector<32x16xf32>
    %c0_31 = arith.constant 0 : index
    %c0_32 = arith.constant 0 : index
    %71 = vector.load %arg9[%c0_31, %c0_32] : memref<16x16xf32, #tpu.memory_space<vmem>>, vector<16x16xf32>
    %cst_33 = arith.constant dense<0.000000e+00> : vector<32x16xf32>
    %72 = tpu.matmul %70, %71, %cst_33 {dimension_numbers = #tpu.dot_dimension_numbers<[1], [0], [0], [1], [0, 0, 1, 1], [], []>} : vector<32x16xf32>, vector<16x16xf32>, vector<32x16xf32> -> vector<32x16xf32>
    %c0_34 = arith.constant 0 : index
    %c0_35 = arith.constant 0 : index
    %73 = vector.load %arg10[%c0_34, %c0_35] : memref<1x16xf32, #tpu.memory_space<vmem>>, vector<1x16xf32>
    %74 = vector.broadcast %73 : vector<1x16xf32> to vector<32x16xf32>
    %75 = arith.addf %72, %74 : vector<32x16xf32>
    %cst_36 = arith.constant dense<0.000000e+00> : vector<32xf32>
    %76 = vector.multi_reduction <add>, %75, %cst_36 [1] : vector<32x16xf32> to vector<32xf32>
    %77 = vector.shape_cast %76 : vector<32xf32> to vector<32x1xf32>
    %cst_37 = arith.constant 1.600000e+01 : f32
    %78 = vector.broadcast %cst_37 : f32 to vector<32x1xf32>
    %79 = arith.divf %77, %78 : vector<32x1xf32>
    %80 = vector.broadcast %79 : vector<32x1xf32> to vector<32x16xf32>
    %81 = arith.subf %75, %80 : vector<32x16xf32>
    %82 = arith.mulf %81, %81 : vector<32x16xf32>
    %cst_38 = arith.constant dense<0.000000e+00> : vector<32xf32>
    %83 = vector.multi_reduction <add>, %82, %cst_38 [1] : vector<32x16xf32> to vector<32xf32>
    %84 = vector.shape_cast %83 : vector<32xf32> to vector<32x1xf32>
    %cst_39 = arith.constant 1.600000e+01 : f32
    %85 = vector.broadcast %cst_39 : f32 to vector<32x1xf32>
    %86 = arith.divf %84, %85 : vector<32x1xf32>
    %87 = vector.broadcast %79 : vector<32x1xf32> to vector<32x16xf32>
    %88 = arith.subf %75, %87 : vector<32x16xf32>
    %cst_40 = arith.constant 9.99999974E-6 : f32
    %89 = vector.broadcast %cst_40 : f32 to vector<32x1xf32>
    %90 = arith.addf %86, %89 : vector<32x1xf32>
    %91 = math.rsqrt %90 : vector<32x1xf32>
    %92 = vector.broadcast %91 : vector<32x1xf32> to vector<32x16xf32>
    %93 = arith.mulf %88, %92 : vector<32x16xf32>
    %c0_41 = arith.constant 0 : index
    %c0_42 = arith.constant 0 : index
    %94 = vector.load %arg11[%c0_41, %c0_42] : memref<1x16xf32, #tpu.memory_space<vmem>>, vector<1x16xf32>
    %95 = vector.broadcast %94 : vector<1x16xf32> to vector<32x16xf32>
    %96 = arith.mulf %93, %95 : vector<32x16xf32>
    %c0_43 = arith.constant 0 : index
    %c0_44 = arith.constant 0 : index
    %97 = vector.load %arg12[%c0_43, %c0_44] : memref<1x16xf32, #tpu.memory_space<vmem>>, vector<1x16xf32>
    %98 = vector.broadcast %97 : vector<1x16xf32> to vector<32x16xf32>
    %99 = arith.addf %96, %98 : vector<32x16xf32>
    %cst_45 = arith.constant 0.000000e+00 : f32
    %100 = vector.broadcast %cst_45 : f32 to vector<32x16xf32>
    %101 = arith.cmpf oge, %99, %100 : vector<32x16xf32>
    %cst_46 = arith.constant 0.00999999977 : f32
    %102 = vector.broadcast %cst_46 : f32 to vector<32x16xf32>
    %103 = arith.mulf %102, %99 : vector<32x16xf32>
    %104 = arith.select %101, %99, %103 : vector<32x16xi1>, vector<32x16xf32>
    %105 = vector.extract_strided_slice %104 {offsets = [0, 0], sizes = [16, 16], strides = [1, 1]} : vector<32x16xf32> to vector<16x16xf32>
    %106 = vector.extract_strided_slice %104 {offsets = [16, 0], sizes = [16, 16], strides = [1, 1]} : vector<32x16xf32> to vector<16x16xf32>
    %107 = vector.extract_strided_slice %0 {offsets = [0, 0], sizes = [16, 1], strides = [1, 1]} : vector<32x1xf32> to vector<16x1xf32>
    %108 = vector.extract_strided_slice %0 {offsets = [16, 0], sizes = [16, 1], strides = [1, 1]} : vector<32x1xf32> to vector<16x1xf32>
    %c0_47 = arith.constant 0 : index
    %c0_48 = arith.constant 0 : index
    %109 = vector.load %arg13[%c0_47, %c0_48] : memref<32x48xf32, #tpu.memory_space<vmem>>, vector<32x48xf32>
    %110 = vector.extract_strided_slice %109 {offsets = [0, 0], sizes = [16, 48], strides = [1, 1]} : vector<32x48xf32> to vector<16x48xf32>
    %cst_49 = arith.constant dense<0.000000e+00> : vector<16x48xf32>
    %111 = tpu.matmul %105, %110, %cst_49 {dimension_numbers = #tpu.dot_dimension_numbers<[1], [0], [0], [1], [0, 0, 1, 1], [], []>} : vector<16x16xf32>, vector<16x48xf32>, vector<16x48xf32> -> vector<16x48xf32>
    %112 = vector.extract_strided_slice %109 {offsets = [16, 0], sizes = [16, 48], strides = [1, 1]} : vector<32x48xf32> to vector<16x48xf32>
    %cst_50 = arith.constant dense<0.000000e+00> : vector<16x48xf32>
    %113 = tpu.matmul %106, %112, %cst_50 {dimension_numbers = #tpu.dot_dimension_numbers<[1], [0], [0], [1], [0, 0, 1, 1], [], []>} : vector<16x16xf32>, vector<16x48xf32>, vector<16x48xf32> -> vector<16x48xf32>
    %114 = arith.addf %111, %113 : vector<16x48xf32>
    %c0_51 = arith.constant 0 : index
    %c0_52 = arith.constant 0 : index
    %115 = vector.load %arg15[%c0_51, %c0_52] : memref<1x48xf32, #tpu.memory_space<vmem>>, vector<1x48xf32>
    %116 = vector.broadcast %115 : vector<1x48xf32> to vector<16x48xf32>
    %117 = arith.addf %114, %116 : vector<16x48xf32>
    %c0_53 = arith.constant 0 : index
    %c0_54 = arith.constant 0 : index
    %118 = vector.load %arg14[%c0_53, %c0_54] : memref<16x48xf32, #tpu.memory_space<vmem>>, vector<16x48xf32>
    %c0_55 = arith.constant 0 : index
    %c0_56 = arith.constant 0 : index
    %119 = vector.load %arg16[%c0_55, %c0_56] : memref<1x48xf32, #tpu.memory_space<vmem>>, vector<1x48xf32>
    %cst_57 = arith.constant 0.000000e+00 : f32
    %120 = vector.broadcast %cst_57 : f32 to vector<2x16xf32>
    %121 = vector.extract_strided_slice %117 {offsets = [0, 0], sizes = [2, 48], strides = [1, 1]} : vector<16x48xf32> to vector<2x48xf32>
    %cst_58 = arith.constant dense<0.000000e+00> : vector<2x48xf32>
    %122 = tpu.matmul %120, %118, %cst_58 {dimension_numbers = #tpu.dot_dimension_numbers<[1], [0], [0], [1], [0, 0, 1, 1], [], []>} : vector<2x16xf32>, vector<16x48xf32>, vector<2x48xf32> -> vector<2x48xf32>
    %123 = vector.broadcast %119 : vector<1x48xf32> to vector<2x48xf32>
    %124 = arith.addf %122, %123 : vector<2x48xf32>
    %125 = vector.extract_strided_slice %121 {offsets = [0, 0], sizes = [2, 16], strides = [1, 1]} : vector<2x48xf32> to vector<2x16xf32>
    %126 = vector.extract_strided_slice %124 {offsets = [0, 0], sizes = [2, 16], strides = [1, 1]} : vector<2x48xf32> to vector<2x16xf32>
    %127 = arith.addf %125, %126 : vector<2x16xf32>
    %128 = arith.negf %127 : vector<2x16xf32>
    %129 = math.exp %128 : vector<2x16xf32>
    %cst_59 = arith.constant 1.000000e+00 : f32
    %130 = vector.broadcast %cst_59 : f32 to vector<2x16xf32>
    %131 = arith.addf %130, %129 : vector<2x16xf32>
    %132 = arith.divf %130, %131 : vector<2x16xf32>
    %133 = vector.extract_strided_slice %121 {offsets = [0, 16], sizes = [2, 16], strides = [1, 1]} : vector<2x48xf32> to vector<2x16xf32>
    %134 = vector.extract_strided_slice %124 {offsets = [0, 16], sizes = [2, 16], strides = [1, 1]} : vector<2x48xf32> to vector<2x16xf32>
    %135 = arith.addf %133, %134 : vector<2x16xf32>
    %136 = arith.negf %135 : vector<2x16xf32>
    %137 = math.exp %136 : vector<2x16xf32>
    %cst_60 = arith.constant 1.000000e+00 : f32
    %138 = vector.broadcast %cst_60 : f32 to vector<2x16xf32>
    %139 = arith.addf %138, %137 : vector<2x16xf32>
    %140 = arith.divf %138, %139 : vector<2x16xf32>
    %141 = vector.extract_strided_slice %121 {offsets = [0, 32], sizes = [2, 16], strides = [1, 1]} : vector<2x48xf32> to vector<2x16xf32>
    %142 = vector.extract_strided_slice %124 {offsets = [0, 32], sizes = [2, 16], strides = [1, 1]} : vector<2x48xf32> to vector<2x16xf32>
    %143 = arith.mulf %132, %142 : vector<2x16xf32>
    %144 = arith.addf %141, %143 : vector<2x16xf32>
    %145 = math.tanh %144 : vector<2x16xf32>
    %cst_61 = arith.constant 1.000000e+00 : f32
    %146 = vector.broadcast %cst_61 : f32 to vector<2x16xf32>
    %147 = arith.subf %146, %140 : vector<2x16xf32>
    %148 = arith.mulf %147, %145 : vector<2x16xf32>
    %149 = arith.mulf %140, %120 : vector<2x16xf32>
    %150 = arith.addf %148, %149 : vector<2x16xf32>
    %c0_62 = arith.constant 0 : index
    %c0_63 = arith.constant 0 : index
    %151 = vector.load %arg32[%c0_62, %c0_63] : memref<16x16xf32, #tpu.memory_space<vmem>>, vector<2x16xf32>
    tpu.vector_store %arg32[%c0_62, %c0_63], %150 {strides = array<i32>} : memref<16x16xf32, #tpu.memory_space<vmem>>, vector<2x16xf32>,
    %152 = vector.extract_strided_slice %117 {offsets = [2, 0], sizes = [2, 48], strides = [1, 1]} : vector<16x48xf32> to vector<2x48xf32>
    %cst_64 = arith.constant dense<0.000000e+00> : vector<2x48xf32>
    %153 = tpu.matmul %150, %118, %cst_64 {dimension_numbers = #tpu.dot_dimension_numbers<[1], [0], [0], [1], [0, 0, 1, 1], [], []>} : vector<2x16xf32>, vector<16x48xf32>, vector<2x48xf32> -> vector<2x48xf32>
    %154 = vector.broadcast %119 : vector<1x48xf32> to vector<2x48xf32>
    %155 = arith.addf %153, %154 : vector<2x48xf32>
    %156 = vector.extract_strided_slice %152 {offsets = [0, 0], sizes = [2, 16], strides = [1, 1]} : vector<2x48xf32> to vector<2x16xf32>
    %157 = vector.extract_strided_slice %155 {offsets = [0, 0], sizes = [2, 16], strides = [1, 1]} : vector<2x48xf32> to vector<2x16xf32>
    %158 = arith.addf %156, %157 : vector<2x16xf32>
    %159 = arith.negf %158 : vector<2x16xf32>
    %160 = math.exp %159 : vector<2x16xf32>
    %cst_65 = arith.constant 1.000000e+00 : f32
    %161 = vector.broadcast %cst_65 : f32 to vector<2x16xf32>
    %162 = arith.addf %161, %160 : vector<2x16xf32>
    %163 = arith.divf %161, %162 : vector<2x16xf32>
    %164 = vector.extract_strided_slice %152 {offsets = [0, 16], sizes = [2, 16], strides = [1, 1]} : vector<2x48xf32> to vector<2x16xf32>
    %165 = vector.extract_strided_slice %155 {offsets = [0, 16], sizes = [2, 16], strides = [1, 1]} : vector<2x48xf32> to vector<2x16xf32>
    %166 = arith.addf %164, %165 : vector<2x16xf32>
    %167 = arith.negf %166 : vector<2x16xf32>
    %168 = math.exp %167 : vector<2x16xf32>
    %cst_66 = arith.constant 1.000000e+00 : f32
    %169 = vector.broadcast %cst_66 : f32 to vector<2x16xf32>
    %170 = arith.addf %169, %168 : vector<2x16xf32>
    %171 = arith.divf %169, %170 : vector<2x16xf32>
    %172 = vector.extract_strided_slice %152 {offsets = [0, 32], sizes = [2, 16], strides = [1, 1]} : vector<2x48xf32> to vector<2x16xf32>
    %173 = vector.extract_strided_slice %155 {offsets = [0, 32], sizes = [2, 16], strides = [1, 1]} : vector<2x48xf32> to vector<2x16xf32>
    %174 = arith.mulf %163, %173 : vector<2x16xf32>
    %175 = arith.addf %172, %174 : vector<2x16xf32>
    %176 = math.tanh %175 : vector<2x16xf32>
    %cst_67 = arith.constant 1.000000e+00 : f32
    %177 = vector.broadcast %cst_67 : f32 to vector<2x16xf32>
    %178 = arith.subf %177, %171 : vector<2x16xf32>
    %179 = arith.mulf %178, %176 : vector<2x16xf32>
    %180 = arith.mulf %171, %150 : vector<2x16xf32>
    %181 = arith.addf %179, %180 : vector<2x16xf32>
    %c2 = arith.constant 2 : index
    %c0_68 = arith.constant 0 : index
    %182 = vector.load %arg32[%c2, %c0_68] : memref<16x16xf32, #tpu.memory_space<vmem>>, vector<2x16xf32>
    tpu.vector_store %arg32[%c2, %c0_68], %181 {strides = array<i32>} : memref<16x16xf32, #tpu.memory_space<vmem>>, vector<2x16xf32>,
    %183 = vector.extract_strided_slice %117 {offsets = [4, 0], sizes = [2, 48], strides = [1, 1]} : vector<16x48xf32> to vector<2x48xf32>
    %cst_69 = arith.constant dense<0.000000e+00> : vector<2x48xf32>
    %184 = tpu.matmul %181, %118, %cst_69 {dimension_numbers = #tpu.dot_dimension_numbers<[1], [0], [0], [1], [0, 0, 1, 1], [], []>} : vector<2x16xf32>, vector<16x48xf32>, vector<2x48xf32> -> vector<2x48xf32>
    %185 = vector.broadcast %119 : vector<1x48xf32> to vector<2x48xf32>
    %186 = arith.addf %184, %185 : vector<2x48xf32>
    %187 = vector.extract_strided_slice %183 {offsets = [0, 0], sizes = [2, 16], strides = [1, 1]} : vector<2x48xf32> to vector<2x16xf32>
    %188 = vector.extract_strided_slice %186 {offsets = [0, 0], sizes = [2, 16], strides = [1, 1]} : vector<2x48xf32> to vector<2x16xf32>
    %189 = arith.addf %187, %188 : vector<2x16xf32>
    %190 = arith.negf %189 : vector<2x16xf32>
    %191 = math.exp %190 : vector<2x16xf32>
    %cst_70 = arith.constant 1.000000e+00 : f32
    %192 = vector.broadcast %cst_70 : f32 to vector<2x16xf32>
    %193 = arith.addf %192, %191 : vector<2x16xf32>
    %194 = arith.divf %192, %193 : vector<2x16xf32>
    %195 = vector.extract_strided_slice %183 {offsets = [0, 16], sizes = [2, 16], strides = [1, 1]} : vector<2x48xf32> to vector<2x16xf32>
    %196 = vector.extract_strided_slice %186 {offsets = [0, 16], sizes = [2, 16], strides = [1, 1]} : vector<2x48xf32> to vector<2x16xf32>
    %197 = arith.addf %195, %196 : vector<2x16xf32>
    %198 = arith.negf %197 : vector<2x16xf32>
    %199 = math.exp %198 : vector<2x16xf32>
    %cst_71 = arith.constant 1.000000e+00 : f32
    %200 = vector.broadcast %cst_71 : f32 to vector<2x16xf32>
    %201 = arith.addf %200, %199 : vector<2x16xf32>
    %202 = arith.divf %200, %201 : vector<2x16xf32>
    %203 = vector.extract_strided_slice %183 {offsets = [0, 32], sizes = [2, 16], strides = [1, 1]} : vector<2x48xf32> to vector<2x16xf32>
    %204 = vector.extract_strided_slice %186 {offsets = [0, 32], sizes = [2, 16], strides = [1, 1]} : vector<2x48xf32> to vector<2x16xf32>
    %205 = arith.mulf %194, %204 : vector<2x16xf32>
    %206 = arith.addf %203, %205 : vector<2x16xf32>
    %207 = math.tanh %206 : vector<2x16xf32>
    %cst_72 = arith.constant 1.000000e+00 : f32
    %208 = vector.broadcast %cst_72 : f32 to vector<2x16xf32>
    %209 = arith.subf %208, %202 : vector<2x16xf32>
    %210 = arith.mulf %209, %207 : vector<2x16xf32>
    %211 = arith.mulf %202, %181 : vector<2x16xf32>
    %212 = arith.addf %210, %211 : vector<2x16xf32>
    %c4 = arith.constant 4 : index
    %c0_73 = arith.constant 0 : index
    %213 = vector.load %arg32[%c4, %c0_73] : memref<16x16xf32, #tpu.memory_space<vmem>>, vector<2x16xf32>
    tpu.vector_store %arg32[%c4, %c0_73], %212 {strides = array<i32>} : memref<16x16xf32, #tpu.memory_space<vmem>>, vector<2x16xf32>,
    %214 = vector.extract_strided_slice %117 {offsets = [6, 0], sizes = [2, 48], strides = [1, 1]} : vector<16x48xf32> to vector<2x48xf32>
    %cst_74 = arith.constant dense<0.000000e+00> : vector<2x48xf32>
    %215 = tpu.matmul %212, %118, %cst_74 {dimension_numbers = #tpu.dot_dimension_numbers<[1], [0], [0], [1], [0, 0, 1, 1], [], []>} : vector<2x16xf32>, vector<16x48xf32>, vector<2x48xf32> -> vector<2x48xf32>
    %216 = vector.broadcast %119 : vector<1x48xf32> to vector<2x48xf32>
    %217 = arith.addf %215, %216 : vector<2x48xf32>
    %218 = vector.extract_strided_slice %214 {offsets = [0, 0], sizes = [2, 16], strides = [1, 1]} : vector<2x48xf32> to vector<2x16xf32>
    %219 = vector.extract_strided_slice %217 {offsets = [0, 0], sizes = [2, 16], strides = [1, 1]} : vector<2x48xf32> to vector<2x16xf32>
    %220 = arith.addf %218, %219 : vector<2x16xf32>
    %221 = arith.negf %220 : vector<2x16xf32>
    %222 = math.exp %221 : vector<2x16xf32>
    %cst_75 = arith.constant 1.000000e+00 : f32
    %223 = vector.broadcast %cst_75 : f32 to vector<2x16xf32>
    %224 = arith.addf %223, %222 : vector<2x16xf32>
    %225 = arith.divf %223, %224 : vector<2x16xf32>
    %226 = vector.extract_strided_slice %214 {offsets = [0, 16], sizes = [2, 16], strides = [1, 1]} : vector<2x48xf32> to vector<2x16xf32>
    %227 = vector.extract_strided_slice %217 {offsets = [0, 16], sizes = [2, 16], strides = [1, 1]} : vector<2x48xf32> to vector<2x16xf32>
    %228 = arith.addf %226, %227 : vector<2x16xf32>
    %229 = arith.negf %228 : vector<2x16xf32>
    %230 = math.exp %229 : vector<2x16xf32>
    %cst_76 = arith.constant 1.000000e+00 : f32
    %231 = vector.broadcast %cst_76 : f32 to vector<2x16xf32>
    %232 = arith.addf %231, %230 : vector<2x16xf32>
    %233 = arith.divf %231, %232 : vector<2x16xf32>
    %234 = vector.extract_strided_slice %214 {offsets = [0, 32], sizes = [2, 16], strides = [1, 1]} : vector<2x48xf32> to vector<2x16xf32>
    %235 = vector.extract_strided_slice %217 {offsets = [0, 32], sizes = [2, 16], strides = [1, 1]} : vector<2x48xf32> to vector<2x16xf32>
    %236 = arith.mulf %225, %235 : vector<2x16xf32>
    %237 = arith.addf %234, %236 : vector<2x16xf32>
    %238 = math.tanh %237 : vector<2x16xf32>
    %cst_77 = arith.constant 1.000000e+00 : f32
    %239 = vector.broadcast %cst_77 : f32 to vector<2x16xf32>
    %240 = arith.subf %239, %233 : vector<2x16xf32>
    %241 = arith.mulf %240, %238 : vector<2x16xf32>
    %242 = arith.mulf %233, %212 : vector<2x16xf32>
    %243 = arith.addf %241, %242 : vector<2x16xf32>
    %c6 = arith.constant 6 : index
    %c0_78 = arith.constant 0 : index
    %244 = vector.load %arg32[%c6, %c0_78] : memref<16x16xf32, #tpu.memory_space<vmem>>, vector<2x16xf32>
    tpu.vector_store %arg32[%c6, %c0_78], %243 {strides = array<i32>} : memref<16x16xf32, #tpu.memory_space<vmem>>, vector<2x16xf32>,
    %245 = vector.extract_strided_slice %117 {offsets = [8, 0], sizes = [2, 48], strides = [1, 1]} : vector<16x48xf32> to vector<2x48xf32>
    %cst_79 = arith.constant dense<0.000000e+00> : vector<2x48xf32>
    %246 = tpu.matmul %243, %118, %cst_79 {dimension_numbers = #tpu.dot_dimension_numbers<[1], [0], [0], [1], [0, 0, 1, 1], [], []>} : vector<2x16xf32>, vector<16x48xf32>, vector<2x48xf32> -> vector<2x48xf32>
    %247 = vector.broadcast %119 : vector<1x48xf32> to vector<2x48xf32>
    %248 = arith.addf %246, %247 : vector<2x48xf32>
    %249 = vector.extract_strided_slice %245 {offsets = [0, 0], sizes = [2, 16], strides = [1, 1]} : vector<2x48xf32> to vector<2x16xf32>
    %250 = vector.extract_strided_slice %248 {offsets = [0, 0], sizes = [2, 16], strides = [1, 1]} : vector<2x48xf32> to vector<2x16xf32>
    %251 = arith.addf %249, %250 : vector<2x16xf32>
    %252 = arith.negf %251 : vector<2x16xf32>
    %253 = math.exp %252 : vector<2x16xf32>
    %cst_80 = arith.constant 1.000000e+00 : f32
    %254 = vector.broadcast %cst_80 : f32 to vector<2x16xf32>
    %255 = arith.addf %254, %253 : vector<2x16xf32>
    %256 = arith.divf %254, %255 : vector<2x16xf32>
    %257 = vector.extract_strided_slice %245 {offsets = [0, 16], sizes = [2, 16], strides = [1, 1]} : vector<2x48xf32> to vector<2x16xf32>
    %258 = vector.extract_strided_slice %248 {offsets = [0, 16], sizes = [2, 16], strides = [1, 1]} : vector<2x48xf32> to vector<2x16xf32>
    %259 = arith.addf %257, %258 : vector<2x16xf32>
    %260 = arith.negf %259 : vector<2x16xf32>
    %261 = math.exp %260 : vector<2x16xf32>
    %cst_81 = arith.constant 1.000000e+00 : f32
    %262 = vector.broadcast %cst_81 : f32 to vector<2x16xf32>
    %263 = arith.addf %262, %261 : vector<2x16xf32>
    %264 = arith.divf %262, %263 : vector<2x16xf32>
    %265 = vector.extract_strided_slice %245 {offsets = [0, 32], sizes = [2, 16], strides = [1, 1]} : vector<2x48xf32> to vector<2x16xf32>
    %266 = vector.extract_strided_slice %248 {offsets = [0, 32], sizes = [2, 16], strides = [1, 1]} : vector<2x48xf32> to vector<2x16xf32>
    %267 = arith.mulf %256, %266 : vector<2x16xf32>
    %268 = arith.addf %265, %267 : vector<2x16xf32>
    %269 = math.tanh %268 : vector<2x16xf32>
    %cst_82 = arith.constant 1.000000e+00 : f32
    %270 = vector.broadcast %cst_82 : f32 to vector<2x16xf32>
    %271 = arith.subf %270, %264 : vector<2x16xf32>
    %272 = arith.mulf %271, %269 : vector<2x16xf32>
    %273 = arith.mulf %264, %243 : vector<2x16xf32>
    %274 = arith.addf %272, %273 : vector<2x16xf32>
    %c8 = arith.constant 8 : index
    %c0_83 = arith.constant 0 : index
    %275 = vector.load %arg32[%c8, %c0_83] : memref<16x16xf32, #tpu.memory_space<vmem>>, vector<2x16xf32>
    tpu.vector_store %arg32[%c8, %c0_83], %274 {strides = array<i32>} : memref<16x16xf32, #tpu.memory_space<vmem>>, vector<2x16xf32>,
    %276 = vector.extract_strided_slice %117 {offsets = [10, 0], sizes = [2, 48], strides = [1, 1]} : vector<16x48xf32> to vector<2x48xf32>
    %cst_84 = arith.constant dense<0.000000e+00> : vector<2x48xf32>
    %277 = tpu.matmul %274, %118, %cst_84 {dimension_numbers = #tpu.dot_dimension_numbers<[1], [0], [0], [1], [0, 0, 1, 1], [], []>} : vector<2x16xf32>, vector<16x48xf32>, vector<2x48xf32> -> vector<2x48xf32>
    %278 = vector.broadcast %119 : vector<1x48xf32> to vector<2x48xf32>
    %279 = arith.addf %277, %278 : vector<2x48xf32>
    %280 = vector.extract_strided_slice %276 {offsets = [0, 0], sizes = [2, 16], strides = [1, 1]} : vector<2x48xf32> to vector<2x16xf32>
    %281 = vector.extract_strided_slice %279 {offsets = [0, 0], sizes = [2, 16], strides = [1, 1]} : vector<2x48xf32> to vector<2x16xf32>
    %282 = arith.addf %280, %281 : vector<2x16xf32>
    %283 = arith.negf %282 : vector<2x16xf32>
    %284 = math.exp %283 : vector<2x16xf32>
    %cst_85 = arith.constant 1.000000e+00 : f32
    %285 = vector.broadcast %cst_85 : f32 to vector<2x16xf32>
    %286 = arith.addf %285, %284 : vector<2x16xf32>
    %287 = arith.divf %285, %286 : vector<2x16xf32>
    %288 = vector.extract_strided_slice %276 {offsets = [0, 16], sizes = [2, 16], strides = [1, 1]} : vector<2x48xf32> to vector<2x16xf32>
    %289 = vector.extract_strided_slice %279 {offsets = [0, 16], sizes = [2, 16], strides = [1, 1]} : vector<2x48xf32> to vector<2x16xf32>
    %290 = arith.addf %288, %289 : vector<2x16xf32>
    %291 = arith.negf %290 : vector<2x16xf32>
    %292 = math.exp %291 : vector<2x16xf32>
    %cst_86 = arith.constant 1.000000e+00 : f32
    %293 = vector.broadcast %cst_86 : f32 to vector<2x16xf32>
    %294 = arith.addf %293, %292 : vector<2x16xf32>
    %295 = arith.divf %293, %294 : vector<2x16xf32>
    %296 = vector.extract_strided_slice %276 {offsets = [0, 32], sizes = [2, 16], strides = [1, 1]} : vector<2x48xf32> to vector<2x16xf32>
    %297 = vector.extract_strided_slice %279 {offsets = [0, 32], sizes = [2, 16], strides = [1, 1]} : vector<2x48xf32> to vector<2x16xf32>
    %298 = arith.mulf %287, %297 : vector<2x16xf32>
    %299 = arith.addf %296, %298 : vector<2x16xf32>
    %300 = math.tanh %299 : vector<2x16xf32>
    %cst_87 = arith.constant 1.000000e+00 : f32
    %301 = vector.broadcast %cst_87 : f32 to vector<2x16xf32>
    %302 = arith.subf %301, %295 : vector<2x16xf32>
    %303 = arith.mulf %302, %300 : vector<2x16xf32>
    %304 = arith.mulf %295, %274 : vector<2x16xf32>
    %305 = arith.addf %303, %304 : vector<2x16xf32>
    %c10 = arith.constant 10 : index
    %c0_88 = arith.constant 0 : index
    %306 = vector.load %arg32[%c10, %c0_88] : memref<16x16xf32, #tpu.memory_space<vmem>>, vector<2x16xf32>
    tpu.vector_store %arg32[%c10, %c0_88], %305 {strides = array<i32>} : memref<16x16xf32, #tpu.memory_space<vmem>>, vector<2x16xf32>,
    %307 = vector.extract_strided_slice %117 {offsets = [12, 0], sizes = [2, 48], strides = [1, 1]} : vector<16x48xf32> to vector<2x48xf32>
    %cst_89 = arith.constant dense<0.000000e+00> : vector<2x48xf32>
    %308 = tpu.matmul %305, %118, %cst_89 {dimension_numbers = #tpu.dot_dimension_numbers<[1], [0], [0], [1], [0, 0, 1, 1], [], []>} : vector<2x16xf32>, vector<16x48xf32>, vector<2x48xf32> -> vector<2x48xf32>
    %309 = vector.broadcast %119 : vector<1x48xf32> to vector<2x48xf32>
    %310 = arith.addf %308, %309 : vector<2x48xf32>
    %311 = vector.extract_strided_slice %307 {offsets = [0, 0], sizes = [2, 16], strides = [1, 1]} : vector<2x48xf32> to vector<2x16xf32>
    %312 = vector.extract_strided_slice %310 {offsets = [0, 0], sizes = [2, 16], strides = [1, 1]} : vector<2x48xf32> to vector<2x16xf32>
    %313 = arith.addf %311, %312 : vector<2x16xf32>
    %314 = arith.negf %313 : vector<2x16xf32>
    %315 = math.exp %314 : vector<2x16xf32>
    %cst_90 = arith.constant 1.000000e+00 : f32
    %316 = vector.broadcast %cst_90 : f32 to vector<2x16xf32>
    %317 = arith.addf %316, %315 : vector<2x16xf32>
    %318 = arith.divf %316, %317 : vector<2x16xf32>
    %319 = vector.extract_strided_slice %307 {offsets = [0, 16], sizes = [2, 16], strides = [1, 1]} : vector<2x48xf32> to vector<2x16xf32>
    %320 = vector.extract_strided_slice %310 {offsets = [0, 16], sizes = [2, 16], strides = [1, 1]} : vector<2x48xf32> to vector<2x16xf32>
    %321 = arith.addf %319, %320 : vector<2x16xf32>
    %322 = arith.negf %321 : vector<2x16xf32>
    %323 = math.exp %322 : vector<2x16xf32>
    %cst_91 = arith.constant 1.000000e+00 : f32
    %324 = vector.broadcast %cst_91 : f32 to vector<2x16xf32>
    %325 = arith.addf %324, %323 : vector<2x16xf32>
    %326 = arith.divf %324, %325 : vector<2x16xf32>
    %327 = vector.extract_strided_slice %307 {offsets = [0, 32], sizes = [2, 16], strides = [1, 1]} : vector<2x48xf32> to vector<2x16xf32>
    %328 = vector.extract_strided_slice %310 {offsets = [0, 32], sizes = [2, 16], strides = [1, 1]} : vector<2x48xf32> to vector<2x16xf32>
    %329 = arith.mulf %318, %328 : vector<2x16xf32>
    %330 = arith.addf %327, %329 : vector<2x16xf32>
    %331 = math.tanh %330 : vector<2x16xf32>
    %cst_92 = arith.constant 1.000000e+00 : f32
    %332 = vector.broadcast %cst_92 : f32 to vector<2x16xf32>
    %333 = arith.subf %332, %326 : vector<2x16xf32>
    %334 = arith.mulf %333, %331 : vector<2x16xf32>
    %335 = arith.mulf %326, %305 : vector<2x16xf32>
    %336 = arith.addf %334, %335 : vector<2x16xf32>
    %c12 = arith.constant 12 : index
    %c0_93 = arith.constant 0 : index
    %337 = vector.load %arg32[%c12, %c0_93] : memref<16x16xf32, #tpu.memory_space<vmem>>, vector<2x16xf32>
    tpu.vector_store %arg32[%c12, %c0_93], %336 {strides = array<i32>} : memref<16x16xf32, #tpu.memory_space<vmem>>, vector<2x16xf32>,
    %338 = vector.extract_strided_slice %117 {offsets = [14, 0], sizes = [2, 48], strides = [1, 1]} : vector<16x48xf32> to vector<2x48xf32>
    %cst_94 = arith.constant dense<0.000000e+00> : vector<2x48xf32>
    %339 = tpu.matmul %336, %118, %cst_94 {dimension_numbers = #tpu.dot_dimension_numbers<[1], [0], [0], [1], [0, 0, 1, 1], [], []>} : vector<2x16xf32>, vector<16x48xf32>, vector<2x48xf32> -> vector<2x48xf32>
    %340 = vector.broadcast %119 : vector<1x48xf32> to vector<2x48xf32>
    %341 = arith.addf %339, %340 : vector<2x48xf32>
    %342 = vector.extract_strided_slice %338 {offsets = [0, 0], sizes = [2, 16], strides = [1, 1]} : vector<2x48xf32> to vector<2x16xf32>
    %343 = vector.extract_strided_slice %341 {offsets = [0, 0], sizes = [2, 16], strides = [1, 1]} : vector<2x48xf32> to vector<2x16xf32>
    %344 = arith.addf %342, %343 : vector<2x16xf32>
    %345 = arith.negf %344 : vector<2x16xf32>
    %346 = math.exp %345 : vector<2x16xf32>
    %cst_95 = arith.constant 1.000000e+00 : f32
    %347 = vector.broadcast %cst_95 : f32 to vector<2x16xf32>
    %348 = arith.addf %347, %346 : vector<2x16xf32>
    %349 = arith.divf %347, %348 : vector<2x16xf32>
    %350 = vector.extract_strided_slice %338 {offsets = [0, 16], sizes = [2, 16], strides = [1, 1]} : vector<2x48xf32> to vector<2x16xf32>
    %351 = vector.extract_strided_slice %341 {offsets = [0, 16], sizes = [2, 16], strides = [1, 1]} : vector<2x48xf32> to vector<2x16xf32>
    %352 = arith.addf %350, %351 : vector<2x16xf32>
    %353 = arith.negf %352 : vector<2x16xf32>
    %354 = math.exp %353 : vector<2x16xf32>
    %cst_96 = arith.constant 1.000000e+00 : f32
    %355 = vector.broadcast %cst_96 : f32 to vector<2x16xf32>
    %356 = arith.addf %355, %354 : vector<2x16xf32>
    %357 = arith.divf %355, %356 : vector<2x16xf32>
    %358 = vector.extract_strided_slice %338 {offsets = [0, 32], sizes = [2, 16], strides = [1, 1]} : vector<2x48xf32> to vector<2x16xf32>
    %359 = vector.extract_strided_slice %341 {offsets = [0, 32], sizes = [2, 16], strides = [1, 1]} : vector<2x48xf32> to vector<2x16xf32>
    %360 = arith.mulf %349, %359 : vector<2x16xf32>
    %361 = arith.addf %358, %360 : vector<2x16xf32>
    %362 = math.tanh %361 : vector<2x16xf32>
    %cst_97 = arith.constant 1.000000e+00 : f32
    %363 = vector.broadcast %cst_97 : f32 to vector<2x16xf32>
    %364 = arith.subf %363, %357 : vector<2x16xf32>
    %365 = arith.mulf %364, %362 : vector<2x16xf32>
    %366 = arith.mulf %357, %336 : vector<2x16xf32>
    %367 = arith.addf %365, %366 : vector<2x16xf32>
    %c14 = arith.constant 14 : index
    %c0_98 = arith.constant 0 : index
    %368 = vector.load %arg32[%c14, %c0_98] : memref<16x16xf32, #tpu.memory_space<vmem>>, vector<2x16xf32>
    tpu.vector_store %arg32[%c14, %c0_98], %367 {strides = array<i32>} : memref<16x16xf32, #tpu.memory_space<vmem>>, vector<2x16xf32>,
    %c0_99 = arith.constant 0 : index
    %c0_100 = arith.constant 0 : index
    %369 = vector.load %arg32[%c0_99, %c0_100] : memref<16x16xf32, #tpu.memory_space<vmem>>, vector<16x16xf32>
    %c0_101 = arith.constant 0 : index
    %c0_102 = arith.constant 0 : index
    %370 = vector.load %arg17[%c0_101, %c0_102] : memref<18x16xf32, #tpu.memory_space<vmem>>, vector<18x16xf32>
    %371 = vector.extract_strided_slice %370 {offsets = [0, 0], sizes = [16, 16], strides = [1, 1]} : vector<18x16xf32> to vector<16x16xf32>
    %cst_103 = arith.constant dense<0.000000e+00> : vector<16x16xf32>
    %372 = tpu.matmul %369, %371, %cst_103 {dimension_numbers = #tpu.dot_dimension_numbers<[1], [0], [0], [1], [0, 0, 1, 1], [], []>} : vector<16x16xf32>, vector<16x16xf32>, vector<16x16xf32> -> vector<16x16xf32>
    %373 = vector.extract_strided_slice %370 {offsets = [16, 0], sizes = [1, 16], strides = [1, 1]} : vector<18x16xf32> to vector<1x16xf32>
    %374 = vector.broadcast %107 : vector<16x1xf32> to vector<16x16xf32>
    %375 = vector.broadcast %373 : vector<1x16xf32> to vector<16x16xf32>
    %376 = arith.mulf %374, %375 : vector<16x16xf32>
    %377 = arith.addf %372, %376 : vector<16x16xf32>
    %378 = vector.extract_strided_slice %370 {offsets = [17, 0], sizes = [1, 16], strides = [1, 1]} : vector<18x16xf32> to vector<1x16xf32>
    %379 = vector.broadcast %108 : vector<16x1xf32> to vector<16x16xf32>
    %380 = vector.broadcast %378 : vector<1x16xf32> to vector<16x16xf32>
    %381 = arith.mulf %379, %380 : vector<16x16xf32>
    %382 = arith.addf %377, %381 : vector<16x16xf32>
    %c0_104 = arith.constant 0 : index
    %c0_105 = arith.constant 0 : index
    %383 = vector.load %arg18[%c0_104, %c0_105] : memref<1x16xf32, #tpu.memory_space<vmem>>, vector<1x16xf32>
    %384 = vector.broadcast %383 : vector<1x16xf32> to vector<16x16xf32>
    %385 = arith.addf %382, %384 : vector<16x16xf32>
    %cst_106 = arith.constant dense<0.000000e+00> : vector<16xf32>
    %386 = vector.multi_reduction <add>, %385, %cst_106 [1] : vector<16x16xf32> to vector<16xf32>
    %387 = vector.shape_cast %386 : vector<16xf32> to vector<16x1xf32>
    %cst_107 = arith.constant 1.600000e+01 : f32
    %388 = vector.broadcast %cst_107 : f32 to vector<16x1xf32>
    %389 = arith.divf %387, %388 : vector<16x1xf32>
    %390 = vector.broadcast %389 : vector<16x1xf32> to vector<16x16xf32>
    %391 = arith.subf %385, %390 : vector<16x16xf32>
    %392 = arith.mulf %391, %391 : vector<16x16xf32>
    %cst_108 = arith.constant dense<0.000000e+00> : vector<16xf32>
    %393 = vector.multi_reduction <add>, %392, %cst_108 [1] : vector<16x16xf32> to vector<16xf32>
    %394 = vector.shape_cast %393 : vector<16xf32> to vector<16x1xf32>
    %cst_109 = arith.constant 1.600000e+01 : f32
    %395 = vector.broadcast %cst_109 : f32 to vector<16x1xf32>
    %396 = arith.divf %394, %395 : vector<16x1xf32>
    %397 = vector.broadcast %389 : vector<16x1xf32> to vector<16x16xf32>
    %398 = arith.subf %385, %397 : vector<16x16xf32>
    %cst_110 = arith.constant 9.99999974E-6 : f32
    %399 = vector.broadcast %cst_110 : f32 to vector<16x1xf32>
    %400 = arith.addf %396, %399 : vector<16x1xf32>
    %401 = math.rsqrt %400 : vector<16x1xf32>
    %402 = vector.broadcast %401 : vector<16x1xf32> to vector<16x16xf32>
    %403 = arith.mulf %398, %402 : vector<16x16xf32>
    %c0_111 = arith.constant 0 : index
    %c0_112 = arith.constant 0 : index
    %404 = vector.load %arg19[%c0_111, %c0_112] : memref<1x16xf32, #tpu.memory_space<vmem>>, vector<1x16xf32>
    %405 = vector.broadcast %404 : vector<1x16xf32> to vector<16x16xf32>
    %406 = arith.mulf %403, %405 : vector<16x16xf32>
    %c0_113 = arith.constant 0 : index
    %c0_114 = arith.constant 0 : index
    %407 = vector.load %arg20[%c0_113, %c0_114] : memref<1x16xf32, #tpu.memory_space<vmem>>, vector<1x16xf32>
    %408 = vector.broadcast %407 : vector<1x16xf32> to vector<16x16xf32>
    %409 = arith.addf %406, %408 : vector<16x16xf32>
    %cst_115 = arith.constant 0.000000e+00 : f32
    %410 = vector.broadcast %cst_115 : f32 to vector<16x16xf32>
    %411 = arith.cmpf oge, %409, %410 : vector<16x16xf32>
    %cst_116 = arith.constant 0.00999999977 : f32
    %412 = vector.broadcast %cst_116 : f32 to vector<16x16xf32>
    %413 = arith.mulf %412, %409 : vector<16x16xf32>
    %414 = arith.select %411, %409, %413 : vector<16x16xi1>, vector<16x16xf32>
    %c0_117 = arith.constant 0 : index
    %c0_118 = arith.constant 0 : index
    %415 = vector.load %arg21[%c0_117, %c0_118] : memref<16x16xf32, #tpu.memory_space<vmem>>, vector<16x16xf32>
    %cst_119 = arith.constant dense<0.000000e+00> : vector<16x16xf32>
    %416 = tpu.matmul %414, %415, %cst_119 {dimension_numbers = #tpu.dot_dimension_numbers<[1], [0], [0], [1], [0, 0, 1, 1], [], []>} : vector<16x16xf32>, vector<16x16xf32>, vector<16x16xf32> -> vector<16x16xf32>
    %c0_120 = arith.constant 0 : index
    %c0_121 = arith.constant 0 : index
    %417 = vector.load %arg22[%c0_120, %c0_121] : memref<1x16xf32, #tpu.memory_space<vmem>>, vector<1x16xf32>
    %418 = vector.broadcast %417 : vector<1x16xf32> to vector<16x16xf32>
    %419 = arith.addf %416, %418 : vector<16x16xf32>
    %cst_122 = arith.constant dense<0.000000e+00> : vector<16xf32>
    %420 = vector.multi_reduction <add>, %419, %cst_122 [1] : vector<16x16xf32> to vector<16xf32>
    %421 = vector.shape_cast %420 : vector<16xf32> to vector<16x1xf32>
    %cst_123 = arith.constant 1.600000e+01 : f32
    %422 = vector.broadcast %cst_123 : f32 to vector<16x1xf32>
    %423 = arith.divf %421, %422 : vector<16x1xf32>
    %424 = vector.broadcast %423 : vector<16x1xf32> to vector<16x16xf32>
    %425 = arith.subf %419, %424 : vector<16x16xf32>
    %426 = arith.mulf %425, %425 : vector<16x16xf32>
    %cst_124 = arith.constant dense<0.000000e+00> : vector<16xf32>
    %427 = vector.multi_reduction <add>, %426, %cst_124 [1] : vector<16x16xf32> to vector<16xf32>
    %428 = vector.shape_cast %427 : vector<16xf32> to vector<16x1xf32>
    %cst_125 = arith.constant 1.600000e+01 : f32
    %429 = vector.broadcast %cst_125 : f32 to vector<16x1xf32>
    %430 = arith.divf %428, %429 : vector<16x1xf32>
    %431 = vector.broadcast %423 : vector<16x1xf32> to vector<16x16xf32>
    %432 = arith.subf %419, %431 : vector<16x16xf32>
    %cst_126 = arith.constant 9.99999974E-6 : f32
    %433 = vector.broadcast %cst_126 : f32 to vector<16x1xf32>
    %434 = arith.addf %430, %433 : vector<16x1xf32>
    %435 = math.rsqrt %434 : vector<16x1xf32>
    %436 = vector.broadcast %435 : vector<16x1xf32> to vector<16x16xf32>
    %437 = arith.mulf %432, %436 : vector<16x16xf32>
    %c0_127 = arith.constant 0 : index
    %c0_128 = arith.constant 0 : index
    %438 = vector.load %arg23[%c0_127, %c0_128] : memref<1x16xf32, #tpu.memory_space<vmem>>, vector<1x16xf32>
    %439 = vector.broadcast %438 : vector<1x16xf32> to vector<16x16xf32>
    %440 = arith.mulf %437, %439 : vector<16x16xf32>
    %c0_129 = arith.constant 0 : index
    %c0_130 = arith.constant 0 : index
    %441 = vector.load %arg24[%c0_129, %c0_130] : memref<1x16xf32, #tpu.memory_space<vmem>>, vector<1x16xf32>
    %442 = vector.broadcast %441 : vector<1x16xf32> to vector<16x16xf32>
    %443 = arith.addf %440, %442 : vector<16x16xf32>
    %cst_131 = arith.constant 0.000000e+00 : f32
    %444 = vector.broadcast %cst_131 : f32 to vector<16x16xf32>
    %445 = arith.cmpf oge, %443, %444 : vector<16x16xf32>
    %cst_132 = arith.constant 0.00999999977 : f32
    %446 = vector.broadcast %cst_132 : f32 to vector<16x16xf32>
    %447 = arith.mulf %446, %443 : vector<16x16xf32>
    %448 = arith.select %445, %443, %447 : vector<16x16xi1>, vector<16x16xf32>
    %c0_133 = arith.constant 0 : index
    %c0_134 = arith.constant 0 : index
    %449 = vector.load %arg25[%c0_133, %c0_134] : memref<16x16xf32, #tpu.memory_space<vmem>>, vector<16x16xf32>
    %cst_135 = arith.constant dense<0.000000e+00> : vector<16x16xf32>
    %450 = tpu.matmul %448, %449, %cst_135 {dimension_numbers = #tpu.dot_dimension_numbers<[1], [0], [0], [1], [0, 0, 1, 1], [], []>} : vector<16x16xf32>, vector<16x16xf32>, vector<16x16xf32> -> vector<16x16xf32>
    %c0_136 = arith.constant 0 : index
    %c0_137 = arith.constant 0 : index
    %451 = vector.load %arg26[%c0_136, %c0_137] : memref<1x16xf32, #tpu.memory_space<vmem>>, vector<1x16xf32>
    %452 = vector.broadcast %451 : vector<1x16xf32> to vector<16x16xf32>
    %453 = arith.addf %450, %452 : vector<16x16xf32>
    %cst_138 = arith.constant dense<0.000000e+00> : vector<16xf32>
    %454 = vector.multi_reduction <add>, %453, %cst_138 [1] : vector<16x16xf32> to vector<16xf32>
    %455 = vector.shape_cast %454 : vector<16xf32> to vector<16x1xf32>
    %cst_139 = arith.constant 1.600000e+01 : f32
    %456 = vector.broadcast %cst_139 : f32 to vector<16x1xf32>
    %457 = arith.divf %455, %456 : vector<16x1xf32>
    %458 = vector.broadcast %457 : vector<16x1xf32> to vector<16x16xf32>
    %459 = arith.subf %453, %458 : vector<16x16xf32>
    %460 = arith.mulf %459, %459 : vector<16x16xf32>
    %cst_140 = arith.constant dense<0.000000e+00> : vector<16xf32>
    %461 = vector.multi_reduction <add>, %460, %cst_140 [1] : vector<16x16xf32> to vector<16xf32>
    %462 = vector.shape_cast %461 : vector<16xf32> to vector<16x1xf32>
    %cst_141 = arith.constant 1.600000e+01 : f32
    %463 = vector.broadcast %cst_141 : f32 to vector<16x1xf32>
    %464 = arith.divf %462, %463 : vector<16x1xf32>
    %465 = vector.broadcast %457 : vector<16x1xf32> to vector<16x16xf32>
    %466 = arith.subf %453, %465 : vector<16x16xf32>
    %cst_142 = arith.constant 9.99999974E-6 : f32
    %467 = vector.broadcast %cst_142 : f32 to vector<16x1xf32>
    %468 = arith.addf %464, %467 : vector<16x1xf32>
    %469 = math.rsqrt %468 : vector<16x1xf32>
    %470 = vector.broadcast %469 : vector<16x1xf32> to vector<16x16xf32>
    %471 = arith.mulf %466, %470 : vector<16x16xf32>
    %c0_143 = arith.constant 0 : index
    %c0_144 = arith.constant 0 : index
    %472 = vector.load %arg27[%c0_143, %c0_144] : memref<1x16xf32, #tpu.memory_space<vmem>>, vector<1x16xf32>
    %473 = vector.broadcast %472 : vector<1x16xf32> to vector<16x16xf32>
    %474 = arith.mulf %471, %473 : vector<16x16xf32>
    %c0_145 = arith.constant 0 : index
    %c0_146 = arith.constant 0 : index
    %475 = vector.load %arg28[%c0_145, %c0_146] : memref<1x16xf32, #tpu.memory_space<vmem>>, vector<1x16xf32>
    %476 = vector.broadcast %475 : vector<1x16xf32> to vector<16x16xf32>
    %477 = arith.addf %474, %476 : vector<16x16xf32>
    %cst_147 = arith.constant 0.000000e+00 : f32
    %478 = vector.broadcast %cst_147 : f32 to vector<16x16xf32>
    %479 = arith.cmpf oge, %477, %478 : vector<16x16xf32>
    %cst_148 = arith.constant 0.00999999977 : f32
    %480 = vector.broadcast %cst_148 : f32 to vector<16x16xf32>
    %481 = arith.mulf %480, %477 : vector<16x16xf32>
    %482 = arith.select %479, %477, %481 : vector<16x16xi1>, vector<16x16xf32>
    %c0_149 = arith.constant 0 : index
    %c0_150 = arith.constant 0 : index
    %483 = vector.load %arg29[%c0_149, %c0_150] : memref<16x14xf32, #tpu.memory_space<vmem>>, vector<16x14xf32>
    %cst_151 = arith.constant dense<0.000000e+00> : vector<16x14xf32>
    %484 = tpu.matmul %482, %483, %cst_151 {dimension_numbers = #tpu.dot_dimension_numbers<[1], [0], [0], [1], [0, 0, 1, 1], [], []>} : vector<16x16xf32>, vector<16x14xf32>, vector<16x14xf32> -> vector<16x14xf32>
    %c0_152 = arith.constant 0 : index
    %c0_153 = arith.constant 0 : index
    %485 = vector.load %arg30[%c0_152, %c0_153] : memref<1x14xf32, #tpu.memory_space<vmem>>, vector<1x14xf32>
    %486 = vector.broadcast %485 : vector<1x14xf32> to vector<16x14xf32>
    %487 = arith.addf %484, %486 : vector<16x14xf32>
    %488 = arith.negf %487 : vector<16x14xf32>
    %489 = math.exp %488 : vector<16x14xf32>
    %cst_154 = arith.constant 1.000000e+00 : f32
    %490 = vector.broadcast %cst_154 : f32 to vector<16x14xf32>
    %491 = arith.addf %490, %489 : vector<16x14xf32>
    %492 = arith.divf %490, %491 : vector<16x14xf32>
    %493 = math.log %492 : vector<16x14xf32>
    %cst_155 = arith.constant 2.30258512 : f32
    %494 = vector.broadcast %cst_155 : f32 to vector<16x14xf32>
    %495 = arith.mulf %494, %493 : vector<16x14xf32>
    %496 = math.exp %495 : vector<16x14xf32>
    %cst_156 = arith.constant 2.000000e+00 : f32
    %497 = vector.broadcast %cst_156 : f32 to vector<16x14xf32>
    %498 = arith.mulf %497, %496 : vector<16x14xf32>
    %cst_157 = arith.constant 1.000000e-07 : f32
    %499 = vector.broadcast %cst_157 : f32 to vector<16x14xf32>
    %500 = arith.addf %498, %499 : vector<16x14xf32>
    %501 = vector.extract_strided_slice %500 {offsets = [0, 0], sizes = [16, 1], strides = [1, 1]} : vector<16x14xf32> to vector<16x1xf32>
    %502 = vector.extract_strided_slice %500 {offsets = [0, 1], sizes = [16, 8], strides = [1, 1]} : vector<16x14xf32> to vector<16x8xf32>
    %503 = vector.extract_strided_slice %500 {offsets = [0, 9], sizes = [16, 5], strides = [1, 1]} : vector<16x14xf32> to vector<16x5xf32>
    %504 = tpu.iota {dimensions = array<i32: 1>} : vector<1x8xi32>
    %505 = arith.sitofp %504 : vector<1x8xi32> to vector<1x8xf32>
    %cst_158 = arith.constant 1.000000e+00 : f32
    %506 = vector.broadcast %cst_158 : f32 to vector<1x8xf32>
    %507 = arith.addf %505, %506 : vector<1x8xf32>
    %508 = vector.broadcast %107 : vector<16x1xf32> to vector<16x8xf32>
    %509 = vector.broadcast %507 : vector<1x8xf32> to vector<16x8xf32>
    %510 = arith.mulf %508, %509 : vector<16x8xf32>
    %cst_159 = arith.constant 8.000000e+00 : f32
    %511 = vector.broadcast %cst_159 : f32 to vector<16x8xf32>
    %512 = arith.cmpf olt, %510, %511 : vector<16x8xf32>
    %cst_160 = arith.constant 1.000000e+00 : f32
    %cst_161 = arith.constant 0.000000e+00 : f32
    %513 = vector.broadcast %cst_160 : f32 to vector<16x8xf32>
    %514 = vector.broadcast %cst_161 : f32 to vector<16x8xf32>
    %515 = arith.select %512, %513, %514 : vector<16x8xi1>, vector<16x8xf32>
    %cst_162 = arith.constant 9.99999974E-5 : f32
    %516 = vector.broadcast %cst_162 : f32 to vector<16x8xf32>
    %517 = arith.addf %515, %516 : vector<16x8xf32>
    %518 = arith.mulf %502, %517 : vector<16x8xf32>
    %cst_163 = arith.constant dense<0.000000e+00> : vector<16xf32>
    %519 = vector.multi_reduction <add>, %518, %cst_163 [1] : vector<16x8xf32> to vector<16xf32>
    %520 = vector.shape_cast %519 : vector<16xf32> to vector<16x1xf32>
    %521 = vector.broadcast %520 : vector<16x1xf32> to vector<16x8xf32>
    %522 = arith.divf %518, %521 : vector<16x8xf32>
    %523 = vector.broadcast %501 : vector<16x1xf32> to vector<16x8xf32>
    %524 = arith.mulf %522, %523 : vector<16x8xf32>
    %c0_164 = arith.constant 0 : index
    %c0_165 = arith.constant 0 : index
    %525 = vector.load %arg31[%c0_164, %c0_165] : memref<16x22xf32, #tpu.memory_space<vmem>>, vector<16x8xf32>
    tpu.vector_store %arg31[%c0_164, %c0_165], %522 {strides = array<i32>} : memref<16x22xf32, #tpu.memory_space<vmem>>, vector<16x8xf32>,
    %c0_166 = arith.constant 0 : index
    %c8_167 = arith.constant 8 : index
    %526 = vector.load %arg31[%c0_166, %c8_167] : memref<16x22xf32, #tpu.memory_space<vmem>>, vector<16x8xf32>
    tpu.vector_store %arg31[%c0_166, %c8_167], %524 {strides = array<i32>} : memref<16x22xf32, #tpu.memory_space<vmem>>, vector<16x8xf32>,
    %c0_168 = arith.constant 0 : index
    %c16 = arith.constant 16 : index
    %527 = vector.load %arg31[%c0_168, %c16] : memref<16x22xf32, #tpu.memory_space<vmem>>, vector<16x1xf32>
    tpu.vector_store %arg31[%c0_168, %c16], %501 {strides = array<i32>} : memref<16x22xf32, #tpu.memory_space<vmem>>, vector<16x1xf32>,
    %c0_169 = arith.constant 0 : index
    %c17 = arith.constant 17 : index
    %528 = vector.load %arg31[%c0_169, %c17] : memref<16x22xf32, #tpu.memory_space<vmem>>, vector<16x5xf32>
    tpu.vector_store %arg31[%c0_169, %c17], %503 {strides = array<i32>} : memref<16x22xf32, #tpu.memory_space<vmem>>, vector<16x5xf32>,
    return
  }
}

module attributes {stable_mosaic.version = 11 : i64} {
  func.func @_noise_branch_kernel(%arg0: memref<16x5xf32, #tpu.memory_space<vmem>>, %arg1: memref<16x8xf32, #tpu.memory_space<vmem>>, %arg2: memref<16x8xf32, #tpu.memory_space<vmem>>) attributes {dimension_semantics = [], scalar_prefetch = 0 : i64, scratch_operands = 0 : i64, tpu.core_type = #tpu.core_type<tc>} {
    %0 = tpu.iota {dimensions = array<i32: 0>} : vector<5x8xi32>
    %1 = arith.sitofp %0 : vector<5x8xi32> to vector<5x8xf32>
    %2 = tpu.iota {dimensions = array<i32: 1>} : vector<5x8xi32>
    %3 = arith.sitofp %2 : vector<5x8xi32> to vector<5x8xf32>
    %c0_i32 = arith.constant 0 : i32
    %4 = vector.broadcast %c0_i32 : i32 to vector<5x8xi32>
    %5 = arith.cmpi eq, %0, %4 : vector<5x8xi32>
    %c4_i32 = arith.constant 4 : i32
    %6 = vector.broadcast %c4_i32 : i32 to vector<5x8xi32>
    %7 = arith.cmpi eq, %0, %6 : vector<5x8xi32>
    %8 = arith.ori %5, %7 : vector<5x8xi1>
    %cst = arith.constant 1.000000e+00 : f32
    %cst_0 = arith.constant 2.000000e+00 : f32
    %9 = vector.broadcast %cst : f32 to vector<5x8xf32>
    %10 = vector.broadcast %cst_0 : f32 to vector<5x8xf32>
    %11 = arith.select %8, %9, %10 : vector<5x8xi1>, vector<5x8xf32>
    %cst_1 = arith.constant 6.28318548 : f32
    %12 = vector.broadcast %cst_1 : f32 to vector<5x8xf32>
    %13 = arith.mulf %12, %1 : vector<5x8xf32>
    %14 = arith.mulf %13, %3 : vector<5x8xf32>
    %cst_2 = arith.constant 8.000000e+00 : f32
    %15 = vector.broadcast %cst_2 : f32 to vector<5x8xf32>
    %16 = arith.divf %14, %15 : vector<5x8xf32>
    %17 = math.cos %16 : vector<5x8xf32>
    %18 = arith.mulf %11, %17 : vector<5x8xf32>
    %cst_3 = arith.constant 8.000000e+00 : f32
    %19 = vector.broadcast %cst_3 : f32 to vector<5x8xf32>
    %20 = arith.divf %18, %19 : vector<5x8xf32>
    %c0 = arith.constant 0 : index
    %c0_4 = arith.constant 0 : index
    %21 = vector.load %arg0[%c0, %c0_4] : memref<16x5xf32, #tpu.memory_space<vmem>>, vector<16x5xf32>
    %cst_5 = arith.constant dense<0.000000e+00> : vector<16x8xf32>
    %22 = tpu.matmul %21, %20, %cst_5 {dimension_numbers = #tpu.dot_dimension_numbers<[1], [0], [0], [1], [0, 0, 1, 1], [], []>} : vector<16x5xf32>, vector<5x8xf32>, vector<16x8xf32> -> vector<16x8xf32>
    %c4_i32_6 = arith.constant 4 : i32
    %23 = tpu.dynamic_rotate %22 by %c4_i32_6 dim 1 : vector<16x8xf32>, i32 -> vector<16x8xf32>
    %24 = tpu.iota {dimensions = array<i32: 1>} : vector<1x8xi32>
    %25 = arith.sitofp %24 : vector<1x8xi32> to vector<1x8xf32>
    %cst_7 = arith.constant 6.28318548 : f32
    %26 = vector.broadcast %cst_7 : f32 to vector<1x8xf32>
    %27 = arith.mulf %26, %25 : vector<1x8xf32>
    %cst_8 = arith.constant 8.000000e+00 : f32
    %28 = vector.broadcast %cst_8 : f32 to vector<1x8xf32>
    %29 = arith.divf %27, %28 : vector<1x8xf32>
    %30 = math.cos %29 : vector<1x8xf32>
    %cst_9 = arith.constant 5.000000e-01 : f32
    %31 = vector.broadcast %cst_9 : f32 to vector<1x8xf32>
    %32 = arith.mulf %31, %30 : vector<1x8xf32>
    %cst_10 = arith.constant 5.000000e-01 : f32
    %33 = vector.broadcast %cst_10 : f32 to vector<1x8xf32>
    %34 = arith.subf %33, %32 : vector<1x8xf32>
    %35 = vector.broadcast %34 : vector<1x8xf32> to vector<16x8xf32>
    %36 = arith.mulf %23, %35 : vector<16x8xf32>
    %c4_i32_11 = arith.constant 4 : i32
    %37 = tpu.dynamic_rotate %36 by %c4_i32_11 dim 1 : vector<16x8xf32>, i32 -> vector<16x8xf32>
    %c0_12 = arith.constant 0 : index
    %c0_13 = arith.constant 0 : index
    %38 = vector.load %arg1[%c0_12, %c0_13] : memref<16x8xf32, #tpu.memory_space<vmem>>, vector<16x8xf32>
    %39 = tpu.iota {dimensions = array<i32: 1>} : vector<16x8xi32>
    %40 = vector.extract_strided_slice %37 {offsets = [0, 0], sizes = [16, 1], strides = [1, 1]} : vector<16x8xf32> to vector<16x1xf32>
    %41 = vector.broadcast %40 : vector<16x1xf32> to vector<16x8xf32>
    %42 = arith.mulf %41, %38 : vector<16x8xf32>
    %c1_i32 = arith.constant 1 : i32
    %43 = vector.broadcast %c1_i32 : i32 to vector<16x8xi32>
    %44 = arith.cmpi sge, %39, %43 : vector<16x8xi32>
    %c1_i32_14 = arith.constant 1 : i32
    %45 = tpu.dynamic_rotate %38 by %c1_i32_14 dim 1 : vector<16x8xf32>, i32 -> vector<16x8xf32>
    %cst_15 = arith.constant 0.000000e+00 : f32
    %46 = vector.broadcast %cst_15 : f32 to vector<16x8xf32>
    %47 = arith.select %44, %45, %46 : vector<16x8xi1>, vector<16x8xf32>
    %48 = vector.extract_strided_slice %37 {offsets = [0, 1], sizes = [16, 1], strides = [1, 1]} : vector<16x8xf32> to vector<16x1xf32>
    %49 = vector.broadcast %48 : vector<16x1xf32> to vector<16x8xf32>
    %50 = arith.mulf %49, %47 : vector<16x8xf32>
    %51 = arith.addf %42, %50 : vector<16x8xf32>
    %c2_i32 = arith.constant 2 : i32
    %52 = vector.broadcast %c2_i32 : i32 to vector<16x8xi32>
    %53 = arith.cmpi sge, %39, %52 : vector<16x8xi32>
    %c2_i32_16 = arith.constant 2 : i32
    %54 = tpu.dynamic_rotate %38 by %c2_i32_16 dim 1 : vector<16x8xf32>, i32 -> vector<16x8xf32>
    %cst_17 = arith.constant 0.000000e+00 : f32
    %55 = vector.broadcast %cst_17 : f32 to vector<16x8xf32>
    %56 = arith.select %53, %54, %55 : vector<16x8xi1>, vector<16x8xf32>
    %57 = vector.extract_strided_slice %37 {offsets = [0, 2], sizes = [16, 1], strides = [1, 1]} : vector<16x8xf32> to vector<16x1xf32>
    %58 = vector.broadcast %57 : vector<16x1xf32> to vector<16x8xf32>
    %59 = arith.mulf %58, %56 : vector<16x8xf32>
    %60 = arith.addf %51, %59 : vector<16x8xf32>
    %c3_i32 = arith.constant 3 : i32
    %61 = vector.broadcast %c3_i32 : i32 to vector<16x8xi32>
    %62 = arith.cmpi sge, %39, %61 : vector<16x8xi32>
    %c3_i32_18 = arith.constant 3 : i32
    %63 = tpu.dynamic_rotate %38 by %c3_i32_18 dim 1 : vector<16x8xf32>, i32 -> vector<16x8xf32>
    %cst_19 = arith.constant 0.000000e+00 : f32
    %64 = vector.broadcast %cst_19 : f32 to vector<16x8xf32>
    %65 = arith.select %62, %63, %64 : vector<16x8xi1>, vector<16x8xf32>
    %66 = vector.extract_strided_slice %37 {offsets = [0, 3], sizes = [16, 1], strides = [1, 1]} : vector<16x8xf32> to vector<16x1xf32>
    %67 = vector.broadcast %66 : vector<16x1xf32> to vector<16x8xf32>
    %68 = arith.mulf %67, %65 : vector<16x8xf32>
    %69 = arith.addf %60, %68 : vector<16x8xf32>
    %c4_i32_20 = arith.constant 4 : i32
    %70 = vector.broadcast %c4_i32_20 : i32 to vector<16x8xi32>
    %71 = arith.cmpi sge, %39, %70 : vector<16x8xi32>
    %c4_i32_21 = arith.constant 4 : i32
    %72 = tpu.dynamic_rotate %38 by %c4_i32_21 dim 1 : vector<16x8xf32>, i32 -> vector<16x8xf32>
    %cst_22 = arith.constant 0.000000e+00 : f32
    %73 = vector.broadcast %cst_22 : f32 to vector<16x8xf32>
    %74 = arith.select %71, %72, %73 : vector<16x8xi1>, vector<16x8xf32>
    %75 = vector.extract_strided_slice %37 {offsets = [0, 4], sizes = [16, 1], strides = [1, 1]} : vector<16x8xf32> to vector<16x1xf32>
    %76 = vector.broadcast %75 : vector<16x1xf32> to vector<16x8xf32>
    %77 = arith.mulf %76, %74 : vector<16x8xf32>
    %78 = arith.addf %69, %77 : vector<16x8xf32>
    %c5_i32 = arith.constant 5 : i32
    %79 = vector.broadcast %c5_i32 : i32 to vector<16x8xi32>
    %80 = arith.cmpi sge, %39, %79 : vector<16x8xi32>
    %c5_i32_23 = arith.constant 5 : i32
    %81 = tpu.dynamic_rotate %38 by %c5_i32_23 dim 1 : vector<16x8xf32>, i32 -> vector<16x8xf32>
    %cst_24 = arith.constant 0.000000e+00 : f32
    %82 = vector.broadcast %cst_24 : f32 to vector<16x8xf32>
    %83 = arith.select %80, %81, %82 : vector<16x8xi1>, vector<16x8xf32>
    %84 = vector.extract_strided_slice %37 {offsets = [0, 5], sizes = [16, 1], strides = [1, 1]} : vector<16x8xf32> to vector<16x1xf32>
    %85 = vector.broadcast %84 : vector<16x1xf32> to vector<16x8xf32>
    %86 = arith.mulf %85, %83 : vector<16x8xf32>
    %87 = arith.addf %78, %86 : vector<16x8xf32>
    %c6_i32 = arith.constant 6 : i32
    %88 = vector.broadcast %c6_i32 : i32 to vector<16x8xi32>
    %89 = arith.cmpi sge, %39, %88 : vector<16x8xi32>
    %c6_i32_25 = arith.constant 6 : i32
    %90 = tpu.dynamic_rotate %38 by %c6_i32_25 dim 1 : vector<16x8xf32>, i32 -> vector<16x8xf32>
    %cst_26 = arith.constant 0.000000e+00 : f32
    %91 = vector.broadcast %cst_26 : f32 to vector<16x8xf32>
    %92 = arith.select %89, %90, %91 : vector<16x8xi1>, vector<16x8xf32>
    %93 = vector.extract_strided_slice %37 {offsets = [0, 6], sizes = [16, 1], strides = [1, 1]} : vector<16x8xf32> to vector<16x1xf32>
    %94 = vector.broadcast %93 : vector<16x1xf32> to vector<16x8xf32>
    %95 = arith.mulf %94, %92 : vector<16x8xf32>
    %96 = arith.addf %87, %95 : vector<16x8xf32>
    %c7_i32 = arith.constant 7 : i32
    %97 = vector.broadcast %c7_i32 : i32 to vector<16x8xi32>
    %98 = arith.cmpi sge, %39, %97 : vector<16x8xi32>
    %c7_i32_27 = arith.constant 7 : i32
    %99 = tpu.dynamic_rotate %38 by %c7_i32_27 dim 1 : vector<16x8xf32>, i32 -> vector<16x8xf32>
    %cst_28 = arith.constant 0.000000e+00 : f32
    %100 = vector.broadcast %cst_28 : f32 to vector<16x8xf32>
    %101 = arith.select %98, %99, %100 : vector<16x8xi1>, vector<16x8xf32>
    %102 = vector.extract_strided_slice %37 {offsets = [0, 7], sizes = [16, 1], strides = [1, 1]} : vector<16x8xf32> to vector<16x1xf32>
    %103 = vector.broadcast %102 : vector<16x1xf32> to vector<16x8xf32>
    %104 = arith.mulf %103, %101 : vector<16x8xf32>
    %105 = arith.addf %96, %104 : vector<16x8xf32>
    %c0_29 = arith.constant 0 : index
    %c0_30 = arith.constant 0 : index
    %106 = vector.load %arg2[%c0_29, %c0_30] : memref<16x8xf32, #tpu.memory_space<vmem>>, vector<16x8xf32>
    tpu.vector_store %arg2[%c0_29, %c0_30], %105 {strides = array<i32>} : memref<16x8xf32, #tpu.memory_space<vmem>>, vector<16x8xf32>,
    return
  }
}

module attributes {stable_mosaic.version = 11 : i64} {
  func.func @_harmonic_kernel(%arg0: memref<2x8xf32, #tpu.memory_space<vmem>>, %arg1: memref<8x2x8xf32, #tpu.memory_space<vmem>>, %arg2: memref<2x8xf32, #tpu.memory_space<vmem>>) attributes {dimension_semantics = [], scalar_prefetch = 0 : i64, scratch_operands = 0 : i64, tpu.core_type = #tpu.core_type<tc>} {
    %c0 = arith.constant 0 : index
    %c0_0 = arith.constant 0 : index
    %0 = vector.load %arg0[%c0, %c0_0] : memref<2x8xf32, #tpu.memory_space<vmem>>, vector<2x8xf32>
    %cst = arith.constant 0.000000e+00 : f32
    %1 = vector.broadcast %cst : f32 to vector<2x8xf32>
    %cst_1 = arith.constant 1.000000e+00 : f32
    %2 = vector.broadcast %cst_1 : f32 to vector<2x8xf32>
    %3 = arith.mulf %0, %2 : vector<2x8xf32>
    %4 = math.sin %3 : vector<2x8xf32>
    %c0_2 = arith.constant 0 : index
    %c0_3 = arith.constant 0 : index
    %c0_4 = arith.constant 0 : index
    %5 = vector.load %arg1[%c0_2, %c0_3, %c0_4] : memref<8x2x8xf32, #tpu.memory_space<vmem>>, vector<1x2x8xf32>
    %6 = vector.shape_cast %5 : vector<1x2x8xf32> to vector<2x8xf32>
    %7 = arith.mulf %4, %6 : vector<2x8xf32>
    %8 = arith.addf %1, %7 : vector<2x8xf32>
    %cst_5 = arith.constant 2.000000e+00 : f32
    %9 = vector.broadcast %cst_5 : f32 to vector<2x8xf32>
    %10 = arith.mulf %0, %9 : vector<2x8xf32>
    %11 = math.sin %10 : vector<2x8xf32>
    %c1 = arith.constant 1 : index
    %c0_6 = arith.constant 0 : index
    %c0_7 = arith.constant 0 : index
    %12 = vector.load %arg1[%c1, %c0_6, %c0_7] : memref<8x2x8xf32, #tpu.memory_space<vmem>>, vector<1x2x8xf32>
    %13 = vector.shape_cast %12 : vector<1x2x8xf32> to vector<2x8xf32>
    %14 = arith.mulf %11, %13 : vector<2x8xf32>
    %15 = arith.addf %8, %14 : vector<2x8xf32>
    %cst_8 = arith.constant 3.000000e+00 : f32
    %16 = vector.broadcast %cst_8 : f32 to vector<2x8xf32>
    %17 = arith.mulf %0, %16 : vector<2x8xf32>
    %18 = math.sin %17 : vector<2x8xf32>
    %c2 = arith.constant 2 : index
    %c0_9 = arith.constant 0 : index
    %c0_10 = arith.constant 0 : index
    %19 = vector.load %arg1[%c2, %c0_9, %c0_10] : memref<8x2x8xf32, #tpu.memory_space<vmem>>, vector<1x2x8xf32>
    %20 = vector.shape_cast %19 : vector<1x2x8xf32> to vector<2x8xf32>
    %21 = arith.mulf %18, %20 : vector<2x8xf32>
    %22 = arith.addf %15, %21 : vector<2x8xf32>
    %cst_11 = arith.constant 4.000000e+00 : f32
    %23 = vector.broadcast %cst_11 : f32 to vector<2x8xf32>
    %24 = arith.mulf %0, %23 : vector<2x8xf32>
    %25 = math.sin %24 : vector<2x8xf32>
    %c3 = arith.constant 3 : index
    %c0_12 = arith.constant 0 : index
    %c0_13 = arith.constant 0 : index
    %26 = vector.load %arg1[%c3, %c0_12, %c0_13] : memref<8x2x8xf32, #tpu.memory_space<vmem>>, vector<1x2x8xf32>
    %27 = vector.shape_cast %26 : vector<1x2x8xf32> to vector<2x8xf32>
    %28 = arith.mulf %25, %27 : vector<2x8xf32>
    %29 = arith.addf %22, %28 : vector<2x8xf32>
    %cst_14 = arith.constant 5.000000e+00 : f32
    %30 = vector.broadcast %cst_14 : f32 to vector<2x8xf32>
    %31 = arith.mulf %0, %30 : vector<2x8xf32>
    %32 = math.sin %31 : vector<2x8xf32>
    %c4 = arith.constant 4 : index
    %c0_15 = arith.constant 0 : index
    %c0_16 = arith.constant 0 : index
    %33 = vector.load %arg1[%c4, %c0_15, %c0_16] : memref<8x2x8xf32, #tpu.memory_space<vmem>>, vector<1x2x8xf32>
    %34 = vector.shape_cast %33 : vector<1x2x8xf32> to vector<2x8xf32>
    %35 = arith.mulf %32, %34 : vector<2x8xf32>
    %36 = arith.addf %29, %35 : vector<2x8xf32>
    %cst_17 = arith.constant 6.000000e+00 : f32
    %37 = vector.broadcast %cst_17 : f32 to vector<2x8xf32>
    %38 = arith.mulf %0, %37 : vector<2x8xf32>
    %39 = math.sin %38 : vector<2x8xf32>
    %c5 = arith.constant 5 : index
    %c0_18 = arith.constant 0 : index
    %c0_19 = arith.constant 0 : index
    %40 = vector.load %arg1[%c5, %c0_18, %c0_19] : memref<8x2x8xf32, #tpu.memory_space<vmem>>, vector<1x2x8xf32>
    %41 = vector.shape_cast %40 : vector<1x2x8xf32> to vector<2x8xf32>
    %42 = arith.mulf %39, %41 : vector<2x8xf32>
    %43 = arith.addf %36, %42 : vector<2x8xf32>
    %cst_20 = arith.constant 7.000000e+00 : f32
    %44 = vector.broadcast %cst_20 : f32 to vector<2x8xf32>
    %45 = arith.mulf %0, %44 : vector<2x8xf32>
    %46 = math.sin %45 : vector<2x8xf32>
    %c6 = arith.constant 6 : index
    %c0_21 = arith.constant 0 : index
    %c0_22 = arith.constant 0 : index
    %47 = vector.load %arg1[%c6, %c0_21, %c0_22] : memref<8x2x8xf32, #tpu.memory_space<vmem>>, vector<1x2x8xf32>
    %48 = vector.shape_cast %47 : vector<1x2x8xf32> to vector<2x8xf32>
    %49 = arith.mulf %46, %48 : vector<2x8xf32>
    %50 = arith.addf %43, %49 : vector<2x8xf32>
    %cst_23 = arith.constant 8.000000e+00 : f32
    %51 = vector.broadcast %cst_23 : f32 to vector<2x8xf32>
    %52 = arith.mulf %0, %51 : vector<2x8xf32>
    %53 = math.sin %52 : vector<2x8xf32>
    %c7 = arith.constant 7 : index
    %c0_24 = arith.constant 0 : index
    %c0_25 = arith.constant 0 : index
    %54 = vector.load %arg1[%c7, %c0_24, %c0_25] : memref<8x2x8xf32, #tpu.memory_space<vmem>>, vector<1x2x8xf32>
    %55 = vector.shape_cast %54 : vector<1x2x8xf32> to vector<2x8xf32>
    %56 = arith.mulf %53, %55 : vector<2x8xf32>
    %57 = arith.addf %50, %56 : vector<2x8xf32>
    %c0_26 = arith.constant 0 : index
    %c0_27 = arith.constant 0 : index
    %58 = vector.load %arg2[%c0_26, %c0_27] : memref<2x8xf32, #tpu.memory_space<vmem>>, vector<2x8xf32>
    tpu.vector_store %arg2[%c0_26, %c0_27], %57 {strides = array<i32>} : memref<2x8xf32, #tpu.memory_space<vmem>>, vector<2x8xf32>,
    return
  }
}

module attributes {stable_mosaic.version = 11 : i64} {
  func.func @_synth_reverb_kernel(%arg0: memref<2x64xf32, #tpu.memory_space<vmem>>, %arg1: memref<8x2x64xf32, #tpu.memory_space<vmem>>, %arg2: memref<2x64xf32, #tpu.memory_space<vmem>>, %arg3: memref<1x16xf32, #tpu.memory_space<vmem>>, %arg4: memref<1x2xf32, #tpu.memory_space<vmem>>, %arg5: memref<2x64xf32, #tpu.memory_space<vmem>>) attributes {dimension_semantics = [], scalar_prefetch = 0 : i64, scratch_operands = 0 : i64, tpu.core_type = #tpu.core_type<tc>} {
    %c0 = arith.constant 0 : index
    %c0_0 = arith.constant 0 : index
    %0 = vector.load %arg0[%c0, %c0_0] : memref<2x64xf32, #tpu.memory_space<vmem>>, vector<2x64xf32>
    %cst = arith.constant 0.000000e+00 : f32
    %1 = vector.broadcast %cst : f32 to vector<2x64xf32>
    %cst_1 = arith.constant 1.000000e+00 : f32
    %2 = vector.broadcast %cst_1 : f32 to vector<2x64xf32>
    %3 = arith.mulf %0, %2 : vector<2x64xf32>
    %4 = math.sin %3 : vector<2x64xf32>
    %c0_2 = arith.constant 0 : index
    %c0_3 = arith.constant 0 : index
    %c0_4 = arith.constant 0 : index
    %5 = vector.load %arg1[%c0_2, %c0_3, %c0_4] : memref<8x2x64xf32, #tpu.memory_space<vmem>>, vector<1x2x64xf32>
    %6 = vector.shape_cast %5 : vector<1x2x64xf32> to vector<2x64xf32>
    %7 = arith.mulf %4, %6 : vector<2x64xf32>
    %8 = arith.addf %1, %7 : vector<2x64xf32>
    %cst_5 = arith.constant 2.000000e+00 : f32
    %9 = vector.broadcast %cst_5 : f32 to vector<2x64xf32>
    %10 = arith.mulf %0, %9 : vector<2x64xf32>
    %11 = math.sin %10 : vector<2x64xf32>
    %c1 = arith.constant 1 : index
    %c0_6 = arith.constant 0 : index
    %c0_7 = arith.constant 0 : index
    %12 = vector.load %arg1[%c1, %c0_6, %c0_7] : memref<8x2x64xf32, #tpu.memory_space<vmem>>, vector<1x2x64xf32>
    %13 = vector.shape_cast %12 : vector<1x2x64xf32> to vector<2x64xf32>
    %14 = arith.mulf %11, %13 : vector<2x64xf32>
    %15 = arith.addf %8, %14 : vector<2x64xf32>
    %cst_8 = arith.constant 3.000000e+00 : f32
    %16 = vector.broadcast %cst_8 : f32 to vector<2x64xf32>
    %17 = arith.mulf %0, %16 : vector<2x64xf32>
    %18 = math.sin %17 : vector<2x64xf32>
    %c2 = arith.constant 2 : index
    %c0_9 = arith.constant 0 : index
    %c0_10 = arith.constant 0 : index
    %19 = vector.load %arg1[%c2, %c0_9, %c0_10] : memref<8x2x64xf32, #tpu.memory_space<vmem>>, vector<1x2x64xf32>
    %20 = vector.shape_cast %19 : vector<1x2x64xf32> to vector<2x64xf32>
    %21 = arith.mulf %18, %20 : vector<2x64xf32>
    %22 = arith.addf %15, %21 : vector<2x64xf32>
    %cst_11 = arith.constant 4.000000e+00 : f32
    %23 = vector.broadcast %cst_11 : f32 to vector<2x64xf32>
    %24 = arith.mulf %0, %23 : vector<2x64xf32>
    %25 = math.sin %24 : vector<2x64xf32>
    %c3 = arith.constant 3 : index
    %c0_12 = arith.constant 0 : index
    %c0_13 = arith.constant 0 : index
    %26 = vector.load %arg1[%c3, %c0_12, %c0_13] : memref<8x2x64xf32, #tpu.memory_space<vmem>>, vector<1x2x64xf32>
    %27 = vector.shape_cast %26 : vector<1x2x64xf32> to vector<2x64xf32>
    %28 = arith.mulf %25, %27 : vector<2x64xf32>
    %29 = arith.addf %22, %28 : vector<2x64xf32>
    %cst_14 = arith.constant 5.000000e+00 : f32
    %30 = vector.broadcast %cst_14 : f32 to vector<2x64xf32>
    %31 = arith.mulf %0, %30 : vector<2x64xf32>
    %32 = math.sin %31 : vector<2x64xf32>
    %c4 = arith.constant 4 : index
    %c0_15 = arith.constant 0 : index
    %c0_16 = arith.constant 0 : index
    %33 = vector.load %arg1[%c4, %c0_15, %c0_16] : memref<8x2x64xf32, #tpu.memory_space<vmem>>, vector<1x2x64xf32>
    %34 = vector.shape_cast %33 : vector<1x2x64xf32> to vector<2x64xf32>
    %35 = arith.mulf %32, %34 : vector<2x64xf32>
    %36 = arith.addf %29, %35 : vector<2x64xf32>
    %cst_17 = arith.constant 6.000000e+00 : f32
    %37 = vector.broadcast %cst_17 : f32 to vector<2x64xf32>
    %38 = arith.mulf %0, %37 : vector<2x64xf32>
    %39 = math.sin %38 : vector<2x64xf32>
    %c5 = arith.constant 5 : index
    %c0_18 = arith.constant 0 : index
    %c0_19 = arith.constant 0 : index
    %40 = vector.load %arg1[%c5, %c0_18, %c0_19] : memref<8x2x64xf32, #tpu.memory_space<vmem>>, vector<1x2x64xf32>
    %41 = vector.shape_cast %40 : vector<1x2x64xf32> to vector<2x64xf32>
    %42 = arith.mulf %39, %41 : vector<2x64xf32>
    %43 = arith.addf %36, %42 : vector<2x64xf32>
    %cst_20 = arith.constant 7.000000e+00 : f32
    %44 = vector.broadcast %cst_20 : f32 to vector<2x64xf32>
    %45 = arith.mulf %0, %44 : vector<2x64xf32>
    %46 = math.sin %45 : vector<2x64xf32>
    %c6 = arith.constant 6 : index
    %c0_21 = arith.constant 0 : index
    %c0_22 = arith.constant 0 : index
    %47 = vector.load %arg1[%c6, %c0_21, %c0_22] : memref<8x2x64xf32, #tpu.memory_space<vmem>>, vector<1x2x64xf32>
    %48 = vector.shape_cast %47 : vector<1x2x64xf32> to vector<2x64xf32>
    %49 = arith.mulf %46, %48 : vector<2x64xf32>
    %50 = arith.addf %43, %49 : vector<2x64xf32>
    %cst_23 = arith.constant 8.000000e+00 : f32
    %51 = vector.broadcast %cst_23 : f32 to vector<2x64xf32>
    %52 = arith.mulf %0, %51 : vector<2x64xf32>
    %53 = math.sin %52 : vector<2x64xf32>
    %c7 = arith.constant 7 : index
    %c0_24 = arith.constant 0 : index
    %c0_25 = arith.constant 0 : index
    %54 = vector.load %arg1[%c7, %c0_24, %c0_25] : memref<8x2x64xf32, #tpu.memory_space<vmem>>, vector<1x2x64xf32>
    %55 = vector.shape_cast %54 : vector<1x2x64xf32> to vector<2x64xf32>
    %56 = arith.mulf %53, %55 : vector<2x64xf32>
    %57 = arith.addf %50, %56 : vector<2x64xf32>
    %c0_26 = arith.constant 0 : index
    %c0_27 = arith.constant 0 : index
    %58 = vector.load %arg2[%c0_26, %c0_27] : memref<2x64xf32, #tpu.memory_space<vmem>>, vector<2x64xf32>
    %59 = arith.addf %57, %58 : vector<2x64xf32>
    %60 = tpu.iota {dimensions = array<i32: 1>} : vector<1x16xi32>
    %61 = arith.sitofp %60 : vector<1x16xi32> to vector<1x16xf32>
    %cst_28 = arith.constant 1.600000e+01 : f32
    %62 = vector.broadcast %cst_28 : f32 to vector<1x16xf32>
    %63 = arith.divf %61, %62 : vector<1x16xf32>
    %c0_29 = arith.constant 0 : index
    %c0_30 = arith.constant 0 : index
    %64 = vector.load %arg4[%c0_29, %c0_30] : memref<1x2xf32, #tpu.memory_space<vmem>>, vector<1x2xf32>
    %65 = vector.extract_strided_slice %64 {offsets = [0, 0], sizes = [1, 1], strides = [1, 1]} : vector<1x2xf32> to vector<1x1xf32>
    %66 = vector.extract_strided_slice %64 {offsets = [0, 1], sizes = [1, 1], strides = [1, 1]} : vector<1x2xf32> to vector<1x1xf32>
    %cst_31 = arith.constant 0.000000e+00 : f32
    %67 = vector.broadcast %cst_31 : f32 to vector<1x1xf32>
    %68 = arith.subf %67, %65 : vector<1x1xf32>
    %69 = math.exp %68 : vector<1x1xf32>
    %cst_32 = arith.constant 1.000000e+00 : f32
    %70 = vector.broadcast %cst_32 : f32 to vector<1x1xf32>
    %71 = arith.addf %70, %69 : vector<1x1xf32>
    %72 = math.log %71 : vector<1x1xf32>
    %cst_33 = arith.constant 0.000000e+00 : f32
    %73 = vector.broadcast %cst_33 : f32 to vector<1x1xf32>
    %74 = arith.subf %73, %72 : vector<1x1xf32>
    %75 = vector.broadcast %74 : vector<1x1xf32> to vector<1x16xf32>
    %76 = arith.mulf %75, %63 : vector<1x16xf32>
    %cst_34 = arith.constant 5.000000e+02 : f32
    %77 = vector.broadcast %cst_34 : f32 to vector<1x16xf32>
    %78 = arith.mulf %76, %77 : vector<1x16xf32>
    %79 = math.exp %78 : vector<1x16xf32>
    %c0_35 = arith.constant 0 : index
    %c0_36 = arith.constant 0 : index
    %80 = vector.load %arg3[%c0_35, %c0_36] : memref<1x16xf32, #tpu.memory_space<vmem>>, vector<1x16xf32>
    %81 = arith.mulf %80, %79 : vector<1x16xf32>
    %82 = arith.negf %66 : vector<1x1xf32>
    %83 = math.exp %82 : vector<1x1xf32>
    %cst_37 = arith.constant 1.000000e+00 : f32
    %84 = vector.broadcast %cst_37 : f32 to vector<1x1xf32>
    %85 = arith.addf %84, %83 : vector<1x1xf32>
    %86 = arith.divf %84, %85 : vector<1x1xf32>
    %87 = vector.broadcast %86 : vector<1x1xf32> to vector<1x16xf32>
    %88 = arith.mulf %81, %87 : vector<1x16xf32>
    %89 = tpu.iota {dimensions = array<i32: 1>} : vector<1x16xi32>
    %c0_i32 = arith.constant 0 : i32
    %90 = vector.broadcast %c0_i32 : i32 to vector<1x16xi32>
    %91 = arith.cmpi eq, %89, %90 : vector<1x16xi32>
    %cst_38 = arith.constant 1.000000e+00 : f32
    %92 = vector.broadcast %cst_38 : f32 to vector<1x16xf32>
    %93 = arith.select %91, %92, %88 : vector<1x16xi1>, vector<1x16xf32>
    %94 = tpu.iota {dimensions = array<i32: 1>} : vector<2x64xi32>
    %95 = vector.extract_strided_slice %93 {offsets = [0, 0], sizes = [1, 1], strides = [1, 1]} : vector<1x16xf32> to vector<1x1xf32>
    %96 = vector.broadcast %95 : vector<1x1xf32> to vector<2x64xf32>
    %97 = arith.mulf %96, %59 : vector<2x64xf32>
    %c1_i32 = arith.constant 1 : i32
    %98 = vector.broadcast %c1_i32 : i32 to vector<2x64xi32>
    %99 = arith.cmpi sge, %94, %98 : vector<2x64xi32>
    %c1_i32_39 = arith.constant 1 : i32
    %100 = tpu.dynamic_rotate %59 by %c1_i32_39 dim 1 : vector<2x64xf32>, i32 -> vector<2x64xf32>
    %cst_40 = arith.constant 0.000000e+00 : f32
    %101 = vector.broadcast %cst_40 : f32 to vector<2x64xf32>
    %102 = arith.select %99, %100, %101 : vector<2x64xi1>, vector<2x64xf32>
    %103 = vector.extract_strided_slice %93 {offsets = [0, 1], sizes = [1, 1], strides = [1, 1]} : vector<1x16xf32> to vector<1x1xf32>
    %104 = vector.broadcast %103 : vector<1x1xf32> to vector<2x64xf32>
    %105 = arith.mulf %104, %102 : vector<2x64xf32>
    %106 = arith.addf %97, %105 : vector<2x64xf32>
    %c2_i32 = arith.constant 2 : i32
    %107 = vector.broadcast %c2_i32 : i32 to vector<2x64xi32>
    %108 = arith.cmpi sge, %94, %107 : vector<2x64xi32>
    %c2_i32_41 = arith.constant 2 : i32
    %109 = tpu.dynamic_rotate %59 by %c2_i32_41 dim 1 : vector<2x64xf32>, i32 -> vector<2x64xf32>
    %cst_42 = arith.constant 0.000000e+00 : f32
    %110 = vector.broadcast %cst_42 : f32 to vector<2x64xf32>
    %111 = arith.select %108, %109, %110 : vector<2x64xi1>, vector<2x64xf32>
    %112 = vector.extract_strided_slice %93 {offsets = [0, 2], sizes = [1, 1], strides = [1, 1]} : vector<1x16xf32> to vector<1x1xf32>
    %113 = vector.broadcast %112 : vector<1x1xf32> to vector<2x64xf32>
    %114 = arith.mulf %113, %111 : vector<2x64xf32>
    %115 = arith.addf %106, %114 : vector<2x64xf32>
    %c3_i32 = arith.constant 3 : i32
    %116 = vector.broadcast %c3_i32 : i32 to vector<2x64xi32>
    %117 = arith.cmpi sge, %94, %116 : vector<2x64xi32>
    %c3_i32_43 = arith.constant 3 : i32
    %118 = tpu.dynamic_rotate %59 by %c3_i32_43 dim 1 : vector<2x64xf32>, i32 -> vector<2x64xf32>
    %cst_44 = arith.constant 0.000000e+00 : f32
    %119 = vector.broadcast %cst_44 : f32 to vector<2x64xf32>
    %120 = arith.select %117, %118, %119 : vector<2x64xi1>, vector<2x64xf32>
    %121 = vector.extract_strided_slice %93 {offsets = [0, 3], sizes = [1, 1], strides = [1, 1]} : vector<1x16xf32> to vector<1x1xf32>
    %122 = vector.broadcast %121 : vector<1x1xf32> to vector<2x64xf32>
    %123 = arith.mulf %122, %120 : vector<2x64xf32>
    %124 = arith.addf %115, %123 : vector<2x64xf32>
    %c4_i32 = arith.constant 4 : i32
    %125 = vector.broadcast %c4_i32 : i32 to vector<2x64xi32>
    %126 = arith.cmpi sge, %94, %125 : vector<2x64xi32>
    %c4_i32_45 = arith.constant 4 : i32
    %127 = tpu.dynamic_rotate %59 by %c4_i32_45 dim 1 : vector<2x64xf32>, i32 -> vector<2x64xf32>
    %cst_46 = arith.constant 0.000000e+00 : f32
    %128 = vector.broadcast %cst_46 : f32 to vector<2x64xf32>
    %129 = arith.select %126, %127, %128 : vector<2x64xi1>, vector<2x64xf32>
    %130 = vector.extract_strided_slice %93 {offsets = [0, 4], sizes = [1, 1], strides = [1, 1]} : vector<1x16xf32> to vector<1x1xf32>
    %131 = vector.broadcast %130 : vector<1x1xf32> to vector<2x64xf32>
    %132 = arith.mulf %131, %129 : vector<2x64xf32>
    %133 = arith.addf %124, %132 : vector<2x64xf32>
    %c5_i32 = arith.constant 5 : i32
    %134 = vector.broadcast %c5_i32 : i32 to vector<2x64xi32>
    %135 = arith.cmpi sge, %94, %134 : vector<2x64xi32>
    %c5_i32_47 = arith.constant 5 : i32
    %136 = tpu.dynamic_rotate %59 by %c5_i32_47 dim 1 : vector<2x64xf32>, i32 -> vector<2x64xf32>
    %cst_48 = arith.constant 0.000000e+00 : f32
    %137 = vector.broadcast %cst_48 : f32 to vector<2x64xf32>
    %138 = arith.select %135, %136, %137 : vector<2x64xi1>, vector<2x64xf32>
    %139 = vector.extract_strided_slice %93 {offsets = [0, 5], sizes = [1, 1], strides = [1, 1]} : vector<1x16xf32> to vector<1x1xf32>
    %140 = vector.broadcast %139 : vector<1x1xf32> to vector<2x64xf32>
    %141 = arith.mulf %140, %138 : vector<2x64xf32>
    %142 = arith.addf %133, %141 : vector<2x64xf32>
    %c6_i32 = arith.constant 6 : i32
    %143 = vector.broadcast %c6_i32 : i32 to vector<2x64xi32>
    %144 = arith.cmpi sge, %94, %143 : vector<2x64xi32>
    %c6_i32_49 = arith.constant 6 : i32
    %145 = tpu.dynamic_rotate %59 by %c6_i32_49 dim 1 : vector<2x64xf32>, i32 -> vector<2x64xf32>
    %cst_50 = arith.constant 0.000000e+00 : f32
    %146 = vector.broadcast %cst_50 : f32 to vector<2x64xf32>
    %147 = arith.select %144, %145, %146 : vector<2x64xi1>, vector<2x64xf32>
    %148 = vector.extract_strided_slice %93 {offsets = [0, 6], sizes = [1, 1], strides = [1, 1]} : vector<1x16xf32> to vector<1x1xf32>
    %149 = vector.broadcast %148 : vector<1x1xf32> to vector<2x64xf32>
    %150 = arith.mulf %149, %147 : vector<2x64xf32>
    %151 = arith.addf %142, %150 : vector<2x64xf32>
    %c7_i32 = arith.constant 7 : i32
    %152 = vector.broadcast %c7_i32 : i32 to vector<2x64xi32>
    %153 = arith.cmpi sge, %94, %152 : vector<2x64xi32>
    %c7_i32_51 = arith.constant 7 : i32
    %154 = tpu.dynamic_rotate %59 by %c7_i32_51 dim 1 : vector<2x64xf32>, i32 -> vector<2x64xf32>
    %cst_52 = arith.constant 0.000000e+00 : f32
    %155 = vector.broadcast %cst_52 : f32 to vector<2x64xf32>
    %156 = arith.select %153, %154, %155 : vector<2x64xi1>, vector<2x64xf32>
    %157 = vector.extract_strided_slice %93 {offsets = [0, 7], sizes = [1, 1], strides = [1, 1]} : vector<1x16xf32> to vector<1x1xf32>
    %158 = vector.broadcast %157 : vector<1x1xf32> to vector<2x64xf32>
    %159 = arith.mulf %158, %156 : vector<2x64xf32>
    %160 = arith.addf %151, %159 : vector<2x64xf32>
    %c8_i32 = arith.constant 8 : i32
    %161 = vector.broadcast %c8_i32 : i32 to vector<2x64xi32>
    %162 = arith.cmpi sge, %94, %161 : vector<2x64xi32>
    %c8_i32_53 = arith.constant 8 : i32
    %163 = tpu.dynamic_rotate %59 by %c8_i32_53 dim 1 : vector<2x64xf32>, i32 -> vector<2x64xf32>
    %cst_54 = arith.constant 0.000000e+00 : f32
    %164 = vector.broadcast %cst_54 : f32 to vector<2x64xf32>
    %165 = arith.select %162, %163, %164 : vector<2x64xi1>, vector<2x64xf32>
    %166 = vector.extract_strided_slice %93 {offsets = [0, 8], sizes = [1, 1], strides = [1, 1]} : vector<1x16xf32> to vector<1x1xf32>
    %167 = vector.broadcast %166 : vector<1x1xf32> to vector<2x64xf32>
    %168 = arith.mulf %167, %165 : vector<2x64xf32>
    %169 = arith.addf %160, %168 : vector<2x64xf32>
    %c9_i32 = arith.constant 9 : i32
    %170 = vector.broadcast %c9_i32 : i32 to vector<2x64xi32>
    %171 = arith.cmpi sge, %94, %170 : vector<2x64xi32>
    %c9_i32_55 = arith.constant 9 : i32
    %172 = tpu.dynamic_rotate %59 by %c9_i32_55 dim 1 : vector<2x64xf32>, i32 -> vector<2x64xf32>
    %cst_56 = arith.constant 0.000000e+00 : f32
    %173 = vector.broadcast %cst_56 : f32 to vector<2x64xf32>
    %174 = arith.select %171, %172, %173 : vector<2x64xi1>, vector<2x64xf32>
    %175 = vector.extract_strided_slice %93 {offsets = [0, 9], sizes = [1, 1], strides = [1, 1]} : vector<1x16xf32> to vector<1x1xf32>
    %176 = vector.broadcast %175 : vector<1x1xf32> to vector<2x64xf32>
    %177 = arith.mulf %176, %174 : vector<2x64xf32>
    %178 = arith.addf %169, %177 : vector<2x64xf32>
    %c10_i32 = arith.constant 10 : i32
    %179 = vector.broadcast %c10_i32 : i32 to vector<2x64xi32>
    %180 = arith.cmpi sge, %94, %179 : vector<2x64xi32>
    %c10_i32_57 = arith.constant 10 : i32
    %181 = tpu.dynamic_rotate %59 by %c10_i32_57 dim 1 : vector<2x64xf32>, i32 -> vector<2x64xf32>
    %cst_58 = arith.constant 0.000000e+00 : f32
    %182 = vector.broadcast %cst_58 : f32 to vector<2x64xf32>
    %183 = arith.select %180, %181, %182 : vector<2x64xi1>, vector<2x64xf32>
    %184 = vector.extract_strided_slice %93 {offsets = [0, 10], sizes = [1, 1], strides = [1, 1]} : vector<1x16xf32> to vector<1x1xf32>
    %185 = vector.broadcast %184 : vector<1x1xf32> to vector<2x64xf32>
    %186 = arith.mulf %185, %183 : vector<2x64xf32>
    %187 = arith.addf %178, %186 : vector<2x64xf32>
    %c11_i32 = arith.constant 11 : i32
    %188 = vector.broadcast %c11_i32 : i32 to vector<2x64xi32>
    %189 = arith.cmpi sge, %94, %188 : vector<2x64xi32>
    %c11_i32_59 = arith.constant 11 : i32
    %190 = tpu.dynamic_rotate %59 by %c11_i32_59 dim 1 : vector<2x64xf32>, i32 -> vector<2x64xf32>
    %cst_60 = arith.constant 0.000000e+00 : f32
    %191 = vector.broadcast %cst_60 : f32 to vector<2x64xf32>
    %192 = arith.select %189, %190, %191 : vector<2x64xi1>, vector<2x64xf32>
    %193 = vector.extract_strided_slice %93 {offsets = [0, 11], sizes = [1, 1], strides = [1, 1]} : vector<1x16xf32> to vector<1x1xf32>
    %194 = vector.broadcast %193 : vector<1x1xf32> to vector<2x64xf32>
    %195 = arith.mulf %194, %192 : vector<2x64xf32>
    %196 = arith.addf %187, %195 : vector<2x64xf32>
    %c12_i32 = arith.constant 12 : i32
    %197 = vector.broadcast %c12_i32 : i32 to vector<2x64xi32>
    %198 = arith.cmpi sge, %94, %197 : vector<2x64xi32>
    %c12_i32_61 = arith.constant 12 : i32
    %199 = tpu.dynamic_rotate %59 by %c12_i32_61 dim 1 : vector<2x64xf32>, i32 -> vector<2x64xf32>
    %cst_62 = arith.constant 0.000000e+00 : f32
    %200 = vector.broadcast %cst_62 : f32 to vector<2x64xf32>
    %201 = arith.select %198, %199, %200 : vector<2x64xi1>, vector<2x64xf32>
    %202 = vector.extract_strided_slice %93 {offsets = [0, 12], sizes = [1, 1], strides = [1, 1]} : vector<1x16xf32> to vector<1x1xf32>
    %203 = vector.broadcast %202 : vector<1x1xf32> to vector<2x64xf32>
    %204 = arith.mulf %203, %201 : vector<2x64xf32>
    %205 = arith.addf %196, %204 : vector<2x64xf32>
    %c13_i32 = arith.constant 13 : i32
    %206 = vector.broadcast %c13_i32 : i32 to vector<2x64xi32>
    %207 = arith.cmpi sge, %94, %206 : vector<2x64xi32>
    %c13_i32_63 = arith.constant 13 : i32
    %208 = tpu.dynamic_rotate %59 by %c13_i32_63 dim 1 : vector<2x64xf32>, i32 -> vector<2x64xf32>
    %cst_64 = arith.constant 0.000000e+00 : f32
    %209 = vector.broadcast %cst_64 : f32 to vector<2x64xf32>
    %210 = arith.select %207, %208, %209 : vector<2x64xi1>, vector<2x64xf32>
    %211 = vector.extract_strided_slice %93 {offsets = [0, 13], sizes = [1, 1], strides = [1, 1]} : vector<1x16xf32> to vector<1x1xf32>
    %212 = vector.broadcast %211 : vector<1x1xf32> to vector<2x64xf32>
    %213 = arith.mulf %212, %210 : vector<2x64xf32>
    %214 = arith.addf %205, %213 : vector<2x64xf32>
    %c14_i32 = arith.constant 14 : i32
    %215 = vector.broadcast %c14_i32 : i32 to vector<2x64xi32>
    %216 = arith.cmpi sge, %94, %215 : vector<2x64xi32>
    %c14_i32_65 = arith.constant 14 : i32
    %217 = tpu.dynamic_rotate %59 by %c14_i32_65 dim 1 : vector<2x64xf32>, i32 -> vector<2x64xf32>
    %cst_66 = arith.constant 0.000000e+00 : f32
    %218 = vector.broadcast %cst_66 : f32 to vector<2x64xf32>
    %219 = arith.select %216, %217, %218 : vector<2x64xi1>, vector<2x64xf32>
    %220 = vector.extract_strided_slice %93 {offsets = [0, 14], sizes = [1, 1], strides = [1, 1]} : vector<1x16xf32> to vector<1x1xf32>
    %221 = vector.broadcast %220 : vector<1x1xf32> to vector<2x64xf32>
    %222 = arith.mulf %221, %219 : vector<2x64xf32>
    %223 = arith.addf %214, %222 : vector<2x64xf32>
    %c15_i32 = arith.constant 15 : i32
    %224 = vector.broadcast %c15_i32 : i32 to vector<2x64xi32>
    %225 = arith.cmpi sge, %94, %224 : vector<2x64xi32>
    %c15_i32_67 = arith.constant 15 : i32
    %226 = tpu.dynamic_rotate %59 by %c15_i32_67 dim 1 : vector<2x64xf32>, i32 -> vector<2x64xf32>
    %cst_68 = arith.constant 0.000000e+00 : f32
    %227 = vector.broadcast %cst_68 : f32 to vector<2x64xf32>
    %228 = arith.select %225, %226, %227 : vector<2x64xi1>, vector<2x64xf32>
    %229 = vector.extract_strided_slice %93 {offsets = [0, 15], sizes = [1, 1], strides = [1, 1]} : vector<1x16xf32> to vector<1x1xf32>
    %230 = vector.broadcast %229 : vector<1x1xf32> to vector<2x64xf32>
    %231 = arith.mulf %230, %228 : vector<2x64xf32>
    %232 = arith.addf %223, %231 : vector<2x64xf32>
    %c0_69 = arith.constant 0 : index
    %c0_70 = arith.constant 0 : index
    %233 = vector.load %arg5[%c0_69, %c0_70] : memref<2x64xf32, #tpu.memory_space<vmem>>, vector<2x64xf32>
    tpu.vector_store %arg5[%c0_69, %c0_70], %232 {strides = array<i32>} : memref<2x64xf32, #tpu.memory_space<vmem>>, vector<2x64xf32>,
    return
  }
}

</mosaic_0001>

<bundles_post_ra>
// kernel: ddsp_forward.7
= control target key start
LH: loop header
LB: loop body
LE: loop exit
PB: predicated region body
PF: predicated region fallthrough
CT: control target
= control target key end

     0   :  { %7 = vsyncpa [#allocation3], 0  ;;  %v1851_v12 = vmov 2102212464   ;;  %v1035_v16 = vmov 920167782   ;;  %s1844_s0 = inlined_call_operand.vmem [shape: f32[2,8], index: 0, kind: input, shape index: {}]   ;;  %s1845_s1 = inlined_call_operand.vmem [shape: f32[8,2,8], index: 1, kind: input, shape index: {}]   ;;  %s1846_s2 = inlined_call_operand.hbm [shape: f32[2,8], index: 2, kind: output, shape index: {}]  }
   0x1   :  { %v1059_v0 = vld [vmem:[%s1844_s0] sm:$0x3]  ;;  %v1036_v19 = vmov 1326507024   ;;  %v1037_v21 = vmov 683565275  }
   0x2   :  { %v16_v1 = vand.u32 2139095040, %v1059_v0  ;;  %v1063_v3 = vmul.f32 2.0, %v1059_v0  ;;  %v13_v11 = vand.u32 2147483647, %v1059_v0  ;;  %v1038_v23 = vmov 2475754826  }
   0x3   :  { %v1074_v25 = vmul.f32 3.0, %v1059_v0  ;;  %v1853_v27 = vmov 2131351028   ;;  %s1040_s28 = smov [#allocation2]  }
   0x4   :  { %v17_v2 = vshrl.u32 %v16_v1, 23  ;;  %v124_v6 = vand.u32 2139095040, %v1063_v3  ;;  %v20_v32 = vand.u32 8388607, %v13_v11  ;;  %s891_s29 = sshll.u32 %s1040_s28, 4  ;;  %s892_s29 = int_to_ptr.vmem [resolvable:$true] %s891_s29 }
   0x5   :  { %v233_v35 = vand.u32 2139095040, %v1074_v25  ;;  %s1010_s30 = scalar_lea.vmem %s892_s29, 32  ;;  %p1015_p1 = scmp.lt.s32.totalorder %s892_s29, %s892_s29 }
   0x6   :  { %v899_v4 = vadd.s32 4294967169, %v17_v2  ;;  %v125_v9 = vshrl.u32 %v124_v6, 23  ;;  %v21_v40 = vor.u32 8388608, %v20_v32  ;;  %v121_v6 = vand.u32 2147483647, %v1063_v3  ;;  %p1011_p0 = scmp.ne.s32.totalorder %s892_s29, %s1010_s30  ;;  %p1016_p2 = scmp.lt.s32.totalorder %s1010_s30, %s1010_s30 }
   0x7   :  { %v234_v42 = vshrl.u32 %v233_v35, 23 }
   0x8   :  { %v23_v5 = vadd.s32 1, %v899_v4  ;;  %v903_v14 = vadd.s32 4294967169, %v125_v9  ;;  %v61_v48 = vshll.u32 %v21_v40, 8  ;;  %p1017_p3 = por %p1016_p2, %p1015_p1 }
   0x9   :  { %v908_v50 = vadd.s32 4294967169, %v234_v42 }
   0xa   :  { %vm24_vm0 = vcmp.gt.s32.totalorder %v23_v5, 0  ;;  %v131_v34 = vadd.s32 1, %v903_v14  ;;  %p1018_p4 = pnand %p1017_p3, %p1011_p0 }
   0xb   :  { %v25_v7 = vsel %vm24_vm0, %v23_v5, 0  ;;  %v240_v59 = vadd.s32 1, %v908_v50 }
   0xc   :  { %v27_v8 = vand.u32 31, %v25_v7  ;;  %v26_v15 = vshrl.u32 %v25_v7, 5  ;;  %vm132_vm4 = vcmp.gt.s32.totalorder %v131_v34, 0 }
   0xd   :  { %v133_v47 = vsel %vm132_vm4, %v131_v34, 0  ;;  %vm241_vm6 = vcmp.gt.s32.totalorder %v240_v59, 0 }
   0xe   :  { %v28_v10 = vsub.s32 32, %v27_v8  ;;  %v39_v13 = vshll.u32 %v1851_v12, %v27_v8  ;;  %v42_v18 = vshll.u32 %v1035_v16, %v27_v8  ;;  %v30_v22 = vshll.u32 %v1037_v21, %v27_v8 }
   0xf   :  { %v33_v24 = vshll.u32 %v1038_v23, %v27_v8  ;;  %v36_v29 = vshll.u32 %v1853_v27, %v27_v8  ;;  %vm48_vm1 = vcmp.lt.s32.totalorder %v26_v15, 4  ;;  %vm45_vm2 = vcmp.lt.s32.totalorder %v26_v15, 1 }
  0x10   :  { %v40_v17 = vshrl.u32 %v1035_v16, %v28_v10  ;;  %v43_v20 = vshrl.u32 %v1036_v19, %v28_v10  ;;  %v31_v26 = vshrl.u32 %v1038_v23, %v28_v10  ;;  %v34_v28 = vshrl.u32 %v1853_v27, %v28_v10 }
  0x11   :  { %v37_v30 = vshrl.u32 %v1851_v12, %v28_v10  ;;  %vm47_vm3 = vcmp.lt.s32.totalorder %v26_v15, 3  ;;  %vm46_vm5 = vcmp.lt.s32.totalorder %v26_v15, 2  ;;  %v135_v52 = vand.u32 31, %v133_v47 }
  0x12   :  { %v41_v31 = vor.u32 %v40_v17, %v39_v13  ;;  %v44_v33 = vor.u32 %v43_v20, %v42_v18  ;;  %v32_v36 = vor.u32 %v31_v26, %v30_v22  ;;  %v35_v37 = vor.u32 %v34_v28, %v33_v24 }
  0x13   :  { %v38_v38 = vor.u32 %v37_v30, %v36_v29  ;;  %v29_v53 = vshrl.u32 %v1037_v21, %v28_v10  ;;  %v1100_v60 = vsub.s32 32, %v135_v52  ;;  %v147_v63 = vshll.u32 %v1851_v12, %v135_v52 }
  0x14   :  { %v54_v39 = vsel %vm48_vm1, %v41_v31, 920167782  ;;  %v58_v41 = vsel %vm48_vm1, %v44_v33, 1326507024  ;;  %v53_v43 = vsel %vm45_vm2, %v32_v36, %v35_v37  ;;  %v150_v2 = vshll.u32 %v1035_v16, %v135_v52 }
  0x15   :  { %v55_v44 = vsel %vm47_vm3, %v38_v38, %v54_v39  ;;  %v57_v45 = vsel %vm45_vm2, %v35_v37, %v38_v38  ;;  %v59_v46 = vsel %vm47_vm3, %v41_v31, %v58_v41  ;;  %v50_v56 = vsel %vm48_vm1, %v38_v38, 2102212464 }
  0x16   :  { %v56_v49 = vsel %vm46_vm5, %v53_v43, %v55_v44  ;;  %v60_v51 = vsel %vm46_vm5, %v57_v45, %v59_v46  ;;  %v49_v61 = vsel %vm45_vm2, %v29_v53, %v32_v36  ;;  %v51_v62 = vsel %vm47_vm3, %v35_v37, %v50_v56 }
  0x17   :  { %v1092_v54 = vmul.u32.u64.low %v61_v48, %v56_v49  ;;  %v1093_v55 = vmul.u32.u64.high %v61_v48, %v56_v49, %v1092_v54  ;;  %v1097_v57 = vmul.u32.u64.low %v61_v48, %v60_v51  ;;  %v1098_v58 = vmul.u32.u64.high %v61_v48, %v60_v51, %v1097_v57 }
  0x18   :  { %v148_v1 = vshrl.u32 %v1035_v16, %v1100_v60  ;;  %v151_v4 = vshrl.u32 %v1036_v19, %v1100_v60  ;;  %v52_v5 = vsel %vm46_vm5, %v49_v61, %v51_v62  ;;  %v1112_v7 = vshrl.u32 %v133_v47, 5 }
  0x19   :  { %v138_v8 = vshll.u32 %v1037_v21, %v135_v52  ;;  %v71_v9 = vadd.s32 1, %v1093_v55  ;;  %v141_v10 = vshll.u32 %v1038_v23, %v135_v52  ;;  %v144_v13 = vshll.u32 %v1853_v27, %v135_v52 }
  0x1a   :  { %v242_v14 = vsel %vm241_vm6, %v240_v59, 0  ;;  %vm70_vm7 = vc.u32 %v1098_v58, %v1092_v54  ;;  %v139_v15 = vshrl.u32 %v1038_v23, %v1100_v60  ;;  %v142_v17 = vshrl.u32 %v1853_v27, %v1100_v60 }
  0x1b   :  { %v145_v18 = vshrl.u32 %v1851_v12, %v1100_v60  ;;  %v149_v20 = vor.u32 %v148_v1, %v147_v63  ;;  %v152_v22 = vor.u32 %v151_v4, %v150_v2  ;;  %v68_v24 = vmul.u32 %v61_v48, %v52_v5 }
  0x1c   :  { %v128_v26 = vand.u32 8388607, %v121_v6  ;;  %vm156_vm8 = vcmp.lt.s32.totalorder %v1112_v7, 4  ;;  %v244_v28 = vand.u32 31, %v242_v14  ;;  %v72_v29 = vsel %vm70_vm7, %v71_v9, %v1093_v55 }
  0x1d   :  { %v140_v30 = vor.u32 %v139_v15, %v138_v8  ;;  %v143_v31 = vor.u32 %v142_v17, %v141_v10  ;;  %v146_v32 = vor.u32 %v145_v18, %v144_v13  ;;  %vm153_vm9 = vcmp.lt.s32.totalorder %v1112_v7, 1 }
  0x1e   :  { %vm155_vm10 = vcmp.lt.s32.totalorder %v1112_v7, 3  ;;  %v162_v33 = vsel %vm156_vm8, %v149_v20, 920167782  ;;  %v166_v34 = vsel %vm156_vm8, %v152_v22, 1326507024  ;;  %v73_v35 = vadd.s32 %v72_v29, %v68_v24 }
  0x1f   :  { %v129_v36 = vor.u32 8388608, %v128_v26  ;;  %v1136_v37 = vsub.s32 32, %v244_v28  ;;  %vm154_vm11 = vcmp.lt.s32.totalorder %v1112_v7, 2  ;;  %v1140_v38 = vmul.f32 4.0, %v1059_v0 }
  0x20   :  { %v161_v39 = vsel %vm153_vm9, %v140_v30, %v143_v31  ;;  %v163_v40 = vsel %vm155_vm10, %v146_v32, %v162_v33  ;;  %v165_v41 = vsel %vm153_vm9, %v143_v31, %v146_v32  ;;  %v167_v42 = vsel %vm155_vm10, %v149_v20, %v166_v34 }
  0x21   :  { %v230_v43 = vand.u32 2147483647, %v1074_v25  ;;  %v74_v44 = vadd.s32 536870912, %v73_v35  ;;  %v1151_v45 = vshll.u32 %v129_v36, 8  ;;  %v256_v46 = vshll.u32 %v1851_v12, %v244_v28 }
  0x22   :  { %v257_v47 = vshrl.u32 %v1035_v16, %v1136_v37  ;;  %v164_v48 = vsel %vm154_vm11, %v161_v39, %v163_v40  ;;  %v168_v49 = vsel %vm154_vm11, %v165_v41, %v167_v42  ;;  %v1160_v50 = vshrl.u32 %v242_v14, 5 }
  0x23   :  { %v342_v51 = vand.u32 2139095040, %v1140_v38  ;;  %v247_v52 = vshll.u32 %v1037_v21, %v244_v28  ;;  %v248_v53 = vshrl.u32 %v1038_v23, %v1136_v37  ;;  %v259_v55 = vshll.u32 %v1035_v16, %v244_v28 }
  0x24   :  { %v260_v56 = vshrl.u32 %v1036_v19, %v1136_v37  ;;  %v250_v57 = vshll.u32 %v1038_v23, %v244_v28  ;;  %v251_v59 = vshrl.u32 %v1853_v27, %v1136_v37  ;;  %v253_v61 = vshll.u32 %v1853_v27, %v244_v28 }
  0x25   :  { %v254_v62 = vshrl.u32 %v1851_v12, %v1136_v37  ;;  %v1176_v63 = vmul.u32.u64.low %v1151_v45, %v164_v48  ;;  %v1177_v1 = vmul.u32.u64.high %v1151_v45, %v164_v48, %v1176_v63  ;;  %v237_v2 = vand.u32 8388607, %v230_v43 }
  0x26   :  { %v258_v4 = vor.u32 %v257_v47, %v256_v46  ;;  %v137_v5 = vshrl.u32 %v1037_v21, %v1100_v60  ;;  %v1185_v8 = vmul.u32.u64.low %v1151_v45, %v168_v49  ;;  %v1186_v9 = vmul.u32.u64.high %v1151_v45, %v168_v49, %v1185_v8 }
  0x27   :  { %vm265_vm12 = vcmp.lt.s32.totalorder %v1160_v50, 4  ;;  %v1189_v10 = vshrl.u32 %v74_v44, 30  ;;  %v158_v13 = vsel %vm156_vm8, %v146_v32, 2102212464  ;;  %v261_v14 = vor.u32 %v260_v56, %v259_v55 }
  0x28   :  { %v249_v15 = vor.u32 %v248_v53, %v247_v52  ;;  %v252_v17 = vor.u32 %v251_v59, %v250_v57  ;;  %v255_v18 = vor.u32 %v254_v62, %v253_v61  ;;  %v343_v20 = vshrl.u32 %v342_v51, 23 }
  0x29   :  { %v238_v22 = vor.u32 8388608, %v237_v2  ;;  %vm262_vm13 = vcmp.lt.s32.totalorder %v1160_v50, 1  ;;  %vm264_vm14 = vcmp.lt.s32.totalorder %v1160_v50, 3  ;;  %v271_v60 = vsel %vm265_vm12, %v258_v4, 920167782 }
  0x2a   :  { %v157_v24 = vsel %vm153_vm9, %v137_v5, %v140_v30  ;;  %v159_v26 = vsel %vm155_vm10, %v143_v31, %v158_v13  ;;  %v913_v28 = vadd.s32 4294967169, %v343_v20  ;;  %v76_v29 = vshll.u32 %v1189_v10, 30 }
  0x2b   :  { %v275_v32 = vsel %vm265_vm12, %v261_v14, 1326507024  ;;  %vm263_vm15 = vcmp.lt.s32.totalorder %v1160_v50, 2  ;;  %v270_v33 = vsel %vm262_vm13, %v249_v15, %v252_v17  ;;  %v272_v34 = vsel %vm264_vm14, %v255_v18, %v271_v60 }
  0x2c   :  { %v349_v36 = vadd.s32 1, %v913_v28  ;;  %v160_v30 = vsel %vm154_vm11, %v157_v24, %v159_v26  ;;  %v179_v31 = vadd.s32 1, %v1177_v1  ;;  %v1212_v39 = vshll.u32 %v238_v22, 8 }
  0x2d   :  { %vm178_vm0 = vc.u32 %v1186_v9, %v1176_v63  ;;  %v274_v40 = vsel %vm262_vm13, %v252_v17, %v255_v18  ;;  %v276_v41 = vsel %vm264_vm14, %v258_v4, %v275_v32  ;;  %v1220_v42 = vsub.s32 %v73_v35, %v76_v29 }
  0x2e   :  { %vm350_vm1 = vcmp.gt.s32.totalorder %v349_v36, 0  ;;  %v273_v7 = vsel %vm263_vm15, %v270_v33, %v272_v34  ;;  %v176_v46 = vmul.u32 %v1151_v45, %v160_v30  ;;  %v246_v47 = vshrl.u32 %v1037_v21, %v1136_v37 }
  0x2f   :  { %v351_v44 = vsel %vm350_vm1, %v349_v36, 0  ;;  %v180_v49 = vsel %vm178_vm0, %v179_v31, %v1177_v1  ;;  %v277_v51 = vsel %vm263_vm15, %v274_v40, %v276_v41  ;;  %v267_v52 = vsel %vm265_vm12, %v255_v18, 2102212464 }
  0x30   :  { %v353_v48 = vand.u32 31, %v351_v44  ;;  %v1233_v35 = vmul.u32.u64.low %v1212_v39, %v273_v7  ;;  %v1234_v53 = vmul.u32.u64.high %v1212_v39, %v273_v7, %v1233_v35  ;;  %v79_v45 = vsub.s32 0, %v1220_v42 }
  0x31   :  { %v1850_v56 = vand.u32 2147483647, %v1140_v38  ;;  %v181_v37 = vadd.s32 %v180_v49, %v176_v46  ;;  %v266_v57 = vsel %vm262_vm13, %v246_v47, %v249_v15  ;;  %v268_v62 = vsel %vm264_vm14, %v252_v17, %v267_v52 }
  0x32   :  { %v354_v55 = vsub.s32 32, %v353_v48  ;;  %v1242_v59 = vmul.u32.u64.low %v1212_v39, %v277_v51  ;;  %v1243_v61 = vmul.u32.u64.high %v1212_v39, %v277_v51, %v1242_v59  ;;  %v1247_v1 = vshrl.u32 %v351_v44, 5 }
  0x33   :  { %v356_v2 = vshll.u32 %v1037_v21, %v353_v48  ;;  %v359_v4 = vshll.u32 %v1038_v23, %v353_v48  ;;  %v362_v13 = vshll.u32 %v1853_v27, %v353_v48  ;;  %v365_v14 = vshll.u32 %v1851_v12, %v353_v48 }
  0x34   :  { %v357_v5 = vshrl.u32 %v1038_v23, %v354_v55  ;;  %v360_v8 = vshrl.u32 %v1853_v27, %v354_v55  ;;  %v363_v15 = vshrl.u32 %v1851_v12, %v354_v55  ;;  %v366_v18 = vshrl.u32 %v1035_v16, %v354_v55 }
  0x35   :  { %v368_v17 = vshll.u32 %v1035_v16, %v353_v48  ;;  %v369_v20 = vshrl.u32 %v1036_v19, %v354_v55  ;;  %v346_v22 = vand.u32 8388607, %v1850_v56  ;;  %v1262_v60 = vmul.f32 5.0, %v1059_v0 }
  0x36   :  { %v900_v24 = vmin.u32 %v79_v45, %v1220_v42  ;;  %v182_v26 = vadd.s32 536870912, %v181_v37  ;;  %v269_v28 = vsel %vm263_vm15, %v266_v57, %v268_v62  ;;  %v288_v29 = vadd.s32 1, %v1234_v53 }
  0x37   :  { %v358_v32 = vor.u32 %v357_v5, %v356_v2  ;;  %v361_v33 = vor.u32 %v360_v8, %v359_v4  ;;  %v364_v34 = vor.u32 %v363_v15, %v362_v13  ;;  %v367_v36 = vor.u32 %v366_v18, %v365_v14 }
  0x38   :  { %v370_v30 = vor.u32 %v369_v20, %v368_v17  ;;  %vm371_vm2 = vcmp.lt.s32.totalorder %v1247_v1, 1  ;;  %vm287_vm3 = vc.u32 %v1243_v61, %v1233_v35  ;;  %v347_v31 = vor.u32 8388608, %v346_v22 }
  0x39   :  { %vm374_vm4 = vcmp.lt.s32.totalorder %v1247_v1, 4  ;;  %v451_v40 = vand.u32 2139095040, %v1262_v60  ;;  %v81_v41 = vclz %v900_v24  ;;  %vm373_vm5 = vcmp.lt.s32.totalorder %v1247_v1, 3 }
  0x3a   :  { %v1274_v50 = vshrl.u32 %v182_v26, 30  ;;  %v285_v7 = vmul.u32 %v1212_v39, %v269_v28  ;;  %vm372_vm6 = vcmp.lt.s32.totalorder %v1247_v1, 2  ;;  %v379_v44 = vsel %vm371_vm2, %v358_v32, %v361_v33 }
  0x3b   :  { %v289_v46 = vsel %vm287_vm3, %v288_v29, %v1234_v53  ;;  %v380_v47 = vsel %vm374_vm4, %v367_v36, 920167782  ;;  %v383_v48 = vsel %vm371_vm2, %v361_v33, %v364_v34  ;;  %v384_v49 = vsel %vm374_vm4, %v370_v30, 1326507024 }
  0x3c   :  { %v381_v51 = vsel %vm373_vm5, %v364_v34, %v380_v47  ;;  %v385_v39 = vsel %vm373_vm5, %v367_v36, %v384_v49  ;;  %v387_v52 = vshll.u32 %v347_v31, 8  ;;  %v452_v45 = vshrl.u32 %v451_v40, 23 }
  0x3d   :  { %v901_v57 = vadd.s32 4294967294, %v81_v41  ;;  %v382_v53 = vsel %vm372_vm6, %v379_v44, %v381_v51  ;;  %v290_v59 = vadd.s32 %v289_v46, %v285_v7  ;;  %v386_v62 = vsel %vm372_vm6, %v383_v48, %v385_v39 }
  0x3e   :  { %v184_v2 = vshll.u32 %v1274_v50, 30  ;;  %v1296_v4 = vmul.u32.u64.low %v387_v52, %v382_v53  ;;  %v1297_v5 = vmul.u32.u64.high %v387_v52, %v382_v53, %v1296_v4  ;;  %v918_v8 = vadd.s32 4294967169, %v452_v45 }
  0x3f   :  { %vm902_vm7 = vcmp.lt.s32.totalorder %v901_v57, 0  ;;  %v1300_v13 = vmul.u32.u64.low %v387_v52, %v386_v62  ;;  %v1301_v14 = vmul.u32.u64.high %v387_v52, %v386_v62, %v1300_v13  ;;  %v291_v15 = vadd.s32 536870912, %v290_v59 }
  0x40   :  { %v355_v18 = vshrl.u32 %v1037_v21, %v354_v55  ;;  %v1304_v17 = vsub.s32 %v181_v37, %v184_v2  ;;  %v376_v20 = vsel %vm374_vm4, %v364_v34, 2102212464  ;;  %v1308_v22 = vsel %vm902_vm7, 0, %v901_v57 }
  0x41   :  { %v458_v24 = vadd.s32 1, %v918_v8  ;;  %v1310_v26 = vshrl.u32 %v291_v15, 30  ;;  %v377_v29 = vsel %vm373_vm5, %v361_v33, %v376_v20  ;;  %v89_v36 = vsub.s32 4294967266, %v1308_v22 }
  0x42   :  { %v375_v28 = vsel %vm371_vm2, %v355_v18, %v358_v32  ;;  %v187_v55 = vsub.s32 0, %v1304_v17  ;;  %v1848_v37 = vand.u32 2147483647, %v1262_v60  ;;  %v397_v34 = vadd.s32 1, %v1297_v5 }
  0x43   :  { %vm459_vm8 = vcmp.gt.s32.totalorder %v458_v24, 0  ;;  %v378_v31 = vsel %vm372_vm6, %v375_v28, %v377_v29  ;;  %vm396_vm9 = vc.u32 %v1301_v14, %v1296_v4  ;;  %v69_v33 = vadd.s32 %v1092_v54, %v1098_v58 }
  0x44   :  { %v460_v30 = vsel %vm459_vm8, %v458_v24, 0  ;;  %v85_v40 = vsub.s32 32, %v1308_v22  ;;  %v86_v41 = vshll.u32 %v1220_v42, %v1308_v22  ;;  %v293_v7 = vshll.u32 %v1310_v26, 30 }
  0x45   :  { %v462_v32 = vand.u32 31, %v460_v30  ;;  %v90_v44 = vadd.s32 127, %v89_v36  ;;  %v904_v46 = vmin.u32 %v187_v55, %v1304_v17  ;;  %v455_v1 = vand.u32 8388607, %v1848_v37 }
  0x46   :  { %v394_v48 = vmul.u32 %v387_v52, %v378_v31  ;;  %v398_v49 = vsel %vm396_vm9, %v397_v34, %v1297_v5  ;;  %v461_v58 = vshrl.u32 %v460_v30, 5  ;;  %v87_v57 = vshrl.u32 %v69_v33, %v85_v40 }
  0x47   :  { %v463_v47 = vsub.s32 32, %v462_v32  ;;  %v465_v51 = vshll.u32 %v1037_v21, %v462_v32  ;;  %v468_v54 = vshll.u32 %v1038_v23, %v462_v32  ;;  %v471_v45 = vshll.u32 %v1853_v27, %v462_v32 }
  0x48   :  { %v1339_v53 = vsub.s32 %v290_v59, %v293_v7  ;;  %v474_v52 = vshll.u32 %v1851_v12, %v462_v32  ;;  %v91_v2 = vshll.u32 %v90_v44, 23  ;;  %v189_v5 = vclz %v904_v46 }
  0x49   :  { %v466_v39 = vshrl.u32 %v1038_v23, %v463_v47  ;;  %v469_v42 = vshrl.u32 %v1853_v27, %v463_v47  ;;  %v472_v62 = vshrl.u32 %v1851_v12, %v463_v47  ;;  %v456_v8 = vor.u32 8388608, %v455_v1 }
  0x4a   :  { %v1344_v13 = vmul.f32 6.0, %v1059_v0  ;;  %v1346_v15 = vadd.s32 %v398_v49, %v394_v48  ;;  %v475_v22 = vshrl.u32 %v1035_v16, %v463_v47  ;;  %v477_v59 = vshll.u32 %v1035_v16, %v462_v32 }
  0x4b   :  { %v467_v18 = vor.u32 %v466_v39, %v465_v51  ;;  %v470_v20 = vor.u32 %v469_v42, %v468_v54  ;;  %v473_v24 = vor.u32 %v472_v62, %v471_v45  ;;  %v478_v28 = vshrl.u32 %v1036_v19, %v463_v47 }
  0x4c   :  { %vm480_vm10 = vcmp.lt.s32.totalorder %v461_v58, 1  ;;  %v296_v29 = vsub.s32 0, %v1339_v53  ;;  %v464_v36 = vshrl.u32 %v1037_v21, %v463_v47  ;;  %v476_v55 = vor.u32 %v475_v22, %v474_v52 }
  0x4d   :  { %vm483_vm11 = vcmp.lt.s32.totalorder %v461_v58, 4  ;;  %v479_v30 = vor.u32 %v478_v28, %v477_v59  ;;  %vm482_vm12 = vcmp.lt.s32.totalorder %v461_v58, 3  ;;  %v560_v31 = vand.u32 2139095040, %v1344_v13 }
  0x4e   :  { %v485_v34 = vsel %vm483_vm11, %v473_v24, 2102212464  ;;  %v905_v33 = vadd.s32 4294967294, %v189_v5  ;;  %vm481_vm13 = vcmp.lt.s32.totalorder %v461_v58, 2  ;;  %v488_v40 = vsel %vm480_vm10, %v467_v18, %v470_v20 }
  0x4f   :  { %v496_v7 = vshll.u32 %v456_v8, 8  ;;  %v400_v32 = vadd.s32 536870912, %v1346_v15  ;;  %v489_v44 = vsel %vm483_vm11, %v476_v55, 920167782  ;;  %v492_v46 = vsel %vm480_vm10, %v470_v20, %v473_v24 }
  0x50   :  { %v493_v1 = vsel %vm483_vm11, %v479_v30, 1326507024  ;;  %v484_v47 = vsel %vm480_vm10, %v464_v36, %v467_v18  ;;  %v486_v48 = vsel %vm482_vm12, %v470_v20, %v485_v34  ;;  %v490_v49 = vsel %vm482_vm12, %v473_v24, %v489_v44 }
  0x51   :  { %v494_v51 = vsel %vm482_vm12, %v476_v55, %v493_v1  ;;  %v909_v54 = vmin.u32 %v296_v29, %v1339_v53  ;;  %v491_v39 = vsel %vm481_vm13, %v488_v40, %v490_v49  ;;  %v561_v45 = vshrl.u32 %v560_v31, 23 }
  0x52   :  { %v495_v42 = vsel %vm481_vm13, %v492_v46, %v494_v51  ;;  %v88_v62 = vor.u32 %v87_v57, %v86_v41  ;;  %vm906_vm14 = vcmp.lt.s32.totalorder %v905_v33, 0  ;;  %v92_v8 = vor.u32 4788187, %v91_v2 }
  0x53   :  { %v1361_v52 = vmul.u32.u64.low %v496_v7, %v495_v42  ;;  %v1362_v5 = vmul.u32.u64.high %v496_v7, %v495_v42, %v1361_v52  ;;  %v487_v22 = vsel %vm481_vm13, %v484_v47, %v486_v48  ;;  %v1369_v20 = vshrl.u32 %v400_v32, 30 }
  0x54   :  { %v1365_v59 = vmul.u32.u64.low %v496_v7, %v491_v39  ;;  %v1366_v18 = vmul.u32.u64.high %v496_v7, %v491_v39, %v1365_v59  ;;  %v192_v24 = vsel %vm906_vm14, 0, %v905_v33  ;;  %v298_v28 = vclz %v909_v54 }
  0x55   :  { %v923_v29 = vadd.s32 4294967169, %v561_v45  ;;  %v95_v36 = vcvt.s32.f32 %v88_v62  ;;  %v99_v55 = vsub.s32 4, %v1189_v10  ;;  %v177_v41 = vadd.s32 %v1176_v63, %v1186_v9 }
  0x56   :  { %v503_v57 = vmul.u32 %v496_v7, %v487_v22  ;;  %v93_v30 = vand.u32 2147483647, %v92_v8  ;;  %vm505_vm15 = vc.u32 %v1362_v5, %v1365_v59  ;;  %v506_v58 = vadd.s32 1, %v1366_v18 }
  0x57   :  { %v567_v2 = vadd.s32 1, %v923_v29  ;;  %v193_v34 = vsub.s32 32, %v192_v24  ;;  %v197_v31 = vsub.s32 4294967266, %v192_v24  ;;  %v402_v33 = vshll.u32 %v1369_v20, 30 }
  0x58   :  { %v1847_v40 = vand.u32 2147483647, %v1344_v13  ;;  %vm15_vm0 = vcmp.lt.s32.totalorder %v1059_v0, 0  ;;  %v910_v32 = vadd.s32 4294967294, %v298_v28  ;;  %v507_v44 = vsel %vm505_vm15, %v506_v58, %v1366_v18 }
  0x59   :  { %vm568_vm1 = vcmp.gt.s32.totalorder %v567_v2, 0  ;;  %v1384_v63 = vsel %vm15_vm0, %v99_v55, %v1189_v10  ;;  %v508_v9 = vadd.s32 %v507_v44, %v503_v57  ;;  %v1386_v46 = vmul.f32 %v95_v36, %v93_v30 }
  0x5a   :  { %v569_v7 = vsel %vm568_vm1, %v567_v2, 0  ;;  %v194_v1 = vshll.u32 %v1304_v17, %v192_v24  ;;  %v1391_v47 = vadd.s32 %v1233_v35, %v1243_v61  ;;  %v195_v49 = vshrl.u32 %v177_v41, %v193_v34 }
  0x5b   :  { %v571_v48 = vand.u32 31, %v569_v7  ;;  %v198_v51 = vadd.s32 127, %v197_v31  ;;  %v1394_v54 = vsub.s32 %v1346_v15, %v402_v33  ;;  %v564_v10 = vand.u32 8388607, %v1847_v40 }
  0x5c   :  { %vm911_vm2 = vcmp.lt.s32.totalorder %v910_v32, 0  ;;  %v509_v39 = vadd.s32 536870912, %v508_v9  ;;  %v570_v42 = vshrl.u32 %v569_v7, 5  ;;  %v1413_v57 = vmul.f32 7.0, %v1059_v0 }
  0x5d   :  { %v572_v45 = vsub.s32 32, %v571_v48  ;;  %v574_v62 = vshll.u32 %v1037_v21, %v571_v48  ;;  %v577_v17 = vshll.u32 %v1038_v23, %v571_v48  ;;  %v580_v35 = vshll.u32 %v1853_v27, %v571_v48 }
  0x5e   :  { %v583_v61 = vshll.u32 %v1851_v12, %v571_v48  ;;  %v586_v22 = vshll.u32 %v1035_v16, %v571_v48  ;;  %v199_v18 = vshll.u32 %v198_v51, 23  ;;  %v405_v24 = vsub.s32 0, %v1394_v54 }
  0x5f   :  { %v575_v52 = vshrl.u32 %v1038_v23, %v572_v45  ;;  %v578_v15 = vshrl.u32 %v1853_v27, %v572_v45  ;;  %v581_v8 = vshrl.u32 %v1851_v12, %v572_v45  ;;  %v565_v28 = vor.u32 8388608, %v564_v10 }
  0x60   :  { %v584_v29 = vshrl.u32 %v1035_v16, %v572_v45  ;;  %v301_v36 = vsel %vm911_vm2, 0, %v910_v32  ;;  %v1409_v55 = vshrl.u32 %v509_v39, 30  ;;  %v587_v41 = vshrl.u32 %v1036_v19, %v572_v45 }
  0x61   :  { %v196_v30 = vor.u32 %v195_v49, %v194_v1  ;;  %v573_v58 = vshrl.u32 %v1037_v21, %v572_v45  ;;  %v576_v2 = vor.u32 %v575_v52, %v574_v62  ;;  %v579_v34 = vor.u32 %v578_v15, %v577_v17 }
  0x62   :  { %v582_v31 = vor.u32 %v581_v8, %v580_v35  ;;  %v585_v33 = vor.u32 %v584_v29, %v583_v61  ;;  %v588_v44 = vor.u32 %v587_v41, %v586_v22  ;;  %vm589_vm3 = vcmp.lt.s32.totalorder %v570_v42, 1 }
  0x63   :  { %v200_v7 = vor.u32 4788187, %v199_v18  ;;  %v306_v48 = vsub.s32 4294967266, %v301_v36  ;;  %v914_v32 = vmin.u32 %v405_v24, %v1394_v54  ;;  %v605_v51 = vshll.u32 %v565_v28, 8 }
  0x64   :  { %v511_v10 = vshll.u32 %v1409_v55, 30  ;;  %vm590_vm4 = vcmp.lt.s32.totalorder %v570_v42, 2  ;;  %vm592_vm5 = vcmp.lt.s32.totalorder %v570_v42, 4  ;;  %v669_v39 = vand.u32 2139095040, %v1413_v57 }
  0x65   :  { %vm591_vm6 = vcmp.lt.s32.totalorder %v570_v42, 3  ;;  %v593_v1 = vsel %vm589_vm3, %v573_v58, %v576_v2  ;;  %v594_v49 = vsel %vm592_vm5, %v582_v31, 2102212464  ;;  %v597_v45 = vsel %vm589_vm3, %v576_v2, %v579_v34 }
  0x66   :  { %v595_v62 = vsel %vm591_vm6, %v579_v34, %v594_v49  ;;  %v598_v17 = vsel %vm592_vm5, %v585_v33, 920167782  ;;  %v601_v35 = vsel %vm589_vm3, %v579_v34, %v582_v31  ;;  %v602_v61 = vsel %vm592_vm5, %v588_v44, 1326507024 }
  0x67   :  { %v201_v52 = vand.u32 2147483647, %v200_v7  ;;  %v203_v15 = vcvt.s32.f32 %v196_v30  ;;  %v302_v8 = vsub.s32 32, %v301_v36  ;;  %v307_v22 = vadd.s32 127, %v306_v48 }
  0x68   :  { %v407_v18 = vclz %v914_v32  ;;  %v599_v24 = vsel %vm591_vm6, %v582_v31, %v598_v17  ;;  %v603_v28 = vsel %vm591_vm6, %v585_v33, %v602_v61  ;;  %v670_v29 = vshrl.u32 %v669_v39, 23 }
  0x69   :  { %v1419_v41 = vsub.s32 %v508_v9, %v511_v10  ;;  %v596_v40 = vsel %vm590_vm4, %v593_v1, %v595_v62  ;;  %v600_v58 = vsel %vm590_vm4, %v597_v45, %v599_v24  ;;  %v604_v2 = vsel %vm590_vm4, %v601_v35, %v603_v28 }
  0x6a   :  { %v1424_v49 = vmul.u32.u64.low %v605_v51, %v604_v2  ;;  %v1425_v37 = vmul.u32.u64.high %v605_v51, %v604_v2, %v1424_v49  ;;  %v1427_v34 = vmul.u32.u64.low %v605_v51, %v600_v58  ;;  %v1428_v44 = vmul.u32.u64.high %v605_v51, %v600_v58, %v1427_v34 }
  0x6b   :  { %v303_v30 = vshll.u32 %v1339_v53, %v301_v36  ;;  %v304_v31 = vshrl.u32 %v1391_v47, %v302_v8  ;;  %v928_v33 = vadd.s32 4294967169, %v670_v29  ;;  %vm1435_vm7 = vcmp.le.f32.partialorder %v13_v11, 0.7853982 }
  0x6c   :  { %v308_v42 = vshll.u32 %v307_v22, 23  ;;  %v915_v7 = vadd.s32 4294967294, %v407_v18  ;;  %v102_v48 = vsel %vm1435_vm7, 0, %v1384_v63  ;;  %v514_v32 = vsub.s32 0, %v1419_v41 }
  0x6d   :  { %v612_v10 = vmul.u32 %v605_v51, %v596_v40  ;;  %v676_v39 = vadd.s32 1, %v928_v33  ;;  %v97_v53 = vxor.u32 2147483648, %v1386_v46  ;;  %v1444_v47 = vmul.f32 %v203_v15, %v201_v52 }
  0x6e   :  { %vm614_vm8 = vc.u32 %v1425_v37, %v1427_v34  ;;  %v615_v11 = vadd.s32 1, %v1428_v44  ;;  %v305_v36 = vor.u32 %v304_v31, %v303_v30  ;;  %v309_v1 = vor.u32 4788187, %v308_v42 }
  0x6f   :  { %vm677_vm9 = vcmp.gt.s32.totalorder %v676_v39, 0  ;;  %vm916_vm10 = vcmp.lt.s32.totalorder %v915_v7, 0  ;;  %v1450_v62 = vadd.s32 3, %v102_v48  ;;  %v919_v40 = vmin.u32 %v514_v32, %v1419_v41 }
  0x70   :  { %v616_v45 = vsel %vm614_vm8, %v615_v11, %v1428_v44  ;;  %v678_v63 = vsel %vm677_vm9, %v676_v39, 0  ;;  %v1849_v17 = vand.u32 2147483647, %v1413_v57  ;;  %v1457_v35 = vsel %vm15_vm0, %v97_v53, %v1386_v46 }
  0x71   :  { %v617_v51 = vadd.s32 %v616_v45, %v612_v10  ;;  %v205_v61 = vxor.u32 2147483648, %v1444_v47  ;;  %v207_v52 = vsub.s32 4, %v1274_v50  ;;  %v680_v15 = vand.u32 31, %v678_v63 }
  0x72   :  { %v395_v8 = vadd.s32 %v1296_v4, %v1301_v14  ;;  %v410_v22 = vsel %vm916_vm10, 0, %v915_v7  ;;  %v1464_v24 = vmul.f32 8.0, %v1059_v0  ;;  %v310_v28 = vand.u32 2147483647, %v309_v1 }
  0x73   :  { %v618_v18 = vadd.s32 536870912, %v617_v51  ;;  %v312_v29 = vcvt.s32.f32 %v305_v36  ;;  %v411_v58 = vsub.s32 32, %v410_v22  ;;  %v681_v2 = vsub.s32 32, %v680_v15 }
  0x74   :  { %v516_v49 = vclz %v919_v40  ;;  %v673_v44 = vand.u32 8388607, %v1849_v17  ;;  %v683_v30 = vshll.u32 %v1037_v21, %v680_v15  ;;  %v686_v4 = vshll.u32 %v1038_v23, %v680_v15 }
  0x75   :  { %v1466_v46 = vshrl.u32 %v618_v18, 30  ;;  %v684_v31 = vshrl.u32 %v1038_v23, %v681_v2  ;;  %v687_v14 = vshrl.u32 %v1853_v27, %v681_v2  ;;  %v692_v33 = vshll.u32 %v1851_v12, %v680_v15 }
  0x76   :  { %v412_v42 = vshll.u32 %v1394_v54, %v410_v22  ;;  %v415_v7 = vsub.s32 4294967266, %v410_v22  ;;  %v679_v32 = vshrl.u32 %v678_v63, 5  ;;  %v689_v10 = vshll.u32 %v1853_v27, %v680_v15 }
  0x77   :  { %v620_v48 = vshll.u32 %v1466_v46, 30  ;;  %v690_v39 = vshrl.u32 %v1851_v12, %v681_v2  ;;  %v693_v53 = vshrl.u32 %v1035_v16, %v681_v2  ;;  %v695_v11 = vshll.u32 %v1035_v16, %v680_v15 }
  0x78   :  { %v413_v36 = vshrl.u32 %v395_v8, %v411_v58  ;;  %v920_v1 = vadd.s32 4294967294, %v516_v49  ;;  %v674_v40 = vor.u32 8388608, %v673_v44  ;;  %v685_v18 = vor.u32 %v684_v31, %v683_v30 }
  0x79   :  { %v1481_v45 = vsub.s32 %v617_v51, %v620_v48  ;;  %v688_v17 = vor.u32 %v687_v14, %v686_v4  ;;  %v694_v54 = vor.u32 %v693_v53, %v692_v33  ;;  %v696_v22 = vshrl.u32 %v1036_v19, %v681_v2 }
  0x7a   :  { %vm123_vm11 = vcmp.lt.s32.totalorder %v1063_v3, 0  ;;  %v416_v63 = vadd.s32 127, %v415_v7  ;;  %v682_v12 = vshrl.u32 %v1037_v21, %v681_v2  ;;  %vm698_vm12 = vcmp.lt.s32.totalorder %v679_v32, 1 }
  0x7b   :  { %v623_v56 = vsub.s32 0, %v1481_v45  ;;  %v1487_v27 = vmul.f32 %v312_v29, %v310_v28  ;;  %v691_v15 = vor.u32 %v690_v39, %v689_v10  ;;  %v697_v8 = vor.u32 %v696_v22, %v695_v11 }
  0x7c   :  { %vm701_vm13 = vcmp.lt.s32.totalorder %v679_v32, 4  ;;  %vm921_vm14 = vcmp.lt.s32.totalorder %v920_v1, 0  ;;  %vm700_vm15 = vcmp.lt.s32.totalorder %v679_v32, 3  ;;  %v714_v58 = vshll.u32 %v674_v40, 8 }
  0x7d   :  { %v924_v51 = vmin.u32 %v623_v56, %v1481_v45  ;;  %vm699_vm0 = vcmp.lt.s32.totalorder %v679_v32, 2  ;;  %v703_v49 = vsel %vm701_vm13, %v691_v15, 2102212464  ;;  %v706_v44 = vsel %vm698_vm12, %v685_v18, %v688_v17 }
  0x7e   :  { %v707_v30 = vsel %vm701_vm13, %v694_v54, 920167782  ;;  %vm1495_vm1 = vcmp.le.f32.partialorder %v121_v6, 0.7853982  ;;  %v414_v29 = vor.u32 %v413_v36, %v412_v42  ;;  %v417_v2 = vshll.u32 %v416_v63, 23 }
  0x7f   :  { %v702_v31 = vsel %vm698_vm12, %v682_v12, %v685_v18  ;;  %v778_v56 = vand.u32 2139095040, %v1464_v24  ;;  %vm232_vm2 = vcmp.lt.s32.totalorder %v1074_v25, 0  ;;  %v704_v4 = vsel %vm700_vm15, %v688_v17, %v703_v49 }
  0x80   :  { %v708_v14 = vsel %vm700_vm15, %v691_v15, %v707_v30  ;;  %v710_v33 = vsel %vm698_vm12, %v688_v17, %v691_v15  ;;  %v711_v7 = vsel %vm701_vm13, %v697_v8, 1326507024  ;;  %v519_v6 = vsel %vm921_vm14, 0, %v920_v1 }
  0x81   :  { %v625_v48 = vclz %v924_v51  ;;  %v709_v42 = vsel %vm699_vm0, %v706_v44, %v708_v14  ;;  %v712_v10 = vsel %vm700_vm15, %v694_v54, %v711_v7  ;;  %v705_v12 = vsel %vm699_vm0, %v702_v31, %v704_v4 }
  0x82   :  { %v713_v39 = vsel %vm699_vm0, %v710_v33, %v712_v10  ;;  %v1511_v53 = vmul.u32.u64.low %v714_v58, %v709_v42  ;;  %v1512_v11 = vmul.u32.u64.high %v714_v58, %v709_v42, %v1511_v53  ;;  %v418_v36 = vor.u32 4788187, %v417_v2 }
  0x83   :  { %v1515_v40 = vmul.u32.u64.low %v714_v58, %v713_v39  ;;  %v1516_v17 = vmul.u32.u64.high %v714_v58, %v713_v39, %v1515_v40  ;;  %v779_v18 = vshrl.u32 %v778_v56, 23  ;;  %v101_v1 = vsel %vm1435_vm7, %v1059_v0, %v1457_v35 }
  0x84   :  { %v1523_v54 = vand.u32 3, %v1450_v62  ;;  %v208_v32 = vsel %vm123_vm11, %v207_v52, %v1274_v50  ;;  %vm1532_vm3 = vcmp.le.f32.partialorder %v230_v43, 0.7853982  ;;  %v524_v63 = vsub.s32 4294967266, %v519_v6 }
  0x85   :  { %v925_v15 = vadd.s32 4294967294, %v625_v48  ;;  %v721_v8 = vmul.u32 %v714_v58, %v705_v12  ;;  %v933_v9 = vadd.s32 4294967169, %v779_v18  ;;  %v206_v0 = vsel %vm123_vm11, %v205_v61, %v1444_v47 }
  0x86   :  { %v504_v62 = vadd.s32 %v1365_v59, %v1362_v5  ;;  %v520_v50 = vsub.s32 32, %v519_v6  ;;  %v724_v35 = vadd.s32 1, %v1512_v11  ;;  %v314_v43 = vxor.u32 2147483648, %v1487_v27 }
  0x87   :  { %v419_v52 = vand.u32 2147483647, %v418_v36  ;;  %v421_v51 = vcvt.s32.f32 %v414_v29  ;;  %vm723_vm4 = vc.u32 %v1516_v17, %v1511_v53  ;;  %977 = vcosq.f32 %v101_v1 }
  0x88   :  { %v210_v58 = vsel %vm1495_vm1, 0, %v208_v32  ;;  %v725_v49 = vsel %vm723_vm4, %v724_v35, %v1512_v11  ;;  %v785_v47 = vadd.s32 1, %v933_v9  ;;  %v316_v61 = vsub.s32 4, %v1310_v26 }
  0x89   :  { %v525_v5 = vadd.s32 127, %v524_v63  ;;  %vm926_vm5 = vcmp.lt.s32.totalorder %v925_v15, 0  ;;  %v726_v59 = vadd.s32 %v725_v49, %v721_v8  ;;  %v209_v44 = vsel %vm1495_vm1, %v1063_v3, %v206_v0 }
  0x8a   :  { %v521_v30 = vshll.u32 %v1419_v41, %v519_v6  ;;  %v522_v29 = vshrl.u32 %v504_v62, %v520_v50  ;;  %vm786_vm6 = vcmp.gt.s32.totalorder %v785_v47, 0  ;;  %v315_v2 = vsel %vm232_vm2, %v314_v43, %v1487_v27 }
  0x8b   :  { %v1558_v31 = vmul.f32 %v421_v51, %v419_v52  ;;  %v727_v56 = vadd.s32 536870912, %v726_v59  ;;  %v775_v4 = vand.u32 2147483647, %v1464_v24  ;;  %979 = vsinq.f32 %v101_v1 }
  0x8c   :  { %v1561_v14 = vadd.s32 3, %v210_v58  ;;  %v1563_v33 = vsel %vm926_vm5, 0, %v925_v15  ;;  %v787_v28 = vsel %vm786_vm6, %v785_v47, 0  ;;  %981 = vcosq.f32 %v209_v44 }
  0x8d   :  { %v1568_v41 = vsel %vm232_vm2, %v316_v61, %v1310_v26  ;;  %v526_v7 = vshll.u32 %v525_v5, 23  ;;  %v1570_v6 = vshrl.u32 %v727_v56, 30  ;;  %983 = vsinq.f32 %v209_v44 }
  0x8e   :  { %v1575_v27 = vsel %vm1532_vm3, %v1074_v25, %v315_v2  ;;  %v1577_v48 = vor.u32 %v522_v29, %v521_v30  ;;  %v789_v42 = vand.u32 31, %v787_v28  ;;  %v423_v10 = vxor.u32 2147483648, %v1558_v31 }
  0x8f   :  { %v633_v12 = vsub.s32 4294967266, %v1563_v33  ;;  %v729_v39 = vshll.u32 %v1570_v6, 30  ;;  %v782_v26 = vand.u32 8388607, %v775_v4  ;;  %v613_v11 = vadd.s32 %v1427_v34, %v1425_v37 }
  0x90   :  { %v629_v36 = vsub.s32 32, %v1563_v33  ;;  %v788_v40 = vshrl.u32 %v787_v28, 5  ;;  %v790_v18 = vsub.s32 32, %v789_v42  ;;  %v1587_v1 = vor.u32 4788187, %v526_v7 }
  0x91   :  { %v1589_v32 = vsub.s32 %v726_v59, %v729_v39  ;;  %v792_v63 = vshll.u32 %v1037_v21, %v789_v42  ;;  %v795_v15 = vshll.u32 %v1038_v23, %v789_v42  ;;  %v1593_v8 = vpop.eup %977  ;;  %v530_v9 = vcvt.s32.f32 %v1577_v48 }
  0x92   :  { %v793_v0 = vshrl.u32 %v1038_v23, %v790_v18  ;;  %v1861_v62 = vmov 2131351028   ;;  %v634_v50 = vadd.s32 127, %v633_v12  ;;  %v783_v43 = vor.u32 8388608, %v782_v26 }
  0x93   :  { %v796_v37 = vshrl.u32 %v1861_v62, %v790_v18  ;;  %v798_v34 = vshll.u32 %v1861_v62, %v789_v42  ;;  %v732_v35 = vsub.s32 0, %v1589_v32  ;;  %v1862_v52 = vmov 2102212464  }
  0x94   :  { %v799_v51 = vshrl.u32 %v1862_v52, %v790_v18  ;;  %v630_v58 = vshll.u32 %v1481_v45, %v1563_v33  ;;  %v631_v49 = vshrl.u32 %v613_v11, %v629_v36  ;;  %v801_v47 = vshll.u32 %v1862_v52, %v789_v42 }
  0x95   :  { %vm807_vm7 = vcmp.lt.s32.totalorder %v788_v40, 1  ;;  %v929_v61 = vmin.u32 %v732_v35, %v1589_v32  ;;  %v791_v23 = vshrl.u32 %v1037_v21, %v790_v18  ;;  %v794_v5 = vor.u32 %v793_v0, %v792_v63  ;;  %v1606_v44 = vpop.eup %979 }
  0x96   :  { %v797_v59 = vor.u32 %v796_v37, %v795_v15  ;;  %v800_v30 = vor.u32 %v799_v51, %v798_v34  ;;  %v802_v29 = vshrl.u32 %v1035_v16, %v790_v18  ;;  %v804_v2 = vshll.u32 %v1035_v16, %v789_v42  ;;  %v1611_v45 = vpop.eup %981 }
  0x97   :  { %v805_v56 = vshrl.u32 %v1036_v19, %v790_v18  ;;  %vm341_vm8 = vcmp.lt.s32.totalorder %v1140_v38, 0  ;;  %v635_v33 = vshll.u32 %v634_v50, 23  ;;  %v722_v28 = vadd.s32 %v1511_v53, %v1516_v17  ;;  %v1616_v12 = vpop.eup %983 }
  0x98   :  { %v734_v21 = vclz %v929_v61  ;;  %v823_v7 = vshll.u32 %v783_v43, 8  ;;  %v803_v39 = vor.u32 %v802_v29, %v801_v47  ;;  %vm808_vm9 = vcmp.lt.s32.totalorder %v788_v40, 2 }
  0x99   :  { %v806_v26 = vor.u32 %v805_v56, %v804_v2  ;;  %vm809_vm10 = vcmp.lt.s32.totalorder %v788_v40, 3  ;;  %vm810_vm11 = vcmp.lt.s32.totalorder %v788_v40, 4  ;;  %v811_v16 = vsel %vm807_vm7, %v791_v23, %v794_v5 }
  0x9a   :  { %v930_v11 = vadd.s32 4294967294, %v734_v21  ;;  %v815_v19 = vsel %vm807_vm7, %v794_v5, %v797_v59  ;;  %v812_v42 = vsel %vm810_vm11, %v800_v30, 2102212464  ;;  %v816_v36 = vsel %vm810_vm11, %v803_v39, 920167782 }
  0x9b   :  { %v819_v18 = vsel %vm807_vm7, %v797_v59, %v800_v30  ;;  %v820_v63 = vsel %vm810_vm11, %v806_v26, 1326507024  ;;  %v813_v53 = vsel %vm809_vm10, %v797_v59, %v812_v42  ;;  %v817_v17 = vsel %vm809_vm10, %v800_v30, %v816_v36 }
  0x9c   :  { %vm931_vm12 = vcmp.lt.s32.totalorder %v930_v11, 0  ;;  %v821_v15 = vsel %vm809_vm10, %v803_v39, %v820_v63  ;;  %v528_v0 = vand.u32 2147483647, %v1587_v1  ;;  %v818_v37 = vsel %vm808_vm9, %v815_v19, %v817_v17 }
  0x9d   :  { %v737_v62 = vsel %vm931_vm12, 0, %v930_v11  ;;  %v822_v34 = vsel %vm808_vm9, %v819_v18, %v821_v15  ;;  %v632_v50 = vor.u32 %v631_v49, %v630_v58  ;;  %v814_v52 = vsel %vm808_vm9, %v811_v16, %v813_v53 }
  0x9e   :  { %v738_v35 = vsub.s32 32, %v737_v62  ;;  %v742_v43 = vsub.s32 4294967266, %v737_v62  ;;  %v1625_v51 = vmul.u32.u64.low %v823_v7, %v822_v34  ;;  %v1626_v47 = vmul.u32.u64.high %v823_v7, %v822_v34, %v1625_v51 }
  0x9f   :  { %v1628_v61 = vmul.u32.u64.low %v823_v7, %v818_v37  ;;  %v1629_v23 = vmul.u32.u64.high %v823_v7, %v818_v37, %v1628_v61  ;;  %v636_v5 = vor.u32 4788187, %v635_v33  ;;  %v739_v1 = vshll.u32 %v1589_v32, %v737_v62 }
  0xa0   :  { %v740_v59 = vshrl.u32 %v722_v28, %v738_v35  ;;  %v743_v30 = vadd.s32 127, %v742_v43  ;;  %v1634_v29 = vand.u32 3, %v1561_v14  ;;  %v319_v40 = vsel %vm1532_vm3, 0, %v1568_v41 }
  0xa1   :  { %v1863_v58 = vand.u32 2147483647, %v1140_v38  ;;  %985 = vcosq.f32 %v1575_v27  ;;  %v425_v2 = vsub.s32 4, %v1369_v20  ;;  %v830_v56 = vmul.u32 %v823_v7, %v814_v52  ;;  %v1009_v52 = vld [vmem:[%s1844_s0] sm:$0x3] }
  0xa2   :  { %v744_v32 = vshll.u32 %v743_v30, 23  ;;  %vm108_vm14 = vcmp.lt.s32.totalorder %v1523_v54, 2  ;;  %v424_v22 = vsel %vm341_vm8, %v423_v10, %v1558_v31  ;;  %v531_v14 = vmul.f32 %v530_v9, %v528_v0 }
  0xa3   :  { %vm1641_vm13 = vcmp.le.f32.partialorder %v1863_v58, 0.7853982  ;;  %vm832_vm15 = vc.u32 %v1626_v47, %v1628_v61  ;;  %v833_v41 = vadd.s32 1, %v1629_v23  ;;  %v637_v33 = vand.u32 2147483647, %v636_v5 }
  0xa4   :  { %v639_v28 = vcvt.s32.f32 %v632_v50  ;;  %v741_v21 = vor.u32 %v740_v59, %v739_v1  ;;  %v745_v7 = vor.u32 4788187, %v744_v32  ;;  %vm109_vm0 = vcmp.eq.s32.totalorder %v1523_v54, 0 }
  0xa5   :  { %987 = vsinq.f32 %v1575_v27  ;;  %v323_v39 = vadd.s32 3, %v319_v40  ;;  %v834_v26 = vsel %vm832_vm15, %v833_v41, %v1629_v23  ;;  %vm112_vm1 = vcmp.eq.s32.totalorder %v1523_v54, 2 }
  0xa6   :  { %v113_v31 = vxor.u32 2147483648, %v1593_v8  ;;  %vm217_vm2 = vcmp.eq.s32.totalorder %v1634_v29, 0  ;;  %v835_v48 = vadd.s32 %v834_v26, %v830_v56  ;;  %v110_v10 = vxor.u32 2147483648, %v1606_v44 }
  0xa7   :  { %v426_v9 = vsel %vm341_vm8, %v425_v2, %v1369_v20  ;;  %v427_v27 = vsel %vm1641_vm13, %v1140_v38, %v424_v22  ;;  %v532_v11 = vxor.u32 2147483648, %v531_v14  ;;  %v640_v16 = vmul.f32 %v639_v28, %v637_v33 }
  0xa8   :  { %v746_v19 = vand.u32 2147483647, %v745_v7  ;;  %v748_v42 = vcvt.s32.f32 %v741_v21  ;;  %v836_v36 = vadd.s32 536870912, %v835_v48  ;;  %vm220_vm3 = vcmp.eq.s32.totalorder %v1634_v29, 2 }
  0xa9   :  { %v1672_v18 = vand.u32 3, %v323_v39  ;;  %v1866_v63 = vand.u32 2147483647, %v1262_v60  ;;  %vm450_vm5 = vcmp.lt.s32.totalorder %v1262_v60, 0  ;;  %v114_v20 = vsel %vm112_vm1, %v113_v31, %v1606_v44 }
  0xaa   :  { %v428_v17 = vsel %vm1641_vm13, 0, %v426_v9  ;;  %989 = vcosq.f32 %v427_v27  ;;  %v1686_v15 = vshrl.u32 %v836_v36, 30  ;;  %v111_v0 = vsel %vm109_vm0, %v1593_v8, %v110_v10 }
  0xab   :  { %vm1676_vm4 = vcmp.le.f32.partialorder %v1866_v63, 0.7853982  ;;  %v218_v62 = vxor.u32 2147483648, %v1616_v12  ;;  %v221_v37 = vxor.u32 2147483648, %v1611_v45  ;;  %991 = vsinq.f32 %v427_v27  ;;  %v986_v34 = vpop.eup %985 }
  0xac   :  { %v533_v50 = vsel %vm450_vm5, %v532_v11, %v531_v14  ;;  %v641_v44 = vxor.u32 2147483648, %v640_v16  ;;  %v749_v35 = vmul.f32 %v748_v42, %v746_v19  ;;  %v838_v43 = vshll.u32 %v1686_v15, 30 }
  0xad   :  { %vm105_vm6 = vweird.f32 %v1009_v52  ;;  %vm213_vm7 = vweird.f32 %v1063_v3  ;;  %v432_v8 = vadd.s32 3, %v428_v17  ;;  %vm559_vm8 = vcmp.lt.s32.totalorder %v1344_v13, 0  ;;  %v117_v17 = vld [vmem:[%s1845_s1] sm:$0x3] }
  0xae   :  { %v115_v51 = vsel %vm108_vm14, %v111_v0, %v114_v20  ;;  %vm216_vm9 = vcmp.lt.s32.totalorder %v1634_v29, 2  ;;  %vm329_vm10 = vcmp.eq.s32.totalorder %v1672_v18, 2  ;;  %v1705_v23 = vsub.s32 %v835_v48, %v838_v43 }
  0xaf   :  { %v988_v5 = vpop.eup %987  ;;  %v219_v1 = vsel %vm217_vm2, %v1611_v45, %v218_v62  ;;  %v222_v59 = vsel %vm220_vm3, %v221_v37, %v1616_v12  ;;  %v534_v30 = vsub.s32 4, %v1409_v55  ;;  %v536_v54 = vsel %vm1676_vm4, %v1262_v60, %v533_v50 }
  0xb0   :  { %vm325_vm11 = vcmp.lt.s32.totalorder %v1672_v18, 2  ;;  %v1869_v40 = vand.u32 2147483647, %v1344_v13  ;;  %v642_v45 = vsel %vm559_vm8, %v641_v44, %v640_v16  ;;  %v750_v49 = vxor.u32 2147483648, %v749_v35 }
  0xb1   :  { %v841_v12 = vsub.s32 0, %v1705_v23  ;;  %v330_v2 = vxor.u32 2147483648, %v986_v34  ;;  %v1727_v32 = vand.u32 3, %v432_v8  ;;  %v643_v56 = vsub.s32 4, %v1466_v46 }
  0xb2   :  { %vm1720_vm12 = vcmp.le.f32.partialorder %v1869_v40, 0.7853982  ;;  %vm668_vm13 = vcmp.lt.s32.totalorder %v1413_v57, 0  ;;  %v223_v22 = vsel %vm216_vm9, %v219_v1, %v222_v59  ;;  %v327_v14 = vxor.u32 2147483648, %v988_v5 }
  0xb3   :  { %993 = vcosq.f32 %v536_v54  ;;  %v934_v41 = vmin.u32 %v841_v12, %v1705_v23  ;;  %vm326_vm14 = vcmp.eq.s32.totalorder %v1672_v18, 0  ;;  %v535_v33 = vsel %vm450_vm5, %v534_v30, %v1409_v55 }
  0xb4   :  { %995 = vsinq.f32 %v536_v54  ;;  %v645_v28 = vsel %vm1720_vm12, %v1344_v13, %v642_v45  ;;  %v990_v21 = vpop.eup %989  ;;  %v116_v7 = vsel %vm105_vm6, nan, %v115_v51  ;;  %vm322_vm15 = vweird.f32 %v1074_v25 }
  0xb5   :  { %v1872_v29 = vand.u32 2147483647, %v1413_v57  ;;  %v751_v26 = vsel %vm668_vm13, %v750_v49, %v749_v35  ;;  %v843_v55 = vclz %v934_v41  ;;  %v992_v31 = vpop.eup %991  ;;  %v224_v48 = vsel %vm213_vm7, nan, %v223_v22 }
  0xb6   :  { %v331_v10 = vsel %vm329_vm10, %v330_v2, %v988_v5  ;;  %vm434_vm1 = vcmp.lt.s32.totalorder %v1727_v32, 2  ;;  %v644_v9 = vsel %vm559_vm8, %v643_v56, %v1466_v46  ;;  %v328_v27 = vsel %vm326_vm14, %v986_v34, %v327_v14 }
  0xb7   :  { %vm1745_vm0 = vcmp.le.f32.partialorder %v1872_v29, 0.7853982  ;;  %v537_v11 = vsel %vm1676_vm4, 0, %v535_v33  ;;  %997 = vcosq.f32 %v645_v28  ;;  %v935_v16 = vadd.s32 4294967294, %v843_v55  ;;  %v917_v29 = vld [vmem:[%s1845_s1 + $0x6] sm:$0x3] }
  0xb8   :  { %v439_v19 = vxor.u32 2147483648, %v990_v21  ;;  %999 = vsinq.f32 %v645_v28  ;;  %v752_v3 = vsub.s32 4, %v1570_v6  ;;  %v754_v42 = vsel %vm1745_vm0, %v1413_v57, %v751_v26 }
  0xb9   :  { %v436_v36 = vxor.u32 2147483648, %v992_v31  ;;  %v646_v63 = vsel %vm1720_vm12, 0, %v644_v9  ;;  %v831_v46 = vadd.s32 %v1628_v61, %v1626_v47  ;;  %vm936_vm2 = vcmp.lt.s32.totalorder %v935_v16, 0  ;;  %v907_v47 = vld [vmem:[%s1845_s1 + $0x2] sm:$0x3] }
  0xba   :  { %vm435_vm3 = vcmp.eq.s32.totalorder %v1727_v32, 0  ;;  %vm438_vm4 = vcmp.eq.s32.totalorder %v1727_v32, 2  ;;  %v541_v53 = vadd.s32 3, %v537_v11  ;;  %v846_v20 = vsel %vm936_vm2, 0, %v935_v16 }
  0xbb   :  { %1001 = vcosq.f32 %v754_v42  ;;  %v847_v0 = vsub.s32 32, %v846_v20  ;;  %v848_v62 = vshll.u32 %v1705_v23, %v846_v20  ;;  %v851_v37 = vsub.s32 4294967266, %v846_v20  ;;  %v922_v20 = vld [vmem:[%s1845_s1 + $0x8] sm:$0x3] }
  0xbc   :  { %v332_v61 = vsel %vm325_vm11, %v328_v27, %v331_v10  ;;  %v650_v34 = vadd.s32 3, %v646_v63  ;;  %v753_v50 = vsel %vm668_vm13, %v752_v3, %v1570_v6  ;;  %1003 = vsinq.f32 %v754_v42  ;;  %v912_v6 = vld [vmem:[%s1845_s1 + $0x4] sm:$0x3] }
  0xbd   :  { %v994_v44 = vpop.eup %993  ;;  %v437_v35 = vsel %vm435_vm3, %v990_v21, %v436_v36  ;;  %v440_v43 = vsel %vm438_vm4, %v439_v19, %v992_v31  ;;  %v849_v52 = vshrl.u32 %v831_v46, %v847_v0  ;;  %v852_v8 = vadd.s32 127, %v851_v37 }
  0xbe   :  { %v996_v51 = vpop.eup %995  ;;  %v118_v23 = vmul.f32 %v117_v17, %v116_v7  ;;  %v542_v5 = vand.u32 3, %v541_v53  ;;  %v227_v1 = vmul.f32 %v907_v47, %v224_v48  ;;  %v755_v59 = vsel %vm1745_vm0, 0, %v753_v50 }
  0xbf   :  { %v850_v18 = vor.u32 %v849_v52, %v848_v62  ;;  %v853_v30 = vshll.u32 %v852_v8, 23  ;;  %v333_v54 = vsel %vm322_vm15, nan, %v332_v61  ;;  %vm431_vm5 = vweird.f32 %v1140_v38  ;;  %v932_v52 = vld [vmem:[%s1845_s1 + $0xc] sm:$0x3] }
  0xc0   :  { %v441_v40 = vsel %vm434_vm1, %v437_v35, %v440_v43  ;;  %v651_v58 = vand.u32 3, %v650_v34  ;;  %v545_v49 = vxor.u32 2147483648, %v996_v51  ;;  %v548_v12 = vxor.u32 2147483648, %v994_v44 }
  0xc1   :  { %v998_v45 = vpop.eup %997  ;;  %v854_v2 = vor.u32 4788187, %v853_v30  ;;  %v857_v56 = vcvt.s32.f32 %v850_v18  ;;  %vm544_vm6 = vcmp.eq.s32.totalorder %v542_v5, 0  ;;  %vm547_vm7 = vcmp.eq.s32.totalorder %v542_v5, 2  ;;  %v937_v30 = vld [vmem:[%s1845_s1 + $0xe] sm:$0x3] }
  0xc2   :  { %v1000_v22 = vpop.eup %999  ;;  %v759_v25 = vadd.s32 3, %v755_v59  ;;  %v228_v14 = vadd.f32 %v227_v1, %v118_v23  ;;  %v336_v41 = vmul.f32 %v912_v6, %v333_v54  ;;  %v861_v28 = vsub.s32 4, %v1686_v15 }
  0xc3   :  { %v855_v33 = vand.u32 2147483647, %v854_v2  ;;  %v442_v21 = vsel %vm431_vm5, nan, %v441_v40  ;;  %vm543_vm8 = vcmp.lt.s32.totalorder %v542_v5, 2  ;;  %vm656_vm9 = vcmp.eq.s32.totalorder %v651_v58, 2 }
  0xc4   :  { %v657_v32 = vxor.u32 2147483648, %v998_v45  ;;  %v546_v39 = vsel %vm544_vm6, %v994_v44, %v545_v49  ;;  %v549_v26 = vsel %vm547_vm7, %v548_v12, %v996_v51  ;;  %v654_v55 = vxor.u32 2147483648, %v1000_v22 }
  0xc5   :  { %v1002_v7 = vpop.eup %1001  ;;  %v858_v31 = vmul.f32 %v857_v56, %v855_v33  ;;  %vm540_vm10 = vweird.f32 %v1262_v60  ;;  %vm653_vm11 = vcmp.eq.s32.totalorder %v651_v58, 0  ;;  %v760_v10 = vand.u32 3, %v759_v25  ;;  %v927_v60 = vld [vmem:[%s1845_s1 + $0xa] sm:$0x3] }
  0xc6   :  { %v1004_v48 = vpop.eup %1003  ;;  %vm777_vm12 = vcmp.lt.s32.totalorder %v1464_v24, 0  ;;  %v337_v38 = vadd.f32 %v336_v41, %v228_v14  ;;  %vm1803_vm13 = vcmp.le.f32.partialorder %v775_v4, 0.7853982  ;;  %v445_v16 = vmul.f32 %v917_v29, %v442_v21 }
  0xc7   :  { %v859_v27 = vxor.u32 2147483648, %v858_v31  ;;  %v862_v11 = vsel %vm777_vm12, %v861_v28, %v1686_v15  ;;  %v550_v19 = vsel %vm543_vm8, %v546_v39, %v549_v26  ;;  %vm652_vm14 = vcmp.lt.s32.totalorder %v651_v58, 2 }
  0xc8   :  { %v658_v3 = vsel %vm656_vm9, %v657_v32, %v1000_v22  ;;  %v655_v42 = vsel %vm653_vm11, %v998_v45, %v654_v55  ;;  %v763_v36 = vxor.u32 2147483648, %v1004_v48  ;;  %v766_v63 = vxor.u32 2147483648, %v1002_v7 }
  0xc9   :  { %v860_v46 = vsel %vm777_vm12, %v859_v27, %v858_v31  ;;  %vm762_vm15 = vcmp.eq.s32.totalorder %v760_v10, 0  ;;  %vm765_vm0 = vcmp.eq.s32.totalorder %v760_v10, 2  ;;  %v864_v53 = vsel %vm1803_vm13, 0, %v862_v11 }
  0xca   :  { %v863_v4 = vsel %vm1803_vm13, %v1464_v24, %v860_v46  ;;  %v551_v15 = vsel %vm540_vm10, nan, %v550_v19  ;;  %vm649_vm1 = vweird.f32 %v1344_v13  ;;  %v659_v17 = vsel %vm652_vm14, %v655_v42, %v658_v3 }
  0xcb   :  { %1005 = vcosq.f32 %v863_v4  ;;  %vm761_vm2 = vcmp.lt.s32.totalorder %v760_v10, 2  ;;  %v764_v0 = vsel %vm762_vm15, %v1002_v7, %v763_v36  ;;  %v767_v62 = vsel %vm765_vm0, %v766_v63, %v1004_v48 }
  0xcc   :  { %1007 = vsinq.f32 %v863_v4  ;;  %v868_v37 = vadd.s32 3, %v864_v53  ;;  %v446_v47 = vadd.f32 %v445_v16, %v337_v38  ;;  %v554_v61 = vmul.f32 %v922_v20, %v551_v15 }
  0xcd   :  { %v660_v34 = vsel %vm649_vm1, nan, %v659_v17  ;;  %vm758_vm3 = vweird.f32 %v1413_v57  ;;  %v768_v50 = vsel %vm761_vm2, %v764_v0, %v767_v62  ;;  %vm867_vm7 = vweird.f32 %v1464_v24 }
  0xce   :  { %v869_v44 = vand.u32 3, %v868_v37  ;;  %v555_v35 = vadd.f32 %v554_v61, %v446_v47  ;;  %v663_v43 = vmul.f32 %v927_v60, %v660_v34  ;;  %v769_v13 = vsel %vm758_vm3, nan, %v768_v50 }
  0xcf   :  { %v772_v5 = vmul.f32 %v932_v52, %v769_v13  ;;  %vm883_vm8 = vcmask 58368  }
  0xd0   :  { %vm874_vm4 = vcmp.eq.s32.totalorder %v869_v44, 2  ;;  %v664_v23 = vadd.f32 %v663_v43, %v555_v35  ;;  %vm871_vm5 = vcmp.eq.s32.totalorder %v869_v44, 0  ;;  %vm870_vm6 = vcmp.lt.s32.totalorder %v869_v44, 2 }
  0xd2   :  { %v773_v54 = vadd.f32 %v772_v5, %v664_v23 }
  0xd5   :  { %v1006_v8 = vpop.eup %1005 }
  0xd6   :  { %v1008_v51 = vpop.eup %1007  ;;  %v875_v1 = vxor.u32 2147483648, %v1006_v8 }
  0xd7   :  { %v872_v59 = vxor.u32 2147483648, %v1008_v51 }
  0xd8   :  { %v876_v57 = vsel %vm874_vm4, %v875_v1, %v1008_v51 }
  0xd9   :  { %v873_v18 = vsel %vm871_vm5, %v1006_v8, %v872_v59 }
  0xda   :  { %v877_v6 = vsel %vm870_vm6, %v873_v18, %v876_v57 }
  0xdb   :  { %v878_v40 = vsel %vm867_vm7, nan, %v877_v6 }
  0xdc   :  { %v881_v58 = vmul.f32 %v937_v30, %v878_v40 }
  0xde   :  { %v882_v45 = vadd.f32 %v881_v58, %v773_v54 }
  0xe0   :  { %884 = vst.msk [vmem:[#allocation2] sm:$0x3] %vm883_vm8, %v882_v45 }
  0xe1   :  { %1021 = shalt.err (!%p1018_p4)
}
  0xe2   :  { %s1022_s1 = scalar_lea.hbm %s1846_s2, 32 }
  0xe3   :  { %p1023_p5 = scmp.ne.s32.totalorder %s1846_s2, %s1022_s1  ;;  %p1026_p6 = scmp.lt.u32.totalorder %s1022_s1, %s1846_s2 }
  0xe5   :  { %p1028_p7 = pnand %p1026_p6, %p1023_p5 }
  0xe7   :  { %1031 = shalt.err (!%p1028_p7)
}
  0xe8   :  { %894 = dma.vmem_to_hbm [thread:$0]  %s892_s29, 32, %s1846_s2, [#allocation3]  }
  0xe9   :  { %1032 = dma.done.wait [#allocation3], 32  }
  0xea   :  { %1033 = vsyncadd [#allocation3], 4294967264 }
  0xeb   :  { %898 = vsyncpa [#allocation3], 1 }

// kernel: ddsp_forward.5
= control target key start
LH: loop header
LB: loop body
LE: loop exit
PB: predicated region body
PF: predicated region fallthrough
CT: control target
= control target key end

     0   :  { %v11_v0 = vlaneseq  ;;  %vm132_vm0 = vcmask 39936   ;;  %v622_v20 = vmov 683565275   ;;  %v623_v22 = vmov 2475754826   ;;  %s630_s13 = smov 4   ;;  %s839_s0 = inlined_call_operand.vmem [shape: f32[16,5], index: 0, kind: input, shape index: {}]   ;;  %s840_s1 = inlined_call_operand.vmem [shape: f32[16,8], index: 1, kind: input, shape index: {}]   ;;  %s841_s2 = inlined_call_operand.vmem [shape: f32[16,8], index: 2, kind: output, shape index: {}]  }
   0x1   :  { %v130_v3 = vld [vmem:[%s839_s0] sm:$0xff]  ;;  %v624_v24 = vmov 2131351028   ;;  %v625_v26 = vmov 2102212464   ;;  %s631_s14 = smov 124  }
   0x2   :  { %v661_v1 = vshrl.u32 %v11_v0, 7  ;;  %v663_v2 = vand.u32 127, %v11_v0  ;;  %562 = vmatprep.mubr.msk.f32.mxu0 %vm132_vm0, %v130_v3  ;;  %v626_v28 = vmov 920167782   ;;  %v627_v35 = vmov 1326507024  }
   0x3   :  { %s635_s19 = smov 122   ;;  %s636_s20 = smov 126  }
   0x4   :  { %v13_v4 = vcvt.s32.f32 %v661_v1  ;;  %v16_v5 = vcvt.s32.f32 %v663_v2  ;;  %vm17_vm10 = vcmp.eq.s32.totalorder %v661_v1, 0  ;;  %vm18_vm11 = vcmp.eq.s32.totalorder %v661_v1, 4  ;;  %v131_v1 = vld [vmem:[%s839_s0 + $0x8] sm:$0xff]  ;;  %s629_s0 = smov 8   ;;  %s637_s21 = smov 123  }
   0x5   :  { %vm19_vm13 = vmor %vm17_vm10, %vm18_vm11  ;;  %s639_s22 = smov 125   ;;  %s645_s23 = smov 127  }
   0x6   :  { %v21_v6 = vmul.f32 6.2831855, %v13_v4 }
   0x8   :  { %v22_v7 = vmul.f32 %v21_v6, %v16_v5 }
   0xa   :  { %v673_v8 = vmul.f32 0.125, %v22_v7 }
   0xc   :  { %v28_v9 = vand.u32 2139095040, %v673_v8  ;;  %v25_v11 = vand.u32 2147483647, %v673_v8  ;;  %vm27_vm8 = vcmp.lt.s32.totalorder %v673_v8, 0 }
   0xe   :  { %v29_v10 = vshrl.u32 %v28_v9, 23  ;;  %v32_v14 = vand.u32 8388607, %v25_v11  ;;  %vm26_vm9 = vcmp.le.f32.partialorder %v25_v11, 0.7853982 }
  0x10   :  { %v546_v12 = vadd.s32 4294967169, %v29_v10  ;;  %v33_v17 = vor.u32 8388608, %v32_v14 }
  0x12   :  { %v35_v13 = vadd.s32 1, %v546_v12  ;;  %v73_v37 = vshll.u32 %v33_v17, 8 }
  0x14   :  { %vm36_vm1 = vcmp.gt.s32.totalorder %v35_v13, 0 }
  0x15   :  { %v37_v15 = vsel %vm36_vm1, %v35_v13, 0  ;;  %vm117_vm1 = vweird.f32 %v673_v8 }
  0x16   :  { %v39_v16 = vand.u32 31, %v37_v15  ;;  %v38_v18 = vshrl.u32 %v37_v15, 5 }
  0x18   :  { %v40_v19 = vsub.s32 32, %v39_v16  ;;  %v42_v21 = vshll.u32 %v622_v20, %v39_v16  ;;  %v45_v23 = vshll.u32 %v623_v22, %v39_v16  ;;  %v48_v25 = vshll.u32 %v624_v24, %v39_v16 }
  0x19   :  { %v51_v27 = vshll.u32 %v625_v26, %v39_v16  ;;  %v54_v29 = vshll.u32 %v626_v28, %v39_v16  ;;  %vm57_vm2 = vcmp.lt.s32.totalorder %v38_v18, 1  ;;  %vm60_vm3 = vcmp.lt.s32.totalorder %v38_v18, 4 }
  0x1a   :  { %v41_v30 = vshrl.u32 %v622_v20, %v40_v19  ;;  %v43_v31 = vshrl.u32 %v623_v22, %v40_v19  ;;  %v46_v32 = vshrl.u32 %v624_v24, %v40_v19  ;;  %v49_v33 = vshrl.u32 %v625_v26, %v40_v19 }
  0x1b   :  { %v52_v34 = vshrl.u32 %v626_v28, %v40_v19  ;;  %v55_v36 = vshrl.u32 %v627_v35, %v40_v19  ;;  %vm58_vm4 = vcmp.lt.s32.totalorder %v38_v18, 2  ;;  %vm59_vm5 = vcmp.lt.s32.totalorder %v38_v18, 3 }
  0x1c   :  { %v44_v38 = vor.u32 %v43_v31, %v42_v21  ;;  %v47_v39 = vor.u32 %v46_v32, %v45_v23  ;;  %v50_v40 = vor.u32 %v49_v33, %v48_v25 }
  0x1d   :  { %v53_v41 = vor.u32 %v52_v34, %v51_v27  ;;  %v56_v42 = vor.u32 %v55_v36, %v54_v29 }
  0x1e   :  { %v61_v43 = vsel %vm57_vm2, %v41_v30, %v44_v38  ;;  %v62_v44 = vsel %vm60_vm3, %v50_v40, 2102212464  ;;  %v65_v45 = vsel %vm57_vm2, %v44_v38, %v47_v39  ;;  %v69_v46 = vsel %vm57_vm2, %v47_v39, %v50_v40 }
  0x1f   :  { %v63_v47 = vsel %vm59_vm5, %v47_v39, %v62_v44  ;;  %v66_v48 = vsel %vm60_vm3, %v53_v41, 920167782  ;;  %v70_v49 = vsel %vm60_vm3, %v56_v42, 1326507024  ;;  %v628_v42 = vmov 2.0  }
  0x20   :  { %v67_v50 = vsel %vm59_vm5, %v50_v40, %v66_v48  ;;  %v71_v51 = vsel %vm59_vm5, %v53_v41, %v70_v49  ;;  %v64_v52 = vsel %vm58_vm4, %v61_v43, %v63_v47  ;;  %v20_v43 = vsel %vm19_vm13, 1.0, %v628_v42 }
  0x21   :  { %v68_v53 = vsel %vm58_vm4, %v65_v45, %v67_v50  ;;  %v72_v54 = vsel %vm58_vm4, %v69_v46, %v71_v51  ;;  %v80_v59 = vmul.u32 %v73_v37, %v64_v52  ;;  %vm139_vm2 = vcmask 1044480  }
  0x22   :  { %v690_v55 = vmul.u32.u64.low %v73_v37, %v72_v54  ;;  %v691_v56 = vmul.u32.u64.high %v73_v37, %v72_v54, %v690_v55  ;;  %v693_v57 = vmul.u32.u64.low %v73_v37, %v68_v53  ;;  %v694_v58 = vmul.u32.u64.high %v73_v37, %v68_v53, %v693_v57 }
  0x24   :  { %vm82_vm6 = vc.u32 %v691_v56, %v693_v57  ;;  %v83_v60 = vadd.s32 1, %v694_v58  ;;  %v81_v12 = vadd.s32 %v693_v57, %v691_v56 }
  0x26   :  { %v84_v61 = vsel %vm82_vm6, %v83_v60, %v694_v58 }
  0x27   :  { %v85_v62 = vadd.s32 %v84_v61, %v80_v59 }
  0x29   :  { %v86_v63 = vadd.s32 536870912, %v85_v62 }
  0x2b   :  { %v87_v0 = vshrl.u32 %v86_v63, 30 }
  0x2d   :  { %v88_v3 = vshll.u32 %v87_v0, 30  ;;  %v111_v31 = vsub.s32 4, %v87_v0 }
  0x2f   :  { %v89_v4 = vsub.s32 %v85_v62, %v88_v3  ;;  %v112_v34 = vsel %vm27_vm8, %v111_v31, %v87_v0 }
  0x30   :  { %v114_v36 = vsel %vm26_vm9, 0, %v112_v34 }
  0x31   :  { %v91_v6 = vsub.s32 0, %v89_v4  ;;  %v118_v37 = vand.u32 3, %v114_v36 }
  0x33   :  { %v547_v7 = vmin.u32 %v91_v6, %v89_v4  ;;  %vm123_vm12 = vcmp.eq.s32.totalorder %v118_v37, 2  ;;  %vm120_vm14 = vcmp.eq.s32.totalorder %v118_v37, 0  ;;  %vm119_vm15 = vcmp.lt.s32.totalorder %v118_v37, 2 }
  0x35   :  { %v93_v9 = vclz %v547_v7 }
  0x37   :  { %v548_v10 = vadd.s32 4294967294, %v93_v9 }
  0x39   :  { %vm549_vm7 = vcmp.lt.s32.totalorder %v548_v10, 0 }
  0x3a   :  { %v96_v13 = vsel %vm549_vm7, 0, %v548_v10 }
  0x3b   :  { %v97_v14 = vsub.s32 32, %v96_v13  ;;  %v98_v15 = vshll.u32 %v89_v4, %v96_v13  ;;  %v101_v16 = vsub.s32 4294967266, %v96_v13 }
  0x3d   :  { %v99_v17 = vshrl.u32 %v81_v12, %v97_v14  ;;  %v102_v18 = vadd.s32 127, %v101_v16 }
  0x3f   :  { %v100_v19 = vor.u32 %v99_v17, %v98_v15  ;;  %v103_v21 = vshll.u32 %v102_v18, 23 }
  0x41   :  { %v104_v23 = vor.u32 4788187, %v103_v21  ;;  %v107_v25 = vcvt.s32.f32 %v100_v19 }
  0x43   :  { %v105_v27 = vand.u32 2147483647, %v104_v23 }
  0x45   :  { %v108_v29 = vmul.f32 %v107_v25, %v105_v27 }
  0x47   :  { %v109_v30 = vxor.u32 2147483648, %v108_v29 }
  0x49   :  { %v110_v32 = vsel %vm27_vm8, %v109_v30, %v108_v29 }
  0x4a   :  { %v113_v33 = vsel %vm26_vm9, %v673_v8, %v110_v32  ;;  %v231_v8 = vmul.f32 6.2831855, %v16_v5 }
  0x4b   :  { %614 = vcosq.f32 %v113_v33 }
  0x4c   :  { %616 = vsinq.f32 %v113_v33  ;;  %v713_v49 = vmul.f32 0.125, %v231_v8 }
  0x4e   :  { %v236_v50 = vand.u32 2139095040, %v713_v49  ;;  %v233_v57 = vand.u32 2147483647, %v713_v49  ;;  %vm235_vm9 = vcmp.lt.s32.totalorder %v713_v49, 0 }
  0x50   :  { %v237_v51 = vshrl.u32 %v236_v50, 23  ;;  %v240_v5 = vand.u32 8388607, %v233_v57  ;;  %vm234_vm10 = vcmp.le.f32.partialorder %v233_v57, 0.7853982 }
  0x52   :  { %v553_v52 = vadd.s32 4294967169, %v237_v51  ;;  %v241_v6 = vor.u32 8388608, %v240_v5 }
  0x54   :  { %v243_v53 = vadd.s32 1, %v553_v52 }
  0x55   :  { %v615_v38 = vpop.eup %614 }
  0x56   :  { %v617_v39 = vpop.eup %616  ;;  %v124_v11 = vxor.u32 2147483648, %v615_v38  ;;  %vm244_vm3 = vcmp.gt.s32.totalorder %v243_v53, 0 }
  0x57   :  { %v121_v40 = vxor.u32 2147483648, %v617_v39  ;;  %v245_v54 = vsel %vm244_vm3, %v243_v53, 0  ;;  %vm434_vm3 = vcmp.ge.s32.totalorder %v663_v2, 3 }
  0x58   :  { %v125_v41 = vsel %vm123_vm12, %v124_v11, %v617_v39  ;;  %v247_v55 = vand.u32 31, %v245_v54  ;;  %v246_v60 = vshrl.u32 %v245_v54, 5 }
  0x59   :  { %v122_v44 = vsel %vm120_vm14, %v615_v38, %v121_v40  ;;  %vm325_vm14 = vweird.f32 %v713_v49 }
  0x5a   :  { %v126_v45 = vsel %vm119_vm15, %v122_v44, %v125_v41  ;;  %v248_v56 = vsub.s32 32, %v247_v55  ;;  %v259_v58 = vshll.u32 %v625_v26, %v247_v55  ;;  %v250_v61 = vshll.u32 %v622_v20, %v247_v55 }
  0x5b   :  { %v127_v46 = vsel %vm117_vm1, nan, %v126_v45  ;;  %v253_v63 = vshll.u32 %v623_v22, %v247_v55  ;;  %v256_v3 = vshll.u32 %v624_v24, %v247_v55  ;;  %v262_v10 = vshll.u32 %v626_v28, %v247_v55 }
  0x5c   :  { %v128_v47 = vmul.f32 %v127_v46, %v20_v43  ;;  %v260_v59 = vshrl.u32 %v626_v28, %v248_v56  ;;  %v251_v62 = vshrl.u32 %v623_v22, %v248_v56  ;;  %v254_v0 = vshrl.u32 %v624_v24, %v248_v56 }
  0x5d   :  { %v257_v4 = vshrl.u32 %v625_v26, %v248_v56  ;;  %v263_v14 = vshrl.u32 %v627_v35, %v248_v56  ;;  %vm266_vm4 = vcmp.lt.s32.totalorder %v246_v60, 2  ;;  %vm267_vm5 = vcmp.lt.s32.totalorder %v246_v60, 3 }
  0x5e   :  { %v129_v48 = vmul.f32 0.125, %v128_v47  ;;  %v252_v7 = vor.u32 %v251_v62, %v250_v61  ;;  %v261_v9 = vor.u32 %v260_v59, %v259_v58  ;;  %v255_v12 = vor.u32 %v254_v0, %v253_v63 }
  0x5f   :  { %v258_v13 = vor.u32 %v257_v4, %v256_v3  ;;  %vm268_vm6 = vcmp.lt.s32.totalorder %v246_v60, 4  ;;  %v281_v22 = vshll.u32 %v241_v6, 8  ;;  %v264_v15 = vor.u32 %v263_v14, %v262_v10 }
  0x60   :  { %560 = vmatprep.subr.msk.mxu0 %vm139_vm2, %v129_v48  ;;  %v274_v24 = vsel %vm268_vm6, %v261_v9, 920167782  ;;  %v249_v18 = vshrl.u32 %v622_v20, %v248_v56  ;;  %vm218_vm15 = vcmask 1047616   ;;  %vm378_vm1 = vcmp.ge.s32.totalorder %v663_v2, 1 }
  0x61   :  { %561 = vmatpush3.msk.msra.mxu0 %vm139_vm2, %v129_v48  ;;  %v275_v17 = vsel %vm267_vm5, %v258_v13, %v274_v24  ;;  %v278_v19 = vsel %vm268_vm6, %v264_v15, 1326507024  ;;  %v270_v21 = vsel %vm268_vm6, %v258_v13, 2102212464  ;;  %vm413_vm2 = vcmp.ge.s32.totalorder %v663_v2, 2 }
  0x62   :  { %563 = vmatmul.mubr.msk.f32.vlgmr.msra.gmra.mrb[0].mxu0 %vm132_vm0, %v131_v1  ;;  %vm265_vm0 = vcmp.lt.s32.totalorder %v246_v60, 1  ;;  %v279_v23 = vsel %vm267_vm5, %v261_v9, %v278_v19  ;;  %v271_v29 = vsel %vm267_vm5, %v255_v12, %v270_v21  ;;  %vm497_vm5 = vcmp.ge.s32.totalorder %v663_v2, 6 }
  0x63   :  { %v273_v16 = vsel %vm265_vm0, %v252_v7, %v255_v12  ;;  %v277_v26 = vsel %vm265_vm0, %v255_v12, %v258_v13  ;;  %v269_v27 = vsel %vm265_vm0, %v249_v18, %v252_v7  ;;  %vm455_vm0 = vcmp.ge.s32.totalorder %v663_v2, 4 }
  0x64   :  { %v276_v28 = vsel %vm266_vm4, %v273_v16, %v275_v17  ;;  %v280_v30 = vsel %vm266_vm4, %v277_v26, %v279_v23  ;;  %v272_v31 = vsel %vm266_vm4, %v269_v27, %v271_v29  ;;  %v773_v29 = vld [vmem:[%s840_s1 + $0x8] sm:$0xff]  ;;  %vm476_vm4 = vcmp.ge.s32.totalorder %v663_v2, 5 }
  0x65   :  { %v733_v35 = vmul.u32.u64.low %v281_v22, %v276_v28  ;;  %v734_v25 = vmul.u32.u64.high %v281_v22, %v276_v28, %v733_v35  ;;  %v739_v32 = vmul.u32.u64.low %v281_v22, %v280_v30  ;;  %v740_v33 = vmul.u32.u64.high %v281_v22, %v280_v30, %v739_v32 }
  0x66   :  { %v288_v34 = vmul.u32 %v281_v22, %v272_v31  ;;  %vm518_vm6 = vcmp.ge.s32.totalorder %v663_v2, 7 }
  0x67   :  { %v291_v20 = vadd.s32 1, %v734_v25  ;;  %vm290_vm7 = vc.u32 %v740_v33, %v733_v35  ;;  %v289_v45 = vadd.s32 %v733_v35, %v740_v33 }
  0x69   :  { %v292_v36 = vsel %vm290_vm7, %v291_v20, %v734_v25  ;;  %v765_v25 = vld [vmem:[%s840_s1] sm:$0xff]  ;;  %s634_s1 = smov 121   ;;  %vm539_vm7 = vcmask 64512  }
  0x6a   :  { %v293_v37 = vadd.s32 %v292_v36, %v288_v34  ;;  %v632_v36 = vmov 4  }
  0x6b   :  { %597 = vset.pattern.permute.xlu0 %v632_v36 }
  0x6c   :  { %v294_v38 = vadd.s32 536870912, %v293_v37 }
  0x6e   :  { %v295_v39 = vshrl.u32 %v294_v38, 30 }
  0x70   :  { %v296_v11 = vshll.u32 %v295_v39, 30  ;;  %v319_v60 = vsub.s32 4, %v295_v39 }
  0x72   :  { %v297_v40 = vsub.s32 %v293_v37, %v296_v11  ;;  %v320_v61 = vsel %vm235_vm9, %v319_v60, %v295_v39  ;;  %v633_v39 = vmov 5  }
  0x73   :  { %v322_v62 = vsel %vm234_vm10, 0, %v320_v61  ;;  %598 = vset.pattern.permute.xlu1 %v633_v39 }
  0x74   :  { %v299_v41 = vsub.s32 0, %v297_v40  ;;  %v326_v3 = vand.u32 3, %v322_v62 }
  0x76   :  { %v554_v42 = vmin.u32 %v299_v41, %v297_v40  ;;  %vm328_vm11 = vcmp.eq.s32.totalorder %v326_v3, 0  ;;  %vm331_vm12 = vcmp.eq.s32.totalorder %v326_v3, 2  ;;  %vm327_vm13 = vcmp.lt.s32.totalorder %v326_v3, 2 }
  0x78   :  { %v301_v43 = vclz %v554_v42 }
  0x7a   :  { %v555_v44 = vadd.s32 4294967294, %v301_v43 }
  0x7c   :  { %vm556_vm8 = vcmp.lt.s32.totalorder %v555_v44, 0 }
  0x7d   :  { %v304_v46 = vsel %vm556_vm8, 0, %v555_v44 }
  0x7e   :  { %v305_v47 = vsub.s32 32, %v304_v46  ;;  %v309_v48 = vsub.s32 4294967266, %v304_v46  ;;  %v306_v1 = vshll.u32 %v297_v40, %v304_v46  ;;  %v638_v46 = vmov 6  }
  0x80   :  { %v307_v8 = vshrl.u32 %v289_v45, %v305_v47  ;;  %v310_v50 = vadd.s32 127, %v309_v48  ;;  %v640_v47 = vmov 9   ;;  %v641_v48 = vmov 11  }
  0x82   :  { %v308_v51 = vor.u32 %v307_v8, %v306_v1  ;;  %v311_v52 = vshll.u32 %v310_v50, 23  ;;  %v642_v8 = vmov 7   ;;  %v643_v50 = vmov 8  }
  0x84   :  { %v312_v53 = vor.u32 4788187, %v311_v52  ;;  %v315_v54 = vcvt.s32.f32 %v308_v51  ;;  %v644_v51 = vmov 10  }
  0x86   :  { %v313_v55 = vand.u32 2147483647, %v312_v53 }
  0x88   :  { %v316_v56 = vmul.f32 %v315_v54, %v313_v55 }
  0x8a   :  { %v317_v58 = vxor.u32 2147483648, %v316_v56 }
  0x8c   :  { %v318_v59 = vsel %vm235_vm9, %v317_v58, %v316_v56 }
  0x8d   :  { %v321_v5 = vsel %vm234_vm10, %v713_v49, %v318_v59 }
  0x8e   :  { %618 = vcosq.f32 %v321_v5 }
  0x8f   :  { %620 = vsinq.f32 %v321_v5 }
  0x98   :  { %v619_v63 = vpop.eup %618 }
  0x99   :  { %v621_v0 = vpop.eup %620  ;;  %v332_v6 = vxor.u32 2147483648, %v619_v63 }
  0x9a   :  { %v329_v4 = vxor.u32 2147483648, %v621_v0 }
  0x9b   :  { %v333_v9 = vsel %vm331_vm12, %v332_v6, %v621_v0 }
  0x9c   :  { %v330_v7 = vsel %vm328_vm11, %v619_v63, %v329_v4 }
  0x9d   :  { %v334_v57 = vsel %vm327_vm13, %v330_v7, %v333_v9 }
  0x9e   :  { %v335_v10 = vsel %vm325_vm14, nan, %v334_v57 }
  0x9f   :  { %v336_v14 = vmul.f32 0.5, %v335_v10 }
  0xa1   :  { %v337_v22 = vsub.f32 0.5, %v336_v14 }
 0x135   :  { %v564_v12 = vpop.f32.mrb[0].mxu0 }
 0x136   :  { %v209_v13 = vpop.f32.mrb[1].mxu0 }
 0x137   :  { %219 = vrot.lane.b32.xlu0 %v209_v13, %s629_s0 }
 0x13b   :  { %222 = vrot.lane.b32.xlu0 %v564_v12, %s629_s0 }
 0x13f   :  { %339 = vrot.lane.b32.xlu0 %v337_v22, %s630_s13 }
 0x1a9   :  { %v220_v15 = vpop.permute.xlu0 %219 }
 0x1aa   :  { %v221_v16 = vsel %vm218_vm15, %v220_v15, %v209_v13 }
 0x1ab   :  { %225 = vrot.lane.b32.xlu1 %v221_v16, %s629_s0 }
 0x1ad   :  { %v223_v49 = vpop.permute.xlu0 %222 }
 0x1ae   :  { %v224_v24 = vsel %vm218_vm15, %v223_v49, %v564_v12 }
 0x1af   :  { %227 = vrot.lane.b32.xlu1 %v224_v24, %s629_s0 }
 0x1b1   :  { %v340_v17 = vpop.permute.xlu0 %339 }
 0x21d   :  { %v226_v26 = vpop.permute.xlu1 %225 }
 0x21e   :  { %v229_v18 = vsel %vm218_vm15, %v226_v26, %v209_v13 }
 0x21f   :  { %v342_v28 = vmul.f32 %v340_v17, %v229_v18 }
 0x221   :  { %v228_v19 = vpop.permute.xlu1 %227  ;;  %346 = vrot.lane.b32.xlu1 %v342_v28, %s631_s14 }
 0x222   :  { %v230_v21 = vsel %vm218_vm15, %v228_v19, %v564_v12 }
 0x223   :  { %v343_v23 = vmul.f32 %v340_v17, %v230_v21 }
 0x225   :  { %348 = vrot.lane.b32.xlu0 %v343_v23, %s631_s14 }
 0x293   :  { %v347_v35 = vpop.permute.xlu1 %346 }
 0x294   :  { %352 = vrot.lane.b32.xlu1 %v347_v35, %s629_s0 }
 0x297   :  { %v349_v27 = vpop.permute.xlu0 %348 }
 0x298   :  { %355 = vrot.lane.b32.xlu0 %v349_v27, %s629_s0  ;;  %379 = vrot.lane.b32.xlu1 %v765_v25, %s629_s0 }
 0x29c   :  { %382 = vrot.lane.b32.xlu0 %v773_v29, %s629_s0 }
 0x306   :  { %v353_v30 = vpop.permute.xlu1 %352 }
 0x307   :  { %v354_v31 = vsel %vm218_vm15, %v353_v30, %v347_v35 }
 0x308   :  { %358 = vrot.lane.b32.xlu1 %v354_v31, %s629_s0 }
 0x30a   :  { %v356_v32 = vpop.permute.xlu0 %355  ;;  %v380_v33 = vpop.permute.xlu1 %379 }
 0x30b   :  { %v357_v34 = vsel %vm218_vm15, %v356_v32, %v349_v27  ;;  %v381_v20 = vsel %vm218_vm15, %v380_v33, %v765_v25 }
 0x30c   :  { %360 = vrot.lane.b32.xlu0 %v357_v34, %s629_s0  ;;  %385 = vrot.lane.b32.xlu1 %v381_v20, %s629_s0 }
 0x30e   :  { %v383_v37 = vpop.permute.xlu0 %382 }
 0x30f   :  { %v384_v38 = vsel %vm218_vm15, %v383_v37, %v773_v29 }
 0x310   :  { %387 = vrot.lane.b32.xlu0 %v384_v38, %s629_s0 }
 0x37a   :  { %v359_v11 = vpop.permute.xlu1 %358 }
 0x37b   :  { %v362_v1 = vsel %vm218_vm15, %v359_v11, %v347_v35 }
 0x37e   :  { %v361_v40 = vpop.permute.xlu0 %360  ;;  %v386_v41 = vpop.permute.xlu1 %385 }
 0x37f   :  { %v389_v42 = vsel %vm218_vm15, %v386_v41, %v765_v25  ;;  %v363_v45 = vsel %vm218_vm15, %v361_v40, %v349_v27 }
 0x380   :  { %393 = vrot.lane.b32.xlu1 %v389_v42, %s634_s1 }
 0x382   :  { %v388_v43 = vpop.permute.xlu0 %387 }
 0x383   :  { %v390_v44 = vsel %vm218_vm15, %v388_v43, %v773_v29 }
 0x384   :  { %416 = vrot.lane.b32.xlu0 %v390_v44, %s635_s19  ;;  %395 = vrot.lane.b32.xlu1 %v390_v44, %s634_s1 }
 0x388   :  { %458 = vrot.lane.b32.xlu0 %v390_v44, %s631_s14  ;;  %414 = vrot.lane.b32.xlu1 %v389_v42, %s635_s19 }
 0x38c   :  { %498 = vrot.lane.b32.xlu0 %v389_v42, %s636_s20  ;;  %435 = vrot.lane.b32.xlu1 %v389_v42, %s637_s21 }
 0x390   :  { %373 = vperm.xlu0 %597, %v363_v45   ;;  %437 = vrot.lane.b32.xlu1 %v390_v44, %s637_s21 }
 0x394   :  { %599 = vset.pattern.permute.xlu0 %v638_v46  ;;  %456 = vrot.lane.b32.xlu1 %v389_v42, %s631_s14 }
 0x395   :  { %427 = vperm.xlu0 %599, %v363_v45  }
 0x398   :  { %477 = vrot.lane.b32.xlu1 %v389_v42, %s639_s22 }
 0x399   :  { %602 = vset.pattern.permute.xlu0 %v640_v47 }
 0x39a   :  { %490 = vperm.xlu0 %602, %v363_v45  }
 0x39c   :  { %479 = vrot.lane.b32.xlu1 %v390_v44, %s639_s22 }
 0x39e   :  { %604 = vset.pattern.permute.xlu0 %v641_v48 }
 0x39f   :  { %532 = vperm.xlu0 %604, %v363_v45  }
 0x3a0   :  { %406 = vperm.xlu1 %598, %v363_v45  }
 0x3a3   :  { %606 = vset.pattern.permute.xlu0 %v633_v39 }
 0x3a4   :  { %402 = vperm.xlu0 %606, %v362_v1   ;;  %600 = vset.pattern.permute.xlu1 %v642_v8 }
 0x3a5   :  { %448 = vperm.xlu1 %600, %v363_v45  }
 0x3a8   :  { %609 = vset.pattern.permute.xlu0 %v643_v50 }
 0x3a9   :  { %465 = vperm.xlu0 %609, %v362_v1   ;;  %601 = vset.pattern.permute.xlu1 %v643_v50 }
 0x3aa   :  { %469 = vperm.xlu1 %601, %v363_v45  }
 0x3ad   :  { %611 = vset.pattern.permute.xlu0 %v644_v51 }
 0x3ae   :  { %507 = vperm.xlu0 %611, %v362_v1   ;;  %603 = vset.pattern.permute.xlu1 %v644_v51 }
 0x3af   :  { %511 = vperm.xlu1 %603, %v363_v45  }
 0x3b2   :  { %519 = vrot.lane.b32.xlu0 %v389_v42, %s645_s23 }
 0x3b3   :  { %605 = vset.pattern.permute.xlu1 %v632_v36  ;;  %613 = vset.pattern.permute.xlu0 %v641_v48 }
 0x3b4   :  { %368 = vperm.xlu1 %605, %v362_v1  }
 0x3b8   :  { %607 = vset.pattern.permute.xlu1 %v638_v46 }
 0x3b9   :  { %423 = vperm.xlu1 %607, %v362_v1  }
 0x3bd   :  { %608 = vset.pattern.permute.xlu1 %v642_v8 }
 0x3be   :  { %444 = vperm.xlu1 %608, %v362_v1  }
 0x3c2   :  { %610 = vset.pattern.permute.xlu1 %v640_v47 }
 0x3c3   :  { %486 = vperm.xlu1 %610, %v362_v1  }
 0x3c7   :  { %612 = vset.pattern.permute.xlu1 %v641_v48 }
 0x3c8   :  { %528 = vperm.xlu1 %612, %v362_v1  }
 0x3cc   :  { %500 = vrot.lane.b32.xlu1 %v390_v44, %s636_s20 }
 0x3d0   :  { %521 = vrot.lane.b32.xlu1 %v390_v44, %s645_s23 }
 0x3f2   :  { %v394_v52 = vpop.permute.xlu1 %393 }
 0x3f3   :  { %v399_v15 = vsel %vm378_vm1, %v394_v52, 0.0 }
 0x3f6   :  { %v396_v53 = vpop.permute.xlu1 %395  ;;  %v417_v58 = vpop.permute.xlu0 %416 }
 0x3f7   :  { %v400_v17 = vsel %vm378_vm1, %v396_v53, 0.0  ;;  %v421_v33 = vsel %vm413_vm2, %v417_v58, 0.0 }
 0x3fa   :  { %v415_v54 = vpop.permute.xlu1 %414  ;;  %v459_v5 = vpop.permute.xlu0 %458 }
 0x3fb   :  { %v420_v16 = vsel %vm413_vm2, %v415_v54, 0.0  ;;  %v463_v44 = vsel %vm455_vm0, %v459_v5, 0.0 }
 0x3fe   :  { %v436_v55 = vpop.permute.xlu1 %435  ;;  %v499_v61 = vpop.permute.xlu0 %498 }
 0x3ff   :  { %v441_v18 = vsel %vm434_vm3, %v436_v55, 0.0  ;;  %v504_v39 = vsel %vm497_vm5, %v499_v61, 0.0 }
 0x402   :  { %v438_v56 = vpop.permute.xlu1 %437 }
 0x406   :  { %v457_v59 = vpop.permute.xlu1 %456 }
 0x40a   :  { %v478_v60 = vpop.permute.xlu1 %477 }
 0x40b   :  { %v483_v34 = vsel %vm476_vm4, %v478_v60, 0.0 }
 0x40e   :  { %v480_v63 = vpop.permute.xlu1 %479 }
 0x40f   :  { %v374_v62 = vpop.permute.xlu0 %373  ;;  %v484_v53 = vsel %vm476_vm4, %v480_v63, 0.0 }
 0x410   :  { %v377_v27 = vmul.f32 %v374_v62, %v773_v29  ;;  %v442_v29 = vsel %vm434_vm3, %v438_v56, 0.0 }
 0x414   :  { %v428_v3 = vpop.permute.xlu0 %427 }
 0x415   :  { %v431_v37 = vmul.f32 %v428_v3, %v421_v33 }
 0x419   :  { %v491_v6 = vpop.permute.xlu0 %490 }
 0x41a   :  { %v494_v55 = vmul.f32 %v491_v6, %v484_v53 }
 0x41e   :  { %v797_v9 = vpop.permute.xlu0 %532 }
 0x41f   :  { %v407_v0 = vpop.permute.xlu1 %406 }
 0x420   :  { %v410_v28 = vmul.f32 %v407_v0, %v400_v17 }
 0x422   :  { %v412_v32 = vadd.f32 %v410_v28, %v377_v27 }
 0x423   :  { %v403_v10 = vpop.permute.xlu0 %402 }
 0x424   :  { %v449_v4 = vpop.permute.xlu1 %448  ;;  %v409_v49 = vmul.f32 %v403_v10, %v399_v15  ;;  %v433_v40 = vadd.f32 %v431_v37, %v412_v32 }
 0x425   :  { %v452_v41 = vmul.f32 %v449_v4, %v442_v29 }
 0x427   :  { %v454_v8 = vadd.f32 %v452_v41, %v433_v40 }
 0x428   :  { %v466_v13 = vpop.permute.xlu0 %465 }
 0x429   :  { %v470_v7 = vpop.permute.xlu1 %469 }
 0x42a   :  { %v473_v45 = vmul.f32 %v470_v7, %v463_v44 }
 0x42c   :  { %v475_v51 = vadd.f32 %v473_v45, %v454_v8 }
 0x42d   :  { %v508_v21 = vpop.permute.xlu0 %507 }
 0x42e   :  { %v512_v57 = vpop.permute.xlu1 %511  ;;  %v514_v42 = vmul.f32 %v508_v21, %v504_v39  ;;  %v496_v58 = vadd.f32 %v494_v55, %v475_v51 }
 0x431   :  { %v520_v11 = vpop.permute.xlu0 %519 }
 0x432   :  { %v525_v46 = vsel %vm518_vm6, %v520_v11, 0.0 }
 0x433   :  { %v369_v12 = vpop.permute.xlu1 %368 }
 0x434   :  { %v376_v14 = vmul.f32 %v369_v12, %v765_v25  ;;  %v462_v25 = vsel %vm455_vm0, %v457_v59, 0.0 }
 0x435   :  { %v472_v30 = vmul.f32 %v466_v13, %v462_v25 }
 0x436   :  { %v411_v26 = vadd.f32 %v409_v49, %v376_v14 }
 0x438   :  { %v424_v22 = vpop.permute.xlu1 %423 }
 0x439   :  { %v430_v24 = vmul.f32 %v424_v22, %v420_v16 }
 0x43b   :  { %v432_v23 = vadd.f32 %v430_v24, %v411_v26 }
 0x43d   :  { %v445_v19 = vpop.permute.xlu1 %444 }
 0x43e   :  { %v451_v35 = vmul.f32 %v445_v19, %v441_v18 }
 0x440   :  { %v453_v31 = vadd.f32 %v451_v35, %v432_v23 }
 0x442   :  { %v474_v20 = vadd.f32 %v472_v30, %v453_v31  ;;  %v487_v36 = vpop.permute.xlu1 %486 }
 0x443   :  { %v493_v38 = vmul.f32 %v487_v36, %v483_v34 }
 0x445   :  { %v495_v43 = vadd.f32 %v493_v38, %v474_v20 }
 0x447   :  { %v516_v47 = vadd.f32 %v514_v42, %v495_v43  ;;  %v529_v48 = vpop.permute.xlu1 %528 }
 0x448   :  { %v535_v1 = vmul.f32 %v529_v48, %v525_v46 }
 0x44a   :  { %v537_v50 = vadd.f32 %v535_v1, %v516_v47 }
 0x44b   :  { %v501_v52 = vpop.permute.xlu1 %500 }
 0x44c   :  { %540 = vst.msk [vmem:[%s841_s2] sm:$0xff] %vm539_vm7, %v537_v50  ;;  %v505_v54 = vsel %vm497_vm5, %v501_v52, 0.0 }
 0x44d   :  { %v515_v56 = vmul.f32 %v512_v57, %v505_v54 }
 0x44f   :  { %v522_v59 = vpop.permute.xlu1 %521  ;;  %v517_v60 = vadd.f32 %v515_v56, %v496_v58 }
 0x450   :  { %v526_v5 = vsel %vm518_vm6, %v522_v59, 0.0 }
 0x451   :  { %v536_v61 = vmul.f32 %v797_v9, %v526_v5 }
 0x453   :  { %v538_v62 = vadd.f32 %v536_v61, %v517_v60 }
 0x455   :  { %541 = vst.msk [vmem:[%s841_s2 + $0x8] sm:$0xff] %vm539_vm7, %v538_v62 }

// kernel: ddsp_forward.4
= control target key start
LH: loop header
LB: loop body
LE: loop exit
PB: predicated region body
PF: predicated region fallthrough
CT: control target
= control target key end

     0   :  { %v2823_v0 = vmov 0   ;;  %v1706_v5 = vlaneseq  ;;  %s2824_s6 = smov 1   ;;  %s2825_s10 = smov 2   ;;  %vm176_vm0 = vcmask 130048   ;;  %vm2836_vm9 = vmmov 0   ;;  %s3204_s0 = inlined_call_operand.smem [shape: u32[32], index: -1, kind: input, shape index: {}] }
   0x1   :  { %2718 = vset.pattern.permute.xlu1 %v2823_v0  ;;  %2717 = vset.pattern.permute.xlu0 %v2823_v0  ;;  %s1_s5 = sld [smem:[%s3204_s0]]   ;;  %s2826_s14 = smov 5   ;;  %vm935_vm14 = vcmask 123904   ;;  %vm1043_vm15 = vcmask 125954  }
   0x2   :  { %v2257_v6 = vand.u32 127, %v1706_v5  ;;  %s2352_s9 = sld [smem:[%s3204_s0 + %s2824_s6]]   ;;  %s2827_s18 = smov 3  }
   0x3   :  { %s2353_s13 = sld [smem:[%s3204_s0 + %s2825_s10]]   ;;  %s2828_s22 = smov 4  }
   0x4   :  { %v2258_v7 = vcvt.s32.f32 %v2257_v6  ;;  %s2356_s17 = sld [smem:[%s3204_s0 + %s2826_s14]]   ;;  %s2829_s26 = smov 6  }
   0x5   :  { %s2354_s21 = sld [smem:[%s3204_s0 + %s2827_s18]]   ;;  %s2830_s30 = smov 9  }
   0x6   :  { %v2878_v8 = vadd.f32 1.0, %v2258_v7  ;;  %s2355_s25 = sld [smem:[%s3204_s0 + %s2828_s22]]   ;;  %s2831_s4 = smov 7  }
   0x7   :  { %v132_v1 = vld [vmem:[%s1_s5 + $0x10] sm:$0xff]  ;;  %v130_v2 = vld [vmem:[%s1_s5] sm:$0xff]  ;;  %v133_v3 = vld [vmem:[%s1_s5 + $0x18] sm:$0xff]  ;;  %s2357_s29 = sld [smem:[%s3204_s0 + %s2829_s26]]   ;;  %s2843_s11 = smov 15  }
   0x8   :  { %147 = vperm.xlu1 %2718, %v132_v1   ;;  %137 = vperm.xlu0 %2717, %v130_v2   ;;  %v131_v4 = vld [vmem:[%s1_s5 + $0x8] sm:$0xff]  ;;  %v2383_v9 = vld [vmem:[%s2352_s9] ss:$0 sm:$0xff]  ;;  %s2360_s3 = sld [smem:[%s3204_s0 + %s2830_s30]]   ;;  %s2832_s9 = smov 8  }
   0x9   :  { %v2384_v12 = vld [vmem:[%s2353_s13] ss:$0 sm:$0xff]  ;;  %s2358_s8 = sld [smem:[%s3204_s0 + %s2831_s4]]   ;;  %s2833_s13 = smov 10  }
   0xa   :  { %v264_v48 = vld [vmem:[%s2356_s17] sm:$0xff]  ;;  %v265_v49 = vld [vmem:[%s2356_s17 + $0x8] sm:$0xff]  ;;  %s2359_s12 = sld [smem:[%s3204_s0 + %s2832_s9]]   ;;  %s2835_s17 = smov 14  }
   0xb   :  { %v2620_v50 = vpack.c.bf16 %v265_v49, %v264_v48  ;;  %v2385_v0 = vld [vmem:[%s2354_s21] ss:$0 sm:$0xff]  ;;  %s2361_s16 = sld [smem:[%s3204_s0 + %s2833_s13]]   ;;  %s2838_s21 = smov 13  }
   0xc   :  { %152 = vperm.xlu1 %2718, %v133_v3   ;;  %142 = vperm.xlu0 %2717, %v131_v4   ;;  %v2386_v2 = vld [vmem:[%s2355_s25] ss:$0 sm:$0xff]  ;;  %s2365_s20 = sld [smem:[%s3204_s0 + %s2835_s17]]   ;;  %s2839_s25 = smov 16  }
   0xd   :  { %2621 = vmatprep.subr.bf16.mxu0 %v2620_v50  ;;  %s2364_s24 = sld [smem:[%s3204_s0 + %s2838_s21]]   ;;  %s2841_s30 = smov 11  }
   0xe   :  { %2623 = vmatpush3.bf16.msra.mxu0 %v2620_v50  ;;  %s2367_s28 = sld [smem:[%s3204_s0 + %s2839_s25]]   ;;  %s2842_s5 = smov 12  }
   0xf   :  { %s2363_s10 = sld [smem:[%s3204_s0 + %s2842_s5]]   ;;  %s2844_s15 = smov 32  }
  0x10   :  { %s2366_s14 = sld [smem:[%s3204_s0 + %s2843_s11]]   ;;  %s2846_s17 = smov 17  }
  0x11   :  { %s2847_s21 = smov 18   ;;  %s2848_s26 = smov 21  }
  0x12   :  { %s2850_s5 = smov 20   ;;  %s2851_s11 = smov 22  }
  0x13   :  { %s2853_s19 = smov 23   ;;  %s2854_s23 = smov 24  }
  0x14   :  { %s2374_s22 = sld [smem:[%s3204_s0 + %s2853_s19]]   ;;  %s2856_s2 = smov 29  }
  0x15   :  { %s2375_s27 = sld [smem:[%s3204_s0 + %s2854_s23]]  }
  0x16   :  { %s2380_s7 = sld [smem:[%s3204_s0 + %s2856_s2]]  }
  0x87   :  { %v2880_v10 = vpop.permute.xlu1 %147  ;;  %v2882_v11 = vpop.permute.xlu0 %137 }
  0x88   :  { %v163_v13 = vmul.f32 %v2383_v9, %v2880_v10  ;;  %v161_v14 = vmul.f32 %v2383_v9, %v2882_v11  ;;  %v2888_v15 = vmul.f32 %v2878_v8, %v2882_v11 }
  0x8a   :  { %v172_v16 = vadd.f32 %v2384_v12, %v161_v14  ;;  %v174_v19 = vadd.f32 %v2384_v12, %v163_v13 }
  0x8b   :  { %v2890_v17 = vpop.permute.xlu1 %152  ;;  %v2892_v18 = vpop.permute.xlu0 %142 }
  0x8c   :  { %v162_v20 = vmul.f32 %v2383_v9, %v2892_v18  ;;  %v164_v21 = vmul.f32 %v2383_v9, %v2890_v17  ;;  %v177_v22 = vsel %vm176_vm0, %v172_v16, 0.0  ;;  %v183_v24 = vsel %vm176_vm0, %v174_v19, 0.0 }
  0x8d   :  { %178 = vadd.xlane.f32.xlu0 %v177_v22 }
  0x8e   :  { %v173_v23 = vadd.f32 %v2384_v12, %v162_v20  ;;  %v175_v26 = vadd.f32 %v2384_v12, %v164_v21 }
  0x90   :  { %v180_v25 = vsel %vm176_vm0, %v173_v23, 0.0  ;;  %v186_v27 = vsel %vm176_vm0, %v175_v26, 0.0 }
  0x91   :  { %181 = vadd.xlane.f32.xlu1 %v180_v25  ;;  %184 = vadd.xlane.f32.xlu0 %v183_v24 }
  0x95   :  { %187 = vadd.xlane.f32.xlu0 %v186_v27 }
 0x11a   :  { %v179_v28 = vpop.xlane.xlu0 %178 }
 0x11b   :  { %v190_v29 = vmul.f32 0.0625, %v179_v28 }
 0x11d   :  { %v194_v30 = vsub.f32 %v172_v16, %v190_v29 }
 0x11e   :  { %v182_v31 = vpop.xlane.xlu1 %181  ;;  %v185_v33 = vpop.xlane.xlu0 %184 }
 0x11f   :  { %v191_v32 = vmul.f32 0.0625, %v182_v31  ;;  %v192_v34 = vmul.f32 0.0625, %v185_v33  ;;  %v198_v35 = vmul.f32 %v194_v30, %v194_v30 }
 0x121   :  { %v195_v36 = vsub.f32 %v173_v23, %v191_v32  ;;  %v196_v37 = vsub.f32 %v174_v19, %v192_v34  ;;  %v202_v38 = vsel %vm176_vm0, %v198_v35, 0.0  ;;  %v2387_v32 = vld [vmem:[%s2357_s29] ss:$0 sm:$0xff]  ;;  %s2840_s29 = smov 96  }
 0x122   :  { %203 = vadd.xlane.f32.xlu1 %v202_v38  ;;  %v188_v39 = vpop.xlane.xlu0 %187 }
 0x123   :  { %v199_v40 = vmul.f32 %v195_v36, %v195_v36  ;;  %v193_v41 = vmul.f32 0.0625, %v188_v39  ;;  %v200_v42 = vmul.f32 %v196_v37, %v196_v37 }
 0x125   :  { %v205_v43 = vsel %vm176_vm0, %v199_v40, 0.0  ;;  %v197_v44 = vsub.f32 %v175_v26, %v193_v41  ;;  %v208_v45 = vsel %vm176_vm0, %v200_v42, 0.0 }
 0x126   :  { %206 = vadd.xlane.f32.xlu0 %v205_v43  ;;  %209 = vadd.xlane.f32.xlu1 %v208_v45 }
 0x127   :  { %v201_v46 = vmul.f32 %v197_v44, %v197_v44 }
 0x129   :  { %v211_v47 = vsel %vm176_vm0, %v201_v46, 0.0 }
 0x12a   :  { %212 = vadd.xlane.f32.xlu0 %v211_v47 }
 0x1af   :  { %v204_v51 = vpop.xlane.xlu1 %203 }
 0x1b0   :  { %v214_v52 = vmul.f32 0.0625, %v204_v51 }
 0x1b2   :  { %v218_v53 = vadd.f32 1e-05, %v214_v52 }
 0x1b3   :  { %v207_v54 = vpop.xlane.xlu0 %206  ;;  %v210_v55 = vpop.xlane.xlu1 %209 }
 0x1b4   :  { %v215_v56 = vmul.f32 0.0625, %v207_v54  ;;  %2719 = vrsqrt.f32 %v218_v53  ;;  %v216_v57 = vmul.f32 0.0625, %v210_v55 }
 0x1b6   :  { %v219_v58 = vadd.f32 1e-05, %v215_v56  ;;  %v220_v59 = vadd.f32 1e-05, %v216_v57 }
 0x1b7   :  { %v213_v60 = vpop.xlane.xlu0 %212 }
 0x1b8   :  { %2721 = vrsqrt.f32 %v219_v58  ;;  %v217_v61 = vmul.f32 0.0625, %v213_v60 }
 0x1b9   :  { %2723 = vrsqrt.f32 %v220_v59 }
 0x1ba   :  { %v221_v62 = vadd.f32 1e-05, %v217_v61 }
 0x1bc   :  { %2725 = vrsqrt.f32 %v221_v62 }
 0x1be   :  { %v2720_v63 = vpop.eup %2719 }
 0x1bf   :  { %v226_v1 = vmul.f32 %v2720_v63, %v194_v30 }
 0x1c1   :  { %v237_v4 = vmul.f32 %v2385_v0, %v226_v1  ;;  %v456_v1 = vld [vmem:[%s2360_s3] sm:$0xff] }
 0x1c2   :  { %v2722_v3 = vpop.eup %2721 }
 0x1c3   :  { %v2724_v6 = vpop.eup %2723  ;;  %v227_v7 = vmul.f32 %v2722_v3, %v195_v36  ;;  %v248_v9 = vadd.f32 %v2386_v2, %v237_v4 }
 0x1c4   :  { %v228_v12 = vmul.f32 %v2724_v6, %v196_v37 }
 0x1c5   :  { %v238_v13 = vmul.f32 %v2385_v0, %v227_v7  ;;  %vm252_vm1 = vcmp.ge.f32.partialorder %v248_v9, 0.0  ;;  %v256_v14 = vmul.f32 0.01, %v248_v9 }
 0x1c6   :  { %v239_v16 = vmul.f32 %v2385_v0, %v228_v12  ;;  %v2726_v19 = vpop.eup %2725 }
 0x1c7   :  { %v249_v20 = vadd.f32 %v2386_v2, %v238_v13  ;;  %v260_v21 = vsel %vm252_vm1, %v248_v9, %v256_v14  ;;  %v229_v23 = vmul.f32 %v2726_v19, %v197_v44  ;;  %vm1265_vm1 = vcmask 130054  }
 0x1c8   :  { %v250_v22 = vadd.f32 %v2386_v2, %v239_v16  ;;  %2506 = vmatprep.mubr.msk.f32.mxu0 %vm176_vm0, %v260_v21 }
 0x1c9   :  { %vm253_vm2 = vcmp.ge.f32.partialorder %v249_v20, 0.0  ;;  %v257_v24 = vmul.f32 0.01, %v249_v20  ;;  %v240_v26 = vmul.f32 %v2385_v0, %v229_v23 }
 0x1ca   :  { %vm254_vm3 = vcmp.ge.f32.partialorder %v250_v22, 0.0  ;;  %v258_v25 = vmul.f32 0.01, %v250_v22 }
 0x1cb   :  { %v261_v27 = vsel %vm253_vm2, %v249_v20, %v257_v24  ;;  %v251_v29 = vadd.f32 %v2386_v2, %v240_v26  ;;  %v457_v2 = vld [vmem:[%s2360_s3 + $0x8] sm:$0xff]  ;;  %v2392_v24 = vld [vmem:[%s2358_s8] ss:$0 sm:$0xff]  ;;  %s2362_s3 = sld [smem:[%s3204_s0 + %s2841_s30]]   ;;  %vm1154_vm2 = vcmask 128004   ;;  %s2849_s30 = smov 19  }
 0x1cc   :  { %2507 = vmatmul.mubr.msk.f32.vlgmr.msra.gmra.mrb[0].mxu0 %vm176_vm0, %v261_v27  ;;  %v262_v28 = vsel %vm254_vm3, %v250_v22, %v258_v25  ;;  %v2624_v3 = vpack.c.bf16 %v457_v2, %v456_v1  ;;  %v824_v1 = vld [vmem:[%s2365_s20 + $0x8] sm:$0xff]  ;;  %s2857_s8 = smov 27  }
 0x1cd   :  { %2509 = vmatprep.mubr.msk.f32.mxu0 %vm176_vm0, %v262_v28  ;;  %vm255_vm4 = vcmp.ge.f32.partialorder %v251_v29, 0.0  ;;  %v259_v30 = vmul.f32 0.01, %v251_v29  ;;  %v2393_v28 = vld [vmem:[%s2359_s12] ss:$0 sm:$0xff]  ;;  %s2858_s12 = smov 28  }
 0x1ce   :  { %2625 = vmatprep.subr.bf16.mxu1 %v2624_v3 }
 0x1cf   :  { %v263_v31 = vsel %vm255_vm4, %v251_v29, %v259_v30  ;;  %2627 = vmatpush3.bf16.msra.mxu1 %v2624_v3 }
 0x1d0   :  { %2510 = vmatmul.mubr.msk.f32.gmra.mrb[2].mxu0 %vm176_vm0, %v263_v31 }
 0x29f   :  { %v2508_v33 = vpop.f32.mrb[0].mxu0 }
 0x2a0   :  { %v357_v34 = vadd.f32 %v2508_v33, %v2387_v32  ;;  %v351_v35 = vpop.f32.mrb[1].mxu0 }
 0x2a1   :  { %v352_v36 = vadd.f32 %v2387_v32, %v351_v35 }
 0x2a2   :  { %v373_v37 = vsel %vm176_vm0, %v357_v34, 0.0 }
 0x2a3   :  { %374 = vadd.xlane.f32.xlu0 %v373_v37  ;;  %v370_v38 = vsel %vm176_vm0, %v352_v36, 0.0  ;;  %v2511_v39 = vpop.f32.mrb[2].mxu0 }
 0x2a4   :  { %371 = vadd.xlane.f32.xlu1 %v370_v38  ;;  %v367_v40 = vadd.f32 %v2511_v39, %v2387_v32  ;;  %v361_v41 = vpop.f32.mrb[3].mxu0 }
 0x2a5   :  { %v362_v42 = vadd.f32 %v2387_v32, %v361_v41 }
 0x2a6   :  { %v379_v43 = vsel %vm176_vm0, %v367_v40, 0.0 }
 0x2a7   :  { %380 = vadd.xlane.f32.xlu0 %v379_v43  ;;  %v376_v44 = vsel %vm176_vm0, %v362_v42, 0.0 }
 0x2a8   :  { %377 = vadd.xlane.f32.xlu1 %v376_v44 }
 0x330   :  { %v375_v45 = vpop.xlane.xlu0 %374 }
 0x331   :  { %v383_v46 = vmul.f32 0.0625, %v375_v45  ;;  %v372_v47 = vpop.xlane.xlu1 %371 }
 0x332   :  { %v382_v48 = vmul.f32 0.0625, %v372_v47 }
 0x333   :  { %v387_v49 = vsub.f32 %v357_v34, %v383_v46 }
 0x334   :  { %v386_v50 = vsub.f32 %v352_v36, %v382_v48  ;;  %v381_v51 = vpop.xlane.xlu0 %380 }
 0x335   :  { %v391_v52 = vmul.f32 %v387_v49, %v387_v49  ;;  %v385_v53 = vmul.f32 0.0625, %v381_v51  ;;  %v378_v54 = vpop.xlane.xlu1 %377  ;;  %v2394_v51 = vld [vmem:[%s2361_s16] ss:$0 sm:$0xff]  ;;  %s2845_s16 = smov 112  }
 0x336   :  { %v390_v55 = vmul.f32 %v386_v50, %v386_v50  ;;  %v384_v56 = vmul.f32 0.0625, %v378_v54 }
 0x337   :  { %v397_v57 = vsel %vm176_vm0, %v391_v52, 0.0  ;;  %v389_v58 = vsub.f32 %v367_v40, %v385_v53 }
 0x338   :  { %398 = vadd.xlane.f32.xlu0 %v397_v57  ;;  %v394_v59 = vsel %vm176_vm0, %v390_v55, 0.0  ;;  %v388_v60 = vsub.f32 %v362_v42, %v384_v56 }
 0x339   :  { %395 = vadd.xlane.f32.xlu1 %v394_v59  ;;  %v393_v61 = vmul.f32 %v389_v58, %v389_v58 }
 0x33a   :  { %v392_v62 = vmul.f32 %v388_v60, %v388_v60 }
 0x33b   :  { %v403_v63 = vsel %vm176_vm0, %v393_v61, 0.0 }
 0x33c   :  { %404 = vadd.xlane.f32.xlu0 %v403_v63  ;;  %v400_v0 = vsel %vm176_vm0, %v392_v62, 0.0  ;;  %v2834_v62 = vmov 0.0|0.0   ;;  %v2837_v63 = vmov 0.0  }
 0x33d   :  { %401 = vadd.xlane.f32.xlu1 %v400_v0  ;;  %2636 = vmatprep.subr.bf16.mxu1 %v2834_v62  ;;  %v823_v0 = vld [vmem:[%s2365_s20] sm:$0xff]  ;;  %s2368_s20 = sld [smem:[%s3204_s0 + %s2846_s17]]  }
 0x33e   :  { %v2956_v2 = vpack.c.bf16 %v824_v1, %v823_v0 }
 0x3c5   :  { %v399_v4 = vpop.xlane.xlu0 %398 }
 0x3c6   :  { %v407_v6 = vmul.f32 0.0625, %v399_v4  ;;  %v396_v7 = vpop.xlane.xlu1 %395 }
 0x3c7   :  { %v406_v9 = vmul.f32 0.0625, %v396_v7 }
 0x3c8   :  { %v411_v12 = vadd.f32 1e-05, %v407_v6 }
 0x3c9   :  { %v410_v13 = vadd.f32 1e-05, %v406_v9  ;;  %v405_v14 = vpop.xlane.xlu0 %404 }
 0x3ca   :  { %2727 = vrsqrt.f32 %v411_v12  ;;  %v409_v16 = vmul.f32 0.0625, %v405_v14  ;;  %v402_v19 = vpop.xlane.xlu1 %401 }
 0x3cb   :  { %2729 = vrsqrt.f32 %v410_v13  ;;  %v408_v20 = vmul.f32 0.0625, %v402_v19 }
 0x3cc   :  { %v413_v21 = vadd.f32 1e-05, %v409_v16 }
 0x3cd   :  { %v412_v22 = vadd.f32 1e-05, %v408_v20 }
 0x3ce   :  { %2731 = vrsqrt.f32 %v413_v21 }
 0x3cf   :  { %2733 = vrsqrt.f32 %v412_v22 }
 0x3d4   :  { %v2728_v23 = vpop.eup %2727 }
 0x3d5   :  { %v2730_v25 = vpop.eup %2729  ;;  %v419_v26 = vmul.f32 %v2728_v23, %v387_v49 }
 0x3d6   :  { %v418_v27 = vmul.f32 %v2730_v25, %v386_v50 }
 0x3d7   :  { %v430_v29 = vmul.f32 %v2392_v24, %v419_v26 }
 0x3d8   :  { %v429_v30 = vmul.f32 %v2392_v24, %v418_v27  ;;  %v2732_v31 = vpop.eup %2731 }
 0x3d9   :  { %v441_v32 = vadd.f32 %v2393_v28, %v430_v29  ;;  %v2734_v33 = vpop.eup %2733  ;;  %v421_v35 = vmul.f32 %v2732_v31, %v389_v58  ;;  %v651_v31 = vld [vmem:[%s2364_s24 + $0x18] sm:$0xff] }
 0x3da   :  { %v440_v34 = vadd.f32 %v2393_v28, %v429_v30  ;;  %v420_v37 = vmul.f32 %v2734_v33, %v388_v60  ;;  %v650_v30 = vld [vmem:[%s2364_s24 + $0x10] sm:$0xff]  ;;  %v648_v33 = vld [vmem:[%s2364_s24] sm:$0xff] }
 0x3db   :  { %v449_v36 = vmul.f32 0.01, %v441_v32  ;;  %vm445_vm6 = vcmp.ge.f32.partialorder %v441_v32, 0.0  ;;  %v432_v39 = vmul.f32 %v2392_v24, %v421_v35 }
 0x3dc   :  { %vm444_vm5 = vcmp.ge.f32.partialorder %v440_v34, 0.0  ;;  %v448_v38 = vmul.f32 0.01, %v440_v34  ;;  %v431_v40 = vmul.f32 %v2392_v24, %v420_v37 }
 0x3dd   :  { %v443_v42 = vadd.f32 %v2393_v28, %v432_v39  ;;  %v453_v43 = vsel %vm445_vm6, %v441_v32, %v449_v36  ;;  %v2628_v32 = vpack.c.bf16 %v651_v31, %v650_v30  ;;  %v2976_v36 = vld [vmem:[%s2367_s28] ss:$0 sm:$0xff]  ;;  %s2855_s28 = smov 26  }
 0x3de   :  { %v452_v41 = vsel %vm444_vm5, %v440_v34, %v448_v38  ;;  %v442_v44 = vadd.f32 %v2393_v28, %v431_v40  ;;  %v649_v34 = vld [vmem:[%s2364_s24 + $0x8] sm:$0xff]  ;;  %s2369_s24 = sld [smem:[%s3204_s0 + %s2847_s21]]  }
 0x3df   :  { %2516 = vmatprep.mubr.msk.f32.mxu1 %vm176_vm0, %v452_v41  ;;  %v451_v45 = vmul.f32 0.01, %v443_v42  ;;  %vm447_vm8 = vcmp.ge.f32.partialorder %v443_v42, 0.0  ;;  %2629 = vmatprep.subr.bf16.mxu0 %v2628_v32  ;;  %v2632_v35 = vpack.c.bf16 %v649_v34, %v648_v33  ;;  %s2377_s1 = sld [smem:[%s3204_s0 + %s2855_s28]]  }
 0x3e0   :  { %2517 = vmatmul.mubr.msk.f32.vlgmr.msra.gmra.mrb[0].mxu1 %vm176_vm0, %v453_v43  ;;  %vm446_vm7 = vcmp.ge.f32.partialorder %v442_v44, 0.0  ;;  %v450_v46 = vmul.f32 0.01, %v442_v44  ;;  %2631 = vmatpush3.bf16.msra.mxu0 %v2628_v32 }
 0x3e1   :  { %v455_v48 = vsel %vm447_vm8, %v443_v42, %v451_v45  ;;  %2638 = vmatpush3.bf16.msra.mxu1 %v2956_v2  ;;  %2633 = vmatprep.subr.bf16.mxu0 %v2632_v35  ;;  %vm2262_vm8 = vcmp.lt.f32.partialorder %v2888_v15, 8.0 }
 0x3e2   :  { %v454_v47 = vsel %vm446_vm7, %v442_v44, %v450_v46  ;;  %2639 = vmatprep.subr.bf16.mxu1 %v2834_v62 }
 0x3e3   :  { %2519 = vmatprep.mubr.msk.f32.mxu1 %vm176_vm0, %v454_v47 }
 0x3e4   :  { %2520 = vmatmul.mubr.msk.f32.gmra.mrb[2].mxu1 %vm176_vm0, %v455_v48 }
 0x3e5   :  { %2540 = vmatprep.mubr.msk.f32.mxu1 %vm2836_vm9, %v2837_v63 }
 0x3e8   :  { %2541 = vmatmul.mubr.f32.vlgmr.msra.gmra.mrb[4].mxu1 %v2837_v63 }
 0x3e9   :  { %2641 = vmatpush3.bf16.msra.mxu1 %v2956_v2  ;;  %2547 = vmatprep.mubr.msk.f32.mxu1 %vm2836_vm9, %v2837_v63 }
 0x3ea   :  { %2645 = vmatprep.subr.bf16.mxu1 %v2834_v62 }
 0x4b3   :  { %v2518_v49 = vpop.f32.mrb[0].mxu1 }
 0x4b4   :  { %v543_v50 = vpop.f32.mrb[1].mxu1  ;;  %v549_v56 = vadd.f32 %v2518_v49, %v2394_v51 }
 0x4b5   :  { %v544_v58 = vadd.f32 %v2394_v51, %v543_v50 }
 0x4b6   :  { %v565_v60 = vsel %vm176_vm0, %v549_v56, 0.0 }
 0x4b7   :  { %v2521_v52 = vpop.f32.mrb[2].mxu1  ;;  %v562_v61 = vsel %vm176_vm0, %v544_v58, 0.0 }
 0x4b8   :  { %v559_v53 = vadd.f32 %v2521_v52, %v2394_v51  ;;  %v553_v54 = vpop.f32.mrb[3].mxu1 }
 0x4b9   :  { %v554_v55 = vadd.f32 %v2394_v51, %v553_v54 }
 0x4ba   :  { %v571_v57 = vsel %vm176_vm0, %v559_v53, 0.0 }
 0x4bb   :  { %572 = vadd.xlane.f32.xlu0 %v571_v57  ;;  %v568_v59 = vsel %vm176_vm0, %v554_v55, 0.0  ;;  %v901_v37 = vpop.f32.mrb[4].mxu1  ;;  %v2400_v57 = vld [vmem:[%s2363_s10] ss:$0 sm:$0xff]  ;;  %s2371_s10 = sld [smem:[%s3204_s0 + %s2850_s5]]  }
 0x4bc   :  { %569 = vadd.xlane.f32.xlu1 %v568_v59  ;;  %v2979_v38 = vadd.f32 %v2976_v36, %v901_v37  ;;  %v2542_v39 = vpop.f32.mrb[5].mxu1 }
 0x4bf   :  { %566 = vadd.xlane.f32.xlu0 %v565_v60 }
 0x4c0   :  { %563 = vadd.xlane.f32.xlu1 %v562_v61 }
 0x548   :  { %v573_v3 = vpop.xlane.xlu0 %572 }
 0x549   :  { %v577_v4 = vmul.f32 0.0625, %v573_v3  ;;  %v570_v6 = vpop.xlane.xlu1 %569 }
 0x54a   :  { %v576_v7 = vmul.f32 0.0625, %v570_v6 }
 0x54b   :  { %v581_v9 = vsub.f32 %v559_v53, %v577_v4  ;;  %v2399_v53 = vld [vmem:[%s2362_s3] ss:$0 sm:$0xff]  ;;  %s2370_s3 = sld [smem:[%s3204_s0 + %s2849_s30]]  }
 0x54c   :  { %v580_v12 = vsub.f32 %v554_v55, %v576_v7  ;;  %v567_v13 = vpop.xlane.xlu0 %566 }
 0x54d   :  { %v575_v14 = vmul.f32 0.0625, %v567_v13  ;;  %v564_v16 = vpop.xlane.xlu1 %563  ;;  %v585_v19 = vmul.f32 %v581_v9, %v581_v9 }
 0x54e   :  { %v574_v20 = vmul.f32 0.0625, %v564_v16  ;;  %v584_v21 = vmul.f32 %v580_v12, %v580_v12 }
 0x54f   :  { %v579_v22 = vsub.f32 %v549_v56, %v575_v14  ;;  %v595_v23 = vsel %vm176_vm0, %v585_v19, 0.0 }
 0x550   :  { %v578_v24 = vsub.f32 %v544_v58, %v574_v20  ;;  %596 = vadd.xlane.f32.xlu0 %v595_v23  ;;  %v592_v25 = vsel %vm176_vm0, %v584_v21, 0.0 }
 0x551   :  { %593 = vadd.xlane.f32.xlu1 %v592_v25  ;;  %v583_v26 = vmul.f32 %v579_v22, %v579_v22 }
 0x552   :  { %v582_v27 = vmul.f32 %v578_v24, %v578_v24 }
 0x553   :  { %v589_v28 = vsel %vm176_vm0, %v583_v26, 0.0 }
 0x554   :  { %590 = vadd.xlane.f32.xlu0 %v589_v28  ;;  %v586_v29 = vsel %vm176_vm0, %v582_v27, 0.0 }
 0x555   :  { %587 = vadd.xlane.f32.xlu1 %v586_v29 }
 0x566   :  { %913 = vrot.lane.b32.xlu1 %v2979_v38, %s2840_s29 }
 0x5dd   :  { %v597_v40 = vpop.xlane.xlu0 %596 }
 0x5de   :  { %v601_v41 = vmul.f32 0.0625, %v597_v40  ;;  %v594_v42 = vpop.xlane.xlu1 %593 }
 0x5df   :  { %v600_v43 = vmul.f32 0.0625, %v594_v42 }
 0x5e0   :  { %v605_v44 = vadd.f32 1e-05, %v601_v41 }
 0x5e1   :  { %v604_v45 = vadd.f32 1e-05, %v600_v43  ;;  %v591_v46 = vpop.xlane.xlu0 %590 }
 0x5e2   :  { %2735 = vrsqrt.f32 %v605_v44  ;;  %v599_v47 = vmul.f32 0.0625, %v591_v46  ;;  %v588_v48 = vpop.xlane.xlu1 %587 }
 0x5e3   :  { %2737 = vrsqrt.f32 %v604_v45  ;;  %v598_v49 = vmul.f32 0.0625, %v588_v48 }
 0x5e4   :  { %v603_v50 = vadd.f32 1e-05, %v599_v47 }
 0x5e5   :  { %v602_v51 = vadd.f32 1e-05, %v598_v49 }
 0x5e6   :  { %2739 = vrsqrt.f32 %v603_v50  ;;  %v914_v33 = vpop.permute.xlu1 %913 }
 0x5e7   :  { %2741 = vrsqrt.f32 %v602_v51 }
 0x5ec   :  { %v2736_v52 = vpop.eup %2735 }
 0x5ed   :  { %v2738_v54 = vpop.eup %2737  ;;  %v613_v55 = vmul.f32 %v2736_v52, %v581_v9 }
 0x5ee   :  { %v612_v56 = vmul.f32 %v2738_v54, %v580_v12 }
 0x5ef   :  { %v624_v58 = vmul.f32 %v2399_v53, %v613_v55 }
 0x5f0   :  { %v2740_v59 = vpop.eup %2739  ;;  %v623_v60 = vmul.f32 %v2399_v53, %v612_v56 }
 0x5f1   :  { %v2742_v61 = vpop.eup %2741  ;;  %v611_v0 = vmul.f32 %v2740_v59, %v579_v22  ;;  %v635_v1 = vadd.f32 %v2400_v57, %v624_v58 }
 0x5f2   :  { %v634_v3 = vadd.f32 %v2400_v57, %v623_v60  ;;  %v610_v4 = vmul.f32 %v2742_v61, %v578_v24  ;;  %v2405_v24 = vld [vmem:[%s2366_s14] ss:$0 sm:$0xff]  ;;  %s2373_s14 = sld [smem:[%s3204_s0 + %s2851_s11]]  }
 0x5f3   :  { %v643_v6 = vmul.f32 0.01, %v635_v1  ;;  %v622_v7 = vmul.f32 %v2399_v53, %v611_v0  ;;  %vm639_vm11 = vcmp.ge.f32.partialorder %v635_v1, 0.0  ;;  %s2378_s11 = sld [smem:[%s3204_s0 + %s2857_s8]]  }
 0x5f4   :  { %vm638_vm10 = vcmp.ge.f32.partialorder %v634_v3, 0.0  ;;  %v642_v13 = vmul.f32 0.01, %v634_v3  ;;  %v621_v14 = vmul.f32 %v2399_v53, %v610_v4 }
 0x5f5   :  { %v647_v9 = vsel %vm639_vm11, %v635_v1, %v643_v6  ;;  %v633_v12 = vadd.f32 %v2400_v57, %v622_v7  ;;  %vm2327_vm11 = vcmask 130112  }
 0x5f6   :  { %v646_v16 = vsel %vm638_vm10, %v634_v3, %v642_v13  ;;  %v632_v19 = vadd.f32 %v2400_v57, %v621_v14 }
 0x5f7   :  { %2526 = vmatprep.mubr.msk.f32.mxu0 %vm176_vm0, %v646_v16  ;;  %v641_v22 = vmul.f32 0.01, %v633_v12  ;;  %vm637_vm13 = vcmp.ge.f32.partialorder %v633_v12, 0.0 }
 0x5f8   :  { %2527 = vmatmul.mubr.msk.f32.vlgmr.msra.gmra.mrb[4].mxu0 %vm176_vm0, %v647_v9  ;;  %vm636_vm12 = vcmp.ge.f32.partialorder %v632_v19, 0.0  ;;  %v640_v20 = vmul.f32 0.01, %v632_v19 }
 0x5f9   :  { %2635 = vmatpush3.bf16.msra.mxu0 %v2632_v35  ;;  %v645_v23 = vsel %vm637_vm13, %v633_v12, %v641_v22  ;;  %vm2345_vm13 = vcmask 179336  }
 0x5fa   :  { %v644_v21 = vsel %vm636_vm12, %v632_v19, %v640_v20  ;;  %2642 = vmatprep.subr.bf16.mxu0 %v2834_v62  ;;  %vm2336_vm12 = vcmask 138368  }
 0x5fb   :  { %2533 = vmatprep.mubr.msk.f32.mxu0 %vm176_vm0, %v644_v21 }
 0x600   :  { %2534 = vmatmul.mubr.msk.f32.vlgmr.msra.gmra.mrb[4].mxu0 %vm176_vm0, %v645_v23 }
 0x601   :  { %2644 = vmatpush3.bf16.msra.mxu0 %v2956_v2  ;;  %2554 = vmatprep.mubr.msk.f32.mxu0 %vm2836_vm9, %v2837_v63 }
 0x602   :  { %2648 = vmatprep.subr.bf16.mxu0 %v2834_v62 }
 0x6d3   :  { %v2535_v25 = vpop.f32.mrb[4].mxu0 }
 0x6d4   :  { %v3001_v26 = vadd.f32 %v2535_v25, %v2405_v24  ;;  %v805_v27 = vpop.f32.mrb[5].mxu0 }
 0x6d5   :  { %v3003_v28 = vadd.f32 %v2405_v24, %v805_v27 }
 0x6d7   :  { %v905_v29 = vadd.f32 %v2979_v38, %v3003_v28 }
 0x6d9   :  { %v2407_v30 = vmul.f32 -1.442695, %v905_v29 }
 0x6db   :  { %2743 = vpow2.f32 %v2407_v30 }
 0x6e5   :  { %v2744_v31 = vpop.eup %2743 }
 0x6e6   :  { %v909_v32 = vadd.f32 1.0, %v2744_v31 }
 0x6e8   :  { %2745 = vrcp.f32 %v909_v32 }
 0x6f2   :  { %v2746_v34 = vpop.eup %2745 }
 0x6f3   :  { %v916_v35 = vmul.f32 %v2746_v34, %v914_v33  ;;  %v923_v38 = vsub.f32 1.0, %v2746_v34  ;;  %v929_v42 = vmul.f32 0.0, %v2746_v34 }
 0x6f5   :  { %918 = vrot.lane.b32.xlu0 %v916_v35, %s2844_s15 }
 0x767   :  { %v919_v37 = vpop.permute.xlu0 %918 }
 0x768   :  { %v921_v39 = vadd.f32 %v919_v37, %v3003_v28 }
 0x76a   :  { %2747 = vtanh.f32 %v921_v39 }
 0x774   :  { %v2748_v40 = vpop.eup %2747 }
 0x775   :  { %925 = vrot.lane.b32.xlu1 %v2748_v40, %s2845_s16 }
 0x7e7   :  { %v926_v41 = vpop.permute.xlu1 %925 }
 0x7e8   :  { %v928_v43 = vmul.f32 %v926_v41, %v923_v38 }
 0x7ea   :  { %v930_v44 = vadd.f32 %v929_v42, %v928_v43 }
 0x7ec   :  { %932 = vrot.lane.b32.xlu1 %v930_v44, %s2845_s16  ;;  %v1035_v60 = vrot.slane %v930_v44, 6 }
 0x85e   :  { %v933_v45 = vpop.permute.xlu1 %932 }
 0x85f   :  { %936 = vst.msk [vmem:[#allocation2] sm:$0x3] %vm935_vm14, %v933_v45  ;;  %2548 = vmatmul.mubr.msk.f32.vlgmr.msra.gmra.mrb[6].mxu1 %vm176_vm0, %v933_v45 }
 0x860   :  { %2647 = vmatpush3.bf16.msra.mxu1 %v2956_v2  ;;  %2561 = vmatprep.mubr.msk.f32.mxu1 %vm2836_vm9, %v2837_v63 }
 0x861   :  { %2651 = vmatprep.subr.bf16.mxu1 %v2834_v62 }
 0x932   :  { %v1005_v46 = vpop.f32.mrb[6].mxu1 }
 0x933   :  { %v1006_v47 = vadd.f32 %v2976_v36, %v1005_v46  ;;  %v2549_v48 = vpop.f32.mrb[7].mxu1 }
 0x935   :  { %v1010_v49 = vrot.slane %v1006_v47, 6 }
 0x937   :  { %1019 = vrot.lane.b32.xlu0 %v1010_v49, %s2840_s29  ;;  %v1012_v50 = vadd.f32 %v1010_v49, %v3003_v28 }
 0x939   :  { %v2409_v51 = vmul.f32 -1.442695, %v1012_v50 }
 0x93b   :  { %2749 = vpow2.f32 %v2409_v51 }
 0x945   :  { %v2750_v52 = vpop.eup %2749 }
 0x946   :  { %v1016_v53 = vadd.f32 1.0, %v2750_v52 }
 0x948   :  { %2751 = vrcp.f32 %v1016_v53 }
 0x952   :  { %v2752_v54 = vpop.eup %2751 }
 0x953   :  { %v1029_v61 = vsub.f32 1.0, %v2752_v54  ;;  %v1037_v3 = vmul.f32 %v2752_v54, %v1035_v60 }
 0x9a9   :  { %v1020_v55 = vpop.permute.xlu0 %1019 }
 0x9aa   :  { %v1022_v56 = vmul.f32 %v2752_v54, %v1020_v55 }
 0x9ac   :  { %1024 = vrot.lane.b32.xlu1 %v1022_v56, %s2844_s15 }
 0xa1e   :  { %v1025_v57 = vpop.permute.xlu1 %1024 }
 0xa1f   :  { %v1027_v58 = vadd.f32 %v1025_v57, %v3003_v28 }
 0xa21   :  { %2753 = vtanh.f32 %v1027_v58 }
 0xa2b   :  { %v2754_v59 = vpop.eup %2753 }
 0xa2c   :  { %1031 = vrot.lane.b32.xlu0 %v2754_v59, %s2845_s16 }
 0xa9e   :  { %v1032_v0 = vpop.permute.xlu0 %1031 }
 0xa9f   :  { %v1034_v1 = vmul.f32 %v1032_v0, %v1029_v61 }
 0xaa1   :  { %v3023_v4 = vadd.f32 %v1037_v3, %v1034_v1 }
 0xaa3   :  { %v1045_v6 = vrot.slane %v3023_v4, 2  ;;  %v1146_v31 = vrot.slane %v3023_v4, 6 }
 0xaa5   :  { %1046 = vrot.lane.b32.xlu1 %v1045_v6, %s2845_s16 }
 0xb17   :  { %v1047_v7 = vpop.permute.xlu1 %1046 }
 0xb18   :  { %2555 = vmatmul.mubr.msk.f32.vlgmr.msra.gmra.mrb[6].mxu0 %vm176_vm0, %v1047_v7 }
 0xb19   :  { %2650 = vmatpush3.bf16.msra.mxu0 %v2956_v2  ;;  %2568 = vmatprep.mubr.msk.f32.mxu0 %vm2836_vm9, %v2837_v63 }
 0xb1a   :  { %2654 = vmatprep.subr.bf16.mxu0 %v2834_v62 }
 0xbeb   :  { %v1116_v13 = vpop.f32.mrb[6].mxu0 }
 0xbec   :  { %v1117_v14 = vadd.f32 %v2976_v36, %v1116_v13  ;;  %v2556_v16 = vpop.f32.mrb[7].mxu0 }
 0xbee   :  { %v1121_v19 = vrot.slane %v1117_v14, 4 }
 0xbf0   :  { %1130 = vrot.lane.b32.xlu0 %v1121_v19, %s2840_s29  ;;  %v1123_v9 = vadd.f32 %v1121_v19, %v3003_v28 }
 0xbf2   :  { %v2411_v12 = vmul.f32 -1.442695, %v1123_v9 }
 0xbf4   :  { %2755 = vpow2.f32 %v2411_v12 }
 0xbfe   :  { %v2756_v20 = vpop.eup %2755 }
 0xbff   :  { %v1127_v21 = vadd.f32 1.0, %v2756_v20 }
 0xc01   :  { %2757 = vrcp.f32 %v1127_v21 }
 0xc0b   :  { %v2758_v22 = vpop.eup %2757 }
 0xc0c   :  { %v1140_v30 = vsub.f32 1.0, %v2758_v22  ;;  %v1148_v33 = vmul.f32 %v2758_v22, %v1146_v31 }
 0xc62   :  { %v1131_v23 = vpop.permute.xlu0 %1130 }
 0xc63   :  { %v1133_v24 = vmul.f32 %v2758_v22, %v1131_v23 }
 0xc65   :  { %1135 = vrot.lane.b32.xlu1 %v1133_v24, %s2844_s15 }
 0xcd7   :  { %v1136_v25 = vpop.permute.xlu1 %1135 }
 0xcd8   :  { %v1138_v27 = vadd.f32 %v1136_v25, %v3003_v28 }
 0xcda   :  { %2759 = vtanh.f32 %v1138_v27 }
 0xce4   :  { %v2760_v29 = vpop.eup %2759 }
 0xce5   :  { %1142 = vrot.lane.b32.xlu0 %v2760_v29, %s2845_s16 }
 0xd57   :  { %v1143_v32 = vpop.permute.xlu0 %1142 }
 0xd58   :  { %v1145_v34 = vmul.f32 %v1143_v32, %v1140_v30 }
 0xd5a   :  { %v3039_v35 = vadd.f32 %v1148_v33, %v1145_v34 }
 0xd5c   :  { %v1156_v37 = vrot.slane %v3039_v35, 4  ;;  %v1257_v53 = vrot.slane %v3039_v35, 6 }
 0xd5e   :  { %1157 = vrot.lane.b32.xlu1 %v1156_v37, %s2845_s16 }
 0xdd0   :  { %v1158_v39 = vpop.permute.xlu1 %1157 }
 0xdd1   :  { %2562 = vmatmul.mubr.msk.f32.vlgmr.msra.gmra.mrb[8].mxu1 %vm176_vm0, %v1158_v39 }
 0xdd2   :  { %2653 = vmatpush3.bf16.msra.mxu1 %v2956_v2  ;;  %2575 = vmatprep.mubr.msk.f32.mxu1 %vm2836_vm9, %v2837_v63 }
 0xdd3   :  { %2657 = vmatprep.subr.bf16.mxu1 %v2834_v62 }
 0xea4   :  { %v1227_v40 = vpop.f32.mrb[8].mxu1 }
 0xea5   :  { %v1228_v38 = vadd.f32 %v2976_v36, %v1227_v40  ;;  %v2563_v41 = vpop.f32.mrb[9].mxu1 }
 0xea7   :  { %v1232_v42 = vrot.slane %v1228_v38, 2 }
 0xea9   :  { %1241 = vrot.lane.b32.xlu0 %v1232_v42, %s2840_s29  ;;  %v1234_v43 = vadd.f32 %v1232_v42, %v3003_v28 }
 0xeab   :  { %v2413_v44 = vmul.f32 -1.442695, %v1234_v43 }
 0xead   :  { %2761 = vpow2.f32 %v2413_v44 }
 0xeb7   :  { %v2762_v45 = vpop.eup %2761 }
 0xeb8   :  { %v1238_v46 = vadd.f32 1.0, %v2762_v45 }
 0xeba   :  { %2763 = vrcp.f32 %v1238_v46 }
 0xec4   :  { %v2764_v47 = vpop.eup %2763 }
 0xec5   :  { %v1251_v52 = vsub.f32 1.0, %v2764_v47  ;;  %v1259_v55 = vmul.f32 %v2764_v47, %v1257_v53 }
 0xf1b   :  { %v1242_v48 = vpop.permute.xlu0 %1241 }
 0xf1c   :  { %v1244_v49 = vmul.f32 %v2764_v47, %v1242_v48 }
 0xf1e   :  { %1246 = vrot.lane.b32.xlu1 %v1244_v49, %s2844_s15 }
 0xf90   :  { %v1247_v62 = vpop.permute.xlu1 %1246 }
 0xf91   :  { %v1249_v50 = vadd.f32 %v1247_v62, %v3003_v28 }
 0xf93   :  { %2765 = vtanh.f32 %v1249_v50 }
 0xf9d   :  { %v2766_v51 = vpop.eup %2765 }
 0xf9e   :  { %1253 = vrot.lane.b32.xlu0 %v2766_v51, %s2845_s16 }
0x1010   :  { %v1254_v54 = vpop.permute.xlu0 %1253 }
0x1011   :  { %v1256_v56 = vmul.f32 %v1254_v54, %v1251_v52 }
0x1013   :  { %v3055_v57 = vadd.f32 %v1259_v55, %v1256_v56 }
0x1015   :  { %v1267_v58 = vrot.slane %v3055_v57, 6 }
0x1017   :  { %1268 = vrot.lane.b32.xlu1 %v1267_v58, %s2845_s16 }
0x1089   :  { %v1269_v59 = vpop.permute.xlu1 %1268 }
0x108a   :  { %2569 = vmatmul.mubr.msk.f32.vlgmr.msra.gmra.mrb[8].mxu0 %vm176_vm0, %v1269_v59 }
0x108b   :  { %2656 = vmatpush3.bf16.msra.mxu0 %v2956_v2  ;;  %2582 = vmatprep.mubr.msk.f32.mxu0 %vm2836_vm9, %v2837_v63 }
0x115d   :  { %v1338_v28 = vpop.f32.mrb[8].mxu0 }
0x115e   :  { %v1339_v60 = vadd.f32 %v2976_v36, %v1338_v28  ;;  %v2570_v61 = vpop.f32.mrb[9].mxu0 }
0x1160   :  { %1350 = vrot.lane.b32.xlu0 %v1339_v60, %s2840_s29  ;;  %v1342_v0 = vadd.f32 %v1339_v60, %v3001_v26 }
0x1162   :  { %v2415_v1 = vmul.f32 -1.442695, %v1342_v0 }
0x1164   :  { %2767 = vpow2.f32 %v2415_v1 }
0x116e   :  { %v2768_v3 = vpop.eup %2767 }
0x116f   :  { %v1346_v6 = vadd.f32 1.0, %v2768_v3 }
0x1171   :  { %2769 = vrcp.f32 %v1346_v6 }
0x117b   :  { %v2770_v7 = vpop.eup %2769 }
0x117c   :  { %v1360_v12 = vsub.f32 1.0, %v2770_v7  ;;  %v1367_v21 = vmul.f32 %v2770_v7, %v1267_v58 }
0x11d2   :  { %v1351_v13 = vpop.permute.xlu0 %1350 }
0x11d3   :  { %v1353_v14 = vmul.f32 %v2770_v7, %v1351_v13 }
0x11d5   :  { %1355 = vrot.lane.b32.xlu1 %v1353_v14, %s2844_s15 }
0x1247   :  { %v1356_v16 = vpop.permute.xlu1 %1355 }
0x1248   :  { %v1358_v19 = vadd.f32 %v1356_v16, %v3001_v26 }
0x124a   :  { %2771 = vtanh.f32 %v1358_v19 }
0x1254   :  { %v2772_v9 = vpop.eup %2771 }
0x1255   :  { %1362 = vrot.lane.b32.xlu0 %v2772_v9, %s2845_s16 }
0x12c7   :  { %v1363_v20 = vpop.permute.xlu0 %1362 }
0x12c8   :  { %v1365_v22 = vmul.f32 %v1363_v20, %v1360_v12 }
0x12ca   :  { %v1368_v23 = vadd.f32 %v1367_v21, %v1365_v22 }
0x12cc   :  { %1370 = vrot.lane.b32.xlu1 %v1368_v23, %s2845_s16  ;;  %v1472_v42 = vrot.slane %v1368_v23, 6 }
0x133e   :  { %v1371_v24 = vpop.permute.xlu1 %1370 }
0x133f   :  { %1373 = vst.msk [vmem:[#allocation2 + $0x8] sm:$0x3] %vm935_vm14, %v1371_v24  ;;  %2576 = vmatmul.mubr.msk.f32.vlgmr.msra.gmra.mrb[10].mxu1 %vm176_vm0, %v1371_v24 }
0x1340   :  { %2659 = vmatpush3.bf16.msra.mxu1 %v2956_v2  ;;  %2589 = vmatprep.mubr.msk.f32.mxu1 %vm2836_vm9, %v2837_v63 }
0x1412   :  { %v1442_v25 = vpop.f32.mrb[10].mxu1 }
0x1413   :  { %v1443_v27 = vadd.f32 %v2976_v36, %v1442_v25  ;;  %v2577_v29 = vpop.f32.mrb[11].mxu1 }
0x1415   :  { %v1447_v30 = vrot.slane %v1443_v27, 6 }
0x1417   :  { %1456 = vrot.lane.b32.xlu0 %v1447_v30, %s2840_s29  ;;  %v1449_v31 = vadd.f32 %v1447_v30, %v3001_v26 }
0x1419   :  { %v2417_v32 = vmul.f32 -1.442695, %v1449_v31 }
0x141b   :  { %2773 = vpow2.f32 %v2417_v32 }
0x1425   :  { %v2774_v33 = vpop.eup %2773 }
0x1426   :  { %v1453_v34 = vadd.f32 1.0, %v2774_v33 }
0x1428   :  { %2775 = vrcp.f32 %v1453_v34 }
0x1432   :  { %v2776_v37 = vpop.eup %2775 }
0x1433   :  { %v1466_v43 = vsub.f32 1.0, %v2776_v37  ;;  %v1474_v46 = vmul.f32 %v2776_v37, %v1472_v42 }
0x1489   :  { %v1457_v39 = vpop.permute.xlu0 %1456 }
0x148a   :  { %v1459_v2 = vmul.f32 %v2776_v37, %v1457_v39 }
0x148c   :  { %1461 = vrot.lane.b32.xlu1 %v1459_v2, %s2844_s15 }
0x14fe   :  { %v1462_v40 = vpop.permute.xlu1 %1461 }
0x14ff   :  { %v1464_v38 = vadd.f32 %v1462_v40, %v3001_v26 }
0x1501   :  { %2777 = vtanh.f32 %v1464_v38 }
0x150b   :  { %v2778_v41 = vpop.eup %2777 }
0x150c   :  { %1468 = vrot.lane.b32.xlu0 %v2778_v41, %s2845_s16 }
0x157e   :  { %v1469_v44 = vpop.permute.xlu0 %1468 }
0x157f   :  { %v1471_v45 = vmul.f32 %v1469_v44, %v1466_v43 }
0x1581   :  { %v3081_v47 = vadd.f32 %v1474_v46, %v1471_v45 }
0x1583   :  { %v1481_v48 = vrot.slane %v3081_v47, 2  ;;  %v1582_v3 = vrot.slane %v3081_v47, 6 }
0x1585   :  { %1482 = vrot.lane.b32.xlu1 %v1481_v48, %s2845_s16 }
0x15f7   :  { %v1483_v49 = vpop.permute.xlu1 %1482 }
0x15f8   :  { %2583 = vmatmul.mubr.msk.f32.vlgmr.msra.gmra.mrb[10].mxu0 %vm176_vm0, %v1483_v49  ;;  %v1705_v49 = vld [vmem:[%s2368_s20 + $0x10] sm:$0x3] }
0x16cb   :  { %v1552_v62 = vpop.f32.mrb[10].mxu0 }
0x16cc   :  { %v1553_v50 = vadd.f32 %v2976_v36, %v1552_v62  ;;  %v2584_v51 = vpop.f32.mrb[11].mxu0 }
0x16ce   :  { %v1557_v52 = vrot.slane %v1553_v50, 4 }
0x16d0   :  { %1566 = vrot.lane.b32.xlu0 %v1557_v52, %s2840_s29  ;;  %v1559_v53 = vadd.f32 %v1557_v52, %v3001_v26 }
0x16d2   :  { %v2419_v54 = vmul.f32 -1.442695, %v1559_v53 }
0x16d4   :  { %2779 = vpow2.f32 %v2419_v54 }
0x16de   :  { %v2780_v55 = vpop.eup %2779 }
0x16df   :  { %v1563_v56 = vadd.f32 1.0, %v2780_v55 }
0x16e1   :  { %2781 = vrcp.f32 %v1563_v56 }
0x16eb   :  { %v2782_v58 = vpop.eup %2781 }
0x16ec   :  { %v1576_v1 = vsub.f32 1.0, %v2782_v58  ;;  %v1584_v7 = vmul.f32 %v2782_v58, %v1582_v3 }
0x1742   :  { %v1567_v59 = vpop.permute.xlu0 %1566 }
0x1743   :  { %v1569_v28 = vmul.f32 %v2782_v58, %v1567_v59 }
0x1745   :  { %1571 = vrot.lane.b32.xlu1 %v1569_v28, %s2844_s15  ;;  %v2424_v28 = vld [vmem:[%s2369_s24] ss:$0 sm:$0xff] }
0x17b7   :  { %v1572_v60 = vpop.permute.xlu1 %1571 }
0x17b8   :  { %v1574_v61 = vadd.f32 %v1572_v60, %v3001_v26 }
0x17ba   :  { %2783 = vtanh.f32 %v1574_v61 }
0x17c4   :  { %v2784_v0 = vpop.eup %2783 }
0x17c5   :  { %1578 = vrot.lane.b32.xlu0 %v2784_v0, %s2845_s16 }
0x1837   :  { %v1579_v6 = vpop.permute.xlu0 %1578 }
0x1838   :  { %v1581_v13 = vmul.f32 %v1579_v6, %v1576_v1 }
0x183a   :  { %v1585_v14 = vadd.f32 %v1584_v7, %v1581_v13 }
0x183c   :  { %v1591_v16 = vrot.slane %v1585_v14, 4  ;;  %v1692_v2 = vrot.slane %v1585_v14, 6 }
0x183e   :  { %1592 = vrot.lane.b32.xlu1 %v1591_v16, %s2845_s16 }
0x18b0   :  { %v1593_v19 = vpop.permute.xlu1 %1592 }
0x18b1   :  { %2590 = vmatmul.mubr.msk.f32.vlgmr.msra.gmra.mrb[12].mxu1 %vm176_vm0, %v1593_v19 }
0x1984   :  { %v1662_v9 = vpop.f32.mrb[12].mxu1 }
0x1985   :  { %v1663_v12 = vadd.f32 %v2976_v36, %v1662_v9  ;;  %v2591_v20 = vpop.f32.mrb[13].mxu1 }
0x1987   :  { %v1667_v21 = vrot.slane %v1663_v12, 2 }
0x1989   :  { %1676 = vrot.lane.b32.xlu0 %v1667_v21, %s2840_s29  ;;  %v1669_v22 = vadd.f32 %v1667_v21, %v3001_v26  ;;  %s2372_s29 = sld [smem:[%s3204_s0 + %s2848_s26]]  }
0x198b   :  { %v2421_v23 = vmul.f32 -1.442695, %v1669_v22 }
0x198d   :  { %2785 = vpow2.f32 %v2421_v23 }
0x198f   :  { %v1860_v20 = vld [vmem:[%s2372_s29] sm:$0xff]  ;;  %v1861_v21 = vld [vmem:[%s2372_s29 + $0x8] sm:$0xff] }
0x1990   :  { %v2664_v22 = vpack.c.bf16 %v1861_v21, %v1860_v20 }
0x1992   :  { %2665 = vmatprep.subr.bf16.mxu1 %v2664_v22 }
0x1993   :  { %2667 = vmatpush3.bf16.msra.mxu1 %v2664_v22 }
0x1997   :  { %v2786_v24 = vpop.eup %2785 }
0x1998   :  { %v1673_v25 = vadd.f32 1.0, %v2786_v24 }
0x199a   :  { %2787 = vrcp.f32 %v1673_v25 }
0x19a4   :  { %v2788_v27 = vpop.eup %2787 }
0x19a5   :  { %v1686_v39 = vsub.f32 1.0, %v2788_v27  ;;  %v1694_v38 = vmul.f32 %v2788_v27, %v1692_v2 }
0x19fb   :  { %v1677_v29 = vpop.permute.xlu0 %1676 }
0x19fc   :  { %v1679_v30 = vmul.f32 %v2788_v27, %v1677_v29 }
0x19fe   :  { %1681 = vrot.lane.b32.xlu1 %v1679_v30, %s2844_s15  ;;  %s2852_s15 = smov 25  }
0x19ff   :  { %s2376_s18 = sld [smem:[%s3204_s0 + %s2852_s15]]  }
0x1a00   :  { %s2379_s15 = sld [smem:[%s3204_s0 + %s2858_s12]]  }
0x1a02   :  { %1040 = vrot.lane.b32.xlu1 %v3023_v4, %s2845_s16 }
0x1a06   :  { %1262 = vrot.lane.b32.xlu1 %v3055_v57, %s2845_s16  ;;  %v1704_v57 = vld [vmem:[%s2368_s20 + $0x8] sm:$0xff] }
0x1a0a   :  { %1587 = vrot.lane.b32.xlu1 %v1585_v14, %s2845_s16 }
0x1a70   :  { %v1682_v36 = vpop.permute.xlu1 %1681 }
0x1a71   :  { %v1684_v31 = vadd.f32 %v1682_v36, %v3001_v26  ;;  %v1703_v26 = vld [vmem:[%s2368_s20] sm:$0xff]  ;;  %s2860_s20 = smov 127  }
0x1a72   :  { %v2660_v37 = vpack.c.bf16 %v1704_v57, %v1703_v26 }
0x1a73   :  { %2789 = vtanh.f32 %v1684_v31  ;;  %v2425_v31 = vld [vmem:[%s2370_s3] ss:$0 sm:$0xff] }
0x1a74   :  { %v1041_v32 = vpop.permute.xlu1 %1040  ;;  %2661 = vmatprep.subr.bf16.mxu0 %v2660_v37 }
0x1a75   :  { %1044 = vst.msk [vmem:[#allocation2] sm:$0xc] %vm1043_vm15, %v1041_v32  ;;  %2663 = vmatpush3.bf16.msra.mxu0 %v2660_v37 }
0x1a78   :  { %v1263_v33 = vpop.permute.xlu1 %1262 }
0x1a79   :  { %1266 = vst.msk [vmem:[#allocation2] sm:$0xc0] %vm1265_vm1, %v1263_v33 }
0x1a7c   :  { %v1588_v34 = vpop.permute.xlu1 %1587 }
0x1a7d   :  { %v2790_v4 = vpop.eup %2789  ;;  %1590 = vst.msk [vmem:[#allocation2 + $0x8] sm:$0x30] %vm1154_vm2, %v1588_v34 }
0x1a7e   :  { %1688 = vrot.lane.b32.xlu0 %v2790_v4, %s2845_s16  ;;  %v2426_v4 = vld [vmem:[%s2371_s10] ss:$0 sm:$0xff] }
0x1a82   :  { %1151 = vrot.lane.b32.xlu0 %v3039_v35, %s2845_s16 }
0x1a86   :  { %1477 = vrot.lane.b32.xlu0 %v3081_v47, %s2845_s16  ;;  %v1707_v47 = vshrl.u32 %v1706_v5, 7 }
0x1a88   :  { %v1708_v48 = vsub.s32 0, %v1707_v47  ;;  %v1795_v62 = vsub.s32 1, %v1707_v47 }
0x1a8a   :  { %v1709_v50 = vrot.slane %v1705_v49, %v1708_v48  ;;  %v1796_v51 = vrot.slane %v1705_v49, %v1795_v62 }
0x1a8c   :  { %v1711_v52 = vmul.f32 %v1709_v50, %v2892_v18  ;;  %v1710_v54 = vmul.f32 %v1709_v50, %v2882_v11  ;;  %v1798_v55 = vmul.f32 %v1796_v51, %v2890_v17  ;;  %v1797_v5 = vmul.f32 %v1796_v51, %v2880_v10 }
0x1af0   :  { %v1689_v40 = vpop.permute.xlu0 %1688 }
0x1af1   :  { %v1691_v41 = vmul.f32 %v1689_v40, %v1686_v39 }
0x1af3   :  { %v1695_v42 = vadd.f32 %v1694_v38, %v1691_v41 }
0x1af4   :  { %v1152_v35 = vpop.permute.xlu0 %1151 }
0x1af5   :  { %1155 = vst.msk [vmem:[#allocation2] sm:$0x30] %vm1154_vm2, %v1152_v35  ;;  %1697 = vrot.lane.b32.xlu0 %v1695_v42, %s2845_s16  ;;  %v2427_v42 = vld [vmem:[%s2373_s14] ss:$0 sm:$0xff]  ;;  %s2859_s16 = smov 30  }
0x1af6   :  { %s2381_s19 = sld [smem:[%s3204_s0 + %s2859_s16]]  }
0x1af8   :  { %v1478_v43 = vpop.permute.xlu0 %1477 }
0x1af9   :  { %1480 = vst.msk [vmem:[#allocation2 + $0x8] sm:$0xc] %vm1043_vm15, %v1478_v43 }
0x1afc   :  { %v1701_v44 = vld [vmem:[#allocation2] sm:$0xff] }
0x1afd   :  { %2596 = vmatprep.mubr.msk.f32.mxu0 %vm176_vm0, %v1701_v44 }
0x1b67   :  { %v1698_v45 = vpop.permute.xlu0 %1697 }
0x1b68   :  { %1700 = vst.msk [vmem:[#allocation2 + $0x8] sm:$0xc0] %vm1265_vm1, %v1698_v45 }
0x1b6f   :  { %v1702_v46 = vld [vmem:[#allocation2 + $0x8] sm:$0xff] }
0x1b70   :  { %2597 = vmatmul.mubr.msk.f32.vlgmr.msra.gmra.mrb[12].mxu0 %vm176_vm0, %v1702_v46 }
0x1c43   :  { %v2598_v53 = vpop.f32.mrb[12].mxu0 }
0x1c44   :  { %v1790_v56 = vadd.f32 %v2598_v53, %v1711_v52  ;;  %v1784_v58 = vpop.f32.mrb[13].mxu0 }
0x1c45   :  { %v1785_v59 = vadd.f32 %v1784_v58, %v1710_v54  ;;  %v2000_v58 = vld [vmem:[%s2376_s18] sm:$0xff] }
0x1c46   :  { %v1800_v60 = vadd.f32 %v1798_v55, %v1790_v56 }
0x1c47   :  { %v1799_v61 = vadd.f32 %v1797_v5, %v1785_v59  ;;  %v2001_v5 = vld [vmem:[%s2376_s18 + $0x8] sm:$0xff] }
0x1c48   :  { %v1809_v0 = vadd.f32 %v2424_v28, %v1800_v60  ;;  %v2668_v59 = vpack.c.bf16 %v2001_v5, %v2000_v58 }
0x1c49   :  { %v1808_v1 = vadd.f32 %v2424_v28, %v1799_v61 }
0x1c4a   :  { %v1813_v3 = vsel %vm176_vm0, %v1809_v0, 0.0  ;;  %2669 = vmatprep.subr.bf16.mxu0 %v2668_v59 }
0x1c4b   :  { %1814 = vadd.xlane.f32.xlu0 %v1813_v3  ;;  %v1810_v6 = vsel %vm176_vm0, %v1808_v1, 0.0  ;;  %2671 = vmatpush3.bf16.msra.mxu0 %v2668_v59 }
0x1c4c   :  { %1811 = vadd.xlane.f32.xlu1 %v1810_v6 }
0x1cd8   :  { %v1815_v7 = vpop.xlane.xlu0 %1814 }
0x1cd9   :  { %v1817_v11 = vmul.f32 0.0625, %v1815_v7  ;;  %v1812_v13 = vpop.xlane.xlu1 %1811  ;;  %v2430_v7 = vld [vmem:[%s2374_s22] ss:$0 sm:$0xff] }
0x1cda   :  { %v1816_v17 = vmul.f32 0.0625, %v1812_v13 }
0x1cdb   :  { %v1819_v14 = vsub.f32 %v1809_v0, %v1817_v11 }
0x1cdc   :  { %v1818_v16 = vsub.f32 %v1808_v1, %v1816_v17 }
0x1cdd   :  { %v1821_v19 = vmul.f32 %v1819_v14, %v1819_v14 }
0x1cde   :  { %v1820_v10 = vmul.f32 %v1818_v16, %v1818_v16 }
0x1cdf   :  { %v1825_v9 = vsel %vm176_vm0, %v1821_v19, 0.0 }
0x1ce0   :  { %1826 = vadd.xlane.f32.xlu1 %v1825_v9  ;;  %v1822_v12 = vsel %vm176_vm0, %v1820_v10, 0.0 }
0x1ce1   :  { %1823 = vadd.xlane.f32.xlu0 %v1822_v12 }
0x1d6d   :  { %v1827_v23 = vpop.xlane.xlu1 %1826 }
0x1d6e   :  { %v1829_v24 = vmul.f32 0.0625, %v1827_v23  ;;  %v1824_v25 = vpop.xlane.xlu0 %1823  ;;  %v2432_v23 = vld [vmem:[%s2377_s1] ss:$0 sm:$0xff] }
0x1d6f   :  { %v1828_v27 = vmul.f32 0.0625, %v1824_v25 }
0x1d70   :  { %v1831_v29 = vadd.f32 1e-05, %v1829_v24 }
0x1d71   :  { %v1830_v30 = vadd.f32 1e-05, %v1828_v27 }
0x1d72   :  { %2791 = vrsqrt.f32 %v1831_v29 }
0x1d73   :  { %2793 = vrsqrt.f32 %v1830_v30 }
0x1d7c   :  { %v2792_v36 = vpop.eup %2791 }
0x1d7d   :  { %v2794_v32 = vpop.eup %2793  ;;  %v1835_v33 = vmul.f32 %v2792_v36, %v1819_v14  ;;  %v2431_v14 = vld [vmem:[%s2375_s27] ss:$0 sm:$0xff] }
0x1d7e   :  { %v1834_v34 = vmul.f32 %v2794_v32, %v1818_v16 }
0x1d7f   :  { %v1844_v26 = vmul.f32 %v2425_v31, %v1835_v33 }
0x1d80   :  { %v1843_v57 = vmul.f32 %v2425_v31, %v1834_v34 }
0x1d81   :  { %v1853_v37 = vadd.f32 %v2426_v4, %v1844_v26 }
0x1d82   :  { %v1852_v39 = vadd.f32 %v2426_v4, %v1843_v57 }
0x1d83   :  { %v1857_v2 = vmul.f32 0.01, %v1853_v37  ;;  %vm1855_vm4 = vcmp.ge.f32.partialorder %v1853_v37, 0.0 }
0x1d84   :  { %vm1854_vm3 = vcmp.ge.f32.partialorder %v1852_v39, 0.0  ;;  %v1856_v40 = vmul.f32 0.01, %v1852_v39 }
0x1d85   :  { %v1859_v41 = vsel %vm1855_vm4, %v1853_v37, %v1857_v2 }
0x1d86   :  { %v1858_v38 = vsel %vm1854_vm3, %v1852_v39, %v1856_v40  ;;  %v2261_v40 = vmul.f32 %v2878_v8, %v2892_v18  ;;  %v2141_v8 = vld [vmem:[%s2380_s7 + $0x8] sm:$0xff] }
0x1d87   :  { %2603 = vmatprep.mubr.msk.f32.mxu1 %vm176_vm0, %v1858_v38 }
0x1d88   :  { %2604 = vmatmul.mubr.msk.f32.vlgmr.msra.gmra.mrb[14].mxu1 %vm176_vm0, %v1859_v41  ;;  %vm2263_vm7 = vcmp.lt.f32.partialorder %v2261_v40, 8.0 }
0x1d89   :  { %v2265_v38 = vsel %vm2263_vm7, 1.0, %v2837_v63 }
0x1d8a   :  { %v2267_v41 = vadd.f32 0.0001, %v2265_v38 }
0x1e5b   :  { %v2605_v35 = vpop.f32.mrb[14].mxu1 }
0x1e5c   :  { %v1947_v43 = vadd.f32 %v2605_v35, %v2427_v42  ;;  %v1941_v44 = vpop.f32.mrb[15].mxu1 }
0x1e5d   :  { %v1942_v45 = vadd.f32 %v2427_v42, %v1941_v44  ;;  %v2264_v42 = vsel %vm2262_vm8, 1.0, %v2837_v63 }
0x1e5e   :  { %v1953_v46 = vsel %vm176_vm0, %v1947_v43, 0.0  ;;  %v2266_v35 = vadd.f32 0.0001, %v2264_v42 }
0x1e5f   :  { %1954 = vadd.xlane.f32.xlu1 %v1953_v46  ;;  %v1950_v47 = vsel %vm176_vm0, %v1942_v45, 0.0 }
0x1e60   :  { %1951 = vadd.xlane.f32.xlu0 %v1950_v47 }
0x1eec   :  { %v1955_v48 = vpop.xlane.xlu1 %1954 }
0x1eed   :  { %v1957_v49 = vmul.f32 0.0625, %v1955_v48  ;;  %v1952_v62 = vpop.xlane.xlu0 %1951 }
0x1eee   :  { %v1956_v50 = vmul.f32 0.0625, %v1952_v62 }
0x1eef   :  { %v1959_v51 = vsub.f32 %v1947_v43, %v1957_v49  ;;  %v2140_v43 = vld [vmem:[%s2380_s7] sm:$0xff] }
0x1ef0   :  { %v1958_v52 = vsub.f32 %v1942_v45, %v1956_v50  ;;  %v2672_v18 = vpack.c.bf16 %v2141_v8, %v2140_v43  ;;  %v2435_v49 = vld [vmem:[%s2378_s11] ss:$0 sm:$0xff] }
0x1ef1   :  { %v1961_v53 = vmul.f32 %v1959_v51, %v1959_v51 }
0x1ef2   :  { %v1960_v54 = vmul.f32 %v1958_v52, %v1958_v52  ;;  %2673 = vmatprep.subr.bf16.mxu1 %v2672_v18 }
0x1ef3   :  { %v1965_v55 = vsel %vm176_vm0, %v1961_v53, 0.0  ;;  %2675 = vmatpush3.bf16.msra.mxu1 %v2672_v18 }
0x1ef4   :  { %1966 = vadd.xlane.f32.xlu1 %v1965_v55  ;;  %v1962_v56 = vsel %vm176_vm0, %v1960_v54, 0.0 }
0x1ef5   :  { %1963 = vadd.xlane.f32.xlu0 %v1962_v56 }
0x1f81   :  { %v1967_v28 = vpop.xlane.xlu1 %1966 }
0x1f82   :  { %v1969_v60 = vmul.f32 0.0625, %v1967_v28  ;;  %v1964_v61 = vpop.xlane.xlu0 %1963 }
0x1f83   :  { %v1968_v0 = vmul.f32 0.0625, %v1964_v61 }
0x1f84   :  { %v1971_v1 = vadd.f32 1e-05, %v1969_v60  ;;  %v2437_v60 = vld [vmem:[%s2381_s19] ss:$0 sm:$0xff] }
0x1f85   :  { %v1970_v3 = vadd.f32 1e-05, %v1968_v0 }
0x1f86   :  { %2795 = vrsqrt.f32 %v1971_v1 }
0x1f87   :  { %2797 = vrsqrt.f32 %v1970_v3 }
0x1f90   :  { %v2796_v6 = vpop.eup %2795 }
0x1f91   :  { %v2798_v11 = vpop.eup %2797  ;;  %v1975_v13 = vmul.f32 %v2796_v6, %v1959_v51 }
0x1f92   :  { %v1974_v17 = vmul.f32 %v2798_v11, %v1958_v52  ;;  %v2436_v52 = vld [vmem:[%s2379_s15] ss:$0 sm:$0xff] }
0x1f93   :  { %v1984_v16 = vmul.f32 %v2430_v7, %v1975_v13 }
0x1f94   :  { %v1983_v19 = vmul.f32 %v2430_v7, %v1974_v17 }
0x1f95   :  { %v1993_v10 = vadd.f32 %v2431_v14, %v1984_v16 }
0x1f96   :  { %v1992_v9 = vadd.f32 %v2431_v14, %v1983_v19 }
0x1f97   :  { %v1997_v12 = vmul.f32 0.01, %v1993_v10  ;;  %vm1995_vm6 = vcmp.ge.f32.partialorder %v1993_v10, 0.0 }
0x1f98   :  { %vm1994_vm5 = vcmp.ge.f32.partialorder %v1992_v9, 0.0  ;;  %v1996_v20 = vmul.f32 0.01, %v1992_v9 }
0x1f99   :  { %v1999_v22 = vsel %vm1995_vm6, %v1993_v10, %v1997_v12 }
0x1f9a   :  { %v1998_v21 = vsel %vm1994_vm5, %v1992_v9, %v1996_v20 }
0x1f9b   :  { %2610 = vmatprep.mubr.msk.f32.mxu0 %vm176_vm0, %v1998_v21 }
0x1f9c   :  { %2611 = vmatmul.mubr.msk.f32.vlgmr.msra.gmra.mrb[14].mxu0 %vm176_vm0, %v1999_v22 }
0x206f   :  { %v2612_v24 = vpop.f32.mrb[14].mxu0 }
0x2070   :  { %v2087_v25 = vadd.f32 %v2612_v24, %v2432_v23  ;;  %v2081_v27 = vpop.f32.mrb[15].mxu0 }
0x2071   :  { %v2082_v29 = vadd.f32 %v2432_v23, %v2081_v27 }
0x2072   :  { %v2093_v30 = vsel %vm176_vm0, %v2087_v25, 0.0 }
0x2073   :  { %2094 = vadd.xlane.f32.xlu1 %v2093_v30  ;;  %v2090_v36 = vsel %vm176_vm0, %v2082_v29, 0.0 }
0x2074   :  { %2091 = vadd.xlane.f32.xlu0 %v2090_v36 }
0x2100   :  { %v2095_v31 = vpop.xlane.xlu1 %2094 }
0x2101   :  { %v2097_v32 = vmul.f32 0.0625, %v2095_v31  ;;  %v2092_v33 = vpop.xlane.xlu0 %2091 }
0x2102   :  { %v2096_v34 = vmul.f32 0.0625, %v2092_v33 }
0x2103   :  { %v2099_v4 = vsub.f32 %v2087_v25, %v2097_v32 }
0x2104   :  { %v2098_v26 = vsub.f32 %v2082_v29, %v2096_v34 }
0x2105   :  { %v2101_v57 = vmul.f32 %v2099_v4, %v2099_v4 }
0x2106   :  { %v2100_v37 = vmul.f32 %v2098_v26, %v2098_v26 }
0x2107   :  { %v2105_v39 = vsel %vm176_vm0, %v2101_v57, 0.0 }
0x2108   :  { %2106 = vadd.xlane.f32.xlu1 %v2105_v39  ;;  %v2102_v2 = vsel %vm176_vm0, %v2100_v37, 0.0 }
0x2109   :  { %2103 = vadd.xlane.f32.xlu0 %v2102_v2 }
0x2119   :  { %2272 = vrot.lane.b32.xlu1 %v2267_v41, %s2824_s6 }
0x211f   :  { %2270 = vrot.lane.b32.xlu0 %v2266_v35, %s2824_s6 }
0x2195   :  { %v2107_v44 = vpop.xlane.xlu1 %2106 }
0x2196   :  { %v2109_v15 = vmul.f32 0.0625, %v2107_v44  ;;  %v2104_v45 = vpop.xlane.xlu0 %2103 }
0x2197   :  { %v2108_v46 = vmul.f32 0.0625, %v2104_v45 }
0x2198   :  { %v2111_v47 = vadd.f32 1e-05, %v2109_v15 }
0x2199   :  { %v2110_v48 = vadd.f32 1e-05, %v2108_v46  ;;  %v2273_v31 = vpop.permute.xlu1 %2272 }
0x219a   :  { %2799 = vrsqrt.f32 %v2111_v47  ;;  %v2271_v33 = vpop.permute.xlu0 %2270 }
0x219b   :  { %2801 = vrsqrt.f32 %v2110_v48 }
0x21a4   :  { %v2800_v63 = vpop.eup %2799 }
0x21a5   :  { %v2802_v62 = vpop.eup %2801  ;;  %v2115_v50 = vmul.f32 %v2800_v63, %v2099_v4 }
0x21a6   :  { %v2114_v51 = vmul.f32 %v2802_v62, %v2098_v26 }
0x21a7   :  { %v2124_v53 = vmul.f32 %v2435_v49, %v2115_v50 }
0x21a8   :  { %v2123_v54 = vmul.f32 %v2435_v49, %v2114_v51 }
0x21a9   :  { %v2133_v55 = vadd.f32 %v2436_v52, %v2124_v53 }
0x21aa   :  { %v2132_v56 = vadd.f32 %v2436_v52, %v2123_v54 }
0x21ab   :  { %v2137_v58 = vmul.f32 0.01, %v2133_v55  ;;  %vm2135_vm10 = vcmp.ge.f32.partialorder %v2133_v55, 0.0 }
0x21ac   :  { %vm2134_vm9 = vcmp.ge.f32.partialorder %v2132_v56, 0.0  ;;  %v2136_v5 = vmul.f32 0.01, %v2132_v56 }
0x21ad   :  { %v2139_v28 = vsel %vm2135_vm10, %v2133_v55, %v2137_v58 }
0x21ae   :  { %v2138_v59 = vsel %vm2134_vm9, %v2132_v56, %v2136_v5 }
0x21af   :  { %2617 = vmatprep.mubr.msk.f32.mxu1 %vm176_vm0, %v2138_v59 }
0x21b0   :  { %2618 = vmatmul.mubr.msk.f32.vlgmr.msra.gmra.mrb[16].mxu1 %vm176_vm0, %v2139_v28  ;;  %vm2286_vm0 = vcmask 64512  }
0x2283   :  { %v2619_v61 = vpop.f32.mrb[16].mxu1 }
0x2284   :  { %v2227_v0 = vadd.f32 %v2619_v61, %v2437_v60  ;;  %v2221_v1 = vpop.f32.mrb[17].mxu1 }
0x2285   :  { %v2222_v3 = vadd.f32 %v2437_v60, %v2221_v1 }
0x2286   :  { %v2441_v6 = vmul.f32 -1.442695, %v2227_v0 }
0x2287   :  { %v2440_v7 = vmul.f32 -1.442695, %v2222_v3 }
0x2288   :  { %2803 = vpow2.f32 %v2441_v6 }
0x2289   :  { %2805 = vpow2.f32 %v2440_v7 }
0x2292   :  { %v2804_v11 = vpop.eup %2803 }
0x2293   :  { %v2806_v13 = vpop.eup %2805  ;;  %v2237_v17 = vadd.f32 1.0, %v2804_v11 }
0x2294   :  { %v2236_v14 = vadd.f32 1.0, %v2806_v13 }
0x2295   :  { %2807 = vrcp.f32 %v2237_v17 }
0x2296   :  { %2809 = vrcp.f32 %v2236_v14 }
0x229f   :  { %v2808_v16 = vpop.eup %2807 }
0x22a0   :  { %v2810_v19 = vpop.eup %2809  ;;  %2811 = vlog2.f32 %v2808_v16 }
0x22a1   :  { %2813 = vlog2.f32 %v2810_v19 }
0x22aa   :  { %v2812_v10 = vpop.eup %2811 }
0x22ab   :  { %v2814_v9 = vpop.eup %2813  ;;  %v2245_v12 = vmul.f32 0.6931472, %v2812_v10 }
0x22ac   :  { %v2243_v20 = vmul.f32 0.6931472, %v2814_v9 }
0x22ad   :  { %v2247_v21 = vmul.f32 2.3025851, %v2245_v12 }
0x22ae   :  { %v2246_v22 = vmul.f32 2.3025851, %v2243_v20 }
0x22af   :  { %v2250_v23 = vmul.f32 1.442695, %v2247_v21 }
0x22b0   :  { %v2248_v24 = vmul.f32 1.442695, %v2246_v22 }
0x22b1   :  { %2815 = vpow2.f32 %v2250_v23 }
0x22b2   :  { %2817 = vpow2.f32 %v2248_v24 }
0x22bb   :  { %v2816_v25 = vpop.eup %2815 }
0x22bc   :  { %v2818_v27 = vpop.eup %2817  ;;  %v2253_v29 = vmul.f32 2.0, %v2816_v25 }
0x22bd   :  { %v2252_v30 = vmul.f32 2.0, %v2818_v27 }
0x22be   :  { %v2255_v36 = vadd.f32 1e-07, %v2253_v29 }
0x22bf   :  { %v2254_v32 = vadd.f32 1e-07, %v2252_v30 }
0x22c0   :  { %v2277_v34 = vmul.f32 %v2273_v31, %v2255_v36 }
0x22c1   :  { %v2276_v4 = vmul.f32 %v2271_v33, %v2254_v32 }
0x22c2   :  { %2282 = vrot.lane.b32.xlu0 %v2277_v34, %s2860_s20 }
0x22c3   :  { %2280 = vrot.lane.b32.xlu1 %v2276_v4, %s2860_s20 }
0x2334   :  { %v2283_v26 = vpop.permute.xlu0 %2282 }
0x2335   :  { %v2281_v57 = vpop.permute.xlu1 %2280  ;;  %v2290_v37 = vsel %vm2286_vm0, %v2283_v26, 0.0 }
0x2336   :  { %2291 = vadd.xlane.f32.xlu0 %v2290_v37  ;;  %v2287_v39 = vsel %vm2286_vm0, %v2281_v57, 0.0 }
0x2337   :  { %2288 = vadd.xlane.f32.xlu1 %v2287_v39 }
0x2348   :  { %2304 = vperm.xlu1 %2718, %v2255_v36  }
0x234c   :  { %2330 = vrot.lane.b32.xlu1 %v2254_v32, %s2839_s25  ;;  %2299 = vperm.xlu0 %2717, %v2254_v32  }
0x2350   :  { %2332 = vrot.lane.b32.xlu0 %v2255_v36, %s2839_s25  ;;  %s2861_s25 = smov 31  }
0x2351   :  { %s2382_s23 = sld [smem:[%s3204_s0 + %s2861_s25]]  }
0x23c3   :  { %v2292_v2 = vpop.xlane.xlu0 %2291 }
0x23c4   :  { %2819 = vrcp.f32 %v2292_v2  ;;  %v2289_v40 = vpop.xlane.xlu1 %2288 }
0x23c5   :  { %2821 = vrcp.f32 %v2289_v40 }
0x23c8   :  { %v2305_v43 = vpop.permute.xlu1 %2304 }
0x23cb   :  { %v2300_v18 = vpop.permute.xlu0 %2299 }
0x23cc   :  { %v2331_v45 = vpop.permute.xlu1 %2330 }
0x23ce   :  { %v2820_v38 = vpop.eup %2819 }
0x23cf   :  { %v2822_v41 = vpop.eup %2821  ;;  %v2296_v42 = vmul.f32 %v2820_v38, %v2277_v34  ;;  %v2333_v15 = vpop.permute.xlu0 %2332 }
0x23d0   :  { %v2294_v35 = vmul.f32 %v2822_v41, %v2276_v4 }
0x23d1   :  { %2313 = vrot.lane.b32.xlu0 %v2296_v42, %s2860_s20  ;;  %v2308_v8 = vmul.f32 %v2305_v43, %v2296_v42 }
0x23d2   :  { %2311 = vrot.lane.b32.xlu1 %v2294_v35, %s2860_s20  ;;  %v2307_v44 = vmul.f32 %v2300_v18, %v2294_v35 }
0x23d5   :  { %2323 = vrot.lane.b32.xlu0 %v2308_v8, %s2831_s4 }
0x23d6   :  { %2321 = vrot.lane.b32.xlu1 %v2307_v44, %s2831_s4 }
0x23d9   :  { %2341 = vrot.lane.b32.xlu0 %v2255_v36, %s2832_s9 }
0x23da   :  { %2339 = vrot.lane.b32.xlu1 %v2254_v32, %s2832_s9 }
0x2443   :  { %v2314_v46 = vpop.permute.xlu0 %2313 }
0x2444   :  { %2318 = vst.msk [vmem:[%s2382_s23 + $0x8] sm:$0xff] %vm2286_vm0, %v2314_v46  ;;  %v2312_v47 = vpop.permute.xlu1 %2311 }
0x2445   :  { %2317 = vst.msk [vmem:[%s2382_s23] sm:$0xff] %vm2286_vm0, %v2312_v47 }
0x2447   :  { %v2324_v48 = vpop.permute.xlu0 %2323 }
0x2448   :  { %2329 = vst.msk [vmem:[%s2382_s23 + $0x8] sm:$0xff] %vm2327_vm11, %v2324_v48  ;;  %v2322_v63 = vpop.permute.xlu1 %2321 }
0x2449   :  { %2328 = vst.msk [vmem:[%s2382_s23] sm:$0xff] %vm2327_vm11, %v2322_v63 }
0x244a   :  { %2338 = vst.msk [vmem:[%s2382_s23 + $0x8] sm:$0xff] %vm2336_vm12, %v2333_v15  ;;  %2337 = vst.msk [vmem:[%s2382_s23] sm:$0xff] %vm2336_vm12, %v2331_v45 }
0x244b   :  { %v2342_v49 = vpop.permute.xlu0 %2341 }
0x244c   :  { %2347 = vst.msk [vmem:[%s2382_s23 + $0x8] sm:$0xff] %vm2345_vm13, %v2342_v49  ;;  %v2340_v62 = vpop.permute.xlu1 %2339 }
0x244d   :  { %2346 = vst.msk [vmem:[%s2382_s23] sm:$0xff] %vm2345_vm13, %v2340_v62 }

// kernel: ddsp_forward.6
= control target key start
LH: loop header
LB: loop body
LE: loop exit
PB: predicated region body
PF: predicated region fallthrough
CT: control target
= control target key end

     0   :  { %s2268_s0 = inlined_call_operand.vmem [shape: f32[2,64], index: 0, kind: input, shape index: {}]   ;;  %s2269_s1 = inlined_call_operand.vmem [shape: f32[8,2,64], index: 1, kind: input, shape index: {}]   ;;  %s2270_s2 = inlined_call_operand.vmem [shape: f32[2,64], index: 2, kind: input, shape index: {}]   ;;  %s2271_s3 = inlined_call_operand.vmem [shape: f32[1,16], index: 3, kind: input, shape index: {}]   ;;  %s2272_s4 = inlined_call_operand.vmem [shape: f32[1,2], index: 4, kind: input, shape index: {}]   ;;  %s2273_s5 = inlined_call_operand.hbm [shape: f32[2,64], index: 5, kind: output, shape index: {}]  }
   0x1   :  { %v1435_v0 = vld [vmem:[%s2268_s0] sm:$0x3] }
   0x2   :  { %v25_v1 = vand.u32 2139095040, %v1435_v0  ;;  %v1439_v3 = vmul.f32 2.0, %v1435_v0 }
   0x4   :  { %v26_v2 = vshrl.u32 %v25_v1, 23  ;;  %v133_v5 = vand.u32 2139095040, %v1439_v3 }
   0x6   :  { %v1149_v4 = vadd.s32 4294967169, %v26_v2  ;;  %v134_v7 = vshrl.u32 %v133_v5, 23 }
   0x8   :  { %v32_v6 = vadd.s32 1, %v1149_v4 }
   0xa   :  { %vm33_vm0 = vcmp.gt.s32.totalorder %v32_v6, 0 }
   0xb   :  { %10 = vsyncpa [#allocation3], 0  ;;  %v34_v8 = vsel %vm33_vm0, %v32_v6, 0  ;;  %v1153_v9 = vadd.s32 4294967169, %v134_v7  ;;  %v22_v11 = vand.u32 2147483647, %v1435_v0 }
   0xc   :  { %v36_v10 = vand.u32 31, %v34_v8  ;;  %v1443_v12 = vshrl.u32 %v34_v8, 5  ;;  %v1446_v15 = vmul.f32 3.0, %v1435_v0  ;;  %v1362_v16 = vmov 683565275   ;;  %s1370_s15 = smov 64  }
   0xd   :  { %v140_v14 = vadd.s32 1, %v1153_v9  ;;  %v1363_v18 = vmov 2475754826   ;;  %v1364_v20 = vmov 2102212464   ;;  %s1371_s16 = smov 126  }
   0xe   :  { %v37_v13 = vsub.s32 32, %v36_v10  ;;  %v39_v17 = vshll.u32 %v1362_v16, %v36_v10  ;;  %v42_v19 = vshll.u32 %v1363_v18, %v36_v10  ;;  %v48_v21 = vshll.u32 %v1364_v20, %v36_v10  ;;  %s1372_s17 = smov 124   ;;  %s1373_s18 = smov 122  }
   0xf   :  { %v1365_v22 = vmov 920167782   ;;  %v1366_v25 = vmov 2131351028   ;;  %v1367_v30 = vmov 1326507024  }
  0x10   :  { %v51_v23 = vshll.u32 %v1365_v22, %v36_v10  ;;  %v40_v24 = vshrl.u32 %v1363_v18, %v37_v13  ;;  %v43_v26 = vshrl.u32 %v1366_v25, %v37_v13  ;;  %v45_v27 = vshll.u32 %v1366_v25, %v36_v10  ;;  %s1374_s19 = smov 120   ;;  %s1376_s20 = smov 127  }
  0x11   :  { %v46_v28 = vshrl.u32 %v1364_v20, %v37_v13  ;;  %v49_v29 = vshrl.u32 %v1365_v22, %v37_v13  ;;  %v52_v31 = vshrl.u32 %v1367_v30, %v37_v13  ;;  %v29_v32 = vand.u32 8388607, %v22_v11  ;;  %s1377_s21 = smov 116   ;;  %s1379_s22 = smov 114  }
  0x12   :  { %vm57_vm1 = vcmp.lt.s32.totalorder %v1443_v12, 4  ;;  %vm141_vm2 = vcmp.gt.s32.totalorder %v140_v14, 0  ;;  %v41_v35 = vor.u32 %v40_v24, %v39_v17  ;;  %v44_v36 = vor.u32 %v43_v26, %v42_v19  ;;  %s1381_s23 = smov 121   ;;  %s1382_s24 = smov 119  }
  0x13   :  { %v50_v33 = vor.u32 %v49_v29, %v48_v21  ;;  %v53_v34 = vor.u32 %v52_v31, %v51_v23  ;;  %v47_v37 = vor.u32 %v46_v28, %v45_v27  ;;  %v242_v38 = vand.u32 2139095040, %v1446_v15  ;;  %s1383_s25 = smov 117   ;;  %s1384_s26 = smov 115  }
  0x14   :  { %vm54_vm3 = vcmp.lt.s32.totalorder %v1443_v12, 1  ;;  %vm56_vm4 = vcmp.lt.s32.totalorder %v1443_v12, 3  ;;  %v30_v40 = vor.u32 8388608, %v29_v32  ;;  %v142_v42 = vsel %vm141_vm2, %v140_v14, 0  ;;  %s1385_s27 = smov 113   ;;  %s1386_s28 = smov 66  }
  0x15   :  { %v63_v39 = vsel %vm57_vm1, %v50_v33, 920167782  ;;  %v67_v41 = vsel %vm57_vm1, %v53_v34, 1326507024  ;;  %vm55_vm5 = vcmp.lt.s32.totalorder %v1443_v12, 2  ;;  %v62_v43 = vsel %vm54_vm3, %v41_v35, %v44_v36  ;;  %s1387_s29 = smov 65  }
  0x16   :  { %v64_v44 = vsel %vm56_vm4, %v47_v37, %v63_v39  ;;  %v243_v45 = vshrl.u32 %v242_v38, 23  ;;  %v66_v46 = vsel %vm54_vm3, %v44_v36, %v47_v37  ;;  %v68_v47 = vsel %vm56_vm4, %v50_v33, %v67_v41  ;;  %s1388_s30 = smov 68   ;;  %s1389_s6 = smov 67  }
  0x17   :  { %v144_v48 = vand.u32 31, %v142_v42  ;;  %v70_v49 = vshll.u32 %v30_v40, 8  ;;  %v65_v50 = vsel %vm55_vm5, %v62_v43, %v64_v44  ;;  %v69_v51 = vsel %vm55_vm5, %v66_v46, %v68_v47  ;;  %s1390_s7 = smov 70   ;;  %s1391_s8 = smov 69  }
  0x18   :  { %v1158_v52 = vadd.s32 4294967169, %v243_v45  ;;  %v38_v54 = vshrl.u32 %v1362_v16, %v37_v13  ;;  %v59_v57 = vsel %vm57_vm1, %v47_v37, 2102212464  ;;  %v130_v61 = vand.u32 2147483647, %v1439_v3  ;;  %s1392_s9 = smov 72  }
  0x19   :  { %v145_v53 = vsub.s32 32, %v144_v48  ;;  %v1482_v55 = vmul.u32.u64.low %v70_v49, %v65_v50  ;;  %v1483_v56 = vmul.u32.u64.high %v70_v49, %v65_v50, %v1482_v55  ;;  %v156_v62 = vshll.u32 %v1364_v20, %v144_v48  ;;  %s1393_s10 = smov 71   ;;  %s1394_s11 = smov 74  }
  0x1a   :  { %v1488_v58 = vmul.u32.u64.low %v70_v49, %v69_v51  ;;  %v1489_v59 = vmul.u32.u64.high %v70_v49, %v69_v51, %v1488_v58  ;;  %v249_v60 = vadd.s32 1, %v1158_v52  ;;  %v58_v1 = vsel %vm54_vm3, %v38_v54, %v41_v35  ;;  %s1395_s12 = smov 73   ;;  %s1396_s13 = smov 76  }
  0x1b   :  { %v157_v63 = vshrl.u32 %v1365_v22, %v145_v53  ;;  %v60_v2 = vsel %vm56_vm4, %v44_v36, %v59_v57  ;;  %v1498_v4 = vshrl.u32 %v142_v42, 5  ;;  %v147_v5 = vshll.u32 %v1362_v16, %v144_v48  ;;  %s1397_s14 = smov 75  }
  0x1c   :  { %v150_v6 = vshll.u32 %v1363_v18, %v144_v48  ;;  %v153_v7 = vshll.u32 %v1366_v25, %v144_v48  ;;  %v159_v8 = vshll.u32 %v1365_v22, %v144_v48  ;;  %v160_v9 = vshrl.u32 %v1367_v30, %v145_v53 }
  0x1d   :  { %v148_v10 = vshrl.u32 %v1363_v18, %v145_v53  ;;  %v151_v13 = vshrl.u32 %v1366_v25, %v145_v53  ;;  %v154_v14 = vshrl.u32 %v1364_v20, %v145_v53  ;;  %vm250_vm6 = vcmp.gt.s32.totalorder %v249_v60, 0 }
  0x1e   :  { %v158_v17 = vor.u32 %v157_v63, %v156_v62  ;;  %v61_v19 = vsel %vm55_vm5, %v58_v1, %v60_v2  ;;  %v80_v21 = vadd.s32 1, %v1483_v56  ;;  %v137_v23 = vand.u32 8388607, %v130_v61 }
  0x1f   :  { %vm165_vm7 = vcmp.lt.s32.totalorder %v1498_v4, 4  ;;  %vm79_vm8 = vc.u32 %v1489_v59, %v1482_v55  ;;  %v161_v24 = vor.u32 %v160_v9, %v159_v8  ;;  %v251_v26 = vsel %vm250_vm6, %v249_v60, 0 }
  0x20   :  { %v149_v27 = vor.u32 %v148_v10, %v147_v5  ;;  %v152_v28 = vor.u32 %v151_v13, %v150_v6  ;;  %v155_v29 = vor.u32 %v154_v14, %v153_v7  ;;  %v77_v31 = vmul.u32 %v70_v49, %v61_v19 }
  0x21   :  { %vm162_vm9 = vcmp.lt.s32.totalorder %v1498_v4, 1  ;;  %vm164_vm10 = vcmp.lt.s32.totalorder %v1498_v4, 3  ;;  %v171_v12 = vsel %vm165_vm7, %v158_v17, 920167782  ;;  %v81_v32 = vsel %vm79_vm8, %v80_v21, %v1483_v56 }
  0x22   :  { %v138_v33 = vor.u32 8388608, %v137_v23  ;;  %v253_v34 = vand.u32 31, %v251_v26  ;;  %v175_v35 = vsel %vm165_vm7, %v161_v24, 1326507024  ;;  %vm163_vm11 = vcmp.lt.s32.totalorder %v1498_v4, 2 }
  0x23   :  { %v170_v36 = vsel %vm162_vm9, %v149_v27, %v152_v28  ;;  %v172_v37 = vsel %vm164_vm10, %v155_v29, %v171_v12  ;;  %v82_v38 = vadd.s32 %v81_v32, %v77_v31  ;;  %v174_v39 = vsel %vm162_vm9, %v152_v28, %v155_v29 }
  0x24   :  { %v176_v40 = vsel %vm164_vm10, %v158_v17, %v175_v35  ;;  %v1532_v41 = vshll.u32 %v138_v33, 8  ;;  %v254_v42 = vsub.s32 32, %v253_v34  ;;  %v173_v43 = vsel %vm163_vm11, %v170_v36, %v172_v37 }
  0x25   :  { %v1537_v44 = vmul.f32 4.0, %v1435_v0  ;;  %v83_v45 = vadd.s32 536870912, %v82_v38  ;;  %v146_v46 = vshrl.u32 %v1362_v16, %v145_v53  ;;  %v177_v47 = vsel %vm163_vm11, %v174_v39, %v176_v40 }
  0x26   :  { %v239_v48 = vand.u32 2147483647, %v1446_v15  ;;  %v1544_v49 = vmul.u32.u64.low %v1532_v41, %v173_v43  ;;  %v1545_v50 = vmul.u32.u64.high %v1532_v41, %v173_v43, %v1544_v49  ;;  %v265_v51 = vshll.u32 %v1364_v20, %v253_v34 }
  0x27   :  { %v266_v52 = vshrl.u32 %v1365_v22, %v254_v42  ;;  %v1550_v54 = vshrl.u32 %v251_v26, 5  ;;  %v268_v56 = vshll.u32 %v1365_v22, %v253_v34  ;;  %v269_v53 = vshrl.u32 %v1367_v30, %v254_v42 }
  0x28   :  { %v351_v57 = vand.u32 2139095040, %v1537_v44  ;;  %v1556_v58 = vmul.u32.u64.low %v1532_v41, %v177_v47  ;;  %v1557_v60 = vmul.u32.u64.high %v1532_v41, %v177_v47, %v1556_v58  ;;  %v256_v62 = vshll.u32 %v1362_v16, %v253_v34 }
  0x29   :  { %v259_v63 = vshll.u32 %v1363_v18, %v253_v34  ;;  %v257_v1 = vshrl.u32 %v1363_v18, %v254_v42  ;;  %v260_v2 = vshrl.u32 %v1366_v25, %v254_v42  ;;  %v262_v5 = vshll.u32 %v1366_v25, %v253_v34 }
  0x2a   :  { %v263_v6 = vshrl.u32 %v1364_v20, %v254_v42  ;;  %v167_v7 = vsel %vm165_vm7, %v155_v29, 2102212464  ;;  %v246_v8 = vand.u32 8388607, %v239_v48  ;;  %v267_v9 = vor.u32 %v266_v52, %v265_v51 }
  0x2b   :  { %v1569_v10 = vshrl.u32 %v83_v45, 30  ;;  %v270_v13 = vor.u32 %v269_v53, %v268_v56  ;;  %vm274_vm12 = vcmp.lt.s32.totalorder %v1550_v54, 4  ;;  %v352_v14 = vshrl.u32 %v351_v57, 23 }
  0x2c   :  { %v166_v17 = vsel %vm162_vm9, %v146_v46, %v149_v27  ;;  %v168_v19 = vsel %vm164_vm10, %v152_v28, %v167_v7  ;;  %v258_v21 = vor.u32 %v257_v1, %v256_v62  ;;  %v261_v23 = vor.u32 %v260_v2, %v259_v63 }
  0x2d   :  { %v264_v24 = vor.u32 %v263_v6, %v262_v5  ;;  %vm271_vm13 = vcmp.lt.s32.totalorder %v1550_v54, 1  ;;  %vm273_vm14 = vcmp.lt.s32.totalorder %v1550_v54, 3  ;;  %v280_v26 = vsel %vm274_vm12, %v267_v9, 920167782 }
  0x2e   :  { %v1163_v29 = vadd.s32 4294967169, %v352_v14  ;;  %v85_v31 = vshll.u32 %v1569_v10, 30  ;;  %v247_v12 = vor.u32 8388608, %v246_v8  ;;  %v284_v27 = vsel %vm274_vm12, %v270_v13, 1326507024 }
  0x2f   :  { %v169_v28 = vsel %vm163_vm11, %v166_v17, %v168_v19  ;;  %v188_v32 = vadd.s32 1, %v1545_v50  ;;  %vm187_vm15 = vc.u32 %v1557_v60, %v1544_v49  ;;  %vm272_vm0 = vcmp.lt.s32.totalorder %v1550_v54, 2 }
  0x30   :  { %v358_v33 = vadd.s32 1, %v1163_v29  ;;  %v279_v34 = vsel %vm271_vm13, %v258_v21, %v261_v23  ;;  %v281_v35 = vsel %vm273_vm14, %v264_v24, %v280_v26  ;;  %v283_v36 = vsel %vm271_vm13, %v261_v23, %v264_v24 }
  0x31   :  { %v285_v4 = vsel %vm273_vm14, %v267_v9, %v284_v27  ;;  %v1597_v37 = vsub.s32 %v82_v38, %v85_v31  ;;  %v185_v39 = vmul.u32 %v1532_v41, %v169_v28  ;;  %v287_v40 = vshll.u32 %v247_v12, 8 }
  0x32   :  { %vm359_vm1 = vcmp.gt.s32.totalorder %v358_v33, 0  ;;  %v189_v43 = vsel %vm187_vm15, %v188_v32, %v1545_v50  ;;  %v282_v45 = vsel %vm272_vm0, %v279_v34, %v281_v35  ;;  %v286_v47 = vsel %vm272_vm0, %v283_v36, %v285_v4 }
  0x33   :  { %v360_v46 = vsel %vm359_vm1, %v358_v33, 0  ;;  %v255_v52 = vshrl.u32 %v1362_v16, %v254_v42  ;;  %v88_v56 = vsub.s32 0, %v1597_v37  ;;  %v190_v38 = vadd.s32 %v189_v43, %v185_v39 }
  0x34   :  { %v362_v51 = vand.u32 31, %v360_v46  ;;  %v1607_v53 = vmul.u32.u64.low %v287_v40, %v282_v45  ;;  %v1608_v57 = vmul.u32.u64.high %v287_v40, %v282_v45, %v1607_v53  ;;  %v276_v41 = vsel %vm274_vm12, %v264_v24, 2102212464 }
  0x35   :  { %v1613_v50 = vmul.u32.u64.low %v287_v40, %v286_v47  ;;  %v1614_v58 = vmul.u32.u64.high %v287_v40, %v286_v47, %v1613_v50  ;;  %v348_v63 = vand.u32 2147483647, %v1537_v44  ;;  %v1150_v42 = vmin.u32 %v88_v56, %v1597_v37 }
  0x36   :  { %v363_v62 = vsub.s32 32, %v362_v51  ;;  %v374_v1 = vshll.u32 %v1364_v20, %v362_v51  ;;  %v191_v2 = vadd.s32 536870912, %v190_v38  ;;  %v275_v5 = vsel %vm271_vm13, %v255_v52, %v258_v21 }
  0x37   :  { %v277_v6 = vsel %vm273_vm14, %v261_v23, %v276_v41  ;;  %v1623_v7 = vshrl.u32 %v360_v46, 5  ;;  %v365_v8 = vshll.u32 %v1362_v16, %v362_v51  ;;  %v368_v9 = vshll.u32 %v1363_v18, %v362_v51 }
  0x38   :  { %v375_v13 = vshrl.u32 %v1365_v22, %v363_v62  ;;  %v366_v14 = vshrl.u32 %v1363_v18, %v363_v62  ;;  %v369_v17 = vshrl.u32 %v1366_v25, %v363_v62  ;;  %v371_v19 = vshll.u32 %v1366_v25, %v362_v51 }
  0x39   :  { %v372_v24 = vshrl.u32 %v1364_v20, %v363_v62  ;;  %v278_v21 = vsel %vm272_vm0, %v275_v5, %v277_v6  ;;  %v377_v26 = vshll.u32 %v1365_v22, %v362_v51  ;;  %v378_v29 = vshrl.u32 %v1367_v30, %v363_v62 }
  0x3a   :  { %v376_v23 = vor.u32 %v375_v13, %v374_v1  ;;  %v297_v31 = vadd.s32 1, %v1608_v57  ;;  %v355_v12 = vand.u32 8388607, %v348_v63  ;;  %v90_v27 = vclz %v1150_v42 }
  0x3b   :  { %v1639_v28 = vshrl.u32 %v191_v2, 30  ;;  %vm296_vm2 = vc.u32 %v1614_v58, %v1607_v53  ;;  %vm383_vm3 = vcmp.lt.s32.totalorder %v1623_v7, 4  ;;  %v294_v54 = vmul.u32 %v287_v40, %v278_v21 }
  0x3c   :  { %v367_v32 = vor.u32 %v366_v14, %v365_v8  ;;  %v370_v33 = vor.u32 %v369_v17, %v368_v9  ;;  %v373_v34 = vor.u32 %v372_v24, %v371_v19  ;;  %v379_v35 = vor.u32 %v378_v29, %v377_v26 }
  0x3d   :  { %vm380_vm4 = vcmp.lt.s32.totalorder %v1623_v7, 1  ;;  %vm382_vm5 = vcmp.lt.s32.totalorder %v1623_v7, 3  ;;  %v389_v36 = vsel %vm383_vm3, %v376_v23, 920167782  ;;  %v298_v4 = vsel %vm296_vm2, %v297_v31, %v1608_v57 }
  0x3e   :  { %v356_v39 = vor.u32 8388608, %v355_v12  ;;  %v1650_v43 = vmul.f32 5.0, %v1435_v0  ;;  %v193_v45 = vshll.u32 %v1639_v28, 30  ;;  %vm381_vm6 = vcmp.lt.s32.totalorder %v1623_v7, 2 }
  0x3f   :  { %v388_v40 = vsel %vm380_vm4, %v367_v32, %v370_v33  ;;  %v390_v46 = vsel %vm382_vm5, %v373_v34, %v389_v36  ;;  %v1151_v47 = vadd.s32 4294967294, %v90_v27  ;;  %v299_v51 = vadd.s32 %v298_v4, %v294_v54 }
  0x40   :  { %v392_v52 = vsel %vm380_vm4, %v370_v33, %v373_v34  ;;  %v393_v56 = vsel %vm383_vm3, %v379_v35, 1326507024  ;;  %v396_v41 = vshll.u32 %v356_v39, 8  ;;  %v391_v50 = vsel %vm381_vm6, %v388_v40, %v390_v46 }
  0x41   :  { %v394_v57 = vsel %vm382_vm5, %v376_v23, %v393_v56  ;;  %v460_v1 = vand.u32 2139095040, %v1650_v43  ;;  %v1667_v42 = vsub.s32 %v190_v38, %v193_v45  ;;  %vm1152_vm7 = vcmp.lt.s32.totalorder %v1151_v47, 0 }
  0x42   :  { %v395_v2 = vsel %vm381_vm6, %v392_v52, %v394_v57  ;;  %v300_v5 = vadd.s32 536870912, %v299_v51  ;;  %v1671_v6 = vmul.u32.u64.low %v396_v41, %v391_v50  ;;  %v1672_v8 = vmul.u32.u64.high %v396_v41, %v391_v50, %v1671_v6 }
  0x43   :  { %v461_v9 = vshrl.u32 %v460_v1, 23  ;;  %v1675_v13 = vmul.u32.u64.low %v396_v41, %v395_v2  ;;  %v1676_v14 = vmul.u32.u64.high %v396_v41, %v395_v2, %v1675_v13  ;;  %v93_v17 = vsel %vm1152_vm7, 0, %v1151_v47 }
  0x44   :  { %v196_v19 = vsub.s32 0, %v1667_v42  ;;  %v364_v24 = vshrl.u32 %v1362_v16, %v363_v62  ;;  %v1680_v21 = vshrl.u32 %v300_v5, 30  ;;  %v385_v23 = vsel %vm383_vm3, %v373_v34, 2102212464 }
  0x45   :  { %v1168_v38 = vadd.s32 4294967169, %v461_v9  ;;  %v78_v29 = vadd.s32 %v1482_v55, %v1489_v59  ;;  %v94_v31 = vsub.s32 32, %v93_v17  ;;  %v98_v12 = vsub.s32 4294967266, %v93_v17 }
  0x46   :  { %v1154_v27 = vmin.u32 %v196_v19, %v1667_v42  ;;  %v384_v54 = vsel %vm380_vm4, %v364_v24, %v367_v32  ;;  %v386_v62 = vsel %vm382_vm5, %v370_v33, %v385_v23  ;;  %v302_v35 = vshll.u32 %v1680_v21, 30 }
  0x47   :  { %v467_v26 = vadd.s32 1, %v1168_v38  ;;  %v457_v36 = vand.u32 2147483647, %v1650_v43  ;;  %v1694_v4 = vmul.f32 6.0, %v1435_v0  ;;  %v406_v55 = vadd.s32 1, %v1672_v8 }
  0x48   :  { %v387_v59 = vsel %vm381_vm6, %v384_v54, %v386_v62  ;;  %vm405_vm9 = vc.u32 %v1676_v14, %v1671_v6  ;;  %v95_v33 = vshll.u32 %v1597_v37, %v93_v17  ;;  %v96_v39 = vshrl.u32 %v78_v29, %v94_v31 }
  0x49   :  { %vm468_vm8 = vcmp.gt.s32.totalorder %v467_v26, 0  ;;  %v99_v45 = vadd.s32 127, %v98_v12  ;;  %v198_v40 = vclz %v1154_v27  ;;  %v1702_v46 = vsub.s32 %v299_v51, %v302_v35 }
  0x4a   :  { %v469_v34 = vsel %vm468_vm8, %v467_v26, 0  ;;  %v464_v47 = vand.u32 8388607, %v457_v36  ;;  %v569_v56 = vand.u32 2139095040, %v1694_v4  ;;  %v403_v57 = vmul.u32 %v396_v41, %v387_v59 }
  0x4b   :  { %v471_v32 = vand.u32 31, %v469_v34  ;;  %v407_v7 = vsel %vm405_vm9, %v406_v55, %v1672_v8  ;;  %v470_v2 = vshrl.u32 %v469_v34, 5  ;;  %v1713_v9 = vor.u32 %v96_v39, %v95_v33 }
  0x4c   :  { %v1155_v13 = vadd.s32 4294967294, %v198_v40  ;;  %v100_v19 = vshll.u32 %v99_v45, 23  ;;  %v305_v8 = vsub.s32 0, %v1702_v46  ;;  %v465_v24 = vor.u32 8388608, %v464_v47 }
  0x4d   :  { %v472_v52 = vsub.s32 32, %v471_v32  ;;  %v474_v50 = vshll.u32 %v1362_v16, %v471_v32  ;;  %v477_v1 = vshll.u32 %v1363_v18, %v471_v32  ;;  %v480_v51 = vshll.u32 %v1366_v25, %v471_v32 }
  0x4e   :  { %v483_v41 = vshll.u32 %v1364_v20, %v471_v32  ;;  %v570_v38 = vshrl.u32 %v569_v56, 23  ;;  %v1718_v23 = vadd.s32 %v407_v7, %v403_v57  ;;  %v486_v27 = vshll.u32 %v1365_v22, %v471_v32 }
  0x4f   :  { %v475_v37 = vshrl.u32 %v1363_v18, %v472_v52  ;;  %v478_v5 = vshrl.u32 %v1366_v25, %v472_v52  ;;  %v481_v17 = vshrl.u32 %v1364_v20, %v472_v52  ;;  %v484_v31 = vshrl.u32 %v1365_v22, %v472_v52 }
  0x50   :  { %v487_v54 = vshrl.u32 %v1367_v30, %v472_v52  ;;  %vm489_vm10 = vcmp.lt.s32.totalorder %v470_v2, 1  ;;  %vm1156_vm11 = vcmp.lt.s32.totalorder %v1155_v13, 0  ;;  %v473_v62 = vshrl.u32 %v1362_v16, %v472_v52 }
  0x51   :  { %v476_v26 = vor.u32 %v475_v37, %v474_v50  ;;  %v479_v29 = vor.u32 %v478_v5, %v477_v1  ;;  %v482_v12 = vor.u32 %v481_v17, %v480_v51  ;;  %v485_v35 = vor.u32 %v484_v31, %v483_v41 }
  0x52   :  { %vm492_vm12 = vcmp.lt.s32.totalorder %v470_v2, 4  ;;  %v488_v34 = vor.u32 %v487_v54, %v486_v27  ;;  %vm491_vm13 = vcmp.lt.s32.totalorder %v470_v2, 3  ;;  %v1173_v59 = vadd.s32 4294967169, %v570_v38 }
  0x53   :  { %v494_v55 = vsel %vm492_vm12, %v482_v12, 2102212464  ;;  %v1159_v33 = vmin.u32 %v305_v8, %v1702_v46  ;;  %vm490_vm14 = vcmp.lt.s32.totalorder %v470_v2, 2  ;;  %v497_v39 = vsel %vm489_vm10, %v476_v26, %v479_v29 }
  0x54   :  { %v505_v45 = vshll.u32 %v465_v24, 8  ;;  %vm24_vm15 = vcmp.lt.s32.totalorder %v1435_v0, 0  ;;  %v409_v32 = vadd.s32 536870912, %v1718_v23  ;;  %v498_v40 = vsel %vm492_vm12, %v485_v35, 920167782 }
  0x55   :  { %v501_v47 = vsel %vm489_vm10, %v479_v29, %v482_v12  ;;  %v502_v52 = vsel %vm492_vm12, %v488_v34, 1326507024  ;;  %v493_v56 = vsel %vm489_vm10, %v473_v62, %v476_v26  ;;  %v495_v57 = vsel %vm491_vm13, %v479_v29, %v494_v55 }
  0x56   :  { %v499_v7 = vsel %vm491_vm13, %v482_v12, %v498_v40  ;;  %v503_v50 = vsel %vm491_vm13, %v485_v35, %v502_v52  ;;  %v101_v1 = vor.u32 4788187, %v100_v19  ;;  %v576_v51 = vadd.s32 1, %v1173_v59 }
  0x57   :  { %v500_v37 = vsel %vm490_vm14, %v497_v39, %v499_v7  ;;  %v504_v5 = vsel %vm490_vm14, %v501_v47, %v503_v50  ;;  %v201_v17 = vsel %vm1156_vm11, 0, %v1155_v13  ;;  %v307_v41 = vclz %v1159_v33 }
  0x58   :  { %v1733_v8 = vmul.u32.u64.low %v505_v45, %v504_v5  ;;  %v1734_v24 = vmul.u32.u64.high %v505_v45, %v504_v5, %v1733_v8  ;;  %v1736_v38 = vshrl.u32 %v409_v32, 30  ;;  %v496_v31 = vsel %vm490_vm14, %v493_v56, %v495_v57 }
  0x59   :  { %v1739_v26 = vmul.u32.u64.low %v505_v45, %v500_v37  ;;  %v1740_v29 = vmul.u32.u64.high %v505_v45, %v500_v37, %v1739_v26  ;;  %v108_v19 = vsub.s32 4, %v1569_v10  ;;  %vm132_vm0 = vcmp.lt.s32.totalorder %v1439_v3, 0 }
  0x5a   :  { %v186_v12 = vadd.s32 %v1544_v49, %v1557_v60  ;;  %v216_v13 = vsub.s32 4, %v1639_v28  ;;  %v102_v27 = vand.u32 2147483647, %v101_v1  ;;  %v104_v54 = vcvt.s32.f32 %v1713_v9 }
  0x5b   :  { %v202_v62 = vsub.s32 32, %v201_v17  ;;  %vm577_vm1 = vcmp.gt.s32.totalorder %v576_v51, 0  ;;  %v206_v2 = vsub.s32 4294967266, %v201_v17  ;;  %v1160_v35 = vadd.s32 4294967294, %v307_v41 }
  0x5c   :  { %v512_v34 = vmul.u32 %v505_v45, %v496_v31  ;;  %v566_v55 = vand.u32 2147483647, %v1694_v4  ;;  %v411_v59 = vshll.u32 %v1736_v38, 30  ;;  %vm514_vm2 = vc.u32 %v1734_v24, %v1739_v26 }
  0x5d   :  { %v515_v33 = vadd.s32 1, %v1740_v29  ;;  %v578_v49 = vsel %vm577_vm1, %v576_v51, 0  ;;  %v1757_v60 = vsel %vm24_vm15, %v108_v19, %v1569_v10  ;;  %v1762_v9 = vsel %vm132_vm0, %v216_v13, %v1639_v28 }
  0x5e   :  { %v1764_v39 = vmul.f32 %v104_v54, %v102_v27  ;;  %v580_v32 = vand.u32 31, %v578_v49  ;;  %v1768_v40 = vmul.f32 7.0, %v1435_v0  ;;  %v203_v47 = vshll.u32 %v1667_v42, %v201_v17 }
  0x5f   :  { %v516_v45 = vsel %vm514_vm2, %v515_v33, %v1740_v29  ;;  %v204_v52 = vshrl.u32 %v186_v12, %v202_v62  ;;  %v207_v56 = vadd.s32 127, %v206_v2  ;;  %vm1161_vm3 = vcmp.lt.s32.totalorder %v1160_v35, 0 }
  0x60   :  { %v517_v57 = vadd.s32 %v516_v45, %v512_v34  ;;  %v1772_v10 = vsub.s32 %v1718_v23, %v411_v59  ;;  %v573_v28 = vand.u32 8388607, %v566_v55  ;;  %v581_v7 = vsub.s32 32, %v580_v32 }
  0x61   :  { %v579_v1 = vshrl.u32 %v578_v49, 5  ;;  %v583_v37 = vshll.u32 %v1362_v16, %v580_v32  ;;  %v586_v5 = vshll.u32 %v1363_v18, %v580_v32  ;;  %v589_v17 = vshll.u32 %v1366_v25, %v580_v32 }
  0x62   :  { %v518_v50 = vadd.s32 536870912, %v517_v57  ;;  %v584_v51 = vshrl.u32 %v1363_v18, %v581_v7  ;;  %v587_v42 = vshrl.u32 %v1366_v25, %v581_v7  ;;  %v592_v41 = vshll.u32 %v1364_v20, %v580_v32 }
  0x63   :  { %v590_v8 = vshrl.u32 %v1364_v20, %v581_v7  ;;  %v593_v31 = vshrl.u32 %v1365_v22, %v581_v7  ;;  %v595_v29 = vshll.u32 %v1365_v22, %v580_v32  ;;  %v205_v19 = vor.u32 %v204_v52, %v203_v47 }
  0x64   :  { %v1782_v23 = vshrl.u32 %v518_v50, 30  ;;  %v208_v12 = vshll.u32 %v207_v56, 23  ;;  %v295_v13 = vadd.s32 %v1607_v53, %v1614_v58  ;;  %v596_v27 = vshrl.u32 %v1367_v30, %v581_v7 }
  0x65   :  { %v1791_v54 = vsel %vm1161_vm3, 0, %v1160_v35  ;;  %v414_v62 = vsub.s32 0, %v1772_v10  ;;  %v585_v2 = vor.u32 %v584_v51, %v583_v37  ;;  %v588_v34 = vor.u32 %v587_v42, %v586_v5 }
  0x66   :  { %v520_v59 = vshll.u32 %v1782_v23, 30  ;;  %v574_v33 = vor.u32 8388608, %v573_v28  ;;  %v594_v49 = vor.u32 %v593_v31, %v592_v41  ;;  %vm598_vm4 = vcmp.lt.s32.totalorder %v579_v1, 1 }
  0x67   :  { %v582_v45 = vshrl.u32 %v1362_v16, %v581_v7  ;;  %v591_v32 = vor.u32 %v590_v8, %v589_v17  ;;  %v597_v47 = vor.u32 %v596_v27, %v595_v29  ;;  %vm601_vm5 = vcmp.lt.s32.totalorder %v579_v1, 4 }
  0x68   :  { %v106_v53 = vxor.u32 2147483648, %v1764_v39  ;;  %v209_v58 = vor.u32 4788187, %v208_v12  ;;  %v315_v35 = vsub.s32 4294967266, %v1791_v54  ;;  %vm600_vm6 = vcmp.lt.s32.totalorder %v579_v1, 3 }
  0x69   :  { %v1164_v52 = vmin.u32 %v414_v62, %v1772_v10  ;;  %vm599_vm7 = vcmp.lt.s32.totalorder %v579_v1, 2  ;;  %v603_v56 = vsel %vm601_vm5, %v591_v32, 2102212464  ;;  %v606_v28 = vsel %vm598_vm4, %v585_v2, %v588_v34 }
  0x6a   :  { %v212_v50 = vcvt.s32.f32 %v205_v19  ;;  %v1801_v37 = vsub.s32 %v517_v57, %v520_v59  ;;  %v607_v7 = vsel %vm601_vm5, %v594_v49, 920167782  ;;  %v614_v5 = vshll.u32 %v574_v33, 8 }
  0x6b   :  { %v602_v51 = vsel %vm598_vm4, %v582_v45, %v585_v2  ;;  %v608_v42 = vsel %vm600_vm6, %v591_v32, %v607_v7  ;;  %v610_v17 = vsel %vm598_vm4, %v588_v34, %v591_v32  ;;  %v611_v41 = vsel %vm601_vm5, %v597_v47, 1326507024 }
  0x6c   :  { %v604_v8 = vsel %vm600_vm6, %v588_v34, %v603_v56  ;;  %v609_v31 = vsel %vm599_vm7, %v606_v28, %v608_v42  ;;  %v612_v29 = vsel %vm600_vm6, %v594_v49, %v611_v41  ;;  %v678_v12 = vand.u32 2139095040, %v1768_v40 }
  0x6d   :  { %v210_v27 = vand.u32 2147483647, %v209_v58  ;;  %v311_v57 = vsub.s32 32, %v1791_v54  ;;  %v316_v19 = vadd.s32 127, %v315_v35  ;;  %v416_v62 = vclz %v1164_v52 }
  0x6e   :  { %v613_v59 = vsel %vm599_vm7, %v610_v17, %v612_v29  ;;  %v1811_v33 = vmul.u32.u64.low %v614_v5, %v609_v31  ;;  %v1812_v2 = vmul.u32.u64.high %v614_v5, %v609_v31, %v1811_v33  ;;  %v679_v45 = vshrl.u32 %v678_v12, 23 }
  0x6f   :  { %v523_v32 = vsub.s32 0, %v1801_v37  ;;  %v605_v34 = vsel %vm599_vm7, %v602_v51, %v604_v8  ;;  %v1817_v47 = vmul.u32.u64.low %v614_v5, %v613_v59  ;;  %v1818_v49 = vmul.u32.u64.high %v614_v5, %v613_v59, %v1817_v47 }
  0x70   :  { %vm1822_vm8 = vcmp.le.f32.partialorder %v22_v11, 0.7853982  ;;  %vm1828_vm9 = vcmp.le.f32.partialorder %v130_v61, 0.7853982  ;;  %v1178_v52 = vadd.s32 4294967169, %v679_v45  ;;  %v107_v1 = vsel %vm24_vm15, %v106_v53, %v1764_v39 }
  0x71   :  { %v111_v56 = vsel %vm1822_vm8, 0, %v1757_v60  ;;  %v219_v11 = vsel %vm1828_vm9, 0, %v1762_v9  ;;  %v1165_v28 = vadd.s32 4294967294, %v416_v62  ;;  %v1368_v7 = vmov 0  }
  0x72   :  { %1293 = vset.pattern.permute.xlu0 %v1368_v7  ;;  %v213_v61 = vmul.f32 %v212_v50, %v210_v27  ;;  %v621_v51 = vmul.u32 %v614_v5, %v605_v34  ;;  %v624_v42 = vadd.s32 1, %v1812_v2  ;;  %v685_v17 = vadd.s32 1, %v1178_v52 }
  0x73   :  { %v312_v41 = vshll.u32 %v1702_v46, %v1791_v54  ;;  %v313_v39 = vshrl.u32 %v295_v13, %v311_v57  ;;  %v317_v53 = vshll.u32 %v316_v19, 23  ;;  %v1169_v8 = vmin.u32 %v523_v32, %v1801_v37 }
  0x74   :  { %v115_v60 = vadd.s32 3, %v111_v56  ;;  %vm623_vm10 = vc.u32 %v1818_v49, %v1811_v33  ;;  %vm686_vm11 = vcmp.gt.s32.totalorder %v685_v17, 0  ;;  %v223_v9 = vadd.s32 3, %v219_v11 }
  0x75   :  { %v325_v31 = vsub.s32 4, %v1680_v21  ;;  %vm1166_vm12 = vcmp.lt.s32.totalorder %v1165_v28, 0  ;;  %v625_v50 = vsel %vm623_vm10, %v624_v42, %v1812_v2  ;;  %v1852_v5 = vsel %vm1822_vm8, %v1435_v0, %v107_v1 }
  0x76   :  { %v214_v46 = vxor.u32 2147483648, %v213_v61  ;;  %v626_v13 = vadd.s32 %v625_v50, %v621_v51  ;;  %v687_v54 = vsel %vm686_vm11, %v685_v17, 0  ;;  %vm241_vm13 = vcmp.lt.s32.totalorder %v1446_v15, 0 }
  0x77   :  { %v314_v29 = vor.u32 %v313_v39, %v312_v41  ;;  %v318_v12 = vor.u32 4788187, %v317_v53  ;;  %v525_v27 = vclz %v1169_v8  ;;  %v1855_v57 = vsel %vm1166_vm12, 0, %v1165_v28 }
  0x78   :  { %v627_v19 = vadd.s32 536870912, %v626_v13  ;;  %v2274_v62 = vand.u32 2147483647, %v1768_v40  ;;  %v689_v59 = vand.u32 31, %v687_v54  ;;  %1295 = vcosq.f32 %v1852_v5 }
  0x79   :  { %v1859_v2 = vand.u32 3, %v115_v60  ;;  %v1861_v45 = vand.u32 3, %v223_v9  ;;  %v1866_v32 = vsel %vm241_vm13, %v325_v31, %v1680_v21  ;;  %v1870_v34 = vsel %vm132_vm0, %v214_v46, %v213_v61 }
  0x7a   :  { %v404_v47 = vadd.s32 %v1671_v6, %v1676_v14  ;;  %v1874_v58 = vshrl.u32 %v627_v19, 30  ;;  %v690_v52 = vsub.s32 32, %v689_v59  ;;  %v319_v1 = vand.u32 2147483647, %v318_v12 }
  0x7b   :  { %v321_v56 = vcvt.s32.f32 %v314_v29  ;;  %v424_v11 = vsub.s32 4294967266, %v1855_v57  ;;  %v1170_v28 = vadd.s32 4294967294, %v525_v27  ;;  %v682_v21 = vand.u32 8388607, %v2274_v62 }
  0x7c   :  { %v629_v7 = vshll.u32 %v1874_v58, 30  ;;  %v688_v51 = vshrl.u32 %v687_v54, 5  ;;  %v692_v61 = vshll.u32 %v1362_v16, %v689_v59  ;;  %v693_v42 = vshrl.u32 %v1363_v18, %v690_v52 }
  0x7d   :  { %v695_v6 = vshll.u32 %v1363_v18, %v689_v59  ;;  %v696_v14 = vshrl.u32 %v1366_v25, %v690_v52  ;;  %v701_v17 = vshll.u32 %v1364_v20, %v689_v59  ;;  %v698_v39 = vshll.u32 %v1366_v25, %v689_v59 }
  0x7e   :  { %v1885_v41 = vsub.s32 %v626_v13, %v629_v7  ;;  %v699_v53 = vshrl.u32 %v1364_v20, %v690_v52  ;;  %v702_v8 = vshrl.u32 %v1365_v22, %v690_v52  ;;  %v1890_v60 = vmul.f32 %v321_v56, %v319_v1 }
  0x7f   :  { %v420_v9 = vsub.s32 32, %v1855_v57  ;;  %v425_v31 = vadd.s32 127, %v424_v11  ;;  %v704_v50 = vshll.u32 %v1365_v22, %v689_v59  ;;  %vm1171_vm14 = vcmp.lt.s32.totalorder %v1170_v28, 0 }
  0x80   :  { %v632_v46 = vsub.s32 0, %v1885_v41  ;;  %v683_v54 = vor.u32 8388608, %v682_v21  ;;  %vm707_vm15 = vcmp.lt.s32.totalorder %v688_v51, 1  ;;  %v694_v13 = vor.u32 %v693_v42, %v692_v61 }
  0x81   :  { %v697_v29 = vor.u32 %v696_v14, %v695_v6  ;;  %v703_v12 = vor.u32 %v702_v8, %v701_v17  ;;  %v705_v27 = vshrl.u32 %v1367_v30, %v690_v52  ;;  %v691_v1 = vshrl.u32 %v1362_v16, %v690_v52 }
  0x82   :  { %v1174_v19 = vmin.u32 %v632_v46, %v1885_v41  ;;  %v700_v56 = vor.u32 %v699_v53, %v698_v39  ;;  %vm710_vm0 = vcmp.lt.s32.totalorder %v688_v51, 4  ;;  %v1898_v7 = vpop.eup %1295  ;;  %v421_v59 = vshll.u32 %v1772_v10, %v1855_v57 }
  0x83   :  { %v706_v11 = vor.u32 %v705_v27, %v704_v50  ;;  %vm709_vm1 = vcmp.lt.s32.totalorder %v688_v51, 3  ;;  %v1903_v21 = vmul.f32 8.0, %v1435_v0  ;;  %v422_v61 = vshrl.u32 %v404_v47, %v420_v9 }
  0x84   :  { %vm708_vm2 = vcmp.lt.s32.totalorder %v688_v51, 2  ;;  %v712_v42 = vsel %vm710_vm0, %v700_v56, 2102212464  ;;  %v723_v6 = vshll.u32 %v683_v54, 8  ;;  %vm1908_vm3 = vcmp.le.f32.partialorder %v239_v48, 0.7853982 }
  0x85   :  { %v426_v14 = vshll.u32 %v425_v31, 23  ;;  %v528_v17 = vsel %vm1171_vm14, 0, %v1170_v28  ;;  %v715_v10 = vsel %vm707_vm15, %v694_v13, %v697_v29  ;;  %v716_v57 = vsel %vm710_vm0, %v703_v12, 920167782  ;;  %v899_v28 = vld [vmem:[%s2272_s4] sm:$0x1] }
  0x86   :  { %v634_v0 = vclz %v1174_v19  ;;  %v711_v47 = vsel %vm707_vm15, %v691_v1, %v694_v13  ;;  %v717_v39 = vsel %vm709_vm1, %v700_v56, %v716_v57  ;;  %v719_v53 = vsel %vm707_vm15, %v697_v29, %v700_v56  ;;  %s1378_s4 = smov 125  }
  0x87   :  { %v713_v8 = vsel %vm709_vm1, %v697_v29, %v712_v42  ;;  %v718_v48 = vsel %vm708_vm2, %v715_v10, %v717_v39  ;;  %v720_v9 = vsel %vm710_vm0, %v706_v11, 1326507024  ;;  %v787_v31 = vand.u32 2139095040, %v1903_v21 }
  0x88   :  { %v533_v50 = vsub.s32 4294967266, %v528_v17  ;;  %v721_v46 = vsel %vm709_vm1, %v703_v12, %v720_v9  ;;  %v1926_v54 = vmul.u32.u64.low %v723_v6, %v718_v48  ;;  %v1927_v13 = vmul.u32.u64.high %v723_v6, %v718_v48, %v1926_v54 }
  0x89   :  { %v513_v29 = vadd.s32 %v1739_v26, %v1734_v24  ;;  %v529_v27 = vsub.s32 32, %v528_v17  ;;  %v722_v19 = vsel %vm708_vm2, %v719_v53, %v721_v46  ;;  %v788_v1 = vshrl.u32 %v787_v31, 23 }
  0x8a   :  { %v423_v56 = vor.u32 %v422_v61, %v421_v59  ;;  %v427_v11 = vor.u32 4788187, %v426_v14  ;;  %v714_v42 = vsel %vm708_vm2, %v711_v47, %v713_v8  ;;  %v900_v10 = vsub.f32 0.0, %v899_v28 }
  0x8b   :  { %v1175_v57 = vadd.s32 4294967294, %v634_v0  ;;  %v1934_v39 = vmul.u32.u64.low %v723_v6, %v722_v19  ;;  %v1935_v62 = vmul.u32.u64.high %v723_v6, %v722_v19, %v1934_v39  ;;  %v1183_v12 = vadd.s32 4294967169, %v788_v1 }
  0x8c   :  { %v218_v48 = vsel %vm1828_vm9, %v1439_v3, %v1870_v34  ;;  %v323_v24 = vxor.u32 2147483648, %v1890_v60  ;;  %v534_v26 = vadd.s32 127, %v533_v50  ;;  %v733_v53 = vadd.s32 1, %v1927_v13 }
  0x8d   :  { %v530_v59 = vshll.u32 %v1801_v37, %v528_v17  ;;  %v531_v51 = vshrl.u32 %v513_v29, %v529_v27  ;;  %v730_v61 = vmul.u32 %v723_v6, %v714_v42  ;;  %v794_v14 = vadd.s32 1, %v1183_v12 }
  0x8e   :  { %1297 = vsinq.f32 %v1852_v5  ;;  %v328_v0 = vsel %vm1908_vm3, 0, %v1866_v32  ;;  %v428_v47 = vand.u32 2147483647, %v427_v11  ;;  %v430_v8 = vcvt.s32.f32 %v423_v56 }
  0x8f   :  { %vm1176_vm4 = vcmp.lt.s32.totalorder %v1175_v57, 0  ;;  %vm732_vm5 = vc.u32 %v1935_v62, %v1926_v54  ;;  %vm795_vm6 = vcmp.gt.s32.totalorder %v794_v14, 0  ;;  %v901_v35 = vmul.f32 1.442695, %v900_v10 }
  0x90   :  { %1299 = vcosq.f32 %v218_v48  ;;  %v324_v37 = vsel %vm241_vm13, %v323_v24, %v1890_v60  ;;  %v535_v34 = vshll.u32 %v534_v26, 23  ;;  %v734_v5 = vsel %vm732_vm5, %v733_v53, %v1927_v13 }
  0x91   :  { %v1954_v6 = vor.u32 %v531_v51, %v530_v59  ;;  %v735_v17 = vadd.s32 %v734_v5, %v730_v61  ;;  %v784_v32 = vand.u32 2147483647, %v1903_v21  ;;  %v796_v9 = vsel %vm795_vm6, %v794_v14, 0 }
  0x92   :  { %1301 = vsinq.f32 %v218_v48  ;;  %v1957_v31 = vadd.s32 3, %v328_v0  ;;  %v1959_v50 = vsel %vm1176_vm4, 0, %v1175_v57  ;;  %v798_v46 = vand.u32 31, %v796_v9 }
  0x93   :  { %v1964_v29 = vsel %vm1908_vm3, %v1446_v15, %v324_v37  ;;  %v1966_v60 = vmul.f32 %v430_v8, %v428_v47  ;;  %v736_v13 = vadd.s32 536870912, %v735_v17  ;;  %1303 = vpow2.f32 %v901_v35 }
  0x94   :  { %v1968_v27 = vor.u32 4788187, %v535_v34  ;;  %v622_v19 = vadd.s32 %v1811_v33, %v1818_v49  ;;  %v799_v1 = vsub.s32 32, %v798_v46  ;;  %v1188_v56 = vmul.f32 -1.442695, %v899_v28 }
  0x95   :  { %v539_v11 = vcvt.s32.f32 %v1954_v6  ;;  %v642_v42 = vsub.s32 4294967266, %v1959_v50  ;;  %v1974_v10 = vshrl.u32 %v736_v13, 30  ;;  %v791_v52 = vand.u32 8388607, %v784_v32 }
  0x96   :  { %v801_v57 = vshll.u32 %v1362_v16, %v798_v46  ;;  %v802_v39 = vshrl.u32 %v1363_v18, %v799_v1  ;;  %v804_v12 = vshll.u32 %v1363_v18, %v798_v46  ;;  %v810_v48 = vshll.u32 %v1364_v20, %v798_v46 }
  0x97   :  { %v738_v33 = vshll.u32 %v1974_v10, 30  ;;  %v805_v49 = vshrl.u32 %v1366_v25, %v799_v1  ;;  %v807_v28 = vshll.u32 %v1366_v25, %v798_v46  ;;  %v808_v24 = vshrl.u32 %v1364_v20, %v799_v1 }
  0x98   :  { %v1986_v26 = vpop.eup %1297  ;;  %v537_v53 = vand.u32 2147483647, %v1968_v27  ;;  %v638_v59 = vsub.s32 32, %v1959_v50  ;;  %v797_v51 = vshrl.u32 %v796_v9, 5  ;;  %v811_v61 = vshrl.u32 %v1365_v22, %v799_v1 }
  0x99   :  { %v1991_v18 = vsub.s32 %v735_v17, %v738_v33  ;;  %v792_v14 = vor.u32 8388608, %v791_v52  ;;  %v813_v0 = vshll.u32 %v1365_v22, %v798_v46  ;;  %1305 = vpow2.f32 %v1188_v56 }
  0x9a   :  { %v1994_v47 = vpop.eup %1299  ;;  %v643_v25 = vadd.s32 127, %v642_v42  ;;  %v803_v8 = vor.u32 %v802_v39, %v801_v57  ;;  %v806_v20 = vor.u32 %v805_v49, %v804_v12  ;;  %v812_v35 = vor.u32 %v811_v61, %v810_v48 }
  0x9b   :  { %v741_v37 = vsub.s32 0, %v1991_v18  ;;  %v800_v34 = vshrl.u32 %v1362_v16, %v799_v1  ;;  %v809_v5 = vor.u32 %v808_v24, %v807_v28  ;;  %v814_v9 = vshrl.u32 %v1367_v30, %v799_v1 }
  0x9c   :  { %v1999_v13 = vpop.eup %1301  ;;  %v639_v17 = vshll.u32 %v1885_v41, %v1959_v50  ;;  %v640_v22 = vshrl.u32 %v622_v19, %v638_v59  ;;  %vm816_vm7 = vcmp.lt.s32.totalorder %v797_v51, 1  ;;  %vm819_vm8 = vcmp.lt.s32.totalorder %v797_v51, 4 }
  0x9d   :  { %v1304_v46 = vpop.eup %1303  ;;  %vm350_vm9 = vcmp.lt.s32.totalorder %v1537_v44, 0  ;;  %v1179_v56 = vmin.u32 %v741_v37, %v1991_v18  ;;  %v815_v42 = vor.u32 %v814_v9, %v813_v0  ;;  %vm818_vm10 = vcmp.lt.s32.totalorder %v797_v51, 3 }
  0x9e   :  { %v832_v52 = vshll.u32 %v792_v14, 8  ;;  %vm817_vm11 = vcmp.lt.s32.totalorder %v797_v51, 2  ;;  %v821_v16 = vsel %vm819_vm8, %v809_v5, 2102212464  ;;  %v824_v30 = vsel %vm816_vm7, %v803_v8, %v806_v20 }
  0x9f   :  { %v825_v1 = vsel %vm819_vm8, %v812_v35, 920167782  ;;  %v644_v57 = vshll.u32 %v643_v25, 23  ;;  %v743_v39 = vclz %v1179_v56  ;;  %v820_v41 = vsel %vm816_vm7, %v800_v34, %v803_v8 }
  0xa0   :  { %v828_v50 = vsel %vm816_vm7, %v806_v20, %v809_v5  ;;  %vm2009_vm12 = vcmp.le.f32.partialorder %v348_v63, 0.7853982  ;;  %v822_v12 = vsel %vm818_vm10, %v806_v20, %v821_v16  ;;  %v826_v48 = vsel %vm818_vm10, %v809_v5, %v825_v1 }
  0xa1   :  { %v829_v33 = vsel %vm819_vm8, %v815_v42, 1326507024  ;;  %v903_v49 = vadd.f32 1.0, %v1304_v46  ;;  %v731_v28 = vadd.s32 %v1926_v54, %v1935_v62  ;;  %v1180_v24 = vadd.s32 4294967294, %v743_v39 }
  0xa2   :  { %v827_v59 = vsel %vm817_vm11, %v824_v30, %v826_v48  ;;  %v830_v61 = vsel %vm818_vm10, %v812_v35, %v829_v33  ;;  %vm121_vm13 = vcmp.eq.s32.totalorder %v1859_v2, 2  ;;  %v823_v63 = vsel %vm817_vm11, %v820_v41, %v822_v12 }
  0xa3   :  { %v831_v14 = vsel %vm817_vm11, %v828_v50, %v830_v61  ;;  %v2023_v0 = vmul.u32.u64.low %v832_v52, %v827_v59  ;;  %v2024_v25 = vmul.u32.u64.high %v832_v52, %v827_v59, %v2023_v0  ;;  %v1306_v8 = vpop.eup %1305  ;;  %vm1181_vm14 = vcmp.lt.s32.totalorder %v1180_v24, 0 }
  0xa4   :  { %v2027_v20 = vmul.u32.u64.low %v832_v52, %v831_v14  ;;  %v2028_v37 = vmul.u32.u64.high %v832_v52, %v831_v14, %v2027_v20  ;;  %1307 = vlog2.f32 %v903_v49  ;;  %vm118_vm15 = vcmp.eq.s32.totalorder %v1859_v2, 0 }
  0xa5   :  { %v432_v62 = vxor.u32 2147483648, %v1966_v60  ;;  %v641_v54 = vor.u32 %v640_v22, %v639_v17  ;;  %v645_v35 = vor.u32 4788187, %v644_v57  ;;  %v746_v34 = vsel %vm1181_vm14, 0, %v1180_v24 }
  0xa6   :  { %v122_v51 = vxor.u32 2147483648, %v1898_v7  ;;  %v747_v5 = vsub.s32 32, %v746_v34  ;;  %v748_v9 = vshll.u32 %v1991_v18, %v746_v34  ;;  %v751_v46 = vsub.s32 4294967266, %v746_v34 }
  0xa7   :  { %v434_v56 = vsub.s32 4, %v1736_v38  ;;  %v839_v42 = vmul.u32 %v832_v52, %v823_v63  ;;  %v842_v16 = vadd.s32 1, %v2024_v25  ;;  %v925_v30 = vadd.f32 1.0, %v1306_v8 }
  0xa8   :  { %vm117_vm0 = vcmp.lt.s32.totalorder %v1859_v2, 2  ;;  %vm229_vm1 = vcmp.eq.s32.totalorder %v1861_v45, 2  ;;  %1309 = vcosq.f32 %v1964_v29  ;;  %v540_v17 = vmul.f32 %v539_v11, %v537_v53 }
  0xa9   :  { %v749_v22 = vshrl.u32 %v731_v28, %v747_v5  ;;  %v752_v18 = vadd.s32 127, %v751_v46  ;;  %vm226_vm2 = vcmp.eq.s32.totalorder %v1861_v45, 0  ;;  %v433_v52 = vsel %vm350_vm9, %v432_v62, %v1966_v60  ;;  %v1337_v28 = vld [vmem:[%s2268_s0] sm:$0x3]  ;;  %s1380_s0 = smov 123  }
  0xaa   :  { %v646_v1 = vand.u32 2147483647, %v645_v35  ;;  %v648_v57 = vcvt.s32.f32 %v641_v54  ;;  %vm841_vm3 = vc.u32 %v2028_v37, %v2023_v0  ;;  %1311 = vsinq.f32 %v1964_v29 }
  0xab   :  { %v750_v39 = vor.u32 %v749_v22, %v748_v9  ;;  %v753_v27 = vshll.u32 %v752_v18, 23  ;;  %v843_v6 = vsel %vm841_vm3, %v842_v16, %v2024_v25  ;;  %v119_v11 = vxor.u32 2147483648, %v1986_v26 }
  0xac   :  { %vm2054_vm4 = vcmp.le.f32.partialorder %v457_v36, 0.7853982  ;;  %v844_v60 = vadd.s32 %v843_v6, %v839_v42  ;;  %1313 = vrcp.f32 %v925_v30  ;;  %v435_v41 = vsel %vm350_vm9, %v434_v56, %v1736_v38 }
  0xad   :  { %v436_v29 = vsel %vm2009_vm12, %v1537_v44, %v433_v52  ;;  %v541_v50 = vxor.u32 2147483648, %v540_v17  ;;  %v754_v12 = vor.u32 4788187, %v753_v27  ;;  %vm459_vm5 = vcmp.lt.s32.totalorder %v1650_v43, 0 }
  0xae   :  { %v649_v48 = vmul.f32 %v648_v57, %v646_v1  ;;  %v757_v33 = vcvt.s32.f32 %v750_v39  ;;  %v845_v36 = vadd.s32 536870912, %v844_v60  ;;  %v1308_v49 = vpop.eup %1307  ;;  %vm114_vm6 = vweird.f32 %v1337_v28 }
  0xaf   :  { %v123_v38 = vsel %vm121_vm13, %v122_v51, %v1986_v26  ;;  %v230_v24 = vxor.u32 2147483648, %v1994_v47  ;;  %v2073_v59 = vand.u32 3, %v1957_v31  ;;  %v755_v61 = vand.u32 2147483647, %v754_v12 }
  0xb0   :  { %v437_v63 = vsel %vm2009_vm12, 0, %v435_v41  ;;  %1315 = vcosq.f32 %v436_v29  ;;  %v2077_v14 = vshrl.u32 %v845_v36, 30  ;;  %v905_v25 = vmul.f32 0.6931472, %v1308_v49 }
  0xb1   :  { %v120_v8 = vsel %vm118_vm15, %v1898_v7, %v119_v11  ;;  %v227_v20 = vxor.u32 2147483648, %v1999_v13  ;;  %1317 = vsinq.f32 %v436_v29  ;;  %v542_v26 = vsel %vm459_vm5, %v541_v50, %v540_v17 }
  0xb2   :  { %v650_v31 = vxor.u32 2147483648, %v649_v48  ;;  %v758_v62 = vmul.f32 %v757_v33, %v755_v61  ;;  %v847_v54 = vshll.u32 %v2077_v14, 30  ;;  %v906_v19 = vsub.f32 0.0, %v905_v25  ;;  %v1310_v35 = vpop.eup %1309  ;;  %v126_v25 = vld [vmem:[%s2269_s1] sm:$0x3] }
  0xb3   :  { %vm222_vm7 = vweird.f32 %v1439_v3  ;;  %vm225_vm8 = vcmp.lt.s32.totalorder %v1861_v45, 2  ;;  %v441_v34 = vadd.s32 3, %v437_v63  ;;  %vm568_vm9 = vcmp.lt.s32.totalorder %v1694_v4, 0 }
  0xb4   :  { %v124_v7 = vsel %vm117_vm0, %v120_v8, %v123_v38  ;;  %v231_v51 = vsel %vm229_vm1, %v230_v24, %v1999_v13  ;;  %vm338_vm10 = vcmp.eq.s32.totalorder %v2073_v59, 2  ;;  %v2095_v5 = vsub.s32 %v844_v60, %v847_v54  ;;  %909 = vperm.xlu0 %1293, %v906_v19   ;;  %v1312_v9 = vpop.eup %1311 }
  0xb5   :  { %v228_v46 = vsel %vm226_vm2, %v1994_v47, %v227_v20  ;;  %v543_v56 = vsub.s32 4, %v1782_v23  ;;  %v545_v2 = vsel %vm2054_vm4, %v1650_v43, %v542_v26  ;;  %vm334_vm11 = vcmp.lt.s32.totalorder %v2073_v59, 2 }
  0xb6   :  { %v1314_v42 = vpop.eup %1313  ;;  %vm2107_vm12 = vcmp.le.f32.partialorder %v566_v55, 0.7853982  ;;  %v651_v16 = vsel %vm568_vm9, %v650_v31, %v649_v48  ;;  %v759_v30 = vxor.u32 2147483648, %v758_v62  ;;  %v850_v47 = vsub.s32 0, %v2095_v5 }
  0xb7   :  { %v339_v17 = vxor.u32 2147483648, %v1310_v35  ;;  %v2114_v22 = vand.u32 3, %v441_v34  ;;  %v652_v18 = vsub.s32 4, %v1874_v58  ;;  %vm677_vm13 = vcmp.lt.s32.totalorder %v1768_v40, 0 }
  0xb8   :  { %v232_v52 = vsel %vm225_vm8, %v228_v46, %v231_v51  ;;  %v336_v55 = vxor.u32 2147483648, %v1312_v9  ;;  %1319 = vcosq.f32 %v545_v2  ;;  %v1184_v1 = vmin.u32 %v850_v47, %v2095_v5 }
  0xb9   :  { %v1369_v57 = vmov 1   ;;  %vm335_vm14 = vcmp.eq.s32.totalorder %v2073_v59, 0  ;;  %v544_v39 = vsel %vm459_vm5, %v543_v56, %v1782_v23  ;;  %1321 = vsinq.f32 %v545_v2 }
  0xba   :  { %1294 = vset.pattern.permute.xlu0 %v1369_v57  ;;  %v654_v27 = vsel %vm2107_vm12, %v1694_v4, %v651_v16  ;;  %v1316_v45 = vpop.eup %1315  ;;  %v125_v6 = vsel %vm114_vm6, nan, %v124_v7  ;;  %vm331_vm15 = vweird.f32 %v1446_v15  ;;  %v2287_v11 = vand.u32 2147483647, %v1768_v40 }
  0xbb   :  { %930 = vperm.xlu0 %1294, %v1314_v42   ;;  %v760_v23 = vsel %vm677_vm13, %v759_v30, %v758_v62  ;;  %v852_v41 = vclz %v1184_v1  ;;  %v1318_v29 = vpop.eup %1317  ;;  %v233_v50 = vsel %vm222_vm7, nan, %v232_v52  ;;  %v340_v12 = vsel %vm338_vm10, %v339_v17, %v1312_v9 }
  0xbc   :  { %vm2132_vm0 = vcmp.le.f32.partialorder %v2287_v11, 0.7853982  ;;  %vm443_vm1 = vcmp.lt.s32.totalorder %v2114_v22, 2  ;;  %v653_v48 = vsel %vm568_vm9, %v652_v18, %v1874_v58  ;;  %v337_v33 = vsel %vm335_vm14, %v1310_v35, %v336_v55  ;;  %v1167_v11 = vld [vmem:[%s2269_s1 + $0x6] sm:$0x3] }
  0xbd   :  { %v546_v36 = vsel %vm2054_vm4, 0, %v544_v39  ;;  %1323 = vcosq.f32 %v654_v27  ;;  %v1185_v49 = vadd.s32 4294967294, %v852_v41  ;;  %v448_v28 = vxor.u32 2147483648, %v1316_v45 }
  0xbe   :  { %1325 = vsinq.f32 %v654_v27  ;;  %v761_v3 = vsub.s32 4, %v1974_v10  ;;  %v763_v38 = vsel %vm2132_vm0, %v1768_v40, %v760_v23  ;;  %v445_v24 = vxor.u32 2147483648, %v1318_v29 }
  0xbf   :  { %v655_v58 = vsel %vm2107_vm12, 0, %v653_v48  ;;  %v840_v61 = vadd.s32 %v2023_v0, %v2028_v37  ;;  %vm1186_vm2 = vcmp.lt.s32.totalorder %v1185_v49, 0  ;;  %vm444_vm3 = vcmp.eq.s32.totalorder %v2114_v22, 0  ;;  %v1157_v0 = vld [vmem:[%s2269_s1 + $0x2] sm:$0x3] }
  0xc0   :  { %vm447_vm4 = vcmp.eq.s32.totalorder %v2114_v22, 2  ;;  %v550_v53 = vadd.s32 3, %v546_v36  ;;  %v855_v63 = vsel %vm1186_vm2, 0, %v1185_v49  ;;  %1327 = vcosq.f32 %v763_v38 }
  0xc1   :  { %v856_v8 = vsub.s32 32, %v855_v63  ;;  %v857_v20 = vshll.u32 %v2095_v5, %v855_v63  ;;  %v860_v26 = vsub.s32 4294967266, %v855_v63  ;;  %v341_v37 = vsel %vm334_vm11, %v337_v33, %v340_v12  ;;  %v1172_v63 = vld [vmem:[%s2269_s1 + $0x8] sm:$0x3] }
  0xc2   :  { %v659_v31 = vadd.s32 3, %v655_v58  ;;  %v762_v62 = vsel %vm677_vm13, %v761_v3, %v1974_v10  ;;  %1329 = vsinq.f32 %v763_v38  ;;  %v1320_v54 = vpop.eup %1319  ;;  %v446_v19 = vsel %vm444_vm3, %v1316_v45, %v445_v24  ;;  %v1162_v10 = vld [vmem:[%s2269_s1 + $0x4] sm:$0x3] }
  0xc3   :  { %v449_v35 = vsel %vm447_vm4, %v448_v28, %v1318_v29  ;;  %v858_v34 = vshrl.u32 %v840_v61, %v856_v8  ;;  %v861_v7 = vadd.s32 127, %v860_v26  ;;  %v1322_v51 = vpop.eup %1321  ;;  %v127_v5 = vmul.f32 %v126_v25, %v125_v6 }
  0xc4   :  { %v551_v9 = vand.u32 3, %v550_v53  ;;  %v236_v46 = vmul.f32 %v1157_v0, %v233_v50  ;;  %v764_v56 = vsel %vm2132_vm0, 0, %v762_v62  ;;  %v342_v42 = vsel %vm331_vm15, nan, %v341_v37 }
  0xc5   :  { %v859_v59 = vor.u32 %v858_v34, %v857_v20  ;;  %v862_v2 = vshll.u32 %v861_v7, 23  ;;  %vm440_vm5 = vweird.f32 %v1537_v44  ;;  %v450_v13 = vsel %vm443_vm1, %v446_v19, %v449_v35  ;;  %v1182_v34 = vld [vmem:[%s2269_s1 + $0xc] sm:$0x3] }
  0xc6   :  { %v660_v16 = vand.u32 3, %v659_v31  ;;  %v554_v47 = vxor.u32 2147483648, %v1322_v51  ;;  %v557_v17 = vxor.u32 2147483648, %v1320_v54  ;;  %vm553_vm6 = vcmp.eq.s32.totalorder %v551_v9, 0 }
  0xc7   :  { %v1324_v30 = vpop.eup %1323  ;;  %v863_v18 = vor.u32 4788187, %v862_v2  ;;  %v866_v52 = vcvt.s32.f32 %v859_v59  ;;  %vm556_vm7 = vcmp.eq.s32.totalorder %v551_v9, 2  ;;  %v768_v15 = vadd.s32 3, %v764_v56  ;;  %v1187_v2 = vld [vmem:[%s2269_s1 + $0xe] sm:$0x3] }
  0xc8   :  { %v1326_v55 = vpop.eup %1325  ;;  %v237_v1 = vadd.f32 %v236_v46, %v127_v5  ;;  %v345_v57 = vmul.f32 %v1162_v10, %v342_v42  ;;  %v870_v27 = vsub.s32 4, %v2077_v14  ;;  %v451_v45 = vsel %vm440_vm5, nan, %v450_v13 }
  0xc9   :  { %v864_v39 = vand.u32 2147483647, %v863_v18  ;;  %vm552_vm8 = vcmp.lt.s32.totalorder %v551_v9, 2  ;;  %vm665_vm9 = vcmp.eq.s32.totalorder %v660_v16, 2  ;;  %v666_v22 = vxor.u32 2147483648, %v1324_v30 }
  0xca   :  { %v1328_v6 = vpop.eup %1327  ;;  %v555_v60 = vsel %vm553_vm6, %v1320_v54, %v554_v47  ;;  %v558_v23 = vsel %vm556_vm7, %v557_v17, %v1322_v51  ;;  %v663_v41 = vxor.u32 2147483648, %v1326_v55  ;;  %vm549_vm10 = vweird.f32 %v1650_v43  ;;  %v1177_v43 = vld [vmem:[%s2269_s1 + $0xa] sm:$0x3]  ;;  %s1399_s1 = smov 77  }
  0xcb   :  { %v867_v29 = vmul.f32 %v866_v52, %v864_v39  ;;  %vm662_vm11 = vcmp.eq.s32.totalorder %v660_v16, 0  ;;  %v769_v12 = vand.u32 3, %v768_v15  ;;  %vm786_vm12 = vcmp.lt.s32.totalorder %v1903_v21, 0 }
  0xcc   :  { %v1330_v50 = vpop.eup %1329  ;;  %v346_v44 = vadd.f32 %v345_v57, %v237_v1  ;;  %vm2192_vm13 = vcmp.le.f32.partialorder %v784_v32, 0.7853982  ;;  %v871_v36 = vsel %vm786_vm12, %v870_v27, %v2077_v14  ;;  %v454_v49 = vmul.f32 %v1167_v11, %v451_v45  ;;  %v920_v11 = vld [vmem:[%s2271_s3] sm:$0x1]  ;;  %s1375_s3 = smov 118  }
  0xcd   :  { %v868_v33 = vxor.u32 2147483648, %v867_v29  ;;  %v559_v28 = vsel %vm552_vm8, %v555_v60, %v558_v23  ;;  %vm661_vm14 = vcmp.lt.s32.totalorder %v660_v16, 2  ;;  %v667_v3 = vsel %vm665_vm9, %v666_v22, %v1326_v55 }
  0xce   :  { %v664_v38 = vsel %vm662_vm11, %v1324_v30, %v663_v41  ;;  %v772_v24 = vxor.u32 2147483648, %v1330_v50  ;;  %v775_v58 = vxor.u32 2147483648, %v1328_v6  ;;  %vm771_vm15 = vcmp.eq.s32.totalorder %v769_v12, 0  ;;  %v892_v30 = vld [vmem:[%s2270_s2] sm:$0x3]  ;;  %s1400_s2 = smov 79  }
  0xcf   :  { %v869_v61 = vsel %vm786_vm12, %v868_v33, %v867_v29  ;;  %vm774_vm0 = vcmp.eq.s32.totalorder %v769_v12, 2  ;;  %v873_v53 = vsel %vm2192_vm13, 0, %v871_v36  ;;  %v560_v14 = vsel %vm549_vm10, nan, %v559_v28 }
  0xd0   :  { %v872_v32 = vsel %vm2192_vm13, %v1903_v21, %v869_v61  ;;  %vm658_vm1 = vweird.f32 %v1694_v4  ;;  %v668_v25 = vsel %vm661_vm14, %v664_v38, %v667_v3  ;;  %vm770_vm2 = vcmp.lt.s32.totalorder %v769_v12, 2 }
  0xd1   :  { %1331 = vcosq.f32 %v872_v32  ;;  %v773_v8 = vsel %vm771_vm15, %v1328_v6, %v772_v24  ;;  %v776_v20 = vsel %vm774_vm0, %v775_v58, %v1330_v50  ;;  %v877_v26 = vadd.s32 3, %v873_v53 }
  0xd2   :  { %1333 = vsinq.f32 %v872_v32  ;;  %v455_v0 = vadd.f32 %v454_v49, %v346_v44  ;;  %v563_v37 = vmul.f32 %v1172_v63, %v560_v14  ;;  %v669_v31 = vsel %vm658_vm1, nan, %v668_v25 }
  0xd3   :  { %vm767_vm3 = vweird.f32 %v1768_v40  ;;  %v777_v62 = vsel %vm770_vm2, %v773_v8, %v776_v20  ;;  %v878_v54 = vand.u32 3, %v877_v26  ;;  %v672_v35 = vmul.f32 %v1177_v43, %v669_v31 }
  0xd4   :  { %v564_v19 = vadd.f32 %v563_v37, %v455_v0  ;;  %v778_v4 = vsel %vm767_vm3, nan, %v777_v62  ;;  %vm876_vm7 = vweird.f32 %v1903_v21  ;;  %v894_v21 = vlaneseq }
  0xd5   :  { %vm883_vm4 = vcmp.eq.s32.totalorder %v878_v54, 2  ;;  %v781_v9 = vmul.f32 %v1182_v34, %v778_v4  ;;  %vm880_vm5 = vcmp.eq.s32.totalorder %v878_v54, 0  ;;  %vm879_vm6 = vcmp.lt.s32.totalorder %v878_v54, 2 }
  0xd6   :  { %v673_v5 = vadd.f32 %v672_v35, %v564_v19  ;;  %v2228_v18 = vand.u32 127, %v894_v21  ;;  %v913_v52 = vshrl.u32 %v894_v21, 7  ;;  %vm946_vm9 = vcmask 1048064  }
  0xd8   :  { %v782_v42 = vadd.f32 %v781_v9, %v673_v5  ;;  %v896_v55 = vcvt.s32.f32 %v2228_v18  ;;  %v914_v15 = vsub.s32 0, %v913_v52  ;;  %vm938_vm8 = vcmp.eq.s32.totalorder %v2228_v18, 0 }
  0xd9   :  { %vm945_vm10 = vcmp.ge.s32.totalorder %v2228_v18, 1  ;;  %vm965_vm11 = vcmp.ge.s32.totalorder %v2228_v18, 2  ;;  %vm977_vm12 = vcmp.ge.s32.totalorder %v2228_v18, 3  ;;  %vm989_vm13 = vcmp.ge.s32.totalorder %v2228_v18, 4 }
  0xda   :  { %v898_v1 = vmul.f32 0.0625, %v896_v55  ;;  %vm1001_vm14 = vcmp.ge.s32.totalorder %v2228_v18, 5  ;;  %vm1013_vm15 = vcmp.ge.s32.totalorder %v2228_v18, 6  ;;  %vm1025_vm0 = vcmp.ge.s32.totalorder %v2228_v18, 7 }
  0xdb   :  { %v1332_v7 = vpop.eup %1331  ;;  %vm1037_vm1 = vcmp.ge.s32.totalorder %v2228_v18, 8  ;;  %vm1049_vm2 = vcmp.ge.s32.totalorder %v2228_v18, 9  ;;  %vm1061_vm3 = vcmp.ge.s32.totalorder %v2228_v18, 10 }
  0xdc   :  { %v1334_v51 = vpop.eup %1333  ;;  %v884_v46 = vxor.u32 2147483648, %v1332_v7 }
  0xdd   :  { %v881_v56 = vxor.u32 2147483648, %v1334_v51 }
  0xde   :  { %v885_v40 = vsel %vm883_vm4, %v884_v46, %v1334_v51  ;;  %vm1073_vm4 = vcmp.ge.s32.totalorder %v2228_v18, 11 }
  0xdf   :  { %v882_v59 = vsel %vm880_vm5, %v1332_v7, %v881_v56  ;;  %vm1085_vm5 = vcmp.ge.s32.totalorder %v2228_v18, 12 }
  0xe0   :  { %v886_v10 = vsel %vm879_vm6, %v882_v59, %v885_v40  ;;  %vm1097_vm6 = vcmp.ge.s32.totalorder %v2228_v18, 13 }
  0xe1   :  { %v887_v13 = vsel %vm876_vm7, nan, %v886_v10  ;;  %vm1109_vm7 = vcmp.ge.s32.totalorder %v2228_v18, 14 }
  0xe2   :  { %v890_v16 = vmul.f32 %v1187_v2, %v887_v13 }
  0xe4   :  { %v891_v47 = vadd.f32 %v890_v16, %v782_v42 }
  0xe6   :  { %v2224_v17 = vadd.f32 %v892_v30, %v891_v47 }
  0xe8   :  { %947 = vrot.lane.b32.xlu1 %v2224_v17, %s1370_s15 }
 0x133   :  { %v910_v57 = vpop.permute.xlu0 %909 }
 0x134   :  { %v915_v39 = vrot.slane %v910_v57, %v914_v15 }
 0x136   :  { %v916_v27 = vmul.f32 %v915_v39, %v898_v1 }
 0x138   :  { %v917_v45 = vmul.f32 500.0, %v916_v27 }
 0x13a   :  { %v918_v22 = vmul.f32 1.442695, %v917_v45  ;;  %v931_v6 = vpop.permute.xlu0 %930 }
 0x13b   :  { %v936_v60 = vrot.slane %v931_v6, %v914_v15 }
 0x13c   :  { %1335 = vpow2.f32 %v918_v22 }
 0x146   :  { %v1336_v23 = vpop.eup %1335 }
 0x147   :  { %v921_v41 = vmul.f32 %v1336_v23, %v920_v11 }
 0x149   :  { %v937_v29 = vmul.f32 %v936_v60, %v921_v41 }
 0x14b   :  { %v939_v50 = vsel %vm938_vm8, 1.0, %v937_v29  ;;  %vm1121_vm8 = vcmp.ge.s32.totalorder %v2228_v18, 15 }
 0x14c   :  { %970 = vrot.lane.b32.xlu0 %v939_v50, %s1371_s16  ;;  %1221 = vpush %v939_v50 }
 0x150   :  { %994 = vrot.lane.b32.xlu0 %v939_v50, %s1372_s17 }
 0x154   :  { %1018 = vrot.lane.b32.xlu0 %v939_v50, %s1373_s18 }
 0x158   :  { %1042 = vrot.lane.b32.xlu0 %v939_v50, %s1374_s19 }
 0x15a   :  { %v948_v12 = vpop.permute.xlu1 %947 }
 0x15b   :  { %v949_v44 = vsel %vm946_vm9, %v948_v12, %v2224_v17 }
 0x15c   :  { %950 = vrot.lane.b32.xlu1 %v949_v44, %s1370_s15  ;;  %1066 = vrot.lane.b32.xlu0 %v939_v50, %s1375_s3  ;;  %s1398_s15 = smov 78  }
 0x160   :  { %958 = vrot.lane.b32.xlu1 %v939_v50, %s1376_s20  ;;  %1090 = vrot.lane.b32.xlu0 %v939_v50, %s1377_s21 }
 0x164   :  { %982 = vrot.lane.b32.xlu1 %v939_v50, %s1378_s4  ;;  %1114 = vrot.lane.b32.xlu0 %v939_v50, %s1379_s22 }
 0x168   :  { %1006 = vrot.lane.b32.xlu1 %v939_v50, %s1380_s0 }
 0x16c   :  { %1030 = vrot.lane.b32.xlu1 %v939_v50, %s1381_s23 }
 0x170   :  { %1054 = vrot.lane.b32.xlu1 %v939_v50, %s1382_s24 }
 0x174   :  { %1078 = vrot.lane.b32.xlu1 %v939_v50, %s1383_s25 }
 0x178   :  { %1102 = vrot.lane.b32.xlu1 %v939_v50, %s1384_s26 }
 0x17c   :  { %1126 = vrot.lane.b32.xlu1 %v939_v50, %s1385_s27 }
 0x17d   :  { %s1222_s16 = spop %1221 }
 0x17e   :  { %v942_v26 = vstv %s1222_s16 }
 0x17f   :  { %v944_v19 = vmul.f32 %v942_v26, %v2224_v17 }
 0x1be   :  { %v971_v48 = vpop.permute.xlu0 %970 }
 0x1c2   :  { %v995_v33 = vpop.permute.xlu0 %994 }
 0x1c6   :  { %v1019_v28 = vpop.permute.xlu0 %1018 }
 0x1ca   :  { %v1043_v24 = vpop.permute.xlu0 %1042 }
 0x1ce   :  { %v951_v36 = vpop.permute.xlu1 %950  ;;  %v1067_v61 = vpop.permute.xlu0 %1066 }
 0x1cf   :  { %v952_v49 = vsel %vm946_vm9, %v951_v36, %v2224_v17  ;;  %vm1133_vm9 = vcmask 517120  }
 0x1d0   :  { %966 = vrot.lane.b32.xlu1 %v952_v49, %s1386_s28  ;;  %954 = vrot.lane.b32.xlu0 %v952_v49, %s1387_s29  ;;  %s1401_s29 = smov [#allocation2]  }
 0x1d2   :  { %v959_v3 = vpop.permute.xlu1 %958  ;;  %v1091_v14 = vpop.permute.xlu0 %1090 }
 0x1d3   :  { %1223 = vpush %v959_v3 }
 0x1d4   :  { %990 = vrot.lane.b32.xlu1 %v952_v49, %s1388_s30  ;;  %978 = vrot.lane.b32.xlu0 %v952_v49, %s1389_s6  ;;  %1225 = vpush %v971_v48  ;;  %s1141_s30 = sshll.u32 %s1401_s29, 4  ;;  %s1142_s30 = int_to_ptr.vmem [resolvable:$true] %s1141_s30 }
 0x1d5   :  { %s1338_s6 = scalar_lea.vmem %s1142_s30, 32  ;;  %p1343_p1 = scmp.lt.s32.totalorder %s1142_s30, %s1142_s30 }
 0x1d6   :  { %v983_v38 = vpop.permute.xlu1 %982  ;;  %v1115_v25 = vpop.permute.xlu0 %1114  ;;  %p1339_p0 = scmp.ne.s32.totalorder %s1142_s30, %s1338_s6  ;;  %p1344_p2 = scmp.lt.s32.totalorder %s1338_s6, %s1338_s6 }
 0x1d7   :  { %1227 = vpush %v983_v38 }
 0x1d8   :  { %1014 = vrot.lane.b32.xlu1 %v952_v49, %s1390_s7  ;;  %1002 = vrot.lane.b32.xlu0 %v952_v49, %s1391_s8  ;;  %1229 = vpush %v995_v33  ;;  %p1345_p3 = por %p1344_p2, %p1343_p1 }
 0x1da   :  { %v1007_v58 = vpop.permute.xlu1 %1006  ;;  %p1346_p4 = pnand %p1345_p3, %p1339_p0 }
 0x1db   :  { %1231 = vpush %v1007_v58 }
 0x1dc   :  { %1038 = vrot.lane.b32.xlu1 %v952_v49, %s1392_s9  ;;  %1026 = vrot.lane.b32.xlu0 %v952_v49, %s1393_s10  ;;  %1233 = vpush %v1019_v28 }
 0x1de   :  { %v1031_v32 = vpop.permute.xlu1 %1030 }
 0x1df   :  { %1235 = vpush %v1031_v32 }
 0x1e0   :  { %1062 = vrot.lane.b32.xlu1 %v952_v49, %s1394_s11  ;;  %1050 = vrot.lane.b32.xlu0 %v952_v49, %s1395_s12  ;;  %1237 = vpush %v1043_v24 }
 0x1e2   :  { %v1055_v53 = vpop.permute.xlu1 %1054 }
 0x1e3   :  { %1239 = vpush %v1055_v53 }
 0x1e4   :  { %1086 = vrot.lane.b32.xlu1 %v952_v49, %s1396_s13  ;;  %1074 = vrot.lane.b32.xlu0 %v952_v49, %s1397_s14  ;;  %1241 = vpush %v1067_v61 }
 0x1e6   :  { %v1079_v63 = vpop.permute.xlu1 %1078 }
 0x1e7   :  { %1243 = vpush %v1079_v63 }
 0x1e8   :  { %1110 = vrot.lane.b32.xlu1 %v952_v49, %s1398_s15  ;;  %1098 = vrot.lane.b32.xlu0 %v952_v49, %s1399_s1  ;;  %1245 = vpush %v1091_v14 }
 0x1ea   :  { %v1103_v8 = vpop.permute.xlu1 %1102 }
 0x1eb   :  { %1247 = vpush %v1103_v8 }
 0x1ec   :  { %1122 = vrot.lane.b32.xlu0 %v952_v49, %s1400_s2  ;;  %1249 = vpush %v1115_v25 }
 0x1ee   :  { %v1127_v20 = vpop.permute.xlu1 %1126 }
 0x1ef   :  { %1251 = vpush %v1127_v20 }
 0x204   :  { %s1224_s17 = spop %1223 }
 0x205   :  { %s1226_s18 = spop %1225  ;;  %v961_v0 = vstv %s1224_s17 }
 0x206   :  { %v973_v62 = vstv %s1226_s18 }
 0x208   :  { %s1228_s19 = spop %1227 }
 0x209   :  { %s1230_s3 = spop %1229  ;;  %v985_v5 = vstv %s1228_s19 }
 0x20a   :  { %v997_v59 = vstv %s1230_s3 }
 0x20c   :  { %s1232_s20 = spop %1231 }
 0x20d   :  { %s1234_s21 = spop %1233  ;;  %v1009_v16 = vstv %s1232_s20 }
 0x20e   :  { %v1021_v52 = vstv %s1234_s21 }
 0x210   :  { %s1236_s4 = spop %1235 }
 0x211   :  { %s1238_s22 = spop %1237  ;;  %v1033_v39 = vstv %s1236_s4 }
 0x212   :  { %v1045_v11 = vstv %s1238_s22 }
 0x214   :  { %s1240_s0 = spop %1239 }
 0x215   :  { %s1242_s23 = spop %1241  ;;  %v1057_v50 = vstv %s1240_s0 }
 0x216   :  { %v1069_v36 = vstv %s1242_s23 }
 0x218   :  { %s1244_s24 = spop %1243 }
 0x219   :  { %s1246_s25 = spop %1245  ;;  %v1081_v24 = vstv %s1244_s24 }
 0x21a   :  { %v1093_v14 = vstv %s1246_s25 }
 0x21c   :  { %s1248_s26 = spop %1247 }
 0x21d   :  { %s1250_s27 = spop %1249  ;;  %v1105_v26 = vstv %s1248_s26 }
 0x220   :  { %s1252_s28 = spop %1251 }
 0x242   :  { %v955_v37 = vpop.permute.xlu0 %954  ;;  %v967_v31 = vpop.permute.xlu1 %966 }
 0x243   :  { %v957_v43 = vsel %vm945_vm10, %v955_v37, 0.0  ;;  %v969_v54 = vsel %vm965_vm11, %v967_v31, 0.0 }
 0x244   :  { %v963_v35 = vmul.f32 %v961_v0, %v957_v43  ;;  %v975_v34 = vmul.f32 %v973_v62, %v969_v54  ;;  %v1117_v62 = vstv %s1250_s27 }
 0x246   :  { %v964_v4 = vadd.f32 %v963_v35, %v944_v19  ;;  %v979_v7 = vpop.permute.xlu0 %978  ;;  %v991_v51 = vpop.permute.xlu1 %990 }
 0x247   :  { %v981_v9 = vsel %vm977_vm12, %v979_v7, 0.0  ;;  %v993_v46 = vsel %vm989_vm13, %v991_v51, 0.0 }
 0x248   :  { %v976_v56 = vadd.f32 %v975_v34, %v964_v4  ;;  %v987_v40 = vmul.f32 %v985_v5, %v981_v9  ;;  %v999_v42 = vmul.f32 %v997_v59, %v993_v46  ;;  %v1129_v4 = vstv %s1252_s28 }
 0x24a   :  { %v988_v2 = vadd.f32 %v987_v40, %v976_v56  ;;  %v1003_v10 = vpop.permute.xlu0 %1002  ;;  %v1015_v13 = vpop.permute.xlu1 %1014 }
 0x24b   :  { %v1005_v30 = vsel %vm1001_vm14, %v1003_v10, 0.0  ;;  %v1017_v47 = vsel %vm1013_vm15, %v1015_v13, 0.0 }
 0x24c   :  { %v1000_v17 = vadd.f32 %v999_v42, %v988_v2  ;;  %v1011_v21 = vmul.f32 %v1009_v16, %v1005_v30  ;;  %v1023_v15 = vmul.f32 %v1021_v52, %v1017_v47 }
 0x24e   :  { %v1012_v55 = vadd.f32 %v1011_v21, %v1000_v17  ;;  %v1027_v1 = vpop.permute.xlu0 %1026  ;;  %v1039_v57 = vpop.permute.xlu1 %1038 }
 0x24f   :  { %v1029_v27 = vsel %vm1025_vm0, %v1027_v1, 0.0  ;;  %v1041_v45 = vsel %vm1037_vm1, %v1039_v57, 0.0 }
 0x250   :  { %v1024_v22 = vadd.f32 %v1023_v15, %v1012_v55  ;;  %v1035_v6 = vmul.f32 %v1033_v39, %v1029_v27  ;;  %v1047_v23 = vmul.f32 %v1045_v11, %v1041_v45 }
 0x252   :  { %v1036_v60 = vadd.f32 %v1035_v6, %v1024_v22  ;;  %v1051_v41 = vpop.permute.xlu0 %1050  ;;  %v1063_v29 = vpop.permute.xlu1 %1062 }
 0x253   :  { %v1053_v12 = vsel %vm1049_vm2, %v1051_v41, 0.0  ;;  %v1065_v44 = vsel %vm1061_vm3, %v1063_v29, 0.0 }
 0x254   :  { %v1048_v48 = vadd.f32 %v1047_v23, %v1036_v60  ;;  %v1059_v33 = vmul.f32 %v1057_v50, %v1053_v12  ;;  %v1071_v28 = vmul.f32 %v1069_v36, %v1065_v44 }
 0x256   :  { %v1060_v49 = vadd.f32 %v1059_v33, %v1048_v48  ;;  %v1075_v3 = vpop.permute.xlu0 %1074  ;;  %v1087_v38 = vpop.permute.xlu1 %1086 }
 0x257   :  { %v1077_v58 = vsel %vm1073_vm4, %v1075_v3, 0.0  ;;  %v1089_v61 = vsel %vm1085_vm5, %v1087_v38, 0.0 }
 0x258   :  { %v1072_v32 = vadd.f32 %v1071_v28, %v1060_v49  ;;  %v1083_v53 = vmul.f32 %v1081_v24, %v1077_v58  ;;  %v1095_v25 = vmul.f32 %v1093_v14, %v1089_v61 }
 0x25a   :  { %v1084_v63 = vadd.f32 %v1083_v53, %v1072_v32  ;;  %v1099_v8 = vpop.permute.xlu0 %1098  ;;  %v1111_v20 = vpop.permute.xlu1 %1110 }
 0x25b   :  { %v1101_v0 = vsel %vm1097_vm6, %v1099_v8, 0.0  ;;  %v1113_v37 = vsel %vm1109_vm7, %v1111_v20, 0.0 }
 0x25c   :  { %v1096_v31 = vadd.f32 %v1095_v25, %v1084_v63  ;;  %v1107_v43 = vmul.f32 %v1105_v26, %v1101_v0  ;;  %v1119_v19 = vmul.f32 %v1117_v62, %v1113_v37 }
 0x25e   :  { %v1108_v54 = vadd.f32 %v1107_v43, %v1096_v31  ;;  %v1123_v35 = vpop.permute.xlu0 %1122 }
 0x25f   :  { %v1125_v34 = vsel %vm1121_vm8, %v1123_v35, 0.0 }
 0x260   :  { %v1120_v7 = vadd.f32 %v1119_v19, %v1108_v54  ;;  %v1131_v51 = vmul.f32 %v1129_v4, %v1125_v34 }
 0x262   :  { %v1132_v5 = vadd.f32 %v1131_v51, %v1120_v7 }
 0x264   :  { %1134 = vst.msk [vmem:[#allocation2] sm:$0x3] %vm1133_vm9, %v1132_v5 }
 0x265   :  { %1349 = shalt.err (!%p1346_p4)
}
 0x266   :  { %s1350_s9 = scalar_lea.hbm %s2273_s5, 32 }
 0x267   :  { %p1351_p5 = scmp.ne.s32.totalorder %s2273_s5, %s1350_s9  ;;  %p1354_p6 = scmp.lt.u32.totalorder %s1350_s9, %s2273_s5 }
 0x269   :  { %p1356_p7 = pnand %p1354_p6, %p1351_p5 }
 0x26b   :  { %1359 = shalt.err (!%p1356_p7)
}
 0x26c   :  { %1144 = dma.vmem_to_hbm [thread:$0]  %s1142_s30, 32, %s2273_s5, [#allocation3]  }
 0x26d   :  { %1360 = dma.done.wait [#allocation3], 32  }
 0x26e   :  { %1361 = vsyncadd [#allocation3], 4294967264 }
 0x26f   :  { %1148 = vsyncpa [#allocation3], 1 }

</bundles_post_ra>
